<compile_context>
chip_gen: v7x
topology: tpu7x:2x2x1
jax: 0.10.0
libtpu: 0.0.40
codegen_flags: <defaults>
</compile_context>

<pallas_src>
import functools
import math

import numpy as np
import jax
import jax.numpy as jnp
from jax.experimental import pallas as pl
from jax.experimental.pallas import tpu as pltpu

# ---------------- config (small shapes consistent with the module) ----------
EMBEDDING_SIZE = 32          # hidden_size == embedding_size
VOCAB_SIZE = 15              # +1 start token -> 16 soft-token dims
UTT_LEN = 6
NUM_MEANING_TYPES = 4
MEANINGS_PER_TYPE = 5
NUM_LAYERS = 2
BATCH = 2
LN_EPS = 1e-5
NEG_INF = -1e30

H = EMBEDDING_SIZE
VP1 = VOCAB_SIZE + 1
FF = 4 * H                   # 128 — exactly one lane width
S_PAD = 8                    # fixed padded sequence length (sublane multiple)

# ------------------- packed-parameter static layout --------------------------
# wmat blob: [N_SLABS, 32, 128] f32, each slab a zero-padded weight matrix.
SLAB_V2E = 0                 # w_v2e  [16, 32]
SLAB_PE = 1                  # pe + b_v2e, padded to [8, 32]
SLAB_E2V = 2                 # w_e2v  [32, 16]
SLAB_L0 = 3
SLABS_PER_LAYER = 5          # wqkv [32,96] | wo | wv2 | wo2 | w1 [32,128]
N_SLABS = SLAB_L0 + NUM_LAYERS * SLABS_PER_LAYER

# vecs blob: [N_ROWS, 128] f32, each row a zero-padded bias / LN vector.
ROW_B_E2V = 0
ROW_L0 = 1
ROWS_PER_LAYER = 12          # bqkv, bo, bv2, bo2, b1, b2, g1, be1, g2, be2, g3, be3
N_ROWS = ROW_L0 + NUM_LAYERS * ROWS_PER_LAYER


def _layernorm(x, g, b):
    mu = jnp.mean(x, axis=-1, keepdims=True)
    var = jnp.mean(jnp.square(x - mu), axis=-1, keepdims=True)
    return (x - mu) * jax.lax.rsqrt(var + LN_EPS) * g + b


def _softmax_ref(x):                         # reference: plain divide
    m = jnp.max(x, axis=-1, keepdims=True)
    e = jnp.exp(x - m)
    return e / jnp.sum(e, axis=-1, keepdims=True)


def _softmax_k(x):                           # kernel: EUP approx reciprocal
    m = jnp.max(x, axis=-1, keepdims=True)
    e = jnp.exp(x - m)
    return e * pl.reciprocal(jnp.sum(e, axis=-1, keepdims=True), approx=True)


# ----------------------------- Pallas kernel --------------------------------
def transdec_kernel(src_ref, wmat_ref, w2_ref, vecs_ref, out_ref, *,
                    utt_len, num_layers, hidden, vocab_p1, batch, s_pad):
    f32 = jnp.float32
    scale = 1.0 / math.sqrt(hidden)

    # ---- unpack parameters once (loop-invariant; origin-aligned slices) ----
    w_v2e = wmat_ref[SLAB_V2E, 0:vocab_p1, 0:hidden]            # [16, 32]
    pe_b = wmat_ref[SLAB_PE, 0:s_pad, 0:hidden]                 # [8, 32] (pe + b_v2e)
    w_e2v = wmat_ref[SLAB_E2V, :, 0:vocab_p1]                   # [32, 16]
    b_e2v = vecs_ref[ROW_B_E2V:ROW_B_E2V + 1, 0:vocab_p1]       # [1, 16]

    src = src_ref[...]                                          # [B, 32]

    wqkv, wo, w1, w2 = [], [], [], []
    bqkv, bo, b1, b2 = [], [], [], []
    g1, be1, g2, be2, g3, be3 = [], [], [], [], [], []
    ca = []                                                     # hoisted cross-attn
    for l in range(num_layers):
        sb = SLAB_L0 + l * SLABS_PER_LAYER
        rb = ROW_L0 + l * ROWS_PER_LAYER
        wqkv.append(wmat_ref[sb + 0])                           # [32, 128] (q|k|v|0)
        wo.append(wmat_ref[sb + 1, :, 0:hidden])                # [32, 32]
        wv2 = wmat_ref[sb + 2, :, 0:hidden]
        wo2 = wmat_ref[sb + 3, :, 0:hidden]
        w1.append(wmat_ref[sb + 4])                             # [32, 128]
        w2.append(w2_ref[l])                                    # [128, 32]

        bqkv.append(vecs_ref[rb + 0:rb + 1, :])                 # [1, 128]
        bo.append(vecs_ref[rb + 1:rb + 2, 0:hidden])
        bv2 = vecs_ref[rb + 2:rb + 3, 0:hidden]
        bo2 = vecs_ref[rb + 3:rb + 4, 0:hidden]
        b1.append(vecs_ref[rb + 4:rb + 5, :])                   # [1, 128]
        b2.append(vecs_ref[rb + 5:rb + 6, 0:hidden])
        g1.append(vecs_ref[rb + 6:rb + 7, 0:hidden])
        be1.append(vecs_ref[rb + 7:rb + 8, 0:hidden])
        g2.append(vecs_ref[rb + 8:rb + 9, 0:hidden])
        be2.append(vecs_ref[rb + 9:rb + 10, 0:hidden])
        g3.append(vecs_ref[rb + 10:rb + 11, 0:hidden])
        be3.append(vecs_ref[rb + 11:rb + 12, 0:hidden])

        # Cross-attention with a length-1 memory: softmax over the single key
        # is identically 1, so the attention output equals the value/output
        # projection of src (exact, same math as nn.MultiheadAttention).
        # It depends only on src and weights -> compute once per layer.
        v_mem = jnp.dot(src, wv2, preferred_element_type=f32) + bv2        # [B, 32]
        ca.append(jnp.dot(v_mem, wo2, preferred_element_type=f32) + bo2)   # [B, 32]

    # Fixed (padded) causal mask: row p attends cols <= p.  Padded positions
    # (> current step) are never read and cannot leak into real positions.
    row = jax.lax.broadcasted_iota(jnp.int32, (s_pad, s_pad), 0)
    col = jax.lax.broadcasted_iota(jnp.int32, (s_pad, s_pad), 1)
    mask = jnp.where(col <= row, 0.0, NEG_INF).astype(f32)[None]           # [1, 8, 8]

    pos = jax.lax.broadcasted_iota(jnp.int32, (batch, s_pad, vocab_p1), 1)
    lane = jax.lax.broadcasted_iota(jnp.int32, (batch, s_pad, vocab_p1), 2)
    # decoded_token_probs[0] = one-hot(start_token == vocab_p1 - 1)
    probs = jnp.where((pos == 0) & (lane == vocab_p1 - 1), 1.0, 0.0).astype(f32)

    step = jax.lax.broadcasted_iota(jnp.int32, (utt_len, batch, vocab_p1), 0)
    out_acc = jnp.zeros((utt_len, batch, vocab_p1), f32)

    for i in range(utt_len):                 # statically unrolled, shape-uniform body
        # v2e + sinusoidal positional encoding (b_v2e pre-folded; dropout = id)
        x = jnp.einsum('bsv,vh->bsh', probs, w_v2e,
                       preferred_element_type=f32) + pe_b[None]

        for l in range(num_layers):          # post-norm decoder layers
            # --- masked self-attention, fused QKV (nhead == 1, head_dim == H) ---
            qkv = jnp.einsum('bsh,hk->bsk', x, wqkv[l],
                             preferred_element_type=f32) + bqkv[l]          # [B,8,128]
            q = qkv[..., 0:hidden]
            k = qkv[..., hidden:2 * hidden]
            v = qkv[..., 2 * hidden:3 * hidden]
            scores = jnp.einsum('bsh,bth->bst', q, k,
                                preferred_element_type=f32) * scale + mask
            attn = _softmax_k(scores)
            ctx = jnp.einsum('bst,bth->bsh', attn, v, preferred_element_type=f32)
            sa = jnp.einsum('bsh,hk->bsk', ctx, wo[l],
                            preferred_element_type=f32) + bo[l]
            x = _layernorm(x + sa, g1[l], be1[l])

            # --- cross-attention (hoisted; constant across decode steps) ---
            x = _layernorm(x + ca[l][:, None, :], g2[l], be2[l])

            # --- feed-forward (relu, dim_feedforward = 4H = 128) ---
            hmid = jnp.maximum(
                jnp.einsum('bsh,hf->bsf', x, w1[l],
                           preferred_element_type=f32) + b1[l], 0.0)
            ff = jnp.einsum('bsf,fh->bsh', hmid, w2[l],
                            preferred_element_type=f32) + b2[l]
            x = _layernorm(x + ff, g3[l], be3[l])

        # e2v on the last real position only
        x_last = x[:, i, :]                                                 # [B, 32]
        logits = jnp.dot(x_last, w_e2v, preferred_element_type=f32) + b_e2v # [B, 16]
        out_acc = jnp.where(step == i, logits[None], out_acc)

        if i + 1 < utt_len:                  # soft feedback token for next step
            p_new = _softmax_k(logits)                                      # [B, 16]
            probs = jnp.where(pos == i + 1, p_new[:, None, :], probs)

    out_ref[...] = out_acc                   # single store of all step logits


# ------------------------------- wrapper -------------------------------------
def _pad2(mat, rows, cols):
    mat = jnp.asarray(mat, jnp.float32)
    r, c = mat.shape
    return jnp.pad(mat, ((0, rows - r), (0, cols - c)))


def pack_inputs(params, pe):
    """Pack all 26 parameter tensors (+ pe) into 3 blobs -> 3 DMAs."""
    slabs = [
        _pad2(params['w_v2e'], H, 128),                       # SLAB_V2E
        _pad2(pe + params['b_v2e'], H, 128),                  # SLAB_PE (b_v2e folded)
        _pad2(params['w_e2v'], H, 128),                       # SLAB_E2V
    ]
    rows = [_pad2(params['b_e2v'], 1, 128)]                   # ROW_B_E2V
    for l in range(NUM_LAYERS):
        wqkv = jnp.concatenate(
            [params['wq'][l], params['wk'][l], params['wv'][l]], axis=1)    # [32,96]
        slabs += [_pad2(wqkv, H, 128),
                  _pad2(params['wo'][l], H, 128),
                  _pad2(params['wv2'][l], H, 128),
                  _pad2(params['wo2'][l], H, 128),
                  _pad2(params['w1'][l], H, 128)]
        bqkv = jnp.concatenate(
            [params['bq'][l], params['bk'][l], params['bv'][l]], axis=1)    # [1,96]
        rows += [_pad2(bqkv, 1, 128),
                 _pad2(params['bo'][l], 1, 128),
                 _pad2(params['bv2'][l], 1, 128),
                 _pad2(params['bo2'][l], 1, 128),
                 _pad2(params['b1'][l], 1, 128),
                 _pad2(params['b2'][l], 1, 128),
                 _pad2(params['g1'][l], 1, 128),
                 _pad2(params['be1'][l], 1, 128),
                 _pad2(params['g2'][l], 1, 128),
                 _pad2(params['be2'][l], 1, 128),
                 _pad2(params['g3'][l], 1, 128),
                 _pad2(params['be3'][l], 1, 128)]
    return {
        'wmat': jnp.stack(slabs, axis=0),                     # [13, 32, 128]
        'w2': jnp.asarray(params['w2'], jnp.float32),         # [L, 128, 32]
        'vecs': jnp.concatenate(rows, axis=0),                # [25, 128]
    }


def transdec_soft_forward(meanings, emb_table, packed):
    # glue: embedding lookup + sum over meaning types (nn.Embedding gather)
    offsets = jnp.arange(NUM_MEANING_TYPES, dtype=jnp.int32) * MEANINGS_PER_TYPE
    src = emb_table[meanings + offsets[None, :]].sum(axis=1)  # [B, H]

    kernel = functools.partial(
        transdec_kernel, utt_len=UTT_LEN, num_layers=NUM_LAYERS,
        hidden=H, vocab_p1=VP1, batch=BATCH, s_pad=S_PAD)
    # TODO(synk): if batch grows, add a "parallel" batch grid axis so v7x's two
    # TensorCores share the work; pointless at B=2.
    return pl.pallas_call(
        kernel,
        out_shape=jax.ShapeDtypeStruct((UTT_LEN, BATCH, VP1), jnp.float32),
        in_specs=[pl.BlockSpec(memory_space=pltpu.MemorySpace.VMEM)] * 4,
        out_specs=pl.BlockSpec(memory_space=pltpu.MemorySpace.VMEM),
    )(src, packed['wmat'], packed['w2'], packed['vecs'])


# ------------------------ pure-JAX reference (same math) ---------------------
def reference_forward(meanings, params, pe):
    offsets = jnp.arange(NUM_MEANING_TYPES, dtype=jnp.int32) * MEANINGS_PER_TYPE
    src = params['emb_table'][meanings + offsets[None, :]].sum(axis=1)
    scale = 1.0 / math.sqrt(H)
    probs = jnp.zeros((BATCH, UTT_LEN + 1, VP1), jnp.float32).at[:, 0, VP1 - 1].set(1.0)
    outs = []
    for i in range(UTT_LEN):
        S = i + 1
        seq = probs[:, :S]
        x = jnp.einsum('bsv,vh->bsh', seq, params['w_v2e']) + params['b_v2e']
        x = x + pe[:S][None]
        r = np.arange(S)[:, None]
        c = np.arange(S)[None, :]
        mask = jnp.asarray(np.where(c <= r, 0.0, NEG_INF).astype(np.float32))
        for l in range(NUM_LAYERS):
            q = jnp.einsum('bsh,hk->bsk', x, params['wq'][l]) + params['bq'][l]
            k = jnp.einsum('bsh,hk->bsk', x, params['wk'][l]) + params['bk'][l]
            v = jnp.einsum('bsh,hk->bsk', x, params['wv'][l]) + params['bv'][l]
            scores = jnp.einsum('bsh,bth->bst', q, k) * scale + mask[None]
            ctx = jnp.einsum('bst,bth->bsh', _softmax_ref(scores), v)
            sa = jnp.einsum('bsh,hk->bsk', ctx, params['wo'][l]) + params['bo'][l]
            x = _layernorm(x + sa, params['g1'][l], params['be1'][l])
            v_mem = src @ params['wv2'][l] + params['bv2'][l]
            ca = v_mem @ params['wo2'][l] + params['bo2'][l]
            x = _layernorm(x + ca[:, None, :], params['g2'][l], params['be2'][l])
            hmid = jnp.maximum(jnp.einsum('bsh,hf->bsf', x, params['w1'][l]) + params['b1'][l], 0.0)
            ff = jnp.einsum('bsf,fh->bsh', hmid, params['w2'][l]) + params['b2'][l]
            x = _layernorm(x + ff, params['g3'][l], params['be3'][l])
        logits = jnp.einsum('bsh,hv->bsv', x, params['w_e2v']) + params['b_e2v']
        last = logits[:, S - 1]
        outs.append(last)
        probs = probs.at[:, i + 1].set(_softmax_ref(last))
    return jnp.stack(outs, axis=0)


# ---------------------- deterministic parameter init -------------------------
def sinusoidal_pe(max_len, d):
    pos = np.arange(max_len, dtype=np.float32)[:, None]
    div = np.exp(np.arange(0, d, 2, dtype=np.float32) * (-np.log(10000.0) / d))
    pe = np.zeros((max_len, d), np.float32)
    pe[:, 0::2] = np.sin(pos * div)
    pe[:, 1::2] = np.cos(pos * div)
    return jnp.asarray(pe)


def build_params(key):
    keys = iter(jax.random.split(key, 32))

    def nrm(shape, scale=0.1):
        return scale * jax.random.normal(next(keys), shape, dtype=jnp.float32)

    p = {
        'emb_table': nrm((NUM_MEANING_TYPES * MEANINGS_PER_TYPE, H), 1.0),
        'w_v2e': nrm((VP1, H)), 'b_v2e': nrm((1, H)),
        'w_e2v': nrm((H, VP1)), 'b_e2v': nrm((1, VP1)),
        'wq': nrm((NUM_LAYERS, H, H)), 'wk': nrm((NUM_LAYERS, H, H)),
        'wv': nrm((NUM_LAYERS, H, H)), 'wo': nrm((NUM_LAYERS, H, H)),
        'bq': nrm((NUM_LAYERS, 1, H)), 'bk': nrm((NUM_LAYERS, 1, H)),
        'bv': nrm((NUM_LAYERS, 1, H)), 'bo': nrm((NUM_LAYERS, 1, H)),
        'wv2': nrm((NUM_LAYERS, H, H)), 'wo2': nrm((NUM_LAYERS, H, H)),
        'bv2': nrm((NUM_LAYERS, 1, H)), 'bo2': nrm((NUM_LAYERS, 1, H)),
        'w1': nrm((NUM_LAYERS, H, FF)), 'b1': nrm((NUM_LAYERS, 1, FF)),
        'w2': nrm((NUM_LAYERS, FF, H)), 'b2': nrm((NUM_LAYERS, 1, H)),
        'g1': jnp.ones((NUM_LAYERS, 1, H), jnp.float32),
        'be1': jnp.zeros((NUM_LAYERS, 1, H), jnp.float32),
        'g2': jnp.ones((NUM_LAYERS, 1, H), jnp.float32),
        'be2': jnp.zeros((NUM_LAYERS, 1, H), jnp.float32),
        'g3': jnp.ones((NUM_LAYERS, 1, H), jnp.float32),
        'be3': jnp.zeros((NUM_LAYERS, 1, H), jnp.float32),
    }
    return p


if __name__ == "__main__":
    key = jax.random.PRNGKey(0)
    pkey, mkey = jax.random.split(key)
    params = build_params(pkey)
    pe = sinusoidal_pe(UTT_LEN, H)
    meanings = jax.random.randint(mkey, (BATCH, NUM_MEANING_TYPES), 0,
                                  MEANINGS_PER_TYPE, dtype=jnp.int32)

    packed = jax.tree_util.tree_map(jax.block_until_ready, pack_inputs(params, pe))

    out = jax.block_until_ready(
        transdec_soft_forward(meanings, params['emb_table'], packed))
    ref = jax.block_until_ready(reference_forward(meanings, params, pe))

    assert out.shape == (UTT_LEN, BATCH, VP1)
    assert np.all(np.isfinite(np.asarray(out)))
    # Tolerance accounts for default (non-'highest') MXU matmul precision and
    # the EUP approx reciprocal in the kernel softmax.
    if not np.allclose(np.asarray(out), np.asarray(ref), atol=3e-2, rtol=3e-2):
        raise AssertionError("Pallas output mismatches JAX reference")
    # TODO(synk): training-mode gumbel_softmax path (PyTorch RNG) not reproduced.
    print("KERNEL_OK")
</pallas_src>

<mosaic_0001>
module attributes {stable_mosaic.version = 11 : i64} {
  func.func @transdec_kernel(%arg0: memref<2x32xf32, #tpu.memory_space<vmem>>, %arg1: memref<13x32x128xf32, #tpu.memory_space<vmem>>, %arg2: memref<2x128x32xf32, #tpu.memory_space<vmem>>, %arg3: memref<25x128xf32, #tpu.memory_space<vmem>>, %arg4: memref<6x2x16xf32, #tpu.memory_space<vmem>>) attributes {dimension_semantics = [], scalar_prefetch = 0 : i64, scratch_operands = 0 : i64, tpu.core_type = #tpu.core_type<tc>} {
    %c0 = arith.constant 0 : index
    %c0_0 = arith.constant 0 : index
    %c0_1 = arith.constant 0 : index
    %0 = vector.load %arg1[%c0, %c0_0, %c0_1] : memref<13x32x128xf32, #tpu.memory_space<vmem>>, vector<1x16x32xf32>
    %1 = vector.shape_cast %0 : vector<1x16x32xf32> to vector<16x32xf32>
    %c1 = arith.constant 1 : index
    %c0_2 = arith.constant 0 : index
    %c0_3 = arith.constant 0 : index
    %2 = vector.load %arg1[%c1, %c0_2, %c0_3] : memref<13x32x128xf32, #tpu.memory_space<vmem>>, vector<1x8x32xf32>
    %3 = vector.shape_cast %2 : vector<1x8x32xf32> to vector<8x32xf32>
    %c2 = arith.constant 2 : index
    %c0_4 = arith.constant 0 : index
    %c0_5 = arith.constant 0 : index
    %4 = vector.load %arg1[%c2, %c0_4, %c0_5] : memref<13x32x128xf32, #tpu.memory_space<vmem>>, vector<1x32x16xf32>
    %5 = vector.shape_cast %4 : vector<1x32x16xf32> to vector<32x16xf32>
    %c0_6 = arith.constant 0 : index
    %c0_7 = arith.constant 0 : index
    %6 = vector.load %arg3[%c0_6, %c0_7] : memref<25x128xf32, #tpu.memory_space<vmem>>, vector<1x16xf32>
    %c0_8 = arith.constant 0 : index
    %c0_9 = arith.constant 0 : index
    %7 = vector.load %arg0[%c0_8, %c0_9] : memref<2x32xf32, #tpu.memory_space<vmem>>, vector<2x32xf32>
    %c3 = arith.constant 3 : index
    %c0_10 = arith.constant 0 : index
    %c0_11 = arith.constant 0 : index
    %8 = vector.load %arg1[%c3, %c0_10, %c0_11] : memref<13x32x128xf32, #tpu.memory_space<vmem>>, vector<1x32x128xf32>
    %9 = vector.shape_cast %8 : vector<1x32x128xf32> to vector<32x128xf32>
    %c4 = arith.constant 4 : index
    %c0_12 = arith.constant 0 : index
    %c0_13 = arith.constant 0 : index
    %10 = vector.load %arg1[%c4, %c0_12, %c0_13] : memref<13x32x128xf32, #tpu.memory_space<vmem>>, vector<1x32x32xf32>
    %11 = vector.shape_cast %10 : vector<1x32x32xf32> to vector<32x32xf32>
    %c5 = arith.constant 5 : index
    %c0_14 = arith.constant 0 : index
    %c0_15 = arith.constant 0 : index
    %12 = vector.load %arg1[%c5, %c0_14, %c0_15] : memref<13x32x128xf32, #tpu.memory_space<vmem>>, vector<1x32x32xf32>
    %13 = vector.shape_cast %12 : vector<1x32x32xf32> to vector<32x32xf32>
    %c6 = arith.constant 6 : index
    %c0_16 = arith.constant 0 : index
    %c0_17 = arith.constant 0 : index
    %14 = vector.load %arg1[%c6, %c0_16, %c0_17] : memref<13x32x128xf32, #tpu.memory_space<vmem>>, vector<1x32x32xf32>
    %15 = vector.shape_cast %14 : vector<1x32x32xf32> to vector<32x32xf32>
    %c7 = arith.constant 7 : index
    %c0_18 = arith.constant 0 : index
    %c0_19 = arith.constant 0 : index
    %16 = vector.load %arg1[%c7, %c0_18, %c0_19] : memref<13x32x128xf32, #tpu.memory_space<vmem>>, vector<1x32x128xf32>
    %17 = vector.shape_cast %16 : vector<1x32x128xf32> to vector<32x128xf32>
    %c0_20 = arith.constant 0 : index
    %c0_21 = arith.constant 0 : index
    %c0_22 = arith.constant 0 : index
    %18 = vector.load %arg2[%c0_20, %c0_21, %c0_22] : memref<2x128x32xf32, #tpu.memory_space<vmem>>, vector<1x128x32xf32>
    %19 = vector.shape_cast %18 : vector<1x128x32xf32> to vector<128x32xf32>
    %c1_23 = arith.constant 1 : index
    %c0_24 = arith.constant 0 : index
    %20 = vector.load %arg3[%c1_23, %c0_24] : memref<25x128xf32, #tpu.memory_space<vmem>>, vector<1x128xf32>
    %c2_25 = arith.constant 2 : index
    %c0_26 = arith.constant 0 : index
    %21 = vector.load %arg3[%c2_25, %c0_26] : memref<25x128xf32, #tpu.memory_space<vmem>>, vector<1x32xf32>
    %c3_27 = arith.constant 3 : index
    %c0_28 = arith.constant 0 : index
    %22 = vector.load %arg3[%c3_27, %c0_28] : memref<25x128xf32, #tpu.memory_space<vmem>>, vector<1x32xf32>
    %c4_29 = arith.constant 4 : index
    %c0_30 = arith.constant 0 : index
    %23 = vector.load %arg3[%c4_29, %c0_30] : memref<25x128xf32, #tpu.memory_space<vmem>>, vector<1x32xf32>
    %c5_31 = arith.constant 5 : index
    %c0_32 = arith.constant 0 : index
    %24 = vector.load %arg3[%c5_31, %c0_32] : memref<25x128xf32, #tpu.memory_space<vmem>>, vector<1x128xf32>
    %c6_33 = arith.constant 6 : index
    %c0_34 = arith.constant 0 : index
    %25 = vector.load %arg3[%c6_33, %c0_34] : memref<25x128xf32, #tpu.memory_space<vmem>>, vector<1x32xf32>
    %c7_35 = arith.constant 7 : index
    %c0_36 = arith.constant 0 : index
    %26 = vector.load %arg3[%c7_35, %c0_36] : memref<25x128xf32, #tpu.memory_space<vmem>>, vector<1x32xf32>
    %c8 = arith.constant 8 : index
    %c0_37 = arith.constant 0 : index
    %27 = vector.load %arg3[%c8, %c0_37] : memref<25x128xf32, #tpu.memory_space<vmem>>, vector<1x32xf32>
    %c9 = arith.constant 9 : index
    %c0_38 = arith.constant 0 : index
    %28 = vector.load %arg3[%c9, %c0_38] : memref<25x128xf32, #tpu.memory_space<vmem>>, vector<1x32xf32>
    %c10 = arith.constant 10 : index
    %c0_39 = arith.constant 0 : index
    %29 = vector.load %arg3[%c10, %c0_39] : memref<25x128xf32, #tpu.memory_space<vmem>>, vector<1x32xf32>
    %c11 = arith.constant 11 : index
    %c0_40 = arith.constant 0 : index
    %30 = vector.load %arg3[%c11, %c0_40] : memref<25x128xf32, #tpu.memory_space<vmem>>, vector<1x32xf32>
    %c12 = arith.constant 12 : index
    %c0_41 = arith.constant 0 : index
    %31 = vector.load %arg3[%c12, %c0_41] : memref<25x128xf32, #tpu.memory_space<vmem>>, vector<1x32xf32>
    %cst = arith.constant dense<0.000000e+00> : vector<2x32xf32>
    %32 = tpu.matmul %7, %13, %cst {dimension_numbers = #tpu.dot_dimension_numbers<[1], [0], [0], [1], [0, 0, 1, 1], [], []>} : vector<2x32xf32>, vector<32x32xf32>, vector<2x32xf32> -> vector<2x32xf32>
    %33 = vector.broadcast %22 : vector<1x32xf32> to vector<2x32xf32>
    %34 = arith.addf %32, %33 : vector<2x32xf32>
    %cst_42 = arith.constant dense<0.000000e+00> : vector<2x32xf32>
    %35 = tpu.matmul %34, %15, %cst_42 {dimension_numbers = #tpu.dot_dimension_numbers<[1], [0], [0], [1], [0, 0, 1, 1], [], []>} : vector<2x32xf32>, vector<32x32xf32>, vector<2x32xf32> -> vector<2x32xf32>
    %36 = vector.broadcast %23 : vector<1x32xf32> to vector<2x32xf32>
    %37 = arith.addf %35, %36 : vector<2x32xf32>
    %c8_43 = arith.constant 8 : index
    %c0_44 = arith.constant 0 : index
    %c0_45 = arith.constant 0 : index
    %38 = vector.load %arg1[%c8_43, %c0_44, %c0_45] : memref<13x32x128xf32, #tpu.memory_space<vmem>>, vector<1x32x128xf32>
    %39 = vector.shape_cast %38 : vector<1x32x128xf32> to vector<32x128xf32>
    %c9_46 = arith.constant 9 : index
    %c0_47 = arith.constant 0 : index
    %c0_48 = arith.constant 0 : index
    %40 = vector.load %arg1[%c9_46, %c0_47, %c0_48] : memref<13x32x128xf32, #tpu.memory_space<vmem>>, vector<1x32x32xf32>
    %41 = vector.shape_cast %40 : vector<1x32x32xf32> to vector<32x32xf32>
    %c10_49 = arith.constant 10 : index
    %c0_50 = arith.constant 0 : index
    %c0_51 = arith.constant 0 : index
    %42 = vector.load %arg1[%c10_49, %c0_50, %c0_51] : memref<13x32x128xf32, #tpu.memory_space<vmem>>, vector<1x32x32xf32>
    %43 = vector.shape_cast %42 : vector<1x32x32xf32> to vector<32x32xf32>
    %c11_52 = arith.constant 11 : index
    %c0_53 = arith.constant 0 : index
    %c0_54 = arith.constant 0 : index
    %44 = vector.load %arg1[%c11_52, %c0_53, %c0_54] : memref<13x32x128xf32, #tpu.memory_space<vmem>>, vector<1x32x32xf32>
    %45 = vector.shape_cast %44 : vector<1x32x32xf32> to vector<32x32xf32>
    %c12_55 = arith.constant 12 : index
    %c0_56 = arith.constant 0 : index
    %c0_57 = arith.constant 0 : index
    %46 = vector.load %arg1[%c12_55, %c0_56, %c0_57] : memref<13x32x128xf32, #tpu.memory_space<vmem>>, vector<1x32x128xf32>
    %47 = vector.shape_cast %46 : vector<1x32x128xf32> to vector<32x128xf32>
    %c1_58 = arith.constant 1 : index
    %c0_59 = arith.constant 0 : index
    %c0_60 = arith.constant 0 : index
    %48 = vector.load %arg2[%c1_58, %c0_59, %c0_60] : memref<2x128x32xf32, #tpu.memory_space<vmem>>, vector<1x128x32xf32>
    %49 = vector.shape_cast %48 : vector<1x128x32xf32> to vector<128x32xf32>
    %c13 = arith.constant 13 : index
    %c0_61 = arith.constant 0 : index
    %50 = vector.load %arg3[%c13, %c0_61] : memref<25x128xf32, #tpu.memory_space<vmem>>, vector<1x128xf32>
    %c14 = arith.constant 14 : index
    %c0_62 = arith.constant 0 : index
    %51 = vector.load %arg3[%c14, %c0_62] : memref<25x128xf32, #tpu.memory_space<vmem>>, vector<1x32xf32>
    %c15 = arith.constant 15 : index
    %c0_63 = arith.constant 0 : index
    %52 = vector.load %arg3[%c15, %c0_63] : memref<25x128xf32, #tpu.memory_space<vmem>>, vector<1x32xf32>
    %c16 = arith.constant 16 : index
    %c0_64 = arith.constant 0 : index
    %53 = vector.load %arg3[%c16, %c0_64] : memref<25x128xf32, #tpu.memory_space<vmem>>, vector<1x32xf32>
    %c17 = arith.constant 17 : index
    %c0_65 = arith.constant 0 : index
    %54 = vector.load %arg3[%c17, %c0_65] : memref<25x128xf32, #tpu.memory_space<vmem>>, vector<1x128xf32>
    %c18 = arith.constant 18 : index
    %c0_66 = arith.constant 0 : index
    %55 = vector.load %arg3[%c18, %c0_66] : memref<25x128xf32, #tpu.memory_space<vmem>>, vector<1x32xf32>
    %c19 = arith.constant 19 : index
    %c0_67 = arith.constant 0 : index
    %56 = vector.load %arg3[%c19, %c0_67] : memref<25x128xf32, #tpu.memory_space<vmem>>, vector<1x32xf32>
    %c20 = arith.constant 20 : index
    %c0_68 = arith.constant 0 : index
    %57 = vector.load %arg3[%c20, %c0_68] : memref<25x128xf32, #tpu.memory_space<vmem>>, vector<1x32xf32>
    %c21 = arith.constant 21 : index
    %c0_69 = arith.constant 0 : index
    %58 = vector.load %arg3[%c21, %c0_69] : memref<25x128xf32, #tpu.memory_space<vmem>>, vector<1x32xf32>
    %c22 = arith.constant 22 : index
    %c0_70 = arith.constant 0 : index
    %59 = vector.load %arg3[%c22, %c0_70] : memref<25x128xf32, #tpu.memory_space<vmem>>, vector<1x32xf32>
    %c23 = arith.constant 23 : index
    %c0_71 = arith.constant 0 : index
    %60 = vector.load %arg3[%c23, %c0_71] : memref<25x128xf32, #tpu.memory_space<vmem>>, vector<1x32xf32>
    %c24 = arith.constant 24 : index
    %c0_72 = arith.constant 0 : index
    %61 = vector.load %arg3[%c24, %c0_72] : memref<25x128xf32, #tpu.memory_space<vmem>>, vector<1x32xf32>
    %cst_73 = arith.constant dense<0.000000e+00> : vector<2x32xf32>
    %62 = tpu.matmul %7, %43, %cst_73 {dimension_numbers = #tpu.dot_dimension_numbers<[1], [0], [0], [1], [0, 0, 1, 1], [], []>} : vector<2x32xf32>, vector<32x32xf32>, vector<2x32xf32> -> vector<2x32xf32>
    %63 = vector.broadcast %52 : vector<1x32xf32> to vector<2x32xf32>
    %64 = arith.addf %62, %63 : vector<2x32xf32>
    %cst_74 = arith.constant dense<0.000000e+00> : vector<2x32xf32>
    %65 = tpu.matmul %64, %45, %cst_74 {dimension_numbers = #tpu.dot_dimension_numbers<[1], [0], [0], [1], [0, 0, 1, 1], [], []>} : vector<2x32xf32>, vector<32x32xf32>, vector<2x32xf32> -> vector<2x32xf32>
    %66 = vector.broadcast %53 : vector<1x32xf32> to vector<2x32xf32>
    %67 = arith.addf %65, %66 : vector<2x32xf32>
    %68 = tpu.iota {dimensions = array<i32: 0>} : vector<8x8xi32>
    %69 = tpu.iota {dimensions = array<i32: 1>} : vector<8x8xi32>
    %70 = arith.cmpi sle, %69, %68 : vector<8x8xi32>
    %cst_75 = arith.constant 0.000000e+00 : f32
    %cst_76 = arith.constant -1.000000e+30 : f32
    %71 = vector.broadcast %cst_75 : f32 to vector<8x8xf32>
    %72 = vector.broadcast %cst_76 : f32 to vector<8x8xf32>
    %73 = arith.select %70, %71, %72 : vector<8x8xi1>, vector<8x8xf32>
    %74 = vector.shape_cast %73 : vector<8x8xf32> to vector<1x8x8xf32>
    %75 = tpu.iota {dimensions = array<i32: 1>} : vector<2x8x16xi32>
    %76 = tpu.iota {dimensions = array<i32: 2>} : vector<2x8x16xi32>
    %c0_i32 = arith.constant 0 : i32
    %77 = vector.broadcast %c0_i32 : i32 to vector<2x8x16xi32>
    %78 = arith.cmpi eq, %75, %77 : vector<2x8x16xi32>
    %c15_i32 = arith.constant 15 : i32
    %79 = vector.broadcast %c15_i32 : i32 to vector<2x8x16xi32>
    %80 = arith.cmpi eq, %76, %79 : vector<2x8x16xi32>
    %81 = arith.andi %78, %80 : vector<2x8x16xi1>
    %cst_77 = arith.constant 1.000000e+00 : f32
    %cst_78 = arith.constant 0.000000e+00 : f32
    %82 = vector.broadcast %cst_77 : f32 to vector<2x8x16xf32>
    %83 = vector.broadcast %cst_78 : f32 to vector<2x8x16xf32>
    %84 = arith.select %81, %82, %83 : vector<2x8x16xi1>, vector<2x8x16xf32>
    %85 = tpu.iota {dimensions = array<i32: 0>} : vector<6x2x16xi32>
    %cst_79 = arith.constant 0.000000e+00 : f32
    %86 = vector.broadcast %cst_79 : f32 to vector<6x2x16xf32>
    "tpu.trace_start"() <{level = 10 : i32, message = "bsv,vh->bsh"}> : () -> ()
    %cst_80 = arith.constant dense<0.000000e+00> : vector<2x8x32xf32>
    %87 = tpu.matmul %84, %1, %cst_80 {dimension_numbers = #tpu.dot_dimension_numbers<[2], [0], [0, 1], [1], [0, 0, 0, 1, 1, 1], [], []>} : vector<2x8x16xf32>, vector<16x32xf32>, vector<2x8x32xf32> -> vector<2x8x32xf32>
    "tpu.trace_stop"() : () -> ()
    %88 = vector.shape_cast %3 : vector<8x32xf32> to vector<1x8x32xf32>
    %89 = vector.broadcast %88 : vector<1x8x32xf32> to vector<2x8x32xf32>
    %90 = arith.addf %87, %89 : vector<2x8x32xf32>
    "tpu.trace_start"() <{level = 10 : i32, message = "bsh,hk->bsk"}> : () -> ()
    %cst_81 = arith.constant dense<0.000000e+00> : vector<2x8x128xf32>
    %91 = tpu.matmul %90, %9, %cst_81 {dimension_numbers = #tpu.dot_dimension_numbers<[2], [0], [0, 1], [1], [0, 0, 0, 1, 1, 1], [], []>} : vector<2x8x32xf32>, vector<32x128xf32>, vector<2x8x128xf32> -> vector<2x8x128xf32>
    "tpu.trace_stop"() : () -> ()
    %92 = vector.shape_cast %20 : vector<1x128xf32> to vector<1x1x128xf32>
    %93 = vector.broadcast %92 : vector<1x1x128xf32> to vector<2x8x128xf32>
    %94 = arith.addf %91, %93 : vector<2x8x128xf32>
    %95 = vector.extract_strided_slice %94 {offsets = [0, 0, 0], sizes = [2, 8, 32], strides = [1, 1, 1]} : vector<2x8x128xf32> to vector<2x8x32xf32>
    %96 = vector.extract_strided_slice %94 {offsets = [0, 0, 32], sizes = [2, 8, 32], strides = [1, 1, 1]} : vector<2x8x128xf32> to vector<2x8x32xf32>
    %97 = vector.extract_strided_slice %94 {offsets = [0, 0, 64], sizes = [2, 8, 32], strides = [1, 1, 1]} : vector<2x8x128xf32> to vector<2x8x32xf32>
    "tpu.trace_start"() <{level = 10 : i32, message = "bsh,bth->bst"}> : () -> ()
    %cst_82 = arith.constant dense<0.000000e+00> : vector<2x8x8xf32>
    %98 = tpu.matmul %95, %96, %cst_82 {dimension_numbers = #tpu.dot_dimension_numbers<[2], [2], [1], [1], [0, 0, 0, 1, 1, 1], [0], [0]>} : vector<2x8x32xf32>, vector<2x8x32xf32>, vector<2x8x8xf32> -> vector<2x8x8xf32>
    "tpu.trace_stop"() : () -> ()
    %cst_83 = arith.constant 0.176776692 : f32
    %99 = vector.broadcast %cst_83 : f32 to vector<2x8x8xf32>
    %100 = arith.mulf %98, %99 : vector<2x8x8xf32>
    %101 = vector.broadcast %74 : vector<1x8x8xf32> to vector<2x8x8xf32>
    %102 = arith.addf %100, %101 : vector<2x8x8xf32>
    %cst_84 = arith.constant dense<0xFF800000> : vector<2x8xf32>
    %103 = vector.multi_reduction <maximumf>, %102, %cst_84 [2] : vector<2x8x8xf32> to vector<2x8xf32>
    %104 = vector.shape_cast %103 : vector<2x8xf32> to vector<2x8x1xf32>
    %105 = vector.broadcast %104 : vector<2x8x1xf32> to vector<2x8x8xf32>
    %106 = arith.subf %102, %105 : vector<2x8x8xf32>
    %107 = math.exp %106 : vector<2x8x8xf32>
    %cst_85 = arith.constant dense<0.000000e+00> : vector<2x8xf32>
    %108 = vector.multi_reduction <add>, %107, %cst_85 [2] : vector<2x8x8xf32> to vector<2x8xf32>
    %109 = vector.shape_cast %108 : vector<2x8xf32> to vector<2x8x1xf32>
    %110 = tpu.reciprocal %109 {approx = true} : vector<2x8x1xf32> -> vector<2x8x1xf32>
    %111 = vector.broadcast %110 : vector<2x8x1xf32> to vector<2x8x8xf32>
    %112 = arith.mulf %107, %111 : vector<2x8x8xf32>
    "tpu.trace_start"() <{level = 10 : i32, message = "bst,bth->bsh"}> : () -> ()
    %cst_86 = arith.constant dense<0.000000e+00> : vector<2x8x32xf32>
    %113 = tpu.matmul %112, %97, %cst_86 {dimension_numbers = #tpu.dot_dimension_numbers<[2], [1], [1], [2], [0, 0, 0, 1, 1, 2], [0], [0]>} : vector<2x8x8xf32>, vector<2x8x32xf32>, vector<2x8x32xf32> -> vector<2x8x32xf32>
    "tpu.trace_stop"() : () -> ()
    "tpu.trace_start"() <{level = 10 : i32, message = "bsh,hk->bsk"}> : () -> ()
    %cst_87 = arith.constant dense<0.000000e+00> : vector<2x8x32xf32>
    %114 = tpu.matmul %113, %11, %cst_87 {dimension_numbers = #tpu.dot_dimension_numbers<[2], [0], [0, 1], [1], [0, 0, 0, 1, 1, 1], [], []>} : vector<2x8x32xf32>, vector<32x32xf32>, vector<2x8x32xf32> -> vector<2x8x32xf32>
    "tpu.trace_stop"() : () -> ()
    %115 = vector.shape_cast %21 : vector<1x32xf32> to vector<1x1x32xf32>
    %116 = vector.broadcast %115 : vector<1x1x32xf32> to vector<2x8x32xf32>
    %117 = arith.addf %114, %116 : vector<2x8x32xf32>
    %118 = arith.addf %90, %117 : vector<2x8x32xf32>
    %cst_88 = arith.constant dense<0.000000e+00> : vector<2x8xf32>
    %119 = vector.multi_reduction <add>, %118, %cst_88 [2] : vector<2x8x32xf32> to vector<2x8xf32>
    %120 = vector.shape_cast %119 : vector<2x8xf32> to vector<2x8x1xf32>
    %cst_89 = arith.constant 3.200000e+01 : f32
    %121 = vector.broadcast %cst_89 : f32 to vector<2x8x1xf32>
    %122 = arith.divf %120, %121 : vector<2x8x1xf32>
    %123 = vector.broadcast %122 : vector<2x8x1xf32> to vector<2x8x32xf32>
    %124 = arith.subf %118, %123 : vector<2x8x32xf32>
    %125 = arith.mulf %124, %124 : vector<2x8x32xf32>
    %cst_90 = arith.constant dense<0.000000e+00> : vector<2x8xf32>
    %126 = vector.multi_reduction <add>, %125, %cst_90 [2] : vector<2x8x32xf32> to vector<2x8xf32>
    %127 = vector.shape_cast %126 : vector<2x8xf32> to vector<2x8x1xf32>
    %cst_91 = arith.constant 3.200000e+01 : f32
    %128 = vector.broadcast %cst_91 : f32 to vector<2x8x1xf32>
    %129 = arith.divf %127, %128 : vector<2x8x1xf32>
    %130 = vector.broadcast %122 : vector<2x8x1xf32> to vector<2x8x32xf32>
    %131 = arith.subf %118, %130 : vector<2x8x32xf32>
    %cst_92 = arith.constant 9.99999974E-6 : f32
    %132 = vector.broadcast %cst_92 : f32 to vector<2x8x1xf32>
    %133 = arith.addf %129, %132 : vector<2x8x1xf32>
    %134 = math.rsqrt %133 : vector<2x8x1xf32>
    %135 = vector.broadcast %134 : vector<2x8x1xf32> to vector<2x8x32xf32>
    %136 = arith.mulf %131, %135 : vector<2x8x32xf32>
    %137 = vector.shape_cast %26 : vector<1x32xf32> to vector<1x1x32xf32>
    %138 = vector.broadcast %137 : vector<1x1x32xf32> to vector<2x8x32xf32>
    %139 = arith.mulf %136, %138 : vector<2x8x32xf32>
    %140 = vector.shape_cast %27 : vector<1x32xf32> to vector<1x1x32xf32>
    %141 = vector.broadcast %140 : vector<1x1x32xf32> to vector<2x8x32xf32>
    %142 = arith.addf %139, %141 : vector<2x8x32xf32>
    %143 = vector.shape_cast %37 : vector<2x32xf32> to vector<2x1x32xf32>
    %144 = vector.broadcast %143 : vector<2x1x32xf32> to vector<2x8x32xf32>
    %145 = arith.addf %142, %144 : vector<2x8x32xf32>
    %cst_93 = arith.constant dense<0.000000e+00> : vector<2x8xf32>
    %146 = vector.multi_reduction <add>, %145, %cst_93 [2] : vector<2x8x32xf32> to vector<2x8xf32>
    %147 = vector.shape_cast %146 : vector<2x8xf32> to vector<2x8x1xf32>
    %cst_94 = arith.constant 3.200000e+01 : f32
    %148 = vector.broadcast %cst_94 : f32 to vector<2x8x1xf32>
    %149 = arith.divf %147, %148 : vector<2x8x1xf32>
    %150 = vector.broadcast %149 : vector<2x8x1xf32> to vector<2x8x32xf32>
    %151 = arith.subf %145, %150 : vector<2x8x32xf32>
    %152 = arith.mulf %151, %151 : vector<2x8x32xf32>
    %cst_95 = arith.constant dense<0.000000e+00> : vector<2x8xf32>
    %153 = vector.multi_reduction <add>, %152, %cst_95 [2] : vector<2x8x32xf32> to vector<2x8xf32>
    %154 = vector.shape_cast %153 : vector<2x8xf32> to vector<2x8x1xf32>
    %cst_96 = arith.constant 3.200000e+01 : f32
    %155 = vector.broadcast %cst_96 : f32 to vector<2x8x1xf32>
    %156 = arith.divf %154, %155 : vector<2x8x1xf32>
    %157 = vector.broadcast %149 : vector<2x8x1xf32> to vector<2x8x32xf32>
    %158 = arith.subf %145, %157 : vector<2x8x32xf32>
    %cst_97 = arith.constant 9.99999974E-6 : f32
    %159 = vector.broadcast %cst_97 : f32 to vector<2x8x1xf32>
    %160 = arith.addf %156, %159 : vector<2x8x1xf32>
    %161 = math.rsqrt %160 : vector<2x8x1xf32>
    %162 = vector.broadcast %161 : vector<2x8x1xf32> to vector<2x8x32xf32>
    %163 = arith.mulf %158, %162 : vector<2x8x32xf32>
    %164 = vector.shape_cast %28 : vector<1x32xf32> to vector<1x1x32xf32>
    %165 = vector.broadcast %164 : vector<1x1x32xf32> to vector<2x8x32xf32>
    %166 = arith.mulf %163, %165 : vector<2x8x32xf32>
    %167 = vector.shape_cast %29 : vector<1x32xf32> to vector<1x1x32xf32>
    %168 = vector.broadcast %167 : vector<1x1x32xf32> to vector<2x8x32xf32>
    %169 = arith.addf %166, %168 : vector<2x8x32xf32>
    "tpu.trace_start"() <{level = 10 : i32, message = "bsh,hf->bsf"}> : () -> ()
    %cst_98 = arith.constant dense<0.000000e+00> : vector<2x8x128xf32>
    %170 = tpu.matmul %169, %17, %cst_98 {dimension_numbers = #tpu.dot_dimension_numbers<[2], [0], [0, 1], [1], [0, 0, 0, 1, 1, 1], [], []>} : vector<2x8x32xf32>, vector<32x128xf32>, vector<2x8x128xf32> -> vector<2x8x128xf32>
    "tpu.trace_stop"() : () -> ()
    %171 = vector.shape_cast %24 : vector<1x128xf32> to vector<1x1x128xf32>
    %172 = vector.broadcast %171 : vector<1x1x128xf32> to vector<2x8x128xf32>
    %173 = arith.addf %170, %172 : vector<2x8x128xf32>
    %cst_99 = arith.constant 0.000000e+00 : f32
    %174 = vector.broadcast %cst_99 : f32 to vector<2x8x128xf32>
    %175 = arith.maximumf %173, %174 : vector<2x8x128xf32>
    "tpu.trace_start"() <{level = 10 : i32, message = "bsf,fh->bsh"}> : () -> ()
    %cst_100 = arith.constant dense<0.000000e+00> : vector<2x8x32xf32>
    %176 = tpu.matmul %175, %19, %cst_100 {dimension_numbers = #tpu.dot_dimension_numbers<[2], [0], [0, 1], [1], [0, 0, 0, 1, 1, 1], [], []>} : vector<2x8x128xf32>, vector<128x32xf32>, vector<2x8x32xf32> -> vector<2x8x32xf32>
    "tpu.trace_stop"() : () -> ()
    %177 = vector.shape_cast %25 : vector<1x32xf32> to vector<1x1x32xf32>
    %178 = vector.broadcast %177 : vector<1x1x32xf32> to vector<2x8x32xf32>
    %179 = arith.addf %176, %178 : vector<2x8x32xf32>
    %180 = arith.addf %169, %179 : vector<2x8x32xf32>
    %cst_101 = arith.constant dense<0.000000e+00> : vector<2x8xf32>
    %181 = vector.multi_reduction <add>, %180, %cst_101 [2] : vector<2x8x32xf32> to vector<2x8xf32>
    %182 = vector.shape_cast %181 : vector<2x8xf32> to vector<2x8x1xf32>
    %cst_102 = arith.constant 3.200000e+01 : f32
    %183 = vector.broadcast %cst_102 : f32 to vector<2x8x1xf32>
    %184 = arith.divf %182, %183 : vector<2x8x1xf32>
    %185 = vector.broadcast %184 : vector<2x8x1xf32> to vector<2x8x32xf32>
    %186 = arith.subf %180, %185 : vector<2x8x32xf32>
    %187 = arith.mulf %186, %186 : vector<2x8x32xf32>
    %cst_103 = arith.constant dense<0.000000e+00> : vector<2x8xf32>
    %188 = vector.multi_reduction <add>, %187, %cst_103 [2] : vector<2x8x32xf32> to vector<2x8xf32>
    %189 = vector.shape_cast %188 : vector<2x8xf32> to vector<2x8x1xf32>
    %cst_104 = arith.constant 3.200000e+01 : f32
    %190 = vector.broadcast %cst_104 : f32 to vector<2x8x1xf32>
    %191 = arith.divf %189, %190 : vector<2x8x1xf32>
    %192 = vector.broadcast %184 : vector<2x8x1xf32> to vector<2x8x32xf32>
    %193 = arith.subf %180, %192 : vector<2x8x32xf32>
    %cst_105 = arith.constant 9.99999974E-6 : f32
    %194 = vector.broadcast %cst_105 : f32 to vector<2x8x1xf32>
    %195 = arith.addf %191, %194 : vector<2x8x1xf32>
    %196 = math.rsqrt %195 : vector<2x8x1xf32>
    %197 = vector.broadcast %196 : vector<2x8x1xf32> to vector<2x8x32xf32>
    %198 = arith.mulf %193, %197 : vector<2x8x32xf32>
    %199 = vector.shape_cast %30 : vector<1x32xf32> to vector<1x1x32xf32>
    %200 = vector.broadcast %199 : vector<1x1x32xf32> to vector<2x8x32xf32>
    %201 = arith.mulf %198, %200 : vector<2x8x32xf32>
    %202 = vector.shape_cast %31 : vector<1x32xf32> to vector<1x1x32xf32>
    %203 = vector.broadcast %202 : vector<1x1x32xf32> to vector<2x8x32xf32>
    %204 = arith.addf %201, %203 : vector<2x8x32xf32>
    "tpu.trace_start"() <{level = 10 : i32, message = "bsh,hk->bsk"}> : () -> ()
    %cst_106 = arith.constant dense<0.000000e+00> : vector<2x8x128xf32>
    %205 = tpu.matmul %204, %39, %cst_106 {dimension_numbers = #tpu.dot_dimension_numbers<[2], [0], [0, 1], [1], [0, 0, 0, 1, 1, 1], [], []>} : vector<2x8x32xf32>, vector<32x128xf32>, vector<2x8x128xf32> -> vector<2x8x128xf32>
    "tpu.trace_stop"() : () -> ()
    %206 = vector.shape_cast %50 : vector<1x128xf32> to vector<1x1x128xf32>
    %207 = vector.broadcast %206 : vector<1x1x128xf32> to vector<2x8x128xf32>
    %208 = arith.addf %205, %207 : vector<2x8x128xf32>
    %209 = vector.extract_strided_slice %208 {offsets = [0, 0, 0], sizes = [2, 8, 32], strides = [1, 1, 1]} : vector<2x8x128xf32> to vector<2x8x32xf32>
    %210 = vector.extract_strided_slice %208 {offsets = [0, 0, 32], sizes = [2, 8, 32], strides = [1, 1, 1]} : vector<2x8x128xf32> to vector<2x8x32xf32>
    %211 = vector.extract_strided_slice %208 {offsets = [0, 0, 64], sizes = [2, 8, 32], strides = [1, 1, 1]} : vector<2x8x128xf32> to vector<2x8x32xf32>
    "tpu.trace_start"() <{level = 10 : i32, message = "bsh,bth->bst"}> : () -> ()
    %cst_107 = arith.constant dense<0.000000e+00> : vector<2x8x8xf32>
    %212 = tpu.matmul %209, %210, %cst_107 {dimension_numbers = #tpu.dot_dimension_numbers<[2], [2], [1], [1], [0, 0, 0, 1, 1, 1], [0], [0]>} : vector<2x8x32xf32>, vector<2x8x32xf32>, vector<2x8x8xf32> -> vector<2x8x8xf32>
    "tpu.trace_stop"() : () -> ()
    %cst_108 = arith.constant 0.176776692 : f32
    %213 = vector.broadcast %cst_108 : f32 to vector<2x8x8xf32>
    %214 = arith.mulf %212, %213 : vector<2x8x8xf32>
    %215 = vector.broadcast %74 : vector<1x8x8xf32> to vector<2x8x8xf32>
    %216 = arith.addf %214, %215 : vector<2x8x8xf32>
    %cst_109 = arith.constant dense<0xFF800000> : vector<2x8xf32>
    %217 = vector.multi_reduction <maximumf>, %216, %cst_109 [2] : vector<2x8x8xf32> to vector<2x8xf32>
    %218 = vector.shape_cast %217 : vector<2x8xf32> to vector<2x8x1xf32>
    %219 = vector.broadcast %218 : vector<2x8x1xf32> to vector<2x8x8xf32>
    %220 = arith.subf %216, %219 : vector<2x8x8xf32>
    %221 = math.exp %220 : vector<2x8x8xf32>
    %cst_110 = arith.constant dense<0.000000e+00> : vector<2x8xf32>
    %222 = vector.multi_reduction <add>, %221, %cst_110 [2] : vector<2x8x8xf32> to vector<2x8xf32>
    %223 = vector.shape_cast %222 : vector<2x8xf32> to vector<2x8x1xf32>
    %224 = tpu.reciprocal %223 {approx = true} : vector<2x8x1xf32> -> vector<2x8x1xf32>
    %225 = vector.broadcast %224 : vector<2x8x1xf32> to vector<2x8x8xf32>
    %226 = arith.mulf %221, %225 : vector<2x8x8xf32>
    "tpu.trace_start"() <{level = 10 : i32, message = "bst,bth->bsh"}> : () -> ()
    %cst_111 = arith.constant dense<0.000000e+00> : vector<2x8x32xf32>
    %227 = tpu.matmul %226, %211, %cst_111 {dimension_numbers = #tpu.dot_dimension_numbers<[2], [1], [1], [2], [0, 0, 0, 1, 1, 2], [0], [0]>} : vector<2x8x8xf32>, vector<2x8x32xf32>, vector<2x8x32xf32> -> vector<2x8x32xf32>
    "tpu.trace_stop"() : () -> ()
    "tpu.trace_start"() <{level = 10 : i32, message = "bsh,hk->bsk"}> : () -> ()
    %cst_112 = arith.constant dense<0.000000e+00> : vector<2x8x32xf32>
    %228 = tpu.matmul %227, %41, %cst_112 {dimension_numbers = #tpu.dot_dimension_numbers<[2], [0], [0, 1], [1], [0, 0, 0, 1, 1, 1], [], []>} : vector<2x8x32xf32>, vector<32x32xf32>, vector<2x8x32xf32> -> vector<2x8x32xf32>
    "tpu.trace_stop"() : () -> ()
    %229 = vector.shape_cast %51 : vector<1x32xf32> to vector<1x1x32xf32>
    %230 = vector.broadcast %229 : vector<1x1x32xf32> to vector<2x8x32xf32>
    %231 = arith.addf %228, %230 : vector<2x8x32xf32>
    %232 = arith.addf %204, %231 : vector<2x8x32xf32>
    %cst_113 = arith.constant dense<0.000000e+00> : vector<2x8xf32>
    %233 = vector.multi_reduction <add>, %232, %cst_113 [2] : vector<2x8x32xf32> to vector<2x8xf32>
    %234 = vector.shape_cast %233 : vector<2x8xf32> to vector<2x8x1xf32>
    %cst_114 = arith.constant 3.200000e+01 : f32
    %235 = vector.broadcast %cst_114 : f32 to vector<2x8x1xf32>
    %236 = arith.divf %234, %235 : vector<2x8x1xf32>
    %237 = vector.broadcast %236 : vector<2x8x1xf32> to vector<2x8x32xf32>
    %238 = arith.subf %232, %237 : vector<2x8x32xf32>
    %239 = arith.mulf %238, %238 : vector<2x8x32xf32>
    %cst_115 = arith.constant dense<0.000000e+00> : vector<2x8xf32>
    %240 = vector.multi_reduction <add>, %239, %cst_115 [2] : vector<2x8x32xf32> to vector<2x8xf32>
    %241 = vector.shape_cast %240 : vector<2x8xf32> to vector<2x8x1xf32>
    %cst_116 = arith.constant 3.200000e+01 : f32
    %242 = vector.broadcast %cst_116 : f32 to vector<2x8x1xf32>
    %243 = arith.divf %241, %242 : vector<2x8x1xf32>
    %244 = vector.broadcast %236 : vector<2x8x1xf32> to vector<2x8x32xf32>
    %245 = arith.subf %232, %244 : vector<2x8x32xf32>
    %cst_117 = arith.constant 9.99999974E-6 : f32
    %246 = vector.broadcast %cst_117 : f32 to vector<2x8x1xf32>
    %247 = arith.addf %243, %246 : vector<2x8x1xf32>
    %248 = math.rsqrt %247 : vector<2x8x1xf32>
    %249 = vector.broadcast %248 : vector<2x8x1xf32> to vector<2x8x32xf32>
    %250 = arith.mulf %245, %249 : vector<2x8x32xf32>
    %251 = vector.shape_cast %56 : vector<1x32xf32> to vector<1x1x32xf32>
    %252 = vector.broadcast %251 : vector<1x1x32xf32> to vector<2x8x32xf32>
    %253 = arith.mulf %250, %252 : vector<2x8x32xf32>
    %254 = vector.shape_cast %57 : vector<1x32xf32> to vector<1x1x32xf32>
    %255 = vector.broadcast %254 : vector<1x1x32xf32> to vector<2x8x32xf32>
    %256 = arith.addf %253, %255 : vector<2x8x32xf32>
    %257 = vector.shape_cast %67 : vector<2x32xf32> to vector<2x1x32xf32>
    %258 = vector.broadcast %257 : vector<2x1x32xf32> to vector<2x8x32xf32>
    %259 = arith.addf %256, %258 : vector<2x8x32xf32>
    %cst_118 = arith.constant dense<0.000000e+00> : vector<2x8xf32>
    %260 = vector.multi_reduction <add>, %259, %cst_118 [2] : vector<2x8x32xf32> to vector<2x8xf32>
    %261 = vector.shape_cast %260 : vector<2x8xf32> to vector<2x8x1xf32>
    %cst_119 = arith.constant 3.200000e+01 : f32
    %262 = vector.broadcast %cst_119 : f32 to vector<2x8x1xf32>
    %263 = arith.divf %261, %262 : vector<2x8x1xf32>
    %264 = vector.broadcast %263 : vector<2x8x1xf32> to vector<2x8x32xf32>
    %265 = arith.subf %259, %264 : vector<2x8x32xf32>
    %266 = arith.mulf %265, %265 : vector<2x8x32xf32>
    %cst_120 = arith.constant dense<0.000000e+00> : vector<2x8xf32>
    %267 = vector.multi_reduction <add>, %266, %cst_120 [2] : vector<2x8x32xf32> to vector<2x8xf32>
    %268 = vector.shape_cast %267 : vector<2x8xf32> to vector<2x8x1xf32>
    %cst_121 = arith.constant 3.200000e+01 : f32
    %269 = vector.broadcast %cst_121 : f32 to vector<2x8x1xf32>
    %270 = arith.divf %268, %269 : vector<2x8x1xf32>
    %271 = vector.broadcast %263 : vector<2x8x1xf32> to vector<2x8x32xf32>
    %272 = arith.subf %259, %271 : vector<2x8x32xf32>
    %cst_122 = arith.constant 9.99999974E-6 : f32
    %273 = vector.broadcast %cst_122 : f32 to vector<2x8x1xf32>
    %274 = arith.addf %270, %273 : vector<2x8x1xf32>
    %275 = math.rsqrt %274 : vector<2x8x1xf32>
    %276 = vector.broadcast %275 : vector<2x8x1xf32> to vector<2x8x32xf32>
    %277 = arith.mulf %272, %276 : vector<2x8x32xf32>
    %278 = vector.shape_cast %58 : vector<1x32xf32> to vector<1x1x32xf32>
    %279 = vector.broadcast %278 : vector<1x1x32xf32> to vector<2x8x32xf32>
    %280 = arith.mulf %277, %279 : vector<2x8x32xf32>
    %281 = vector.shape_cast %59 : vector<1x32xf32> to vector<1x1x32xf32>
    %282 = vector.broadcast %281 : vector<1x1x32xf32> to vector<2x8x32xf32>
    %283 = arith.addf %280, %282 : vector<2x8x32xf32>
    "tpu.trace_start"() <{level = 10 : i32, message = "bsh,hf->bsf"}> : () -> ()
    %cst_123 = arith.constant dense<0.000000e+00> : vector<2x8x128xf32>
    %284 = tpu.matmul %283, %47, %cst_123 {dimension_numbers = #tpu.dot_dimension_numbers<[2], [0], [0, 1], [1], [0, 0, 0, 1, 1, 1], [], []>} : vector<2x8x32xf32>, vector<32x128xf32>, vector<2x8x128xf32> -> vector<2x8x128xf32>
    "tpu.trace_stop"() : () -> ()
    %285 = vector.shape_cast %54 : vector<1x128xf32> to vector<1x1x128xf32>
    %286 = vector.broadcast %285 : vector<1x1x128xf32> to vector<2x8x128xf32>
    %287 = arith.addf %284, %286 : vector<2x8x128xf32>
    %cst_124 = arith.constant 0.000000e+00 : f32
    %288 = vector.broadcast %cst_124 : f32 to vector<2x8x128xf32>
    %289 = arith.maximumf %287, %288 : vector<2x8x128xf32>
    "tpu.trace_start"() <{level = 10 : i32, message = "bsf,fh->bsh"}> : () -> ()
    %cst_125 = arith.constant dense<0.000000e+00> : vector<2x8x32xf32>
    %290 = tpu.matmul %289, %49, %cst_125 {dimension_numbers = #tpu.dot_dimension_numbers<[2], [0], [0, 1], [1], [0, 0, 0, 1, 1, 1], [], []>} : vector<2x8x128xf32>, vector<128x32xf32>, vector<2x8x32xf32> -> vector<2x8x32xf32>
    "tpu.trace_stop"() : () -> ()
    %291 = vector.shape_cast %55 : vector<1x32xf32> to vector<1x1x32xf32>
    %292 = vector.broadcast %291 : vector<1x1x32xf32> to vector<2x8x32xf32>
    %293 = arith.addf %290, %292 : vector<2x8x32xf32>
    %294 = arith.addf %283, %293 : vector<2x8x32xf32>
    %cst_126 = arith.constant dense<0.000000e+00> : vector<2x8xf32>
    %295 = vector.multi_reduction <add>, %294, %cst_126 [2] : vector<2x8x32xf32> to vector<2x8xf32>
    %296 = vector.shape_cast %295 : vector<2x8xf32> to vector<2x8x1xf32>
    %cst_127 = arith.constant 3.200000e+01 : f32
    %297 = vector.broadcast %cst_127 : f32 to vector<2x8x1xf32>
    %298 = arith.divf %296, %297 : vector<2x8x1xf32>
    %299 = vector.broadcast %298 : vector<2x8x1xf32> to vector<2x8x32xf32>
    %300 = arith.subf %294, %299 : vector<2x8x32xf32>
    %301 = arith.mulf %300, %300 : vector<2x8x32xf32>
    %cst_128 = arith.constant dense<0.000000e+00> : vector<2x8xf32>
    %302 = vector.multi_reduction <add>, %301, %cst_128 [2] : vector<2x8x32xf32> to vector<2x8xf32>
    %303 = vector.shape_cast %302 : vector<2x8xf32> to vector<2x8x1xf32>
    %cst_129 = arith.constant 3.200000e+01 : f32
    %304 = vector.broadcast %cst_129 : f32 to vector<2x8x1xf32>
    %305 = arith.divf %303, %304 : vector<2x8x1xf32>
    %306 = vector.broadcast %298 : vector<2x8x1xf32> to vector<2x8x32xf32>
    %307 = arith.subf %294, %306 : vector<2x8x32xf32>
    %cst_130 = arith.constant 9.99999974E-6 : f32
    %308 = vector.broadcast %cst_130 : f32 to vector<2x8x1xf32>
    %309 = arith.addf %305, %308 : vector<2x8x1xf32>
    %310 = math.rsqrt %309 : vector<2x8x1xf32>
    %311 = vector.broadcast %310 : vector<2x8x1xf32> to vector<2x8x32xf32>
    %312 = arith.mulf %307, %311 : vector<2x8x32xf32>
    %313 = vector.shape_cast %60 : vector<1x32xf32> to vector<1x1x32xf32>
    %314 = vector.broadcast %313 : vector<1x1x32xf32> to vector<2x8x32xf32>
    %315 = arith.mulf %312, %314 : vector<2x8x32xf32>
    %316 = vector.shape_cast %61 : vector<1x32xf32> to vector<1x1x32xf32>
    %317 = vector.broadcast %316 : vector<1x1x32xf32> to vector<2x8x32xf32>
    %318 = arith.addf %315, %317 : vector<2x8x32xf32>
    %319 = vector.extract_strided_slice %318 {offsets = [0, 0, 0], sizes = [2, 1, 32], strides = [1, 1, 1]} : vector<2x8x32xf32> to vector<2x1x32xf32>
    %320 = vector.shape_cast %319 : vector<2x1x32xf32> to vector<2x32xf32>
    %cst_131 = arith.constant dense<0.000000e+00> : vector<2x16xf32>
    %321 = tpu.matmul %320, %5, %cst_131 {dimension_numbers = #tpu.dot_dimension_numbers<[1], [0], [0], [1], [0, 0, 1, 1], [], []>} : vector<2x32xf32>, vector<32x16xf32>, vector<2x16xf32> -> vector<2x16xf32>
    %322 = vector.broadcast %6 : vector<1x16xf32> to vector<2x16xf32>
    %323 = arith.addf %321, %322 : vector<2x16xf32>
    %c0_i32_132 = arith.constant 0 : i32
    %324 = vector.broadcast %c0_i32_132 : i32 to vector<6x2x16xi32>
    %325 = arith.cmpi eq, %85, %324 : vector<6x2x16xi32>
    %326 = vector.shape_cast %323 : vector<2x16xf32> to vector<1x2x16xf32>
    %327 = vector.shape_cast %326 : vector<1x2x16xf32> to vector<1x2x16xf32>
    %328 = vector.broadcast %327 : vector<1x2x16xf32> to vector<6x2x16xf32>
    %329 = arith.select %325, %328, %86 : vector<6x2x16xi1>, vector<6x2x16xf32>
    %cst_133 = arith.constant dense<0xFF800000> : vector<2xf32>
    %330 = vector.multi_reduction <maximumf>, %323, %cst_133 [1] : vector<2x16xf32> to vector<2xf32>
    %331 = vector.shape_cast %330 : vector<2xf32> to vector<2x1xf32>
    %332 = vector.broadcast %331 : vector<2x1xf32> to vector<2x16xf32>
    %333 = arith.subf %323, %332 : vector<2x16xf32>
    %334 = math.exp %333 : vector<2x16xf32>
    %cst_134 = arith.constant dense<0.000000e+00> : vector<2xf32>
    %335 = vector.multi_reduction <add>, %334, %cst_134 [1] : vector<2x16xf32> to vector<2xf32>
    %336 = vector.shape_cast %335 : vector<2xf32> to vector<2x1xf32>
    %337 = tpu.reciprocal %336 {approx = true} : vector<2x1xf32> -> vector<2x1xf32>
    %338 = vector.broadcast %337 : vector<2x1xf32> to vector<2x16xf32>
    %339 = arith.mulf %334, %338 : vector<2x16xf32>
    %c1_i32 = arith.constant 1 : i32
    %340 = vector.broadcast %c1_i32 : i32 to vector<2x8x16xi32>
    %341 = arith.cmpi eq, %75, %340 : vector<2x8x16xi32>
    %342 = vector.shape_cast %339 : vector<2x16xf32> to vector<2x1x16xf32>
    %343 = vector.shape_cast %342 : vector<2x1x16xf32> to vector<2x1x16xf32>
    %344 = vector.broadcast %343 : vector<2x1x16xf32> to vector<2x8x16xf32>
    %345 = arith.select %341, %344, %84 : vector<2x8x16xi1>, vector<2x8x16xf32>
    "tpu.trace_start"() <{level = 10 : i32, message = "bsv,vh->bsh"}> : () -> ()
    %cst_135 = arith.constant dense<0.000000e+00> : vector<2x8x32xf32>
    %346 = tpu.matmul %345, %1, %cst_135 {dimension_numbers = #tpu.dot_dimension_numbers<[2], [0], [0, 1], [1], [0, 0, 0, 1, 1, 1], [], []>} : vector<2x8x16xf32>, vector<16x32xf32>, vector<2x8x32xf32> -> vector<2x8x32xf32>
    "tpu.trace_stop"() : () -> ()
    %347 = vector.shape_cast %3 : vector<8x32xf32> to vector<1x8x32xf32>
    %348 = vector.broadcast %347 : vector<1x8x32xf32> to vector<2x8x32xf32>
    %349 = arith.addf %346, %348 : vector<2x8x32xf32>
    "tpu.trace_start"() <{level = 10 : i32, message = "bsh,hk->bsk"}> : () -> ()
    %cst_136 = arith.constant dense<0.000000e+00> : vector<2x8x128xf32>
    %350 = tpu.matmul %349, %9, %cst_136 {dimension_numbers = #tpu.dot_dimension_numbers<[2], [0], [0, 1], [1], [0, 0, 0, 1, 1, 1], [], []>} : vector<2x8x32xf32>, vector<32x128xf32>, vector<2x8x128xf32> -> vector<2x8x128xf32>
    "tpu.trace_stop"() : () -> ()
    %351 = vector.shape_cast %20 : vector<1x128xf32> to vector<1x1x128xf32>
    %352 = vector.broadcast %351 : vector<1x1x128xf32> to vector<2x8x128xf32>
    %353 = arith.addf %350, %352 : vector<2x8x128xf32>
    %354 = vector.extract_strided_slice %353 {offsets = [0, 0, 0], sizes = [2, 8, 32], strides = [1, 1, 1]} : vector<2x8x128xf32> to vector<2x8x32xf32>
    %355 = vector.extract_strided_slice %353 {offsets = [0, 0, 32], sizes = [2, 8, 32], strides = [1, 1, 1]} : vector<2x8x128xf32> to vector<2x8x32xf32>
    %356 = vector.extract_strided_slice %353 {offsets = [0, 0, 64], sizes = [2, 8, 32], strides = [1, 1, 1]} : vector<2x8x128xf32> to vector<2x8x32xf32>
    "tpu.trace_start"() <{level = 10 : i32, message = "bsh,bth->bst"}> : () -> ()
    %cst_137 = arith.constant dense<0.000000e+00> : vector<2x8x8xf32>
    %357 = tpu.matmul %354, %355, %cst_137 {dimension_numbers = #tpu.dot_dimension_numbers<[2], [2], [1], [1], [0, 0, 0, 1, 1, 1], [0], [0]>} : vector<2x8x32xf32>, vector<2x8x32xf32>, vector<2x8x8xf32> -> vector<2x8x8xf32>
    "tpu.trace_stop"() : () -> ()
    %cst_138 = arith.constant 0.176776692 : f32
    %358 = vector.broadcast %cst_138 : f32 to vector<2x8x8xf32>
    %359 = arith.mulf %357, %358 : vector<2x8x8xf32>
    %360 = vector.broadcast %74 : vector<1x8x8xf32> to vector<2x8x8xf32>
    %361 = arith.addf %359, %360 : vector<2x8x8xf32>
    %cst_139 = arith.constant dense<0xFF800000> : vector<2x8xf32>
    %362 = vector.multi_reduction <maximumf>, %361, %cst_139 [2] : vector<2x8x8xf32> to vector<2x8xf32>
    %363 = vector.shape_cast %362 : vector<2x8xf32> to vector<2x8x1xf32>
    %364 = vector.broadcast %363 : vector<2x8x1xf32> to vector<2x8x8xf32>
    %365 = arith.subf %361, %364 : vector<2x8x8xf32>
    %366 = math.exp %365 : vector<2x8x8xf32>
    %cst_140 = arith.constant dense<0.000000e+00> : vector<2x8xf32>
    %367 = vector.multi_reduction <add>, %366, %cst_140 [2] : vector<2x8x8xf32> to vector<2x8xf32>
    %368 = vector.shape_cast %367 : vector<2x8xf32> to vector<2x8x1xf32>
    %369 = tpu.reciprocal %368 {approx = true} : vector<2x8x1xf32> -> vector<2x8x1xf32>
    %370 = vector.broadcast %369 : vector<2x8x1xf32> to vector<2x8x8xf32>
    %371 = arith.mulf %366, %370 : vector<2x8x8xf32>
    "tpu.trace_start"() <{level = 10 : i32, message = "bst,bth->bsh"}> : () -> ()
    %cst_141 = arith.constant dense<0.000000e+00> : vector<2x8x32xf32>
    %372 = tpu.matmul %371, %356, %cst_141 {dimension_numbers = #tpu.dot_dimension_numbers<[2], [1], [1], [2], [0, 0, 0, 1, 1, 2], [0], [0]>} : vector<2x8x8xf32>, vector<2x8x32xf32>, vector<2x8x32xf32> -> vector<2x8x32xf32>
    "tpu.trace_stop"() : () -> ()
    "tpu.trace_start"() <{level = 10 : i32, message = "bsh,hk->bsk"}> : () -> ()
    %cst_142 = arith.constant dense<0.000000e+00> : vector<2x8x32xf32>
    %373 = tpu.matmul %372, %11, %cst_142 {dimension_numbers = #tpu.dot_dimension_numbers<[2], [0], [0, 1], [1], [0, 0, 0, 1, 1, 1], [], []>} : vector<2x8x32xf32>, vector<32x32xf32>, vector<2x8x32xf32> -> vector<2x8x32xf32>
    "tpu.trace_stop"() : () -> ()
    %374 = vector.shape_cast %21 : vector<1x32xf32> to vector<1x1x32xf32>
    %375 = vector.broadcast %374 : vector<1x1x32xf32> to vector<2x8x32xf32>
    %376 = arith.addf %373, %375 : vector<2x8x32xf32>
    %377 = arith.addf %349, %376 : vector<2x8x32xf32>
    %cst_143 = arith.constant dense<0.000000e+00> : vector<2x8xf32>
    %378 = vector.multi_reduction <add>, %377, %cst_143 [2] : vector<2x8x32xf32> to vector<2x8xf32>
    %379 = vector.shape_cast %378 : vector<2x8xf32> to vector<2x8x1xf32>
    %cst_144 = arith.constant 3.200000e+01 : f32
    %380 = vector.broadcast %cst_144 : f32 to vector<2x8x1xf32>
    %381 = arith.divf %379, %380 : vector<2x8x1xf32>
    %382 = vector.broadcast %381 : vector<2x8x1xf32> to vector<2x8x32xf32>
    %383 = arith.subf %377, %382 : vector<2x8x32xf32>
    %384 = arith.mulf %383, %383 : vector<2x8x32xf32>
    %cst_145 = arith.constant dense<0.000000e+00> : vector<2x8xf32>
    %385 = vector.multi_reduction <add>, %384, %cst_145 [2] : vector<2x8x32xf32> to vector<2x8xf32>
    %386 = vector.shape_cast %385 : vector<2x8xf32> to vector<2x8x1xf32>
    %cst_146 = arith.constant 3.200000e+01 : f32
    %387 = vector.broadcast %cst_146 : f32 to vector<2x8x1xf32>
    %388 = arith.divf %386, %387 : vector<2x8x1xf32>
    %389 = vector.broadcast %381 : vector<2x8x1xf32> to vector<2x8x32xf32>
    %390 = arith.subf %377, %389 : vector<2x8x32xf32>
    %cst_147 = arith.constant 9.99999974E-6 : f32
    %391 = vector.broadcast %cst_147 : f32 to vector<2x8x1xf32>
    %392 = arith.addf %388, %391 : vector<2x8x1xf32>
    %393 = math.rsqrt %392 : vector<2x8x1xf32>
    %394 = vector.broadcast %393 : vector<2x8x1xf32> to vector<2x8x32xf32>
    %395 = arith.mulf %390, %394 : vector<2x8x32xf32>
    %396 = vector.shape_cast %26 : vector<1x32xf32> to vector<1x1x32xf32>
    %397 = vector.broadcast %396 : vector<1x1x32xf32> to vector<2x8x32xf32>
    %398 = arith.mulf %395, %397 : vector<2x8x32xf32>
    %399 = vector.shape_cast %27 : vector<1x32xf32> to vector<1x1x32xf32>
    %400 = vector.broadcast %399 : vector<1x1x32xf32> to vector<2x8x32xf32>
    %401 = arith.addf %398, %400 : vector<2x8x32xf32>
    %402 = vector.shape_cast %37 : vector<2x32xf32> to vector<2x1x32xf32>
    %403 = vector.broadcast %402 : vector<2x1x32xf32> to vector<2x8x32xf32>
    %404 = arith.addf %401, %403 : vector<2x8x32xf32>
    %cst_148 = arith.constant dense<0.000000e+00> : vector<2x8xf32>
    %405 = vector.multi_reduction <add>, %404, %cst_148 [2] : vector<2x8x32xf32> to vector<2x8xf32>
    %406 = vector.shape_cast %405 : vector<2x8xf32> to vector<2x8x1xf32>
    %cst_149 = arith.constant 3.200000e+01 : f32
    %407 = vector.broadcast %cst_149 : f32 to vector<2x8x1xf32>
    %408 = arith.divf %406, %407 : vector<2x8x1xf32>
    %409 = vector.broadcast %408 : vector<2x8x1xf32> to vector<2x8x32xf32>
    %410 = arith.subf %404, %409 : vector<2x8x32xf32>
    %411 = arith.mulf %410, %410 : vector<2x8x32xf32>
    %cst_150 = arith.constant dense<0.000000e+00> : vector<2x8xf32>
    %412 = vector.multi_reduction <add>, %411, %cst_150 [2] : vector<2x8x32xf32> to vector<2x8xf32>
    %413 = vector.shape_cast %412 : vector<2x8xf32> to vector<2x8x1xf32>
    %cst_151 = arith.constant 3.200000e+01 : f32
    %414 = vector.broadcast %cst_151 : f32 to vector<2x8x1xf32>
    %415 = arith.divf %413, %414 : vector<2x8x1xf32>
    %416 = vector.broadcast %408 : vector<2x8x1xf32> to vector<2x8x32xf32>
    %417 = arith.subf %404, %416 : vector<2x8x32xf32>
    %cst_152 = arith.constant 9.99999974E-6 : f32
    %418 = vector.broadcast %cst_152 : f32 to vector<2x8x1xf32>
    %419 = arith.addf %415, %418 : vector<2x8x1xf32>
    %420 = math.rsqrt %419 : vector<2x8x1xf32>
    %421 = vector.broadcast %420 : vector<2x8x1xf32> to vector<2x8x32xf32>
    %422 = arith.mulf %417, %421 : vector<2x8x32xf32>
    %423 = vector.shape_cast %28 : vector<1x32xf32> to vector<1x1x32xf32>
    %424 = vector.broadcast %423 : vector<1x1x32xf32> to vector<2x8x32xf32>
    %425 = arith.mulf %422, %424 : vector<2x8x32xf32>
    %426 = vector.shape_cast %29 : vector<1x32xf32> to vector<1x1x32xf32>
    %427 = vector.broadcast %426 : vector<1x1x32xf32> to vector<2x8x32xf32>
    %428 = arith.addf %425, %427 : vector<2x8x32xf32>
    "tpu.trace_start"() <{level = 10 : i32, message = "bsh,hf->bsf"}> : () -> ()
    %cst_153 = arith.constant dense<0.000000e+00> : vector<2x8x128xf32>
    %429 = tpu.matmul %428, %17, %cst_153 {dimension_numbers = #tpu.dot_dimension_numbers<[2], [0], [0, 1], [1], [0, 0, 0, 1, 1, 1], [], []>} : vector<2x8x32xf32>, vector<32x128xf32>, vector<2x8x128xf32> -> vector<2x8x128xf32>
    "tpu.trace_stop"() : () -> ()
    %430 = vector.shape_cast %24 : vector<1x128xf32> to vector<1x1x128xf32>
    %431 = vector.broadcast %430 : vector<1x1x128xf32> to vector<2x8x128xf32>
    %432 = arith.addf %429, %431 : vector<2x8x128xf32>
    %cst_154 = arith.constant 0.000000e+00 : f32
    %433 = vector.broadcast %cst_154 : f32 to vector<2x8x128xf32>
    %434 = arith.maximumf %432, %433 : vector<2x8x128xf32>
    "tpu.trace_start"() <{level = 10 : i32, message = "bsf,fh->bsh"}> : () -> ()
    %cst_155 = arith.constant dense<0.000000e+00> : vector<2x8x32xf32>
    %435 = tpu.matmul %434, %19, %cst_155 {dimension_numbers = #tpu.dot_dimension_numbers<[2], [0], [0, 1], [1], [0, 0, 0, 1, 1, 1], [], []>} : vector<2x8x128xf32>, vector<128x32xf32>, vector<2x8x32xf32> -> vector<2x8x32xf32>
    "tpu.trace_stop"() : () -> ()
    %436 = vector.shape_cast %25 : vector<1x32xf32> to vector<1x1x32xf32>
    %437 = vector.broadcast %436 : vector<1x1x32xf32> to vector<2x8x32xf32>
    %438 = arith.addf %435, %437 : vector<2x8x32xf32>
    %439 = arith.addf %428, %438 : vector<2x8x32xf32>
    %cst_156 = arith.constant dense<0.000000e+00> : vector<2x8xf32>
    %440 = vector.multi_reduction <add>, %439, %cst_156 [2] : vector<2x8x32xf32> to vector<2x8xf32>
    %441 = vector.shape_cast %440 : vector<2x8xf32> to vector<2x8x1xf32>
    %cst_157 = arith.constant 3.200000e+01 : f32
    %442 = vector.broadcast %cst_157 : f32 to vector<2x8x1xf32>
    %443 = arith.divf %441, %442 : vector<2x8x1xf32>
    %444 = vector.broadcast %443 : vector<2x8x1xf32> to vector<2x8x32xf32>
    %445 = arith.subf %439, %444 : vector<2x8x32xf32>
    %446 = arith.mulf %445, %445 : vector<2x8x32xf32>
    %cst_158 = arith.constant dense<0.000000e+00> : vector<2x8xf32>
    %447 = vector.multi_reduction <add>, %446, %cst_158 [2] : vector<2x8x32xf32> to vector<2x8xf32>
    %448 = vector.shape_cast %447 : vector<2x8xf32> to vector<2x8x1xf32>
    %cst_159 = arith.constant 3.200000e+01 : f32
    %449 = vector.broadcast %cst_159 : f32 to vector<2x8x1xf32>
    %450 = arith.divf %448, %449 : vector<2x8x1xf32>
    %451 = vector.broadcast %443 : vector<2x8x1xf32> to vector<2x8x32xf32>
    %452 = arith.subf %439, %451 : vector<2x8x32xf32>
    %cst_160 = arith.constant 9.99999974E-6 : f32
    %453 = vector.broadcast %cst_160 : f32 to vector<2x8x1xf32>
    %454 = arith.addf %450, %453 : vector<2x8x1xf32>
    %455 = math.rsqrt %454 : vector<2x8x1xf32>
    %456 = vector.broadcast %455 : vector<2x8x1xf32> to vector<2x8x32xf32>
    %457 = arith.mulf %452, %456 : vector<2x8x32xf32>
    %458 = vector.shape_cast %30 : vector<1x32xf32> to vector<1x1x32xf32>
    %459 = vector.broadcast %458 : vector<1x1x32xf32> to vector<2x8x32xf32>
    %460 = arith.mulf %457, %459 : vector<2x8x32xf32>
    %461 = vector.shape_cast %31 : vector<1x32xf32> to vector<1x1x32xf32>
    %462 = vector.broadcast %461 : vector<1x1x32xf32> to vector<2x8x32xf32>
    %463 = arith.addf %460, %462 : vector<2x8x32xf32>
    "tpu.trace_start"() <{level = 10 : i32, message = "bsh,hk->bsk"}> : () -> ()
    %cst_161 = arith.constant dense<0.000000e+00> : vector<2x8x128xf32>
    %464 = tpu.matmul %463, %39, %cst_161 {dimension_numbers = #tpu.dot_dimension_numbers<[2], [0], [0, 1], [1], [0, 0, 0, 1, 1, 1], [], []>} : vector<2x8x32xf32>, vector<32x128xf32>, vector<2x8x128xf32> -> vector<2x8x128xf32>
    "tpu.trace_stop"() : () -> ()
    %465 = vector.shape_cast %50 : vector<1x128xf32> to vector<1x1x128xf32>
    %466 = vector.broadcast %465 : vector<1x1x128xf32> to vector<2x8x128xf32>
    %467 = arith.addf %464, %466 : vector<2x8x128xf32>
    %468 = vector.extract_strided_slice %467 {offsets = [0, 0, 0], sizes = [2, 8, 32], strides = [1, 1, 1]} : vector<2x8x128xf32> to vector<2x8x32xf32>
    %469 = vector.extract_strided_slice %467 {offsets = [0, 0, 32], sizes = [2, 8, 32], strides = [1, 1, 1]} : vector<2x8x128xf32> to vector<2x8x32xf32>
    %470 = vector.extract_strided_slice %467 {offsets = [0, 0, 64], sizes = [2, 8, 32], strides = [1, 1, 1]} : vector<2x8x128xf32> to vector<2x8x32xf32>
    "tpu.trace_start"() <{level = 10 : i32, message = "bsh,bth->bst"}> : () -> ()
    %cst_162 = arith.constant dense<0.000000e+00> : vector<2x8x8xf32>
    %471 = tpu.matmul %468, %469, %cst_162 {dimension_numbers = #tpu.dot_dimension_numbers<[2], [2], [1], [1], [0, 0, 0, 1, 1, 1], [0], [0]>} : vector<2x8x32xf32>, vector<2x8x32xf32>, vector<2x8x8xf32> -> vector<2x8x8xf32>
    "tpu.trace_stop"() : () -> ()
    %cst_163 = arith.constant 0.176776692 : f32
    %472 = vector.broadcast %cst_163 : f32 to vector<2x8x8xf32>
    %473 = arith.mulf %471, %472 : vector<2x8x8xf32>
    %474 = vector.broadcast %74 : vector<1x8x8xf32> to vector<2x8x8xf32>
    %475 = arith.addf %473, %474 : vector<2x8x8xf32>
    %cst_164 = arith.constant dense<0xFF800000> : vector<2x8xf32>
    %476 = vector.multi_reduction <maximumf>, %475, %cst_164 [2] : vector<2x8x8xf32> to vector<2x8xf32>
    %477 = vector.shape_cast %476 : vector<2x8xf32> to vector<2x8x1xf32>
    %478 = vector.broadcast %477 : vector<2x8x1xf32> to vector<2x8x8xf32>
    %479 = arith.subf %475, %478 : vector<2x8x8xf32>
    %480 = math.exp %479 : vector<2x8x8xf32>
    %cst_165 = arith.constant dense<0.000000e+00> : vector<2x8xf32>
    %481 = vector.multi_reduction <add>, %480, %cst_165 [2] : vector<2x8x8xf32> to vector<2x8xf32>
    %482 = vector.shape_cast %481 : vector<2x8xf32> to vector<2x8x1xf32>
    %483 = tpu.reciprocal %482 {approx = true} : vector<2x8x1xf32> -> vector<2x8x1xf32>
    %484 = vector.broadcast %483 : vector<2x8x1xf32> to vector<2x8x8xf32>
    %485 = arith.mulf %480, %484 : vector<2x8x8xf32>
    "tpu.trace_start"() <{level = 10 : i32, message = "bst,bth->bsh"}> : () -> ()
    %cst_166 = arith.constant dense<0.000000e+00> : vector<2x8x32xf32>
    %486 = tpu.matmul %485, %470, %cst_166 {dimension_numbers = #tpu.dot_dimension_numbers<[2], [1], [1], [2], [0, 0, 0, 1, 1, 2], [0], [0]>} : vector<2x8x8xf32>, vector<2x8x32xf32>, vector<2x8x32xf32> -> vector<2x8x32xf32>
    "tpu.trace_stop"() : () -> ()
    "tpu.trace_start"() <{level = 10 : i32, message = "bsh,hk->bsk"}> : () -> ()
    %cst_167 = arith.constant dense<0.000000e+00> : vector<2x8x32xf32>
    %487 = tpu.matmul %486, %41, %cst_167 {dimension_numbers = #tpu.dot_dimension_numbers<[2], [0], [0, 1], [1], [0, 0, 0, 1, 1, 1], [], []>} : vector<2x8x32xf32>, vector<32x32xf32>, vector<2x8x32xf32> -> vector<2x8x32xf32>
    "tpu.trace_stop"() : () -> ()
    %488 = vector.shape_cast %51 : vector<1x32xf32> to vector<1x1x32xf32>
    %489 = vector.broadcast %488 : vector<1x1x32xf32> to vector<2x8x32xf32>
    %490 = arith.addf %487, %489 : vector<2x8x32xf32>
    %491 = arith.addf %463, %490 : vector<2x8x32xf32>
    %cst_168 = arith.constant dense<0.000000e+00> : vector<2x8xf32>
    %492 = vector.multi_reduction <add>, %491, %cst_168 [2] : vector<2x8x32xf32> to vector<2x8xf32>
    %493 = vector.shape_cast %492 : vector<2x8xf32> to vector<2x8x1xf32>
    %cst_169 = arith.constant 3.200000e+01 : f32
    %494 = vector.broadcast %cst_169 : f32 to vector<2x8x1xf32>
    %495 = arith.divf %493, %494 : vector<2x8x1xf32>
    %496 = vector.broadcast %495 : vector<2x8x1xf32> to vector<2x8x32xf32>
    %497 = arith.subf %491, %496 : vector<2x8x32xf32>
    %498 = arith.mulf %497, %497 : vector<2x8x32xf32>
    %cst_170 = arith.constant dense<0.000000e+00> : vector<2x8xf32>
    %499 = vector.multi_reduction <add>, %498, %cst_170 [2] : vector<2x8x32xf32> to vector<2x8xf32>
    %500 = vector.shape_cast %499 : vector<2x8xf32> to vector<2x8x1xf32>
    %cst_171 = arith.constant 3.200000e+01 : f32
    %501 = vector.broadcast %cst_171 : f32 to vector<2x8x1xf32>
    %502 = arith.divf %500, %501 : vector<2x8x1xf32>
    %503 = vector.broadcast %495 : vector<2x8x1xf32> to vector<2x8x32xf32>
    %504 = arith.subf %491, %503 : vector<2x8x32xf32>
    %cst_172 = arith.constant 9.99999974E-6 : f32
    %505 = vector.broadcast %cst_172 : f32 to vector<2x8x1xf32>
    %506 = arith.addf %502, %505 : vector<2x8x1xf32>
    %507 = math.rsqrt %506 : vector<2x8x1xf32>
    %508 = vector.broadcast %507 : vector<2x8x1xf32> to vector<2x8x32xf32>
    %509 = arith.mulf %504, %508 : vector<2x8x32xf32>
    %510 = vector.shape_cast %56 : vector<1x32xf32> to vector<1x1x32xf32>
    %511 = vector.broadcast %510 : vector<1x1x32xf32> to vector<2x8x32xf32>
    %512 = arith.mulf %509, %511 : vector<2x8x32xf32>
    %513 = vector.shape_cast %57 : vector<1x32xf32> to vector<1x1x32xf32>
    %514 = vector.broadcast %513 : vector<1x1x32xf32> to vector<2x8x32xf32>
    %515 = arith.addf %512, %514 : vector<2x8x32xf32>
    %516 = vector.shape_cast %67 : vector<2x32xf32> to vector<2x1x32xf32>
    %517 = vector.broadcast %516 : vector<2x1x32xf32> to vector<2x8x32xf32>
    %518 = arith.addf %515, %517 : vector<2x8x32xf32>
    %cst_173 = arith.constant dense<0.000000e+00> : vector<2x8xf32>
    %519 = vector.multi_reduction <add>, %518, %cst_173 [2] : vector<2x8x32xf32> to vector<2x8xf32>
    %520 = vector.shape_cast %519 : vector<2x8xf32> to vector<2x8x1xf32>
    %cst_174 = arith.constant 3.200000e+01 : f32
    %521 = vector.broadcast %cst_174 : f32 to vector<2x8x1xf32>
    %522 = arith.divf %520, %521 : vector<2x8x1xf32>
    %523 = vector.broadcast %522 : vector<2x8x1xf32> to vector<2x8x32xf32>
    %524 = arith.subf %518, %523 : vector<2x8x32xf32>
    %525 = arith.mulf %524, %524 : vector<2x8x32xf32>
    %cst_175 = arith.constant dense<0.000000e+00> : vector<2x8xf32>
    %526 = vector.multi_reduction <add>, %525, %cst_175 [2] : vector<2x8x32xf32> to vector<2x8xf32>
    %527 = vector.shape_cast %526 : vector<2x8xf32> to vector<2x8x1xf32>
    %cst_176 = arith.constant 3.200000e+01 : f32
    %528 = vector.broadcast %cst_176 : f32 to vector<2x8x1xf32>
    %529 = arith.divf %527, %528 : vector<2x8x1xf32>
    %530 = vector.broadcast %522 : vector<2x8x1xf32> to vector<2x8x32xf32>
    %531 = arith.subf %518, %530 : vector<2x8x32xf32>
    %cst_177 = arith.constant 9.99999974E-6 : f32
    %532 = vector.broadcast %cst_177 : f32 to vector<2x8x1xf32>
    %533 = arith.addf %529, %532 : vector<2x8x1xf32>
    %534 = math.rsqrt %533 : vector<2x8x1xf32>
    %535 = vector.broadcast %534 : vector<2x8x1xf32> to vector<2x8x32xf32>
    %536 = arith.mulf %531, %535 : vector<2x8x32xf32>
    %537 = vector.shape_cast %58 : vector<1x32xf32> to vector<1x1x32xf32>
    %538 = vector.broadcast %537 : vector<1x1x32xf32> to vector<2x8x32xf32>
    %539 = arith.mulf %536, %538 : vector<2x8x32xf32>
    %540 = vector.shape_cast %59 : vector<1x32xf32> to vector<1x1x32xf32>
    %541 = vector.broadcast %540 : vector<1x1x32xf32> to vector<2x8x32xf32>
    %542 = arith.addf %539, %541 : vector<2x8x32xf32>
    "tpu.trace_start"() <{level = 10 : i32, message = "bsh,hf->bsf"}> : () -> ()
    %cst_178 = arith.constant dense<0.000000e+00> : vector<2x8x128xf32>
    %543 = tpu.matmul %542, %47, %cst_178 {dimension_numbers = #tpu.dot_dimension_numbers<[2], [0], [0, 1], [1], [0, 0, 0, 1, 1, 1], [], []>} : vector<2x8x32xf32>, vector<32x128xf32>, vector<2x8x128xf32> -> vector<2x8x128xf32>
    "tpu.trace_stop"() : () -> ()
    %544 = vector.shape_cast %54 : vector<1x128xf32> to vector<1x1x128xf32>
    %545 = vector.broadcast %544 : vector<1x1x128xf32> to vector<2x8x128xf32>
    %546 = arith.addf %543, %545 : vector<2x8x128xf32>
    %cst_179 = arith.constant 0.000000e+00 : f32
    %547 = vector.broadcast %cst_179 : f32 to vector<2x8x128xf32>
    %548 = arith.maximumf %546, %547 : vector<2x8x128xf32>
    "tpu.trace_start"() <{level = 10 : i32, message = "bsf,fh->bsh"}> : () -> ()
    %cst_180 = arith.constant dense<0.000000e+00> : vector<2x8x32xf32>
    %549 = tpu.matmul %548, %49, %cst_180 {dimension_numbers = #tpu.dot_dimension_numbers<[2], [0], [0, 1], [1], [0, 0, 0, 1, 1, 1], [], []>} : vector<2x8x128xf32>, vector<128x32xf32>, vector<2x8x32xf32> -> vector<2x8x32xf32>
    "tpu.trace_stop"() : () -> ()
    %550 = vector.shape_cast %55 : vector<1x32xf32> to vector<1x1x32xf32>
    %551 = vector.broadcast %550 : vector<1x1x32xf32> to vector<2x8x32xf32>
    %552 = arith.addf %549, %551 : vector<2x8x32xf32>
    %553 = arith.addf %542, %552 : vector<2x8x32xf32>
    %cst_181 = arith.constant dense<0.000000e+00> : vector<2x8xf32>
    %554 = vector.multi_reduction <add>, %553, %cst_181 [2] : vector<2x8x32xf32> to vector<2x8xf32>
    %555 = vector.shape_cast %554 : vector<2x8xf32> to vector<2x8x1xf32>
    %cst_182 = arith.constant 3.200000e+01 : f32
    %556 = vector.broadcast %cst_182 : f32 to vector<2x8x1xf32>
    %557 = arith.divf %555, %556 : vector<2x8x1xf32>
    %558 = vector.broadcast %557 : vector<2x8x1xf32> to vector<2x8x32xf32>
    %559 = arith.subf %553, %558 : vector<2x8x32xf32>
    %560 = arith.mulf %559, %559 : vector<2x8x32xf32>
    %cst_183 = arith.constant dense<0.000000e+00> : vector<2x8xf32>
    %561 = vector.multi_reduction <add>, %560, %cst_183 [2] : vector<2x8x32xf32> to vector<2x8xf32>
    %562 = vector.shape_cast %561 : vector<2x8xf32> to vector<2x8x1xf32>
    %cst_184 = arith.constant 3.200000e+01 : f32
    %563 = vector.broadcast %cst_184 : f32 to vector<2x8x1xf32>
    %564 = arith.divf %562, %563 : vector<2x8x1xf32>
    %565 = vector.broadcast %557 : vector<2x8x1xf32> to vector<2x8x32xf32>
    %566 = arith.subf %553, %565 : vector<2x8x32xf32>
    %cst_185 = arith.constant 9.99999974E-6 : f32
    %567 = vector.broadcast %cst_185 : f32 to vector<2x8x1xf32>
    %568 = arith.addf %564, %567 : vector<2x8x1xf32>
    %569 = math.rsqrt %568 : vector<2x8x1xf32>
    %570 = vector.broadcast %569 : vector<2x8x1xf32> to vector<2x8x32xf32>
    %571 = arith.mulf %566, %570 : vector<2x8x32xf32>
    %572 = vector.shape_cast %60 : vector<1x32xf32> to vector<1x1x32xf32>
    %573 = vector.broadcast %572 : vector<1x1x32xf32> to vector<2x8x32xf32>
    %574 = arith.mulf %571, %573 : vector<2x8x32xf32>
    %575 = vector.shape_cast %61 : vector<1x32xf32> to vector<1x1x32xf32>
    %576 = vector.broadcast %575 : vector<1x1x32xf32> to vector<2x8x32xf32>
    %577 = arith.addf %574, %576 : vector<2x8x32xf32>
    %578 = vector.extract_strided_slice %577 {offsets = [0, 1, 0], sizes = [2, 1, 32], strides = [1, 1, 1]} : vector<2x8x32xf32> to vector<2x1x32xf32>
    %579 = vector.shape_cast %578 : vector<2x1x32xf32> to vector<2x32xf32>
    %cst_186 = arith.constant dense<0.000000e+00> : vector<2x16xf32>
    %580 = tpu.matmul %579, %5, %cst_186 {dimension_numbers = #tpu.dot_dimension_numbers<[1], [0], [0], [1], [0, 0, 1, 1], [], []>} : vector<2x32xf32>, vector<32x16xf32>, vector<2x16xf32> -> vector<2x16xf32>
    %581 = vector.broadcast %6 : vector<1x16xf32> to vector<2x16xf32>
    %582 = arith.addf %580, %581 : vector<2x16xf32>
    %c1_i32_187 = arith.constant 1 : i32
    %583 = vector.broadcast %c1_i32_187 : i32 to vector<6x2x16xi32>
    %584 = arith.cmpi eq, %85, %583 : vector<6x2x16xi32>
    %585 = vector.shape_cast %582 : vector<2x16xf32> to vector<1x2x16xf32>
    %586 = vector.shape_cast %585 : vector<1x2x16xf32> to vector<1x2x16xf32>
    %587 = vector.broadcast %586 : vector<1x2x16xf32> to vector<6x2x16xf32>
    %588 = arith.select %584, %587, %329 : vector<6x2x16xi1>, vector<6x2x16xf32>
    %cst_188 = arith.constant dense<0xFF800000> : vector<2xf32>
    %589 = vector.multi_reduction <maximumf>, %582, %cst_188 [1] : vector<2x16xf32> to vector<2xf32>
    %590 = vector.shape_cast %589 : vector<2xf32> to vector<2x1xf32>
    %591 = vector.broadcast %590 : vector<2x1xf32> to vector<2x16xf32>
    %592 = arith.subf %582, %591 : vector<2x16xf32>
    %593 = math.exp %592 : vector<2x16xf32>
    %cst_189 = arith.constant dense<0.000000e+00> : vector<2xf32>
    %594 = vector.multi_reduction <add>, %593, %cst_189 [1] : vector<2x16xf32> to vector<2xf32>
    %595 = vector.shape_cast %594 : vector<2xf32> to vector<2x1xf32>
    %596 = tpu.reciprocal %595 {approx = true} : vector<2x1xf32> -> vector<2x1xf32>
    %597 = vector.broadcast %596 : vector<2x1xf32> to vector<2x16xf32>
    %598 = arith.mulf %593, %597 : vector<2x16xf32>
    %c2_i32 = arith.constant 2 : i32
    %599 = vector.broadcast %c2_i32 : i32 to vector<2x8x16xi32>
    %600 = arith.cmpi eq, %75, %599 : vector<2x8x16xi32>
    %601 = vector.shape_cast %598 : vector<2x16xf32> to vector<2x1x16xf32>
    %602 = vector.shape_cast %601 : vector<2x1x16xf32> to vector<2x1x16xf32>
    %603 = vector.broadcast %602 : vector<2x1x16xf32> to vector<2x8x16xf32>
    %604 = arith.select %600, %603, %345 : vector<2x8x16xi1>, vector<2x8x16xf32>
    "tpu.trace_start"() <{level = 10 : i32, message = "bsv,vh->bsh"}> : () -> ()
    %cst_190 = arith.constant dense<0.000000e+00> : vector<2x8x32xf32>
    %605 = tpu.matmul %604, %1, %cst_190 {dimension_numbers = #tpu.dot_dimension_numbers<[2], [0], [0, 1], [1], [0, 0, 0, 1, 1, 1], [], []>} : vector<2x8x16xf32>, vector<16x32xf32>, vector<2x8x32xf32> -> vector<2x8x32xf32>
    "tpu.trace_stop"() : () -> ()
    %606 = vector.shape_cast %3 : vector<8x32xf32> to vector<1x8x32xf32>
    %607 = vector.broadcast %606 : vector<1x8x32xf32> to vector<2x8x32xf32>
    %608 = arith.addf %605, %607 : vector<2x8x32xf32>
    "tpu.trace_start"() <{level = 10 : i32, message = "bsh,hk->bsk"}> : () -> ()
    %cst_191 = arith.constant dense<0.000000e+00> : vector<2x8x128xf32>
    %609 = tpu.matmul %608, %9, %cst_191 {dimension_numbers = #tpu.dot_dimension_numbers<[2], [0], [0, 1], [1], [0, 0, 0, 1, 1, 1], [], []>} : vector<2x8x32xf32>, vector<32x128xf32>, vector<2x8x128xf32> -> vector<2x8x128xf32>
    "tpu.trace_stop"() : () -> ()
    %610 = vector.shape_cast %20 : vector<1x128xf32> to vector<1x1x128xf32>
    %611 = vector.broadcast %610 : vector<1x1x128xf32> to vector<2x8x128xf32>
    %612 = arith.addf %609, %611 : vector<2x8x128xf32>
    %613 = vector.extract_strided_slice %612 {offsets = [0, 0, 0], sizes = [2, 8, 32], strides = [1, 1, 1]} : vector<2x8x128xf32> to vector<2x8x32xf32>
    %614 = vector.extract_strided_slice %612 {offsets = [0, 0, 32], sizes = [2, 8, 32], strides = [1, 1, 1]} : vector<2x8x128xf32> to vector<2x8x32xf32>
    %615 = vector.extract_strided_slice %612 {offsets = [0, 0, 64], sizes = [2, 8, 32], strides = [1, 1, 1]} : vector<2x8x128xf32> to vector<2x8x32xf32>
    "tpu.trace_start"() <{level = 10 : i32, message = "bsh,bth->bst"}> : () -> ()
    %cst_192 = arith.constant dense<0.000000e+00> : vector<2x8x8xf32>
    %616 = tpu.matmul %613, %614, %cst_192 {dimension_numbers = #tpu.dot_dimension_numbers<[2], [2], [1], [1], [0, 0, 0, 1, 1, 1], [0], [0]>} : vector<2x8x32xf32>, vector<2x8x32xf32>, vector<2x8x8xf32> -> vector<2x8x8xf32>
    "tpu.trace_stop"() : () -> ()
    %cst_193 = arith.constant 0.176776692 : f32
    %617 = vector.broadcast %cst_193 : f32 to vector<2x8x8xf32>
    %618 = arith.mulf %616, %617 : vector<2x8x8xf32>
    %619 = vector.broadcast %74 : vector<1x8x8xf32> to vector<2x8x8xf32>
    %620 = arith.addf %618, %619 : vector<2x8x8xf32>
    %cst_194 = arith.constant dense<0xFF800000> : vector<2x8xf32>
    %621 = vector.multi_reduction <maximumf>, %620, %cst_194 [2] : vector<2x8x8xf32> to vector<2x8xf32>
    %622 = vector.shape_cast %621 : vector<2x8xf32> to vector<2x8x1xf32>
    %623 = vector.broadcast %622 : vector<2x8x1xf32> to vector<2x8x8xf32>
    %624 = arith.subf %620, %623 : vector<2x8x8xf32>
    %625 = math.exp %624 : vector<2x8x8xf32>
    %cst_195 = arith.constant dense<0.000000e+00> : vector<2x8xf32>
    %626 = vector.multi_reduction <add>, %625, %cst_195 [2] : vector<2x8x8xf32> to vector<2x8xf32>
    %627 = vector.shape_cast %626 : vector<2x8xf32> to vector<2x8x1xf32>
    %628 = tpu.reciprocal %627 {approx = true} : vector<2x8x1xf32> -> vector<2x8x1xf32>
    %629 = vector.broadcast %628 : vector<2x8x1xf32> to vector<2x8x8xf32>
    %630 = arith.mulf %625, %629 : vector<2x8x8xf32>
    "tpu.trace_start"() <{level = 10 : i32, message = "bst,bth->bsh"}> : () -> ()
    %cst_196 = arith.constant dense<0.000000e+00> : vector<2x8x32xf32>
    %631 = tpu.matmul %630, %615, %cst_196 {dimension_numbers = #tpu.dot_dimension_numbers<[2], [1], [1], [2], [0, 0, 0, 1, 1, 2], [0], [0]>} : vector<2x8x8xf32>, vector<2x8x32xf32>, vector<2x8x32xf32> -> vector<2x8x32xf32>
    "tpu.trace_stop"() : () -> ()
    "tpu.trace_start"() <{level = 10 : i32, message = "bsh,hk->bsk"}> : () -> ()
    %cst_197 = arith.constant dense<0.000000e+00> : vector<2x8x32xf32>
    %632 = tpu.matmul %631, %11, %cst_197 {dimension_numbers = #tpu.dot_dimension_numbers<[2], [0], [0, 1], [1], [0, 0, 0, 1, 1, 1], [], []>} : vector<2x8x32xf32>, vector<32x32xf32>, vector<2x8x32xf32> -> vector<2x8x32xf32>
    "tpu.trace_stop"() : () -> ()
    %633 = vector.shape_cast %21 : vector<1x32xf32> to vector<1x1x32xf32>
    %634 = vector.broadcast %633 : vector<1x1x32xf32> to vector<2x8x32xf32>
    %635 = arith.addf %632, %634 : vector<2x8x32xf32>
    %636 = arith.addf %608, %635 : vector<2x8x32xf32>
    %cst_198 = arith.constant dense<0.000000e+00> : vector<2x8xf32>
    %637 = vector.multi_reduction <add>, %636, %cst_198 [2] : vector<2x8x32xf32> to vector<2x8xf32>
    %638 = vector.shape_cast %637 : vector<2x8xf32> to vector<2x8x1xf32>
    %cst_199 = arith.constant 3.200000e+01 : f32
    %639 = vector.broadcast %cst_199 : f32 to vector<2x8x1xf32>
    %640 = arith.divf %638, %639 : vector<2x8x1xf32>
    %641 = vector.broadcast %640 : vector<2x8x1xf32> to vector<2x8x32xf32>
    %642 = arith.subf %636, %641 : vector<2x8x32xf32>
    %643 = arith.mulf %642, %642 : vector<2x8x32xf32>
    %cst_200 = arith.constant dense<0.000000e+00> : vector<2x8xf32>
    %644 = vector.multi_reduction <add>, %643, %cst_200 [2] : vector<2x8x32xf32> to vector<2x8xf32>
    %645 = vector.shape_cast %644 : vector<2x8xf32> to vector<2x8x1xf32>
    %cst_201 = arith.constant 3.200000e+01 : f32
    %646 = vector.broadcast %cst_201 : f32 to vector<2x8x1xf32>
    %647 = arith.divf %645, %646 : vector<2x8x1xf32>
    %648 = vector.broadcast %640 : vector<2x8x1xf32> to vector<2x8x32xf32>
    %649 = arith.subf %636, %648 : vector<2x8x32xf32>
    %cst_202 = arith.constant 9.99999974E-6 : f32
    %650 = vector.broadcast %cst_202 : f32 to vector<2x8x1xf32>
    %651 = arith.addf %647, %650 : vector<2x8x1xf32>
    %652 = math.rsqrt %651 : vector<2x8x1xf32>
    %653 = vector.broadcast %652 : vector<2x8x1xf32> to vector<2x8x32xf32>
    %654 = arith.mulf %649, %653 : vector<2x8x32xf32>
    %655 = vector.shape_cast %26 : vector<1x32xf32> to vector<1x1x32xf32>
    %656 = vector.broadcast %655 : vector<1x1x32xf32> to vector<2x8x32xf32>
    %657 = arith.mulf %654, %656 : vector<2x8x32xf32>
    %658 = vector.shape_cast %27 : vector<1x32xf32> to vector<1x1x32xf32>
    %659 = vector.broadcast %658 : vector<1x1x32xf32> to vector<2x8x32xf32>
    %660 = arith.addf %657, %659 : vector<2x8x32xf32>
    %661 = vector.shape_cast %37 : vector<2x32xf32> to vector<2x1x32xf32>
    %662 = vector.broadcast %661 : vector<2x1x32xf32> to vector<2x8x32xf32>
    %663 = arith.addf %660, %662 : vector<2x8x32xf32>
    %cst_203 = arith.constant dense<0.000000e+00> : vector<2x8xf32>
    %664 = vector.multi_reduction <add>, %663, %cst_203 [2] : vector<2x8x32xf32> to vector<2x8xf32>
    %665 = vector.shape_cast %664 : vector<2x8xf32> to vector<2x8x1xf32>
    %cst_204 = arith.constant 3.200000e+01 : f32
    %666 = vector.broadcast %cst_204 : f32 to vector<2x8x1xf32>
    %667 = arith.divf %665, %666 : vector<2x8x1xf32>
    %668 = vector.broadcast %667 : vector<2x8x1xf32> to vector<2x8x32xf32>
    %669 = arith.subf %663, %668 : vector<2x8x32xf32>
    %670 = arith.mulf %669, %669 : vector<2x8x32xf32>
    %cst_205 = arith.constant dense<0.000000e+00> : vector<2x8xf32>
    %671 = vector.multi_reduction <add>, %670, %cst_205 [2] : vector<2x8x32xf32> to vector<2x8xf32>
    %672 = vector.shape_cast %671 : vector<2x8xf32> to vector<2x8x1xf32>
    %cst_206 = arith.constant 3.200000e+01 : f32
    %673 = vector.broadcast %cst_206 : f32 to vector<2x8x1xf32>
    %674 = arith.divf %672, %673 : vector<2x8x1xf32>
    %675 = vector.broadcast %667 : vector<2x8x1xf32> to vector<2x8x32xf32>
    %676 = arith.subf %663, %675 : vector<2x8x32xf32>
    %cst_207 = arith.constant 9.99999974E-6 : f32
    %677 = vector.broadcast %cst_207 : f32 to vector<2x8x1xf32>
    %678 = arith.addf %674, %677 : vector<2x8x1xf32>
    %679 = math.rsqrt %678 : vector<2x8x1xf32>
    %680 = vector.broadcast %679 : vector<2x8x1xf32> to vector<2x8x32xf32>
    %681 = arith.mulf %676, %680 : vector<2x8x32xf32>
    %682 = vector.shape_cast %28 : vector<1x32xf32> to vector<1x1x32xf32>
    %683 = vector.broadcast %682 : vector<1x1x32xf32> to vector<2x8x32xf32>
    %684 = arith.mulf %681, %683 : vector<2x8x32xf32>
    %685 = vector.shape_cast %29 : vector<1x32xf32> to vector<1x1x32xf32>
    %686 = vector.broadcast %685 : vector<1x1x32xf32> to vector<2x8x32xf32>
    %687 = arith.addf %684, %686 : vector<2x8x32xf32>
    "tpu.trace_start"() <{level = 10 : i32, message = "bsh,hf->bsf"}> : () -> ()
    %cst_208 = arith.constant dense<0.000000e+00> : vector<2x8x128xf32>
    %688 = tpu.matmul %687, %17, %cst_208 {dimension_numbers = #tpu.dot_dimension_numbers<[2], [0], [0, 1], [1], [0, 0, 0, 1, 1, 1], [], []>} : vector<2x8x32xf32>, vector<32x128xf32>, vector<2x8x128xf32> -> vector<2x8x128xf32>
    "tpu.trace_stop"() : () -> ()
    %689 = vector.shape_cast %24 : vector<1x128xf32> to vector<1x1x128xf32>
    %690 = vector.broadcast %689 : vector<1x1x128xf32> to vector<2x8x128xf32>
    %691 = arith.addf %688, %690 : vector<2x8x128xf32>
    %cst_209 = arith.constant 0.000000e+00 : f32
    %692 = vector.broadcast %cst_209 : f32 to vector<2x8x128xf32>
    %693 = arith.maximumf %691, %692 : vector<2x8x128xf32>
    "tpu.trace_start"() <{level = 10 : i32, message = "bsf,fh->bsh"}> : () -> ()
    %cst_210 = arith.constant dense<0.000000e+00> : vector<2x8x32xf32>
    %694 = tpu.matmul %693, %19, %cst_210 {dimension_numbers = #tpu.dot_dimension_numbers<[2], [0], [0, 1], [1], [0, 0, 0, 1, 1, 1], [], []>} : vector<2x8x128xf32>, vector<128x32xf32>, vector<2x8x32xf32> -> vector<2x8x32xf32>
    "tpu.trace_stop"() : () -> ()
    %695 = vector.shape_cast %25 : vector<1x32xf32> to vector<1x1x32xf32>
    %696 = vector.broadcast %695 : vector<1x1x32xf32> to vector<2x8x32xf32>
    %697 = arith.addf %694, %696 : vector<2x8x32xf32>
    %698 = arith.addf %687, %697 : vector<2x8x32xf32>
    %cst_211 = arith.constant dense<0.000000e+00> : vector<2x8xf32>
    %699 = vector.multi_reduction <add>, %698, %cst_211 [2] : vector<2x8x32xf32> to vector<2x8xf32>
    %700 = vector.shape_cast %699 : vector<2x8xf32> to vector<2x8x1xf32>
    %cst_212 = arith.constant 3.200000e+01 : f32
    %701 = vector.broadcast %cst_212 : f32 to vector<2x8x1xf32>
    %702 = arith.divf %700, %701 : vector<2x8x1xf32>
    %703 = vector.broadcast %702 : vector<2x8x1xf32> to vector<2x8x32xf32>
    %704 = arith.subf %698, %703 : vector<2x8x32xf32>
    %705 = arith.mulf %704, %704 : vector<2x8x32xf32>
    %cst_213 = arith.constant dense<0.000000e+00> : vector<2x8xf32>
    %706 = vector.multi_reduction <add>, %705, %cst_213 [2] : vector<2x8x32xf32> to vector<2x8xf32>
    %707 = vector.shape_cast %706 : vector<2x8xf32> to vector<2x8x1xf32>
    %cst_214 = arith.constant 3.200000e+01 : f32
    %708 = vector.broadcast %cst_214 : f32 to vector<2x8x1xf32>
    %709 = arith.divf %707, %708 : vector<2x8x1xf32>
    %710 = vector.broadcast %702 : vector<2x8x1xf32> to vector<2x8x32xf32>
    %711 = arith.subf %698, %710 : vector<2x8x32xf32>
    %cst_215 = arith.constant 9.99999974E-6 : f32
    %712 = vector.broadcast %cst_215 : f32 to vector<2x8x1xf32>
    %713 = arith.addf %709, %712 : vector<2x8x1xf32>
    %714 = math.rsqrt %713 : vector<2x8x1xf32>
    %715 = vector.broadcast %714 : vector<2x8x1xf32> to vector<2x8x32xf32>
    %716 = arith.mulf %711, %715 : vector<2x8x32xf32>
    %717 = vector.shape_cast %30 : vector<1x32xf32> to vector<1x1x32xf32>
    %718 = vector.broadcast %717 : vector<1x1x32xf32> to vector<2x8x32xf32>
    %719 = arith.mulf %716, %718 : vector<2x8x32xf32>
    %720 = vector.shape_cast %31 : vector<1x32xf32> to vector<1x1x32xf32>
    %721 = vector.broadcast %720 : vector<1x1x32xf32> to vector<2x8x32xf32>
    %722 = arith.addf %719, %721 : vector<2x8x32xf32>
    "tpu.trace_start"() <{level = 10 : i32, message = "bsh,hk->bsk"}> : () -> ()
    %cst_216 = arith.constant dense<0.000000e+00> : vector<2x8x128xf32>
    %723 = tpu.matmul %722, %39, %cst_216 {dimension_numbers = #tpu.dot_dimension_numbers<[2], [0], [0, 1], [1], [0, 0, 0, 1, 1, 1], [], []>} : vector<2x8x32xf32>, vector<32x128xf32>, vector<2x8x128xf32> -> vector<2x8x128xf32>
    "tpu.trace_stop"() : () -> ()
    %724 = vector.shape_cast %50 : vector<1x128xf32> to vector<1x1x128xf32>
    %725 = vector.broadcast %724 : vector<1x1x128xf32> to vector<2x8x128xf32>
    %726 = arith.addf %723, %725 : vector<2x8x128xf32>
    %727 = vector.extract_strided_slice %726 {offsets = [0, 0, 0], sizes = [2, 8, 32], strides = [1, 1, 1]} : vector<2x8x128xf32> to vector<2x8x32xf32>
    %728 = vector.extract_strided_slice %726 {offsets = [0, 0, 32], sizes = [2, 8, 32], strides = [1, 1, 1]} : vector<2x8x128xf32> to vector<2x8x32xf32>
    %729 = vector.extract_strided_slice %726 {offsets = [0, 0, 64], sizes = [2, 8, 32], strides = [1, 1, 1]} : vector<2x8x128xf32> to vector<2x8x32xf32>
    "tpu.trace_start"() <{level = 10 : i32, message = "bsh,bth->bst"}> : () -> ()
    %cst_217 = arith.constant dense<0.000000e+00> : vector<2x8x8xf32>
    %730 = tpu.matmul %727, %728, %cst_217 {dimension_numbers = #tpu.dot_dimension_numbers<[2], [2], [1], [1], [0, 0, 0, 1, 1, 1], [0], [0]>} : vector<2x8x32xf32>, vector<2x8x32xf32>, vector<2x8x8xf32> -> vector<2x8x8xf32>
    "tpu.trace_stop"() : () -> ()
    %cst_218 = arith.constant 0.176776692 : f32
    %731 = vector.broadcast %cst_218 : f32 to vector<2x8x8xf32>
    %732 = arith.mulf %730, %731 : vector<2x8x8xf32>
    %733 = vector.broadcast %74 : vector<1x8x8xf32> to vector<2x8x8xf32>
    %734 = arith.addf %732, %733 : vector<2x8x8xf32>
    %cst_219 = arith.constant dense<0xFF800000> : vector<2x8xf32>
    %735 = vector.multi_reduction <maximumf>, %734, %cst_219 [2] : vector<2x8x8xf32> to vector<2x8xf32>
    %736 = vector.shape_cast %735 : vector<2x8xf32> to vector<2x8x1xf32>
    %737 = vector.broadcast %736 : vector<2x8x1xf32> to vector<2x8x8xf32>
    %738 = arith.subf %734, %737 : vector<2x8x8xf32>
    %739 = math.exp %738 : vector<2x8x8xf32>
    %cst_220 = arith.constant dense<0.000000e+00> : vector<2x8xf32>
    %740 = vector.multi_reduction <add>, %739, %cst_220 [2] : vector<2x8x8xf32> to vector<2x8xf32>
    %741 = vector.shape_cast %740 : vector<2x8xf32> to vector<2x8x1xf32>
    %742 = tpu.reciprocal %741 {approx = true} : vector<2x8x1xf32> -> vector<2x8x1xf32>
    %743 = vector.broadcast %742 : vector<2x8x1xf32> to vector<2x8x8xf32>
    %744 = arith.mulf %739, %743 : vector<2x8x8xf32>
    "tpu.trace_start"() <{level = 10 : i32, message = "bst,bth->bsh"}> : () -> ()
    %cst_221 = arith.constant dense<0.000000e+00> : vector<2x8x32xf32>
    %745 = tpu.matmul %744, %729, %cst_221 {dimension_numbers = #tpu.dot_dimension_numbers<[2], [1], [1], [2], [0, 0, 0, 1, 1, 2], [0], [0]>} : vector<2x8x8xf32>, vector<2x8x32xf32>, vector<2x8x32xf32> -> vector<2x8x32xf32>
    "tpu.trace_stop"() : () -> ()
    "tpu.trace_start"() <{level = 10 : i32, message = "bsh,hk->bsk"}> : () -> ()
    %cst_222 = arith.constant dense<0.000000e+00> : vector<2x8x32xf32>
    %746 = tpu.matmul %745, %41, %cst_222 {dimension_numbers = #tpu.dot_dimension_numbers<[2], [0], [0, 1], [1], [0, 0, 0, 1, 1, 1], [], []>} : vector<2x8x32xf32>, vector<32x32xf32>, vector<2x8x32xf32> -> vector<2x8x32xf32>
    "tpu.trace_stop"() : () -> ()
    %747 = vector.shape_cast %51 : vector<1x32xf32> to vector<1x1x32xf32>
    %748 = vector.broadcast %747 : vector<1x1x32xf32> to vector<2x8x32xf32>
    %749 = arith.addf %746, %748 : vector<2x8x32xf32>
    %750 = arith.addf %722, %749 : vector<2x8x32xf32>
    %cst_223 = arith.constant dense<0.000000e+00> : vector<2x8xf32>
    %751 = vector.multi_reduction <add>, %750, %cst_223 [2] : vector<2x8x32xf32> to vector<2x8xf32>
    %752 = vector.shape_cast %751 : vector<2x8xf32> to vector<2x8x1xf32>
    %cst_224 = arith.constant 3.200000e+01 : f32
    %753 = vector.broadcast %cst_224 : f32 to vector<2x8x1xf32>
    %754 = arith.divf %752, %753 : vector<2x8x1xf32>
    %755 = vector.broadcast %754 : vector<2x8x1xf32> to vector<2x8x32xf32>
    %756 = arith.subf %750, %755 : vector<2x8x32xf32>
    %757 = arith.mulf %756, %756 : vector<2x8x32xf32>
    %cst_225 = arith.constant dense<0.000000e+00> : vector<2x8xf32>
    %758 = vector.multi_reduction <add>, %757, %cst_225 [2] : vector<2x8x32xf32> to vector<2x8xf32>
    %759 = vector.shape_cast %758 : vector<2x8xf32> to vector<2x8x1xf32>
    %cst_226 = arith.constant 3.200000e+01 : f32
    %760 = vector.broadcast %cst_226 : f32 to vector<2x8x1xf32>
    %761 = arith.divf %759, %760 : vector<2x8x1xf32>
    %762 = vector.broadcast %754 : vector<2x8x1xf32> to vector<2x8x32xf32>
    %763 = arith.subf %750, %762 : vector<2x8x32xf32>
    %cst_227 = arith.constant 9.99999974E-6 : f32
    %764 = vector.broadcast %cst_227 : f32 to vector<2x8x1xf32>
    %765 = arith.addf %761, %764 : vector<2x8x1xf32>
    %766 = math.rsqrt %765 : vector<2x8x1xf32>
    %767 = vector.broadcast %766 : vector<2x8x1xf32> to vector<2x8x32xf32>
    %768 = arith.mulf %763, %767 : vector<2x8x32xf32>
    %769 = vector.shape_cast %56 : vector<1x32xf32> to vector<1x1x32xf32>
    %770 = vector.broadcast %769 : vector<1x1x32xf32> to vector<2x8x32xf32>
    %771 = arith.mulf %768, %770 : vector<2x8x32xf32>
    %772 = vector.shape_cast %57 : vector<1x32xf32> to vector<1x1x32xf32>
    %773 = vector.broadcast %772 : vector<1x1x32xf32> to vector<2x8x32xf32>
    %774 = arith.addf %771, %773 : vector<2x8x32xf32>
    %775 = vector.shape_cast %67 : vector<2x32xf32> to vector<2x1x32xf32>
    %776 = vector.broadcast %775 : vector<2x1x32xf32> to vector<2x8x32xf32>
    %777 = arith.addf %774, %776 : vector<2x8x32xf32>
    %cst_228 = arith.constant dense<0.000000e+00> : vector<2x8xf32>
    %778 = vector.multi_reduction <add>, %777, %cst_228 [2] : vector<2x8x32xf32> to vector<2x8xf32>
    %779 = vector.shape_cast %778 : vector<2x8xf32> to vector<2x8x1xf32>
    %cst_229 = arith.constant 3.200000e+01 : f32
    %780 = vector.broadcast %cst_229 : f32 to vector<2x8x1xf32>
    %781 = arith.divf %779, %780 : vector<2x8x1xf32>
    %782 = vector.broadcast %781 : vector<2x8x1xf32> to vector<2x8x32xf32>
    %783 = arith.subf %777, %782 : vector<2x8x32xf32>
    %784 = arith.mulf %783, %783 : vector<2x8x32xf32>
    %cst_230 = arith.constant dense<0.000000e+00> : vector<2x8xf32>
    %785 = vector.multi_reduction <add>, %784, %cst_230 [2] : vector<2x8x32xf32> to vector<2x8xf32>
    %786 = vector.shape_cast %785 : vector<2x8xf32> to vector<2x8x1xf32>
    %cst_231 = arith.constant 3.200000e+01 : f32
    %787 = vector.broadcast %cst_231 : f32 to vector<2x8x1xf32>
    %788 = arith.divf %786, %787 : vector<2x8x1xf32>
    %789 = vector.broadcast %781 : vector<2x8x1xf32> to vector<2x8x32xf32>
    %790 = arith.subf %777, %789 : vector<2x8x32xf32>
    %cst_232 = arith.constant 9.99999974E-6 : f32
    %791 = vector.broadcast %cst_232 : f32 to vector<2x8x1xf32>
    %792 = arith.addf %788, %791 : vector<2x8x1xf32>
    %793 = math.rsqrt %792 : vector<2x8x1xf32>
    %794 = vector.broadcast %793 : vector<2x8x1xf32> to vector<2x8x32xf32>
    %795 = arith.mulf %790, %794 : vector<2x8x32xf32>
    %796 = vector.shape_cast %58 : vector<1x32xf32> to vector<1x1x32xf32>
    %797 = vector.broadcast %796 : vector<1x1x32xf32> to vector<2x8x32xf32>
    %798 = arith.mulf %795, %797 : vector<2x8x32xf32>
    %799 = vector.shape_cast %59 : vector<1x32xf32> to vector<1x1x32xf32>
    %800 = vector.broadcast %799 : vector<1x1x32xf32> to vector<2x8x32xf32>
    %801 = arith.addf %798, %800 : vector<2x8x32xf32>
    "tpu.trace_start"() <{level = 10 : i32, message = "bsh,hf->bsf"}> : () -> ()
    %cst_233 = arith.constant dense<0.000000e+00> : vector<2x8x128xf32>
    %802 = tpu.matmul %801, %47, %cst_233 {dimension_numbers = #tpu.dot_dimension_numbers<[2], [0], [0, 1], [1], [0, 0, 0, 1, 1, 1], [], []>} : vector<2x8x32xf32>, vector<32x128xf32>, vector<2x8x128xf32> -> vector<2x8x128xf32>
    "tpu.trace_stop"() : () -> ()
    %803 = vector.shape_cast %54 : vector<1x128xf32> to vector<1x1x128xf32>
    %804 = vector.broadcast %803 : vector<1x1x128xf32> to vector<2x8x128xf32>
    %805 = arith.addf %802, %804 : vector<2x8x128xf32>
    %cst_234 = arith.constant 0.000000e+00 : f32
    %806 = vector.broadcast %cst_234 : f32 to vector<2x8x128xf32>
    %807 = arith.maximumf %805, %806 : vector<2x8x128xf32>
    "tpu.trace_start"() <{level = 10 : i32, message = "bsf,fh->bsh"}> : () -> ()
    %cst_235 = arith.constant dense<0.000000e+00> : vector<2x8x32xf32>
    %808 = tpu.matmul %807, %49, %cst_235 {dimension_numbers = #tpu.dot_dimension_numbers<[2], [0], [0, 1], [1], [0, 0, 0, 1, 1, 1], [], []>} : vector<2x8x128xf32>, vector<128x32xf32>, vector<2x8x32xf32> -> vector<2x8x32xf32>
    "tpu.trace_stop"() : () -> ()
    %809 = vector.shape_cast %55 : vector<1x32xf32> to vector<1x1x32xf32>
    %810 = vector.broadcast %809 : vector<1x1x32xf32> to vector<2x8x32xf32>
    %811 = arith.addf %808, %810 : vector<2x8x32xf32>
    %812 = arith.addf %801, %811 : vector<2x8x32xf32>
    %cst_236 = arith.constant dense<0.000000e+00> : vector<2x8xf32>
    %813 = vector.multi_reduction <add>, %812, %cst_236 [2] : vector<2x8x32xf32> to vector<2x8xf32>
    %814 = vector.shape_cast %813 : vector<2x8xf32> to vector<2x8x1xf32>
    %cst_237 = arith.constant 3.200000e+01 : f32
    %815 = vector.broadcast %cst_237 : f32 to vector<2x8x1xf32>
    %816 = arith.divf %814, %815 : vector<2x8x1xf32>
    %817 = vector.broadcast %816 : vector<2x8x1xf32> to vector<2x8x32xf32>
    %818 = arith.subf %812, %817 : vector<2x8x32xf32>
    %819 = arith.mulf %818, %818 : vector<2x8x32xf32>
    %cst_238 = arith.constant dense<0.000000e+00> : vector<2x8xf32>
    %820 = vector.multi_reduction <add>, %819, %cst_238 [2] : vector<2x8x32xf32> to vector<2x8xf32>
    %821 = vector.shape_cast %820 : vector<2x8xf32> to vector<2x8x1xf32>
    %cst_239 = arith.constant 3.200000e+01 : f32
    %822 = vector.broadcast %cst_239 : f32 to vector<2x8x1xf32>
    %823 = arith.divf %821, %822 : vector<2x8x1xf32>
    %824 = vector.broadcast %816 : vector<2x8x1xf32> to vector<2x8x32xf32>
    %825 = arith.subf %812, %824 : vector<2x8x32xf32>
    %cst_240 = arith.constant 9.99999974E-6 : f32
    %826 = vector.broadcast %cst_240 : f32 to vector<2x8x1xf32>
    %827 = arith.addf %823, %826 : vector<2x8x1xf32>
    %828 = math.rsqrt %827 : vector<2x8x1xf32>
    %829 = vector.broadcast %828 : vector<2x8x1xf32> to vector<2x8x32xf32>
    %830 = arith.mulf %825, %829 : vector<2x8x32xf32>
    %831 = vector.shape_cast %60 : vector<1x32xf32> to vector<1x1x32xf32>
    %832 = vector.broadcast %831 : vector<1x1x32xf32> to vector<2x8x32xf32>
    %833 = arith.mulf %830, %832 : vector<2x8x32xf32>
    %834 = vector.shape_cast %61 : vector<1x32xf32> to vector<1x1x32xf32>
    %835 = vector.broadcast %834 : vector<1x1x32xf32> to vector<2x8x32xf32>
    %836 = arith.addf %833, %835 : vector<2x8x32xf32>
    %837 = vector.extract_strided_slice %836 {offsets = [0, 2, 0], sizes = [2, 1, 32], strides = [1, 1, 1]} : vector<2x8x32xf32> to vector<2x1x32xf32>
    %838 = vector.shape_cast %837 : vector<2x1x32xf32> to vector<2x32xf32>
    %cst_241 = arith.constant dense<0.000000e+00> : vector<2x16xf32>
    %839 = tpu.matmul %838, %5, %cst_241 {dimension_numbers = #tpu.dot_dimension_numbers<[1], [0], [0], [1], [0, 0, 1, 1], [], []>} : vector<2x32xf32>, vector<32x16xf32>, vector<2x16xf32> -> vector<2x16xf32>
    %840 = vector.broadcast %6 : vector<1x16xf32> to vector<2x16xf32>
    %841 = arith.addf %839, %840 : vector<2x16xf32>
    %c2_i32_242 = arith.constant 2 : i32
    %842 = vector.broadcast %c2_i32_242 : i32 to vector<6x2x16xi32>
    %843 = arith.cmpi eq, %85, %842 : vector<6x2x16xi32>
    %844 = vector.shape_cast %841 : vector<2x16xf32> to vector<1x2x16xf32>
    %845 = vector.shape_cast %844 : vector<1x2x16xf32> to vector<1x2x16xf32>
    %846 = vector.broadcast %845 : vector<1x2x16xf32> to vector<6x2x16xf32>
    %847 = arith.select %843, %846, %588 : vector<6x2x16xi1>, vector<6x2x16xf32>
    %cst_243 = arith.constant dense<0xFF800000> : vector<2xf32>
    %848 = vector.multi_reduction <maximumf>, %841, %cst_243 [1] : vector<2x16xf32> to vector<2xf32>
    %849 = vector.shape_cast %848 : vector<2xf32> to vector<2x1xf32>
    %850 = vector.broadcast %849 : vector<2x1xf32> to vector<2x16xf32>
    %851 = arith.subf %841, %850 : vector<2x16xf32>
    %852 = math.exp %851 : vector<2x16xf32>
    %cst_244 = arith.constant dense<0.000000e+00> : vector<2xf32>
    %853 = vector.multi_reduction <add>, %852, %cst_244 [1] : vector<2x16xf32> to vector<2xf32>
    %854 = vector.shape_cast %853 : vector<2xf32> to vector<2x1xf32>
    %855 = tpu.reciprocal %854 {approx = true} : vector<2x1xf32> -> vector<2x1xf32>
    %856 = vector.broadcast %855 : vector<2x1xf32> to vector<2x16xf32>
    %857 = arith.mulf %852, %856 : vector<2x16xf32>
    %c3_i32 = arith.constant 3 : i32
    %858 = vector.broadcast %c3_i32 : i32 to vector<2x8x16xi32>
    %859 = arith.cmpi eq, %75, %858 : vector<2x8x16xi32>
    %860 = vector.shape_cast %857 : vector<2x16xf32> to vector<2x1x16xf32>
    %861 = vector.shape_cast %860 : vector<2x1x16xf32> to vector<2x1x16xf32>
    %862 = vector.broadcast %861 : vector<2x1x16xf32> to vector<2x8x16xf32>
    %863 = arith.select %859, %862, %604 : vector<2x8x16xi1>, vector<2x8x16xf32>
    "tpu.trace_start"() <{level = 10 : i32, message = "bsv,vh->bsh"}> : () -> ()
    %cst_245 = arith.constant dense<0.000000e+00> : vector<2x8x32xf32>
    %864 = tpu.matmul %863, %1, %cst_245 {dimension_numbers = #tpu.dot_dimension_numbers<[2], [0], [0, 1], [1], [0, 0, 0, 1, 1, 1], [], []>} : vector<2x8x16xf32>, vector<16x32xf32>, vector<2x8x32xf32> -> vector<2x8x32xf32>
    "tpu.trace_stop"() : () -> ()
    %865 = vector.shape_cast %3 : vector<8x32xf32> to vector<1x8x32xf32>
    %866 = vector.broadcast %865 : vector<1x8x32xf32> to vector<2x8x32xf32>
    %867 = arith.addf %864, %866 : vector<2x8x32xf32>
    "tpu.trace_start"() <{level = 10 : i32, message = "bsh,hk->bsk"}> : () -> ()
    %cst_246 = arith.constant dense<0.000000e+00> : vector<2x8x128xf32>
    %868 = tpu.matmul %867, %9, %cst_246 {dimension_numbers = #tpu.dot_dimension_numbers<[2], [0], [0, 1], [1], [0, 0, 0, 1, 1, 1], [], []>} : vector<2x8x32xf32>, vector<32x128xf32>, vector<2x8x128xf32> -> vector<2x8x128xf32>
    "tpu.trace_stop"() : () -> ()
    %869 = vector.shape_cast %20 : vector<1x128xf32> to vector<1x1x128xf32>
    %870 = vector.broadcast %869 : vector<1x1x128xf32> to vector<2x8x128xf32>
    %871 = arith.addf %868, %870 : vector<2x8x128xf32>
    %872 = vector.extract_strided_slice %871 {offsets = [0, 0, 0], sizes = [2, 8, 32], strides = [1, 1, 1]} : vector<2x8x128xf32> to vector<2x8x32xf32>
    %873 = vector.extract_strided_slice %871 {offsets = [0, 0, 32], sizes = [2, 8, 32], strides = [1, 1, 1]} : vector<2x8x128xf32> to vector<2x8x32xf32>
    %874 = vector.extract_strided_slice %871 {offsets = [0, 0, 64], sizes = [2, 8, 32], strides = [1, 1, 1]} : vector<2x8x128xf32> to vector<2x8x32xf32>
    "tpu.trace_start"() <{level = 10 : i32, message = "bsh,bth->bst"}> : () -> ()
    %cst_247 = arith.constant dense<0.000000e+00> : vector<2x8x8xf32>
    %875 = tpu.matmul %872, %873, %cst_247 {dimension_numbers = #tpu.dot_dimension_numbers<[2], [2], [1], [1], [0, 0, 0, 1, 1, 1], [0], [0]>} : vector<2x8x32xf32>, vector<2x8x32xf32>, vector<2x8x8xf32> -> vector<2x8x8xf32>
    "tpu.trace_stop"() : () -> ()
    %cst_248 = arith.constant 0.176776692 : f32
    %876 = vector.broadcast %cst_248 : f32 to vector<2x8x8xf32>
    %877 = arith.mulf %875, %876 : vector<2x8x8xf32>
    %878 = vector.broadcast %74 : vector<1x8x8xf32> to vector<2x8x8xf32>
    %879 = arith.addf %877, %878 : vector<2x8x8xf32>
    %cst_249 = arith.constant dense<0xFF800000> : vector<2x8xf32>
    %880 = vector.multi_reduction <maximumf>, %879, %cst_249 [2] : vector<2x8x8xf32> to vector<2x8xf32>
    %881 = vector.shape_cast %880 : vector<2x8xf32> to vector<2x8x1xf32>
    %882 = vector.broadcast %881 : vector<2x8x1xf32> to vector<2x8x8xf32>
    %883 = arith.subf %879, %882 : vector<2x8x8xf32>
    %884 = math.exp %883 : vector<2x8x8xf32>
    %cst_250 = arith.constant dense<0.000000e+00> : vector<2x8xf32>
    %885 = vector.multi_reduction <add>, %884, %cst_250 [2] : vector<2x8x8xf32> to vector<2x8xf32>
    %886 = vector.shape_cast %885 : vector<2x8xf32> to vector<2x8x1xf32>
    %887 = tpu.reciprocal %886 {approx = true} : vector<2x8x1xf32> -> vector<2x8x1xf32>
    %888 = vector.broadcast %887 : vector<2x8x1xf32> to vector<2x8x8xf32>
    %889 = arith.mulf %884, %888 : vector<2x8x8xf32>
    "tpu.trace_start"() <{level = 10 : i32, message = "bst,bth->bsh"}> : () -> ()
    %cst_251 = arith.constant dense<0.000000e+00> : vector<2x8x32xf32>
    %890 = tpu.matmul %889, %874, %cst_251 {dimension_numbers = #tpu.dot_dimension_numbers<[2], [1], [1], [2], [0, 0, 0, 1, 1, 2], [0], [0]>} : vector<2x8x8xf32>, vector<2x8x32xf32>, vector<2x8x32xf32> -> vector<2x8x32xf32>
    "tpu.trace_stop"() : () -> ()
    "tpu.trace_start"() <{level = 10 : i32, message = "bsh,hk->bsk"}> : () -> ()
    %cst_252 = arith.constant dense<0.000000e+00> : vector<2x8x32xf32>
    %891 = tpu.matmul %890, %11, %cst_252 {dimension_numbers = #tpu.dot_dimension_numbers<[2], [0], [0, 1], [1], [0, 0, 0, 1, 1, 1], [], []>} : vector<2x8x32xf32>, vector<32x32xf32>, vector<2x8x32xf32> -> vector<2x8x32xf32>
    "tpu.trace_stop"() : () -> ()
    %892 = vector.shape_cast %21 : vector<1x32xf32> to vector<1x1x32xf32>
    %893 = vector.broadcast %892 : vector<1x1x32xf32> to vector<2x8x32xf32>
    %894 = arith.addf %891, %893 : vector<2x8x32xf32>
    %895 = arith.addf %867, %894 : vector<2x8x32xf32>
    %cst_253 = arith.constant dense<0.000000e+00> : vector<2x8xf32>
    %896 = vector.multi_reduction <add>, %895, %cst_253 [2] : vector<2x8x32xf32> to vector<2x8xf32>
    %897 = vector.shape_cast %896 : vector<2x8xf32> to vector<2x8x1xf32>
    %cst_254 = arith.constant 3.200000e+01 : f32
    %898 = vector.broadcast %cst_254 : f32 to vector<2x8x1xf32>
    %899 = arith.divf %897, %898 : vector<2x8x1xf32>
    %900 = vector.broadcast %899 : vector<2x8x1xf32> to vector<2x8x32xf32>
    %901 = arith.subf %895, %900 : vector<2x8x32xf32>
    %902 = arith.mulf %901, %901 : vector<2x8x32xf32>
    %cst_255 = arith.constant dense<0.000000e+00> : vector<2x8xf32>
    %903 = vector.multi_reduction <add>, %902, %cst_255 [2] : vector<2x8x32xf32> to vector<2x8xf32>
    %904 = vector.shape_cast %903 : vector<2x8xf32> to vector<2x8x1xf32>
    %cst_256 = arith.constant 3.200000e+01 : f32
    %905 = vector.broadcast %cst_256 : f32 to vector<2x8x1xf32>
    %906 = arith.divf %904, %905 : vector<2x8x1xf32>
    %907 = vector.broadcast %899 : vector<2x8x1xf32> to vector<2x8x32xf32>
    %908 = arith.subf %895, %907 : vector<2x8x32xf32>
    %cst_257 = arith.constant 9.99999974E-6 : f32
    %909 = vector.broadcast %cst_257 : f32 to vector<2x8x1xf32>
    %910 = arith.addf %906, %909 : vector<2x8x1xf32>
    %911 = math.rsqrt %910 : vector<2x8x1xf32>
    %912 = vector.broadcast %911 : vector<2x8x1xf32> to vector<2x8x32xf32>
    %913 = arith.mulf %908, %912 : vector<2x8x32xf32>
    %914 = vector.shape_cast %26 : vector<1x32xf32> to vector<1x1x32xf32>
    %915 = vector.broadcast %914 : vector<1x1x32xf32> to vector<2x8x32xf32>
    %916 = arith.mulf %913, %915 : vector<2x8x32xf32>
    %917 = vector.shape_cast %27 : vector<1x32xf32> to vector<1x1x32xf32>
    %918 = vector.broadcast %917 : vector<1x1x32xf32> to vector<2x8x32xf32>
    %919 = arith.addf %916, %918 : vector<2x8x32xf32>
    %920 = vector.shape_cast %37 : vector<2x32xf32> to vector<2x1x32xf32>
    %921 = vector.broadcast %920 : vector<2x1x32xf32> to vector<2x8x32xf32>
    %922 = arith.addf %919, %921 : vector<2x8x32xf32>
    %cst_258 = arith.constant dense<0.000000e+00> : vector<2x8xf32>
    %923 = vector.multi_reduction <add>, %922, %cst_258 [2] : vector<2x8x32xf32> to vector<2x8xf32>
    %924 = vector.shape_cast %923 : vector<2x8xf32> to vector<2x8x1xf32>
    %cst_259 = arith.constant 3.200000e+01 : f32
    %925 = vector.broadcast %cst_259 : f32 to vector<2x8x1xf32>
    %926 = arith.divf %924, %925 : vector<2x8x1xf32>
    %927 = vector.broadcast %926 : vector<2x8x1xf32> to vector<2x8x32xf32>
    %928 = arith.subf %922, %927 : vector<2x8x32xf32>
    %929 = arith.mulf %928, %928 : vector<2x8x32xf32>
    %cst_260 = arith.constant dense<0.000000e+00> : vector<2x8xf32>
    %930 = vector.multi_reduction <add>, %929, %cst_260 [2] : vector<2x8x32xf32> to vector<2x8xf32>
    %931 = vector.shape_cast %930 : vector<2x8xf32> to vector<2x8x1xf32>
    %cst_261 = arith.constant 3.200000e+01 : f32
    %932 = vector.broadcast %cst_261 : f32 to vector<2x8x1xf32>
    %933 = arith.divf %931, %932 : vector<2x8x1xf32>
    %934 = vector.broadcast %926 : vector<2x8x1xf32> to vector<2x8x32xf32>
    %935 = arith.subf %922, %934 : vector<2x8x32xf32>
    %cst_262 = arith.constant 9.99999974E-6 : f32
    %936 = vector.broadcast %cst_262 : f32 to vector<2x8x1xf32>
    %937 = arith.addf %933, %936 : vector<2x8x1xf32>
    %938 = math.rsqrt %937 : vector<2x8x1xf32>
    %939 = vector.broadcast %938 : vector<2x8x1xf32> to vector<2x8x32xf32>
    %940 = arith.mulf %935, %939 : vector<2x8x32xf32>
    %941 = vector.shape_cast %28 : vector<1x32xf32> to vector<1x1x32xf32>
    %942 = vector.broadcast %941 : vector<1x1x32xf32> to vector<2x8x32xf32>
    %943 = arith.mulf %940, %942 : vector<2x8x32xf32>
    %944 = vector.shape_cast %29 : vector<1x32xf32> to vector<1x1x32xf32>
    %945 = vector.broadcast %944 : vector<1x1x32xf32> to vector<2x8x32xf32>
    %946 = arith.addf %943, %945 : vector<2x8x32xf32>
    "tpu.trace_start"() <{level = 10 : i32, message = "bsh,hf->bsf"}> : () -> ()
    %cst_263 = arith.constant dense<0.000000e+00> : vector<2x8x128xf32>
    %947 = tpu.matmul %946, %17, %cst_263 {dimension_numbers = #tpu.dot_dimension_numbers<[2], [0], [0, 1], [1], [0, 0, 0, 1, 1, 1], [], []>} : vector<2x8x32xf32>, vector<32x128xf32>, vector<2x8x128xf32> -> vector<2x8x128xf32>
    "tpu.trace_stop"() : () -> ()
    %948 = vector.shape_cast %24 : vector<1x128xf32> to vector<1x1x128xf32>
    %949 = vector.broadcast %948 : vector<1x1x128xf32> to vector<2x8x128xf32>
    %950 = arith.addf %947, %949 : vector<2x8x128xf32>
    %cst_264 = arith.constant 0.000000e+00 : f32
    %951 = vector.broadcast %cst_264 : f32 to vector<2x8x128xf32>
    %952 = arith.maximumf %950, %951 : vector<2x8x128xf32>
    "tpu.trace_start"() <{level = 10 : i32, message = "bsf,fh->bsh"}> : () -> ()
    %cst_265 = arith.constant dense<0.000000e+00> : vector<2x8x32xf32>
    %953 = tpu.matmul %952, %19, %cst_265 {dimension_numbers = #tpu.dot_dimension_numbers<[2], [0], [0, 1], [1], [0, 0, 0, 1, 1, 1], [], []>} : vector<2x8x128xf32>, vector<128x32xf32>, vector<2x8x32xf32> -> vector<2x8x32xf32>
    "tpu.trace_stop"() : () -> ()
    %954 = vector.shape_cast %25 : vector<1x32xf32> to vector<1x1x32xf32>
    %955 = vector.broadcast %954 : vector<1x1x32xf32> to vector<2x8x32xf32>
    %956 = arith.addf %953, %955 : vector<2x8x32xf32>
    %957 = arith.addf %946, %956 : vector<2x8x32xf32>
    %cst_266 = arith.constant dense<0.000000e+00> : vector<2x8xf32>
    %958 = vector.multi_reduction <add>, %957, %cst_266 [2] : vector<2x8x32xf32> to vector<2x8xf32>
    %959 = vector.shape_cast %958 : vector<2x8xf32> to vector<2x8x1xf32>
    %cst_267 = arith.constant 3.200000e+01 : f32
    %960 = vector.broadcast %cst_267 : f32 to vector<2x8x1xf32>
    %961 = arith.divf %959, %960 : vector<2x8x1xf32>
    %962 = vector.broadcast %961 : vector<2x8x1xf32> to vector<2x8x32xf32>
    %963 = arith.subf %957, %962 : vector<2x8x32xf32>
    %964 = arith.mulf %963, %963 : vector<2x8x32xf32>
    %cst_268 = arith.constant dense<0.000000e+00> : vector<2x8xf32>
    %965 = vector.multi_reduction <add>, %964, %cst_268 [2] : vector<2x8x32xf32> to vector<2x8xf32>
    %966 = vector.shape_cast %965 : vector<2x8xf32> to vector<2x8x1xf32>
    %cst_269 = arith.constant 3.200000e+01 : f32
    %967 = vector.broadcast %cst_269 : f32 to vector<2x8x1xf32>
    %968 = arith.divf %966, %967 : vector<2x8x1xf32>
    %969 = vector.broadcast %961 : vector<2x8x1xf32> to vector<2x8x32xf32>
    %970 = arith.subf %957, %969 : vector<2x8x32xf32>
    %cst_270 = arith.constant 9.99999974E-6 : f32
    %971 = vector.broadcast %cst_270 : f32 to vector<2x8x1xf32>
    %972 = arith.addf %968, %971 : vector<2x8x1xf32>
    %973 = math.rsqrt %972 : vector<2x8x1xf32>
    %974 = vector.broadcast %973 : vector<2x8x1xf32> to vector<2x8x32xf32>
    %975 = arith.mulf %970, %974 : vector<2x8x32xf32>
    %976 = vector.shape_cast %30 : vector<1x32xf32> to vector<1x1x32xf32>
    %977 = vector.broadcast %976 : vector<1x1x32xf32> to vector<2x8x32xf32>
    %978 = arith.mulf %975, %977 : vector<2x8x32xf32>
    %979 = vector.shape_cast %31 : vector<1x32xf32> to vector<1x1x32xf32>
    %980 = vector.broadcast %979 : vector<1x1x32xf32> to vector<2x8x32xf32>
    %981 = arith.addf %978, %980 : vector<2x8x32xf32>
    "tpu.trace_start"() <{level = 10 : i32, message = "bsh,hk->bsk"}> : () -> ()
    %cst_271 = arith.constant dense<0.000000e+00> : vector<2x8x128xf32>
    %982 = tpu.matmul %981, %39, %cst_271 {dimension_numbers = #tpu.dot_dimension_numbers<[2], [0], [0, 1], [1], [0, 0, 0, 1, 1, 1], [], []>} : vector<2x8x32xf32>, vector<32x128xf32>, vector<2x8x128xf32> -> vector<2x8x128xf32>
    "tpu.trace_stop"() : () -> ()
    %983 = vector.shape_cast %50 : vector<1x128xf32> to vector<1x1x128xf32>
    %984 = vector.broadcast %983 : vector<1x1x128xf32> to vector<2x8x128xf32>
    %985 = arith.addf %982, %984 : vector<2x8x128xf32>
    %986 = vector.extract_strided_slice %985 {offsets = [0, 0, 0], sizes = [2, 8, 32], strides = [1, 1, 1]} : vector<2x8x128xf32> to vector<2x8x32xf32>
    %987 = vector.extract_strided_slice %985 {offsets = [0, 0, 32], sizes = [2, 8, 32], strides = [1, 1, 1]} : vector<2x8x128xf32> to vector<2x8x32xf32>
    %988 = vector.extract_strided_slice %985 {offsets = [0, 0, 64], sizes = [2, 8, 32], strides = [1, 1, 1]} : vector<2x8x128xf32> to vector<2x8x32xf32>
    "tpu.trace_start"() <{level = 10 : i32, message = "bsh,bth->bst"}> : () -> ()
    %cst_272 = arith.constant dense<0.000000e+00> : vector<2x8x8xf32>
    %989 = tpu.matmul %986, %987, %cst_272 {dimension_numbers = #tpu.dot_dimension_numbers<[2], [2], [1], [1], [0, 0, 0, 1, 1, 1], [0], [0]>} : vector<2x8x32xf32>, vector<2x8x32xf32>, vector<2x8x8xf32> -> vector<2x8x8xf32>
    "tpu.trace_stop"() : () -> ()
    %cst_273 = arith.constant 0.176776692 : f32
    %990 = vector.broadcast %cst_273 : f32 to vector<2x8x8xf32>
    %991 = arith.mulf %989, %990 : vector<2x8x8xf32>
    %992 = vector.broadcast %74 : vector<1x8x8xf32> to vector<2x8x8xf32>
    %993 = arith.addf %991, %992 : vector<2x8x8xf32>
    %cst_274 = arith.constant dense<0xFF800000> : vector<2x8xf32>
    %994 = vector.multi_reduction <maximumf>, %993, %cst_274 [2] : vector<2x8x8xf32> to vector<2x8xf32>
    %995 = vector.shape_cast %994 : vector<2x8xf32> to vector<2x8x1xf32>
    %996 = vector.broadcast %995 : vector<2x8x1xf32> to vector<2x8x8xf32>
    %997 = arith.subf %993, %996 : vector<2x8x8xf32>
    %998 = math.exp %997 : vector<2x8x8xf32>
    %cst_275 = arith.constant dense<0.000000e+00> : vector<2x8xf32>
    %999 = vector.multi_reduction <add>, %998, %cst_275 [2] : vector<2x8x8xf32> to vector<2x8xf32>
    %1000 = vector.shape_cast %999 : vector<2x8xf32> to vector<2x8x1xf32>
    %1001 = tpu.reciprocal %1000 {approx = true} : vector<2x8x1xf32> -> vector<2x8x1xf32>
    %1002 = vector.broadcast %1001 : vector<2x8x1xf32> to vector<2x8x8xf32>
    %1003 = arith.mulf %998, %1002 : vector<2x8x8xf32>
    "tpu.trace_start"() <{level = 10 : i32, message = "bst,bth->bsh"}> : () -> ()
    %cst_276 = arith.constant dense<0.000000e+00> : vector<2x8x32xf32>
    %1004 = tpu.matmul %1003, %988, %cst_276 {dimension_numbers = #tpu.dot_dimension_numbers<[2], [1], [1], [2], [0, 0, 0, 1, 1, 2], [0], [0]>} : vector<2x8x8xf32>, vector<2x8x32xf32>, vector<2x8x32xf32> -> vector<2x8x32xf32>
    "tpu.trace_stop"() : () -> ()
    "tpu.trace_start"() <{level = 10 : i32, message = "bsh,hk->bsk"}> : () -> ()
    %cst_277 = arith.constant dense<0.000000e+00> : vector<2x8x32xf32>
    %1005 = tpu.matmul %1004, %41, %cst_277 {dimension_numbers = #tpu.dot_dimension_numbers<[2], [0], [0, 1], [1], [0, 0, 0, 1, 1, 1], [], []>} : vector<2x8x32xf32>, vector<32x32xf32>, vector<2x8x32xf32> -> vector<2x8x32xf32>
    "tpu.trace_stop"() : () -> ()
    %1006 = vector.shape_cast %51 : vector<1x32xf32> to vector<1x1x32xf32>
    %1007 = vector.broadcast %1006 : vector<1x1x32xf32> to vector<2x8x32xf32>
    %1008 = arith.addf %1005, %1007 : vector<2x8x32xf32>
    %1009 = arith.addf %981, %1008 : vector<2x8x32xf32>
    %cst_278 = arith.constant dense<0.000000e+00> : vector<2x8xf32>
    %1010 = vector.multi_reduction <add>, %1009, %cst_278 [2] : vector<2x8x32xf32> to vector<2x8xf32>
    %1011 = vector.shape_cast %1010 : vector<2x8xf32> to vector<2x8x1xf32>
    %cst_279 = arith.constant 3.200000e+01 : f32
    %1012 = vector.broadcast %cst_279 : f32 to vector<2x8x1xf32>
    %1013 = arith.divf %1011, %1012 : vector<2x8x1xf32>
    %1014 = vector.broadcast %1013 : vector<2x8x1xf32> to vector<2x8x32xf32>
    %1015 = arith.subf %1009, %1014 : vector<2x8x32xf32>
    %1016 = arith.mulf %1015, %1015 : vector<2x8x32xf32>
    %cst_280 = arith.constant dense<0.000000e+00> : vector<2x8xf32>
    %1017 = vector.multi_reduction <add>, %1016, %cst_280 [2] : vector<2x8x32xf32> to vector<2x8xf32>
    %1018 = vector.shape_cast %1017 : vector<2x8xf32> to vector<2x8x1xf32>
    %cst_281 = arith.constant 3.200000e+01 : f32
    %1019 = vector.broadcast %cst_281 : f32 to vector<2x8x1xf32>
    %1020 = arith.divf %1018, %1019 : vector<2x8x1xf32>
    %1021 = vector.broadcast %1013 : vector<2x8x1xf32> to vector<2x8x32xf32>
    %1022 = arith.subf %1009, %1021 : vector<2x8x32xf32>
    %cst_282 = arith.constant 9.99999974E-6 : f32
    %1023 = vector.broadcast %cst_282 : f32 to vector<2x8x1xf32>
    %1024 = arith.addf %1020, %1023 : vector<2x8x1xf32>
    %1025 = math.rsqrt %1024 : vector<2x8x1xf32>
    %1026 = vector.broadcast %1025 : vector<2x8x1xf32> to vector<2x8x32xf32>
    %1027 = arith.mulf %1022, %1026 : vector<2x8x32xf32>
    %1028 = vector.shape_cast %56 : vector<1x32xf32> to vector<1x1x32xf32>
    %1029 = vector.broadcast %1028 : vector<1x1x32xf32> to vector<2x8x32xf32>
    %1030 = arith.mulf %1027, %1029 : vector<2x8x32xf32>
    %1031 = vector.shape_cast %57 : vector<1x32xf32> to vector<1x1x32xf32>
    %1032 = vector.broadcast %1031 : vector<1x1x32xf32> to vector<2x8x32xf32>
    %1033 = arith.addf %1030, %1032 : vector<2x8x32xf32>
    %1034 = vector.shape_cast %67 : vector<2x32xf32> to vector<2x1x32xf32>
    %1035 = vector.broadcast %1034 : vector<2x1x32xf32> to vector<2x8x32xf32>
    %1036 = arith.addf %1033, %1035 : vector<2x8x32xf32>
    %cst_283 = arith.constant dense<0.000000e+00> : vector<2x8xf32>
    %1037 = vector.multi_reduction <add>, %1036, %cst_283 [2] : vector<2x8x32xf32> to vector<2x8xf32>
    %1038 = vector.shape_cast %1037 : vector<2x8xf32> to vector<2x8x1xf32>
    %cst_284 = arith.constant 3.200000e+01 : f32
    %1039 = vector.broadcast %cst_284 : f32 to vector<2x8x1xf32>
    %1040 = arith.divf %1038, %1039 : vector<2x8x1xf32>
    %1041 = vector.broadcast %1040 : vector<2x8x1xf32> to vector<2x8x32xf32>
    %1042 = arith.subf %1036, %1041 : vector<2x8x32xf32>
    %1043 = arith.mulf %1042, %1042 : vector<2x8x32xf32>
    %cst_285 = arith.constant dense<0.000000e+00> : vector<2x8xf32>
    %1044 = vector.multi_reduction <add>, %1043, %cst_285 [2] : vector<2x8x32xf32> to vector<2x8xf32>
    %1045 = vector.shape_cast %1044 : vector<2x8xf32> to vector<2x8x1xf32>
    %cst_286 = arith.constant 3.200000e+01 : f32
    %1046 = vector.broadcast %cst_286 : f32 to vector<2x8x1xf32>
    %1047 = arith.divf %1045, %1046 : vector<2x8x1xf32>
    %1048 = vector.broadcast %1040 : vector<2x8x1xf32> to vector<2x8x32xf32>
    %1049 = arith.subf %1036, %1048 : vector<2x8x32xf32>
    %cst_287 = arith.constant 9.99999974E-6 : f32
    %1050 = vector.broadcast %cst_287 : f32 to vector<2x8x1xf32>
    %1051 = arith.addf %1047, %1050 : vector<2x8x1xf32>
    %1052 = math.rsqrt %1051 : vector<2x8x1xf32>
    %1053 = vector.broadcast %1052 : vector<2x8x1xf32> to vector<2x8x32xf32>
    %1054 = arith.mulf %1049, %1053 : vector<2x8x32xf32>
    %1055 = vector.shape_cast %58 : vector<1x32xf32> to vector<1x1x32xf32>
    %1056 = vector.broadcast %1055 : vector<1x1x32xf32> to vector<2x8x32xf32>
    %1057 = arith.mulf %1054, %1056 : vector<2x8x32xf32>
    %1058 = vector.shape_cast %59 : vector<1x32xf32> to vector<1x1x32xf32>
    %1059 = vector.broadcast %1058 : vector<1x1x32xf32> to vector<2x8x32xf32>
    %1060 = arith.addf %1057, %1059 : vector<2x8x32xf32>
    "tpu.trace_start"() <{level = 10 : i32, message = "bsh,hf->bsf"}> : () -> ()
    %cst_288 = arith.constant dense<0.000000e+00> : vector<2x8x128xf32>
    %1061 = tpu.matmul %1060, %47, %cst_288 {dimension_numbers = #tpu.dot_dimension_numbers<[2], [0], [0, 1], [1], [0, 0, 0, 1, 1, 1], [], []>} : vector<2x8x32xf32>, vector<32x128xf32>, vector<2x8x128xf32> -> vector<2x8x128xf32>
    "tpu.trace_stop"() : () -> ()
    %1062 = vector.shape_cast %54 : vector<1x128xf32> to vector<1x1x128xf32>
    %1063 = vector.broadcast %1062 : vector<1x1x128xf32> to vector<2x8x128xf32>
    %1064 = arith.addf %1061, %1063 : vector<2x8x128xf32>
    %cst_289 = arith.constant 0.000000e+00 : f32
    %1065 = vector.broadcast %cst_289 : f32 to vector<2x8x128xf32>
    %1066 = arith.maximumf %1064, %1065 : vector<2x8x128xf32>
    "tpu.trace_start"() <{level = 10 : i32, message = "bsf,fh->bsh"}> : () -> ()
    %cst_290 = arith.constant dense<0.000000e+00> : vector<2x8x32xf32>
    %1067 = tpu.matmul %1066, %49, %cst_290 {dimension_numbers = #tpu.dot_dimension_numbers<[2], [0], [0, 1], [1], [0, 0, 0, 1, 1, 1], [], []>} : vector<2x8x128xf32>, vector<128x32xf32>, vector<2x8x32xf32> -> vector<2x8x32xf32>
    "tpu.trace_stop"() : () -> ()
    %1068 = vector.shape_cast %55 : vector<1x32xf32> to vector<1x1x32xf32>
    %1069 = vector.broadcast %1068 : vector<1x1x32xf32> to vector<2x8x32xf32>
    %1070 = arith.addf %1067, %1069 : vector<2x8x32xf32>
    %1071 = arith.addf %1060, %1070 : vector<2x8x32xf32>
    %cst_291 = arith.constant dense<0.000000e+00> : vector<2x8xf32>
    %1072 = vector.multi_reduction <add>, %1071, %cst_291 [2] : vector<2x8x32xf32> to vector<2x8xf32>
    %1073 = vector.shape_cast %1072 : vector<2x8xf32> to vector<2x8x1xf32>
    %cst_292 = arith.constant 3.200000e+01 : f32
    %1074 = vector.broadcast %cst_292 : f32 to vector<2x8x1xf32>
    %1075 = arith.divf %1073, %1074 : vector<2x8x1xf32>
    %1076 = vector.broadcast %1075 : vector<2x8x1xf32> to vector<2x8x32xf32>
    %1077 = arith.subf %1071, %1076 : vector<2x8x32xf32>
    %1078 = arith.mulf %1077, %1077 : vector<2x8x32xf32>
    %cst_293 = arith.constant dense<0.000000e+00> : vector<2x8xf32>
    %1079 = vector.multi_reduction <add>, %1078, %cst_293 [2] : vector<2x8x32xf32> to vector<2x8xf32>
    %1080 = vector.shape_cast %1079 : vector<2x8xf32> to vector<2x8x1xf32>
    %cst_294 = arith.constant 3.200000e+01 : f32
    %1081 = vector.broadcast %cst_294 : f32 to vector<2x8x1xf32>
    %1082 = arith.divf %1080, %1081 : vector<2x8x1xf32>
    %1083 = vector.broadcast %1075 : vector<2x8x1xf32> to vector<2x8x32xf32>
    %1084 = arith.subf %1071, %1083 : vector<2x8x32xf32>
    %cst_295 = arith.constant 9.99999974E-6 : f32
    %1085 = vector.broadcast %cst_295 : f32 to vector<2x8x1xf32>
    %1086 = arith.addf %1082, %1085 : vector<2x8x1xf32>
    %1087 = math.rsqrt %1086 : vector<2x8x1xf32>
    %1088 = vector.broadcast %1087 : vector<2x8x1xf32> to vector<2x8x32xf32>
    %1089 = arith.mulf %1084, %1088 : vector<2x8x32xf32>
    %1090 = vector.shape_cast %60 : vector<1x32xf32> to vector<1x1x32xf32>
    %1091 = vector.broadcast %1090 : vector<1x1x32xf32> to vector<2x8x32xf32>
    %1092 = arith.mulf %1089, %1091 : vector<2x8x32xf32>
    %1093 = vector.shape_cast %61 : vector<1x32xf32> to vector<1x1x32xf32>
    %1094 = vector.broadcast %1093 : vector<1x1x32xf32> to vector<2x8x32xf32>
    %1095 = arith.addf %1092, %1094 : vector<2x8x32xf32>
    %1096 = vector.extract_strided_slice %1095 {offsets = [0, 3, 0], sizes = [2, 1, 32], strides = [1, 1, 1]} : vector<2x8x32xf32> to vector<2x1x32xf32>
    %1097 = vector.shape_cast %1096 : vector<2x1x32xf32> to vector<2x32xf32>
    %cst_296 = arith.constant dense<0.000000e+00> : vector<2x16xf32>
    %1098 = tpu.matmul %1097, %5, %cst_296 {dimension_numbers = #tpu.dot_dimension_numbers<[1], [0], [0], [1], [0, 0, 1, 1], [], []>} : vector<2x32xf32>, vector<32x16xf32>, vector<2x16xf32> -> vector<2x16xf32>
    %1099 = vector.broadcast %6 : vector<1x16xf32> to vector<2x16xf32>
    %1100 = arith.addf %1098, %1099 : vector<2x16xf32>
    %c3_i32_297 = arith.constant 3 : i32
    %1101 = vector.broadcast %c3_i32_297 : i32 to vector<6x2x16xi32>
    %1102 = arith.cmpi eq, %85, %1101 : vector<6x2x16xi32>
    %1103 = vector.shape_cast %1100 : vector<2x16xf32> to vector<1x2x16xf32>
    %1104 = vector.shape_cast %1103 : vector<1x2x16xf32> to vector<1x2x16xf32>
    %1105 = vector.broadcast %1104 : vector<1x2x16xf32> to vector<6x2x16xf32>
    %1106 = arith.select %1102, %1105, %847 : vector<6x2x16xi1>, vector<6x2x16xf32>
    %cst_298 = arith.constant dense<0xFF800000> : vector<2xf32>
    %1107 = vector.multi_reduction <maximumf>, %1100, %cst_298 [1] : vector<2x16xf32> to vector<2xf32>
    %1108 = vector.shape_cast %1107 : vector<2xf32> to vector<2x1xf32>
    %1109 = vector.broadcast %1108 : vector<2x1xf32> to vector<2x16xf32>
    %1110 = arith.subf %1100, %1109 : vector<2x16xf32>
    %1111 = math.exp %1110 : vector<2x16xf32>
    %cst_299 = arith.constant dense<0.000000e+00> : vector<2xf32>
    %1112 = vector.multi_reduction <add>, %1111, %cst_299 [1] : vector<2x16xf32> to vector<2xf32>
    %1113 = vector.shape_cast %1112 : vector<2xf32> to vector<2x1xf32>
    %1114 = tpu.reciprocal %1113 {approx = true} : vector<2x1xf32> -> vector<2x1xf32>
    %1115 = vector.broadcast %1114 : vector<2x1xf32> to vector<2x16xf32>
    %1116 = arith.mulf %1111, %1115 : vector<2x16xf32>
    %c4_i32 = arith.constant 4 : i32
    %1117 = vector.broadcast %c4_i32 : i32 to vector<2x8x16xi32>
    %1118 = arith.cmpi eq, %75, %1117 : vector<2x8x16xi32>
    %1119 = vector.shape_cast %1116 : vector<2x16xf32> to vector<2x1x16xf32>
    %1120 = vector.shape_cast %1119 : vector<2x1x16xf32> to vector<2x1x16xf32>
    %1121 = vector.broadcast %1120 : vector<2x1x16xf32> to vector<2x8x16xf32>
    %1122 = arith.select %1118, %1121, %863 : vector<2x8x16xi1>, vector<2x8x16xf32>
    "tpu.trace_start"() <{level = 10 : i32, message = "bsv,vh->bsh"}> : () -> ()
    %cst_300 = arith.constant dense<0.000000e+00> : vector<2x8x32xf32>
    %1123 = tpu.matmul %1122, %1, %cst_300 {dimension_numbers = #tpu.dot_dimension_numbers<[2], [0], [0, 1], [1], [0, 0, 0, 1, 1, 1], [], []>} : vector<2x8x16xf32>, vector<16x32xf32>, vector<2x8x32xf32> -> vector<2x8x32xf32>
    "tpu.trace_stop"() : () -> ()
    %1124 = vector.shape_cast %3 : vector<8x32xf32> to vector<1x8x32xf32>
    %1125 = vector.broadcast %1124 : vector<1x8x32xf32> to vector<2x8x32xf32>
    %1126 = arith.addf %1123, %1125 : vector<2x8x32xf32>
    "tpu.trace_start"() <{level = 10 : i32, message = "bsh,hk->bsk"}> : () -> ()
    %cst_301 = arith.constant dense<0.000000e+00> : vector<2x8x128xf32>
    %1127 = tpu.matmul %1126, %9, %cst_301 {dimension_numbers = #tpu.dot_dimension_numbers<[2], [0], [0, 1], [1], [0, 0, 0, 1, 1, 1], [], []>} : vector<2x8x32xf32>, vector<32x128xf32>, vector<2x8x128xf32> -> vector<2x8x128xf32>
    "tpu.trace_stop"() : () -> ()
    %1128 = vector.shape_cast %20 : vector<1x128xf32> to vector<1x1x128xf32>
    %1129 = vector.broadcast %1128 : vector<1x1x128xf32> to vector<2x8x128xf32>
    %1130 = arith.addf %1127, %1129 : vector<2x8x128xf32>
    %1131 = vector.extract_strided_slice %1130 {offsets = [0, 0, 0], sizes = [2, 8, 32], strides = [1, 1, 1]} : vector<2x8x128xf32> to vector<2x8x32xf32>
    %1132 = vector.extract_strided_slice %1130 {offsets = [0, 0, 32], sizes = [2, 8, 32], strides = [1, 1, 1]} : vector<2x8x128xf32> to vector<2x8x32xf32>
    %1133 = vector.extract_strided_slice %1130 {offsets = [0, 0, 64], sizes = [2, 8, 32], strides = [1, 1, 1]} : vector<2x8x128xf32> to vector<2x8x32xf32>
    "tpu.trace_start"() <{level = 10 : i32, message = "bsh,bth->bst"}> : () -> ()
    %cst_302 = arith.constant dense<0.000000e+00> : vector<2x8x8xf32>
    %1134 = tpu.matmul %1131, %1132, %cst_302 {dimension_numbers = #tpu.dot_dimension_numbers<[2], [2], [1], [1], [0, 0, 0, 1, 1, 1], [0], [0]>} : vector<2x8x32xf32>, vector<2x8x32xf32>, vector<2x8x8xf32> -> vector<2x8x8xf32>
    "tpu.trace_stop"() : () -> ()
    %cst_303 = arith.constant 0.176776692 : f32
    %1135 = vector.broadcast %cst_303 : f32 to vector<2x8x8xf32>
    %1136 = arith.mulf %1134, %1135 : vector<2x8x8xf32>
    %1137 = vector.broadcast %74 : vector<1x8x8xf32> to vector<2x8x8xf32>
    %1138 = arith.addf %1136, %1137 : vector<2x8x8xf32>
    %cst_304 = arith.constant dense<0xFF800000> : vector<2x8xf32>
    %1139 = vector.multi_reduction <maximumf>, %1138, %cst_304 [2] : vector<2x8x8xf32> to vector<2x8xf32>
    %1140 = vector.shape_cast %1139 : vector<2x8xf32> to vector<2x8x1xf32>
    %1141 = vector.broadcast %1140 : vector<2x8x1xf32> to vector<2x8x8xf32>
    %1142 = arith.subf %1138, %1141 : vector<2x8x8xf32>
    %1143 = math.exp %1142 : vector<2x8x8xf32>
    %cst_305 = arith.constant dense<0.000000e+00> : vector<2x8xf32>
    %1144 = vector.multi_reduction <add>, %1143, %cst_305 [2] : vector<2x8x8xf32> to vector<2x8xf32>
    %1145 = vector.shape_cast %1144 : vector<2x8xf32> to vector<2x8x1xf32>
    %1146 = tpu.reciprocal %1145 {approx = true} : vector<2x8x1xf32> -> vector<2x8x1xf32>
    %1147 = vector.broadcast %1146 : vector<2x8x1xf32> to vector<2x8x8xf32>
    %1148 = arith.mulf %1143, %1147 : vector<2x8x8xf32>
    "tpu.trace_start"() <{level = 10 : i32, message = "bst,bth->bsh"}> : () -> ()
    %cst_306 = arith.constant dense<0.000000e+00> : vector<2x8x32xf32>
    %1149 = tpu.matmul %1148, %1133, %cst_306 {dimension_numbers = #tpu.dot_dimension_numbers<[2], [1], [1], [2], [0, 0, 0, 1, 1, 2], [0], [0]>} : vector<2x8x8xf32>, vector<2x8x32xf32>, vector<2x8x32xf32> -> vector<2x8x32xf32>
    "tpu.trace_stop"() : () -> ()
    "tpu.trace_start"() <{level = 10 : i32, message = "bsh,hk->bsk"}> : () -> ()
    %cst_307 = arith.constant dense<0.000000e+00> : vector<2x8x32xf32>
    %1150 = tpu.matmul %1149, %11, %cst_307 {dimension_numbers = #tpu.dot_dimension_numbers<[2], [0], [0, 1], [1], [0, 0, 0, 1, 1, 1], [], []>} : vector<2x8x32xf32>, vector<32x32xf32>, vector<2x8x32xf32> -> vector<2x8x32xf32>
    "tpu.trace_stop"() : () -> ()
    %1151 = vector.shape_cast %21 : vector<1x32xf32> to vector<1x1x32xf32>
    %1152 = vector.broadcast %1151 : vector<1x1x32xf32> to vector<2x8x32xf32>
    %1153 = arith.addf %1150, %1152 : vector<2x8x32xf32>
    %1154 = arith.addf %1126, %1153 : vector<2x8x32xf32>
    %cst_308 = arith.constant dense<0.000000e+00> : vector<2x8xf32>
    %1155 = vector.multi_reduction <add>, %1154, %cst_308 [2] : vector<2x8x32xf32> to vector<2x8xf32>
    %1156 = vector.shape_cast %1155 : vector<2x8xf32> to vector<2x8x1xf32>
    %cst_309 = arith.constant 3.200000e+01 : f32
    %1157 = vector.broadcast %cst_309 : f32 to vector<2x8x1xf32>
    %1158 = arith.divf %1156, %1157 : vector<2x8x1xf32>
    %1159 = vector.broadcast %1158 : vector<2x8x1xf32> to vector<2x8x32xf32>
    %1160 = arith.subf %1154, %1159 : vector<2x8x32xf32>
    %1161 = arith.mulf %1160, %1160 : vector<2x8x32xf32>
    %cst_310 = arith.constant dense<0.000000e+00> : vector<2x8xf32>
    %1162 = vector.multi_reduction <add>, %1161, %cst_310 [2] : vector<2x8x32xf32> to vector<2x8xf32>
    %1163 = vector.shape_cast %1162 : vector<2x8xf32> to vector<2x8x1xf32>
    %cst_311 = arith.constant 3.200000e+01 : f32
    %1164 = vector.broadcast %cst_311 : f32 to vector<2x8x1xf32>
    %1165 = arith.divf %1163, %1164 : vector<2x8x1xf32>
    %1166 = vector.broadcast %1158 : vector<2x8x1xf32> to vector<2x8x32xf32>
    %1167 = arith.subf %1154, %1166 : vector<2x8x32xf32>
    %cst_312 = arith.constant 9.99999974E-6 : f32
    %1168 = vector.broadcast %cst_312 : f32 to vector<2x8x1xf32>
    %1169 = arith.addf %1165, %1168 : vector<2x8x1xf32>
    %1170 = math.rsqrt %1169 : vector<2x8x1xf32>
    %1171 = vector.broadcast %1170 : vector<2x8x1xf32> to vector<2x8x32xf32>
    %1172 = arith.mulf %1167, %1171 : vector<2x8x32xf32>
    %1173 = vector.shape_cast %26 : vector<1x32xf32> to vector<1x1x32xf32>
    %1174 = vector.broadcast %1173 : vector<1x1x32xf32> to vector<2x8x32xf32>
    %1175 = arith.mulf %1172, %1174 : vector<2x8x32xf32>
    %1176 = vector.shape_cast %27 : vector<1x32xf32> to vector<1x1x32xf32>
    %1177 = vector.broadcast %1176 : vector<1x1x32xf32> to vector<2x8x32xf32>
    %1178 = arith.addf %1175, %1177 : vector<2x8x32xf32>
    %1179 = vector.shape_cast %37 : vector<2x32xf32> to vector<2x1x32xf32>
    %1180 = vector.broadcast %1179 : vector<2x1x32xf32> to vector<2x8x32xf32>
    %1181 = arith.addf %1178, %1180 : vector<2x8x32xf32>
    %cst_313 = arith.constant dense<0.000000e+00> : vector<2x8xf32>
    %1182 = vector.multi_reduction <add>, %1181, %cst_313 [2] : vector<2x8x32xf32> to vector<2x8xf32>
    %1183 = vector.shape_cast %1182 : vector<2x8xf32> to vector<2x8x1xf32>
    %cst_314 = arith.constant 3.200000e+01 : f32
    %1184 = vector.broadcast %cst_314 : f32 to vector<2x8x1xf32>
    %1185 = arith.divf %1183, %1184 : vector<2x8x1xf32>
    %1186 = vector.broadcast %1185 : vector<2x8x1xf32> to vector<2x8x32xf32>
    %1187 = arith.subf %1181, %1186 : vector<2x8x32xf32>
    %1188 = arith.mulf %1187, %1187 : vector<2x8x32xf32>
    %cst_315 = arith.constant dense<0.000000e+00> : vector<2x8xf32>
    %1189 = vector.multi_reduction <add>, %1188, %cst_315 [2] : vector<2x8x32xf32> to vector<2x8xf32>
    %1190 = vector.shape_cast %1189 : vector<2x8xf32> to vector<2x8x1xf32>
    %cst_316 = arith.constant 3.200000e+01 : f32
    %1191 = vector.broadcast %cst_316 : f32 to vector<2x8x1xf32>
    %1192 = arith.divf %1190, %1191 : vector<2x8x1xf32>
    %1193 = vector.broadcast %1185 : vector<2x8x1xf32> to vector<2x8x32xf32>
    %1194 = arith.subf %1181, %1193 : vector<2x8x32xf32>
    %cst_317 = arith.constant 9.99999974E-6 : f32
    %1195 = vector.broadcast %cst_317 : f32 to vector<2x8x1xf32>
    %1196 = arith.addf %1192, %1195 : vector<2x8x1xf32>
    %1197 = math.rsqrt %1196 : vector<2x8x1xf32>
    %1198 = vector.broadcast %1197 : vector<2x8x1xf32> to vector<2x8x32xf32>
    %1199 = arith.mulf %1194, %1198 : vector<2x8x32xf32>
    %1200 = vector.shape_cast %28 : vector<1x32xf32> to vector<1x1x32xf32>
    %1201 = vector.broadcast %1200 : vector<1x1x32xf32> to vector<2x8x32xf32>
    %1202 = arith.mulf %1199, %1201 : vector<2x8x32xf32>
    %1203 = vector.shape_cast %29 : vector<1x32xf32> to vector<1x1x32xf32>
    %1204 = vector.broadcast %1203 : vector<1x1x32xf32> to vector<2x8x32xf32>
    %1205 = arith.addf %1202, %1204 : vector<2x8x32xf32>
    "tpu.trace_start"() <{level = 10 : i32, message = "bsh,hf->bsf"}> : () -> ()
    %cst_318 = arith.constant dense<0.000000e+00> : vector<2x8x128xf32>
    %1206 = tpu.matmul %1205, %17, %cst_318 {dimension_numbers = #tpu.dot_dimension_numbers<[2], [0], [0, 1], [1], [0, 0, 0, 1, 1, 1], [], []>} : vector<2x8x32xf32>, vector<32x128xf32>, vector<2x8x128xf32> -> vector<2x8x128xf32>
    "tpu.trace_stop"() : () -> ()
    %1207 = vector.shape_cast %24 : vector<1x128xf32> to vector<1x1x128xf32>
    %1208 = vector.broadcast %1207 : vector<1x1x128xf32> to vector<2x8x128xf32>
    %1209 = arith.addf %1206, %1208 : vector<2x8x128xf32>
    %cst_319 = arith.constant 0.000000e+00 : f32
    %1210 = vector.broadcast %cst_319 : f32 to vector<2x8x128xf32>
    %1211 = arith.maximumf %1209, %1210 : vector<2x8x128xf32>
    "tpu.trace_start"() <{level = 10 : i32, message = "bsf,fh->bsh"}> : () -> ()
    %cst_320 = arith.constant dense<0.000000e+00> : vector<2x8x32xf32>
    %1212 = tpu.matmul %1211, %19, %cst_320 {dimension_numbers = #tpu.dot_dimension_numbers<[2], [0], [0, 1], [1], [0, 0, 0, 1, 1, 1], [], []>} : vector<2x8x128xf32>, vector<128x32xf32>, vector<2x8x32xf32> -> vector<2x8x32xf32>
    "tpu.trace_stop"() : () -> ()
    %1213 = vector.shape_cast %25 : vector<1x32xf32> to vector<1x1x32xf32>
    %1214 = vector.broadcast %1213 : vector<1x1x32xf32> to vector<2x8x32xf32>
    %1215 = arith.addf %1212, %1214 : vector<2x8x32xf32>
    %1216 = arith.addf %1205, %1215 : vector<2x8x32xf32>
    %cst_321 = arith.constant dense<0.000000e+00> : vector<2x8xf32>
    %1217 = vector.multi_reduction <add>, %1216, %cst_321 [2] : vector<2x8x32xf32> to vector<2x8xf32>
    %1218 = vector.shape_cast %1217 : vector<2x8xf32> to vector<2x8x1xf32>
    %cst_322 = arith.constant 3.200000e+01 : f32
    %1219 = vector.broadcast %cst_322 : f32 to vector<2x8x1xf32>
    %1220 = arith.divf %1218, %1219 : vector<2x8x1xf32>
    %1221 = vector.broadcast %1220 : vector<2x8x1xf32> to vector<2x8x32xf32>
    %1222 = arith.subf %1216, %1221 : vector<2x8x32xf32>
    %1223 = arith.mulf %1222, %1222 : vector<2x8x32xf32>
    %cst_323 = arith.constant dense<0.000000e+00> : vector<2x8xf32>
    %1224 = vector.multi_reduction <add>, %1223, %cst_323 [2] : vector<2x8x32xf32> to vector<2x8xf32>
    %1225 = vector.shape_cast %1224 : vector<2x8xf32> to vector<2x8x1xf32>
    %cst_324 = arith.constant 3.200000e+01 : f32
    %1226 = vector.broadcast %cst_324 : f32 to vector<2x8x1xf32>
    %1227 = arith.divf %1225, %1226 : vector<2x8x1xf32>
    %1228 = vector.broadcast %1220 : vector<2x8x1xf32> to vector<2x8x32xf32>
    %1229 = arith.subf %1216, %1228 : vector<2x8x32xf32>
    %cst_325 = arith.constant 9.99999974E-6 : f32
    %1230 = vector.broadcast %cst_325 : f32 to vector<2x8x1xf32>
    %1231 = arith.addf %1227, %1230 : vector<2x8x1xf32>
    %1232 = math.rsqrt %1231 : vector<2x8x1xf32>
    %1233 = vector.broadcast %1232 : vector<2x8x1xf32> to vector<2x8x32xf32>
    %1234 = arith.mulf %1229, %1233 : vector<2x8x32xf32>
    %1235 = vector.shape_cast %30 : vector<1x32xf32> to vector<1x1x32xf32>
    %1236 = vector.broadcast %1235 : vector<1x1x32xf32> to vector<2x8x32xf32>
    %1237 = arith.mulf %1234, %1236 : vector<2x8x32xf32>
    %1238 = vector.shape_cast %31 : vector<1x32xf32> to vector<1x1x32xf32>
    %1239 = vector.broadcast %1238 : vector<1x1x32xf32> to vector<2x8x32xf32>
    %1240 = arith.addf %1237, %1239 : vector<2x8x32xf32>
    "tpu.trace_start"() <{level = 10 : i32, message = "bsh,hk->bsk"}> : () -> ()
    %cst_326 = arith.constant dense<0.000000e+00> : vector<2x8x128xf32>
    %1241 = tpu.matmul %1240, %39, %cst_326 {dimension_numbers = #tpu.dot_dimension_numbers<[2], [0], [0, 1], [1], [0, 0, 0, 1, 1, 1], [], []>} : vector<2x8x32xf32>, vector<32x128xf32>, vector<2x8x128xf32> -> vector<2x8x128xf32>
    "tpu.trace_stop"() : () -> ()
    %1242 = vector.shape_cast %50 : vector<1x128xf32> to vector<1x1x128xf32>
    %1243 = vector.broadcast %1242 : vector<1x1x128xf32> to vector<2x8x128xf32>
    %1244 = arith.addf %1241, %1243 : vector<2x8x128xf32>
    %1245 = vector.extract_strided_slice %1244 {offsets = [0, 0, 0], sizes = [2, 8, 32], strides = [1, 1, 1]} : vector<2x8x128xf32> to vector<2x8x32xf32>
    %1246 = vector.extract_strided_slice %1244 {offsets = [0, 0, 32], sizes = [2, 8, 32], strides = [1, 1, 1]} : vector<2x8x128xf32> to vector<2x8x32xf32>
    %1247 = vector.extract_strided_slice %1244 {offsets = [0, 0, 64], sizes = [2, 8, 32], strides = [1, 1, 1]} : vector<2x8x128xf32> to vector<2x8x32xf32>
    "tpu.trace_start"() <{level = 10 : i32, message = "bsh,bth->bst"}> : () -> ()
    %cst_327 = arith.constant dense<0.000000e+00> : vector<2x8x8xf32>
    %1248 = tpu.matmul %1245, %1246, %cst_327 {dimension_numbers = #tpu.dot_dimension_numbers<[2], [2], [1], [1], [0, 0, 0, 1, 1, 1], [0], [0]>} : vector<2x8x32xf32>, vector<2x8x32xf32>, vector<2x8x8xf32> -> vector<2x8x8xf32>
    "tpu.trace_stop"() : () -> ()
    %cst_328 = arith.constant 0.176776692 : f32
    %1249 = vector.broadcast %cst_328 : f32 to vector<2x8x8xf32>
    %1250 = arith.mulf %1248, %1249 : vector<2x8x8xf32>
    %1251 = vector.broadcast %74 : vector<1x8x8xf32> to vector<2x8x8xf32>
    %1252 = arith.addf %1250, %1251 : vector<2x8x8xf32>
    %cst_329 = arith.constant dense<0xFF800000> : vector<2x8xf32>
    %1253 = vector.multi_reduction <maximumf>, %1252, %cst_329 [2] : vector<2x8x8xf32> to vector<2x8xf32>
    %1254 = vector.shape_cast %1253 : vector<2x8xf32> to vector<2x8x1xf32>
    %1255 = vector.broadcast %1254 : vector<2x8x1xf32> to vector<2x8x8xf32>
    %1256 = arith.subf %1252, %1255 : vector<2x8x8xf32>
    %1257 = math.exp %1256 : vector<2x8x8xf32>
    %cst_330 = arith.constant dense<0.000000e+00> : vector<2x8xf32>
    %1258 = vector.multi_reduction <add>, %1257, %cst_330 [2] : vector<2x8x8xf32> to vector<2x8xf32>
    %1259 = vector.shape_cast %1258 : vector<2x8xf32> to vector<2x8x1xf32>
    %1260 = tpu.reciprocal %1259 {approx = true} : vector<2x8x1xf32> -> vector<2x8x1xf32>
    %1261 = vector.broadcast %1260 : vector<2x8x1xf32> to vector<2x8x8xf32>
    %1262 = arith.mulf %1257, %1261 : vector<2x8x8xf32>
    "tpu.trace_start"() <{level = 10 : i32, message = "bst,bth->bsh"}> : () -> ()
    %cst_331 = arith.constant dense<0.000000e+00> : vector<2x8x32xf32>
    %1263 = tpu.matmul %1262, %1247, %cst_331 {dimension_numbers = #tpu.dot_dimension_numbers<[2], [1], [1], [2], [0, 0, 0, 1, 1, 2], [0], [0]>} : vector<2x8x8xf32>, vector<2x8x32xf32>, vector<2x8x32xf32> -> vector<2x8x32xf32>
    "tpu.trace_stop"() : () -> ()
    "tpu.trace_start"() <{level = 10 : i32, message = "bsh,hk->bsk"}> : () -> ()
    %cst_332 = arith.constant dense<0.000000e+00> : vector<2x8x32xf32>
    %1264 = tpu.matmul %1263, %41, %cst_332 {dimension_numbers = #tpu.dot_dimension_numbers<[2], [0], [0, 1], [1], [0, 0, 0, 1, 1, 1], [], []>} : vector<2x8x32xf32>, vector<32x32xf32>, vector<2x8x32xf32> -> vector<2x8x32xf32>
    "tpu.trace_stop"() : () -> ()
    %1265 = vector.shape_cast %51 : vector<1x32xf32> to vector<1x1x32xf32>
    %1266 = vector.broadcast %1265 : vector<1x1x32xf32> to vector<2x8x32xf32>
    %1267 = arith.addf %1264, %1266 : vector<2x8x32xf32>
    %1268 = arith.addf %1240, %1267 : vector<2x8x32xf32>
    %cst_333 = arith.constant dense<0.000000e+00> : vector<2x8xf32>
    %1269 = vector.multi_reduction <add>, %1268, %cst_333 [2] : vector<2x8x32xf32> to vector<2x8xf32>
    %1270 = vector.shape_cast %1269 : vector<2x8xf32> to vector<2x8x1xf32>
    %cst_334 = arith.constant 3.200000e+01 : f32
    %1271 = vector.broadcast %cst_334 : f32 to vector<2x8x1xf32>
    %1272 = arith.divf %1270, %1271 : vector<2x8x1xf32>
    %1273 = vector.broadcast %1272 : vector<2x8x1xf32> to vector<2x8x32xf32>
    %1274 = arith.subf %1268, %1273 : vector<2x8x32xf32>
    %1275 = arith.mulf %1274, %1274 : vector<2x8x32xf32>
    %cst_335 = arith.constant dense<0.000000e+00> : vector<2x8xf32>
    %1276 = vector.multi_reduction <add>, %1275, %cst_335 [2] : vector<2x8x32xf32> to vector<2x8xf32>
    %1277 = vector.shape_cast %1276 : vector<2x8xf32> to vector<2x8x1xf32>
    %cst_336 = arith.constant 3.200000e+01 : f32
    %1278 = vector.broadcast %cst_336 : f32 to vector<2x8x1xf32>
    %1279 = arith.divf %1277, %1278 : vector<2x8x1xf32>
    %1280 = vector.broadcast %1272 : vector<2x8x1xf32> to vector<2x8x32xf32>
    %1281 = arith.subf %1268, %1280 : vector<2x8x32xf32>
    %cst_337 = arith.constant 9.99999974E-6 : f32
    %1282 = vector.broadcast %cst_337 : f32 to vector<2x8x1xf32>
    %1283 = arith.addf %1279, %1282 : vector<2x8x1xf32>
    %1284 = math.rsqrt %1283 : vector<2x8x1xf32>
    %1285 = vector.broadcast %1284 : vector<2x8x1xf32> to vector<2x8x32xf32>
    %1286 = arith.mulf %1281, %1285 : vector<2x8x32xf32>
    %1287 = vector.shape_cast %56 : vector<1x32xf32> to vector<1x1x32xf32>
    %1288 = vector.broadcast %1287 : vector<1x1x32xf32> to vector<2x8x32xf32>
    %1289 = arith.mulf %1286, %1288 : vector<2x8x32xf32>
    %1290 = vector.shape_cast %57 : vector<1x32xf32> to vector<1x1x32xf32>
    %1291 = vector.broadcast %1290 : vector<1x1x32xf32> to vector<2x8x32xf32>
    %1292 = arith.addf %1289, %1291 : vector<2x8x32xf32>
    %1293 = vector.shape_cast %67 : vector<2x32xf32> to vector<2x1x32xf32>
    %1294 = vector.broadcast %1293 : vector<2x1x32xf32> to vector<2x8x32xf32>
    %1295 = arith.addf %1292, %1294 : vector<2x8x32xf32>
    %cst_338 = arith.constant dense<0.000000e+00> : vector<2x8xf32>
    %1296 = vector.multi_reduction <add>, %1295, %cst_338 [2] : vector<2x8x32xf32> to vector<2x8xf32>
    %1297 = vector.shape_cast %1296 : vector<2x8xf32> to vector<2x8x1xf32>
    %cst_339 = arith.constant 3.200000e+01 : f32
    %1298 = vector.broadcast %cst_339 : f32 to vector<2x8x1xf32>
    %1299 = arith.divf %1297, %1298 : vector<2x8x1xf32>
    %1300 = vector.broadcast %1299 : vector<2x8x1xf32> to vector<2x8x32xf32>
    %1301 = arith.subf %1295, %1300 : vector<2x8x32xf32>
    %1302 = arith.mulf %1301, %1301 : vector<2x8x32xf32>
    %cst_340 = arith.constant dense<0.000000e+00> : vector<2x8xf32>
    %1303 = vector.multi_reduction <add>, %1302, %cst_340 [2] : vector<2x8x32xf32> to vector<2x8xf32>
    %1304 = vector.shape_cast %1303 : vector<2x8xf32> to vector<2x8x1xf32>
    %cst_341 = arith.constant 3.200000e+01 : f32
    %1305 = vector.broadcast %cst_341 : f32 to vector<2x8x1xf32>
    %1306 = arith.divf %1304, %1305 : vector<2x8x1xf32>
    %1307 = vector.broadcast %1299 : vector<2x8x1xf32> to vector<2x8x32xf32>
    %1308 = arith.subf %1295, %1307 : vector<2x8x32xf32>
    %cst_342 = arith.constant 9.99999974E-6 : f32
    %1309 = vector.broadcast %cst_342 : f32 to vector<2x8x1xf32>
    %1310 = arith.addf %1306, %1309 : vector<2x8x1xf32>
    %1311 = math.rsqrt %1310 : vector<2x8x1xf32>
    %1312 = vector.broadcast %1311 : vector<2x8x1xf32> to vector<2x8x32xf32>
    %1313 = arith.mulf %1308, %1312 : vector<2x8x32xf32>
    %1314 = vector.shape_cast %58 : vector<1x32xf32> to vector<1x1x32xf32>
    %1315 = vector.broadcast %1314 : vector<1x1x32xf32> to vector<2x8x32xf32>
    %1316 = arith.mulf %1313, %1315 : vector<2x8x32xf32>
    %1317 = vector.shape_cast %59 : vector<1x32xf32> to vector<1x1x32xf32>
    %1318 = vector.broadcast %1317 : vector<1x1x32xf32> to vector<2x8x32xf32>
    %1319 = arith.addf %1316, %1318 : vector<2x8x32xf32>
    "tpu.trace_start"() <{level = 10 : i32, message = "bsh,hf->bsf"}> : () -> ()
    %cst_343 = arith.constant dense<0.000000e+00> : vector<2x8x128xf32>
    %1320 = tpu.matmul %1319, %47, %cst_343 {dimension_numbers = #tpu.dot_dimension_numbers<[2], [0], [0, 1], [1], [0, 0, 0, 1, 1, 1], [], []>} : vector<2x8x32xf32>, vector<32x128xf32>, vector<2x8x128xf32> -> vector<2x8x128xf32>
    "tpu.trace_stop"() : () -> ()
    %1321 = vector.shape_cast %54 : vector<1x128xf32> to vector<1x1x128xf32>
    %1322 = vector.broadcast %1321 : vector<1x1x128xf32> to vector<2x8x128xf32>
    %1323 = arith.addf %1320, %1322 : vector<2x8x128xf32>
    %cst_344 = arith.constant 0.000000e+00 : f32
    %1324 = vector.broadcast %cst_344 : f32 to vector<2x8x128xf32>
    %1325 = arith.maximumf %1323, %1324 : vector<2x8x128xf32>
    "tpu.trace_start"() <{level = 10 : i32, message = "bsf,fh->bsh"}> : () -> ()
    %cst_345 = arith.constant dense<0.000000e+00> : vector<2x8x32xf32>
    %1326 = tpu.matmul %1325, %49, %cst_345 {dimension_numbers = #tpu.dot_dimension_numbers<[2], [0], [0, 1], [1], [0, 0, 0, 1, 1, 1], [], []>} : vector<2x8x128xf32>, vector<128x32xf32>, vector<2x8x32xf32> -> vector<2x8x32xf32>
    "tpu.trace_stop"() : () -> ()
    %1327 = vector.shape_cast %55 : vector<1x32xf32> to vector<1x1x32xf32>
    %1328 = vector.broadcast %1327 : vector<1x1x32xf32> to vector<2x8x32xf32>
    %1329 = arith.addf %1326, %1328 : vector<2x8x32xf32>
    %1330 = arith.addf %1319, %1329 : vector<2x8x32xf32>
    %cst_346 = arith.constant dense<0.000000e+00> : vector<2x8xf32>
    %1331 = vector.multi_reduction <add>, %1330, %cst_346 [2] : vector<2x8x32xf32> to vector<2x8xf32>
    %1332 = vector.shape_cast %1331 : vector<2x8xf32> to vector<2x8x1xf32>
    %cst_347 = arith.constant 3.200000e+01 : f32
    %1333 = vector.broadcast %cst_347 : f32 to vector<2x8x1xf32>
    %1334 = arith.divf %1332, %1333 : vector<2x8x1xf32>
    %1335 = vector.broadcast %1334 : vector<2x8x1xf32> to vector<2x8x32xf32>
    %1336 = arith.subf %1330, %1335 : vector<2x8x32xf32>
    %1337 = arith.mulf %1336, %1336 : vector<2x8x32xf32>
    %cst_348 = arith.constant dense<0.000000e+00> : vector<2x8xf32>
    %1338 = vector.multi_reduction <add>, %1337, %cst_348 [2] : vector<2x8x32xf32> to vector<2x8xf32>
    %1339 = vector.shape_cast %1338 : vector<2x8xf32> to vector<2x8x1xf32>
    %cst_349 = arith.constant 3.200000e+01 : f32
    %1340 = vector.broadcast %cst_349 : f32 to vector<2x8x1xf32>
    %1341 = arith.divf %1339, %1340 : vector<2x8x1xf32>
    %1342 = vector.broadcast %1334 : vector<2x8x1xf32> to vector<2x8x32xf32>
    %1343 = arith.subf %1330, %1342 : vector<2x8x32xf32>
    %cst_350 = arith.constant 9.99999974E-6 : f32
    %1344 = vector.broadcast %cst_350 : f32 to vector<2x8x1xf32>
    %1345 = arith.addf %1341, %1344 : vector<2x8x1xf32>
    %1346 = math.rsqrt %1345 : vector<2x8x1xf32>
    %1347 = vector.broadcast %1346 : vector<2x8x1xf32> to vector<2x8x32xf32>
    %1348 = arith.mulf %1343, %1347 : vector<2x8x32xf32>
    %1349 = vector.shape_cast %60 : vector<1x32xf32> to vector<1x1x32xf32>
    %1350 = vector.broadcast %1349 : vector<1x1x32xf32> to vector<2x8x32xf32>
    %1351 = arith.mulf %1348, %1350 : vector<2x8x32xf32>
    %1352 = vector.shape_cast %61 : vector<1x32xf32> to vector<1x1x32xf32>
    %1353 = vector.broadcast %1352 : vector<1x1x32xf32> to vector<2x8x32xf32>
    %1354 = arith.addf %1351, %1353 : vector<2x8x32xf32>
    %1355 = vector.extract_strided_slice %1354 {offsets = [0, 4, 0], sizes = [2, 1, 32], strides = [1, 1, 1]} : vector<2x8x32xf32> to vector<2x1x32xf32>
    %1356 = vector.shape_cast %1355 : vector<2x1x32xf32> to vector<2x32xf32>
    %cst_351 = arith.constant dense<0.000000e+00> : vector<2x16xf32>
    %1357 = tpu.matmul %1356, %5, %cst_351 {dimension_numbers = #tpu.dot_dimension_numbers<[1], [0], [0], [1], [0, 0, 1, 1], [], []>} : vector<2x32xf32>, vector<32x16xf32>, vector<2x16xf32> -> vector<2x16xf32>
    %1358 = vector.broadcast %6 : vector<1x16xf32> to vector<2x16xf32>
    %1359 = arith.addf %1357, %1358 : vector<2x16xf32>
    %c4_i32_352 = arith.constant 4 : i32
    %1360 = vector.broadcast %c4_i32_352 : i32 to vector<6x2x16xi32>
    %1361 = arith.cmpi eq, %85, %1360 : vector<6x2x16xi32>
    %1362 = vector.shape_cast %1359 : vector<2x16xf32> to vector<1x2x16xf32>
    %1363 = vector.shape_cast %1362 : vector<1x2x16xf32> to vector<1x2x16xf32>
    %1364 = vector.broadcast %1363 : vector<1x2x16xf32> to vector<6x2x16xf32>
    %1365 = arith.select %1361, %1364, %1106 : vector<6x2x16xi1>, vector<6x2x16xf32>
    %cst_353 = arith.constant dense<0xFF800000> : vector<2xf32>
    %1366 = vector.multi_reduction <maximumf>, %1359, %cst_353 [1] : vector<2x16xf32> to vector<2xf32>
    %1367 = vector.shape_cast %1366 : vector<2xf32> to vector<2x1xf32>
    %1368 = vector.broadcast %1367 : vector<2x1xf32> to vector<2x16xf32>
    %1369 = arith.subf %1359, %1368 : vector<2x16xf32>
    %1370 = math.exp %1369 : vector<2x16xf32>
    %cst_354 = arith.constant dense<0.000000e+00> : vector<2xf32>
    %1371 = vector.multi_reduction <add>, %1370, %cst_354 [1] : vector<2x16xf32> to vector<2xf32>
    %1372 = vector.shape_cast %1371 : vector<2xf32> to vector<2x1xf32>
    %1373 = tpu.reciprocal %1372 {approx = true} : vector<2x1xf32> -> vector<2x1xf32>
    %1374 = vector.broadcast %1373 : vector<2x1xf32> to vector<2x16xf32>
    %1375 = arith.mulf %1370, %1374 : vector<2x16xf32>
    %c5_i32 = arith.constant 5 : i32
    %1376 = vector.broadcast %c5_i32 : i32 to vector<2x8x16xi32>
    %1377 = arith.cmpi eq, %75, %1376 : vector<2x8x16xi32>
    %1378 = vector.shape_cast %1375 : vector<2x16xf32> to vector<2x1x16xf32>
    %1379 = vector.shape_cast %1378 : vector<2x1x16xf32> to vector<2x1x16xf32>
    %1380 = vector.broadcast %1379 : vector<2x1x16xf32> to vector<2x8x16xf32>
    %1381 = arith.select %1377, %1380, %1122 : vector<2x8x16xi1>, vector<2x8x16xf32>
    "tpu.trace_start"() <{level = 10 : i32, message = "bsv,vh->bsh"}> : () -> ()
    %cst_355 = arith.constant dense<0.000000e+00> : vector<2x8x32xf32>
    %1382 = tpu.matmul %1381, %1, %cst_355 {dimension_numbers = #tpu.dot_dimension_numbers<[2], [0], [0, 1], [1], [0, 0, 0, 1, 1, 1], [], []>} : vector<2x8x16xf32>, vector<16x32xf32>, vector<2x8x32xf32> -> vector<2x8x32xf32>
    "tpu.trace_stop"() : () -> ()
    %1383 = vector.shape_cast %3 : vector<8x32xf32> to vector<1x8x32xf32>
    %1384 = vector.broadcast %1383 : vector<1x8x32xf32> to vector<2x8x32xf32>
    %1385 = arith.addf %1382, %1384 : vector<2x8x32xf32>
    "tpu.trace_start"() <{level = 10 : i32, message = "bsh,hk->bsk"}> : () -> ()
    %cst_356 = arith.constant dense<0.000000e+00> : vector<2x8x128xf32>
    %1386 = tpu.matmul %1385, %9, %cst_356 {dimension_numbers = #tpu.dot_dimension_numbers<[2], [0], [0, 1], [1], [0, 0, 0, 1, 1, 1], [], []>} : vector<2x8x32xf32>, vector<32x128xf32>, vector<2x8x128xf32> -> vector<2x8x128xf32>
    "tpu.trace_stop"() : () -> ()
    %1387 = vector.shape_cast %20 : vector<1x128xf32> to vector<1x1x128xf32>
    %1388 = vector.broadcast %1387 : vector<1x1x128xf32> to vector<2x8x128xf32>
    %1389 = arith.addf %1386, %1388 : vector<2x8x128xf32>
    %1390 = vector.extract_strided_slice %1389 {offsets = [0, 0, 0], sizes = [2, 8, 32], strides = [1, 1, 1]} : vector<2x8x128xf32> to vector<2x8x32xf32>
    %1391 = vector.extract_strided_slice %1389 {offsets = [0, 0, 32], sizes = [2, 8, 32], strides = [1, 1, 1]} : vector<2x8x128xf32> to vector<2x8x32xf32>
    %1392 = vector.extract_strided_slice %1389 {offsets = [0, 0, 64], sizes = [2, 8, 32], strides = [1, 1, 1]} : vector<2x8x128xf32> to vector<2x8x32xf32>
    "tpu.trace_start"() <{level = 10 : i32, message = "bsh,bth->bst"}> : () -> ()
    %cst_357 = arith.constant dense<0.000000e+00> : vector<2x8x8xf32>
    %1393 = tpu.matmul %1390, %1391, %cst_357 {dimension_numbers = #tpu.dot_dimension_numbers<[2], [2], [1], [1], [0, 0, 0, 1, 1, 1], [0], [0]>} : vector<2x8x32xf32>, vector<2x8x32xf32>, vector<2x8x8xf32> -> vector<2x8x8xf32>
    "tpu.trace_stop"() : () -> ()
    %cst_358 = arith.constant 0.176776692 : f32
    %1394 = vector.broadcast %cst_358 : f32 to vector<2x8x8xf32>
    %1395 = arith.mulf %1393, %1394 : vector<2x8x8xf32>
    %1396 = vector.broadcast %74 : vector<1x8x8xf32> to vector<2x8x8xf32>
    %1397 = arith.addf %1395, %1396 : vector<2x8x8xf32>
    %cst_359 = arith.constant dense<0xFF800000> : vector<2x8xf32>
    %1398 = vector.multi_reduction <maximumf>, %1397, %cst_359 [2] : vector<2x8x8xf32> to vector<2x8xf32>
    %1399 = vector.shape_cast %1398 : vector<2x8xf32> to vector<2x8x1xf32>
    %1400 = vector.broadcast %1399 : vector<2x8x1xf32> to vector<2x8x8xf32>
    %1401 = arith.subf %1397, %1400 : vector<2x8x8xf32>
    %1402 = math.exp %1401 : vector<2x8x8xf32>
    %cst_360 = arith.constant dense<0.000000e+00> : vector<2x8xf32>
    %1403 = vector.multi_reduction <add>, %1402, %cst_360 [2] : vector<2x8x8xf32> to vector<2x8xf32>
    %1404 = vector.shape_cast %1403 : vector<2x8xf32> to vector<2x8x1xf32>
    %1405 = tpu.reciprocal %1404 {approx = true} : vector<2x8x1xf32> -> vector<2x8x1xf32>
    %1406 = vector.broadcast %1405 : vector<2x8x1xf32> to vector<2x8x8xf32>
    %1407 = arith.mulf %1402, %1406 : vector<2x8x8xf32>
    "tpu.trace_start"() <{level = 10 : i32, message = "bst,bth->bsh"}> : () -> ()
    %cst_361 = arith.constant dense<0.000000e+00> : vector<2x8x32xf32>
    %1408 = tpu.matmul %1407, %1392, %cst_361 {dimension_numbers = #tpu.dot_dimension_numbers<[2], [1], [1], [2], [0, 0, 0, 1, 1, 2], [0], [0]>} : vector<2x8x8xf32>, vector<2x8x32xf32>, vector<2x8x32xf32> -> vector<2x8x32xf32>
    "tpu.trace_stop"() : () -> ()
    "tpu.trace_start"() <{level = 10 : i32, message = "bsh,hk->bsk"}> : () -> ()
    %cst_362 = arith.constant dense<0.000000e+00> : vector<2x8x32xf32>
    %1409 = tpu.matmul %1408, %11, %cst_362 {dimension_numbers = #tpu.dot_dimension_numbers<[2], [0], [0, 1], [1], [0, 0, 0, 1, 1, 1], [], []>} : vector<2x8x32xf32>, vector<32x32xf32>, vector<2x8x32xf32> -> vector<2x8x32xf32>
    "tpu.trace_stop"() : () -> ()
    %1410 = vector.shape_cast %21 : vector<1x32xf32> to vector<1x1x32xf32>
    %1411 = vector.broadcast %1410 : vector<1x1x32xf32> to vector<2x8x32xf32>
    %1412 = arith.addf %1409, %1411 : vector<2x8x32xf32>
    %1413 = arith.addf %1385, %1412 : vector<2x8x32xf32>
    %cst_363 = arith.constant dense<0.000000e+00> : vector<2x8xf32>
    %1414 = vector.multi_reduction <add>, %1413, %cst_363 [2] : vector<2x8x32xf32> to vector<2x8xf32>
    %1415 = vector.shape_cast %1414 : vector<2x8xf32> to vector<2x8x1xf32>
    %cst_364 = arith.constant 3.200000e+01 : f32
    %1416 = vector.broadcast %cst_364 : f32 to vector<2x8x1xf32>
    %1417 = arith.divf %1415, %1416 : vector<2x8x1xf32>
    %1418 = vector.broadcast %1417 : vector<2x8x1xf32> to vector<2x8x32xf32>
    %1419 = arith.subf %1413, %1418 : vector<2x8x32xf32>
    %1420 = arith.mulf %1419, %1419 : vector<2x8x32xf32>
    %cst_365 = arith.constant dense<0.000000e+00> : vector<2x8xf32>
    %1421 = vector.multi_reduction <add>, %1420, %cst_365 [2] : vector<2x8x32xf32> to vector<2x8xf32>
    %1422 = vector.shape_cast %1421 : vector<2x8xf32> to vector<2x8x1xf32>
    %cst_366 = arith.constant 3.200000e+01 : f32
    %1423 = vector.broadcast %cst_366 : f32 to vector<2x8x1xf32>
    %1424 = arith.divf %1422, %1423 : vector<2x8x1xf32>
    %1425 = vector.broadcast %1417 : vector<2x8x1xf32> to vector<2x8x32xf32>
    %1426 = arith.subf %1413, %1425 : vector<2x8x32xf32>
    %cst_367 = arith.constant 9.99999974E-6 : f32
    %1427 = vector.broadcast %cst_367 : f32 to vector<2x8x1xf32>
    %1428 = arith.addf %1424, %1427 : vector<2x8x1xf32>
    %1429 = math.rsqrt %1428 : vector<2x8x1xf32>
    %1430 = vector.broadcast %1429 : vector<2x8x1xf32> to vector<2x8x32xf32>
    %1431 = arith.mulf %1426, %1430 : vector<2x8x32xf32>
    %1432 = vector.shape_cast %26 : vector<1x32xf32> to vector<1x1x32xf32>
    %1433 = vector.broadcast %1432 : vector<1x1x32xf32> to vector<2x8x32xf32>
    %1434 = arith.mulf %1431, %1433 : vector<2x8x32xf32>
    %1435 = vector.shape_cast %27 : vector<1x32xf32> to vector<1x1x32xf32>
    %1436 = vector.broadcast %1435 : vector<1x1x32xf32> to vector<2x8x32xf32>
    %1437 = arith.addf %1434, %1436 : vector<2x8x32xf32>
    %1438 = vector.shape_cast %37 : vector<2x32xf32> to vector<2x1x32xf32>
    %1439 = vector.broadcast %1438 : vector<2x1x32xf32> to vector<2x8x32xf32>
    %1440 = arith.addf %1437, %1439 : vector<2x8x32xf32>
    %cst_368 = arith.constant dense<0.000000e+00> : vector<2x8xf32>
    %1441 = vector.multi_reduction <add>, %1440, %cst_368 [2] : vector<2x8x32xf32> to vector<2x8xf32>
    %1442 = vector.shape_cast %1441 : vector<2x8xf32> to vector<2x8x1xf32>
    %cst_369 = arith.constant 3.200000e+01 : f32
    %1443 = vector.broadcast %cst_369 : f32 to vector<2x8x1xf32>
    %1444 = arith.divf %1442, %1443 : vector<2x8x1xf32>
    %1445 = vector.broadcast %1444 : vector<2x8x1xf32> to vector<2x8x32xf32>
    %1446 = arith.subf %1440, %1445 : vector<2x8x32xf32>
    %1447 = arith.mulf %1446, %1446 : vector<2x8x32xf32>
    %cst_370 = arith.constant dense<0.000000e+00> : vector<2x8xf32>
    %1448 = vector.multi_reduction <add>, %1447, %cst_370 [2] : vector<2x8x32xf32> to vector<2x8xf32>
    %1449 = vector.shape_cast %1448 : vector<2x8xf32> to vector<2x8x1xf32>
    %cst_371 = arith.constant 3.200000e+01 : f32
    %1450 = vector.broadcast %cst_371 : f32 to vector<2x8x1xf32>
    %1451 = arith.divf %1449, %1450 : vector<2x8x1xf32>
    %1452 = vector.broadcast %1444 : vector<2x8x1xf32> to vector<2x8x32xf32>
    %1453 = arith.subf %1440, %1452 : vector<2x8x32xf32>
    %cst_372 = arith.constant 9.99999974E-6 : f32
    %1454 = vector.broadcast %cst_372 : f32 to vector<2x8x1xf32>
    %1455 = arith.addf %1451, %1454 : vector<2x8x1xf32>
    %1456 = math.rsqrt %1455 : vector<2x8x1xf32>
    %1457 = vector.broadcast %1456 : vector<2x8x1xf32> to vector<2x8x32xf32>
    %1458 = arith.mulf %1453, %1457 : vector<2x8x32xf32>
    %1459 = vector.shape_cast %28 : vector<1x32xf32> to vector<1x1x32xf32>
    %1460 = vector.broadcast %1459 : vector<1x1x32xf32> to vector<2x8x32xf32>
    %1461 = arith.mulf %1458, %1460 : vector<2x8x32xf32>
    %1462 = vector.shape_cast %29 : vector<1x32xf32> to vector<1x1x32xf32>
    %1463 = vector.broadcast %1462 : vector<1x1x32xf32> to vector<2x8x32xf32>
    %1464 = arith.addf %1461, %1463 : vector<2x8x32xf32>
    "tpu.trace_start"() <{level = 10 : i32, message = "bsh,hf->bsf"}> : () -> ()
    %cst_373 = arith.constant dense<0.000000e+00> : vector<2x8x128xf32>
    %1465 = tpu.matmul %1464, %17, %cst_373 {dimension_numbers = #tpu.dot_dimension_numbers<[2], [0], [0, 1], [1], [0, 0, 0, 1, 1, 1], [], []>} : vector<2x8x32xf32>, vector<32x128xf32>, vector<2x8x128xf32> -> vector<2x8x128xf32>
    "tpu.trace_stop"() : () -> ()
    %1466 = vector.shape_cast %24 : vector<1x128xf32> to vector<1x1x128xf32>
    %1467 = vector.broadcast %1466 : vector<1x1x128xf32> to vector<2x8x128xf32>
    %1468 = arith.addf %1465, %1467 : vector<2x8x128xf32>
    %cst_374 = arith.constant 0.000000e+00 : f32
    %1469 = vector.broadcast %cst_374 : f32 to vector<2x8x128xf32>
    %1470 = arith.maximumf %1468, %1469 : vector<2x8x128xf32>
    "tpu.trace_start"() <{level = 10 : i32, message = "bsf,fh->bsh"}> : () -> ()
    %cst_375 = arith.constant dense<0.000000e+00> : vector<2x8x32xf32>
    %1471 = tpu.matmul %1470, %19, %cst_375 {dimension_numbers = #tpu.dot_dimension_numbers<[2], [0], [0, 1], [1], [0, 0, 0, 1, 1, 1], [], []>} : vector<2x8x128xf32>, vector<128x32xf32>, vector<2x8x32xf32> -> vector<2x8x32xf32>
    "tpu.trace_stop"() : () -> ()
    %1472 = vector.shape_cast %25 : vector<1x32xf32> to vector<1x1x32xf32>
    %1473 = vector.broadcast %1472 : vector<1x1x32xf32> to vector<2x8x32xf32>
    %1474 = arith.addf %1471, %1473 : vector<2x8x32xf32>
    %1475 = arith.addf %1464, %1474 : vector<2x8x32xf32>
    %cst_376 = arith.constant dense<0.000000e+00> : vector<2x8xf32>
    %1476 = vector.multi_reduction <add>, %1475, %cst_376 [2] : vector<2x8x32xf32> to vector<2x8xf32>
    %1477 = vector.shape_cast %1476 : vector<2x8xf32> to vector<2x8x1xf32>
    %cst_377 = arith.constant 3.200000e+01 : f32
    %1478 = vector.broadcast %cst_377 : f32 to vector<2x8x1xf32>
    %1479 = arith.divf %1477, %1478 : vector<2x8x1xf32>
    %1480 = vector.broadcast %1479 : vector<2x8x1xf32> to vector<2x8x32xf32>
    %1481 = arith.subf %1475, %1480 : vector<2x8x32xf32>
    %1482 = arith.mulf %1481, %1481 : vector<2x8x32xf32>
    %cst_378 = arith.constant dense<0.000000e+00> : vector<2x8xf32>
    %1483 = vector.multi_reduction <add>, %1482, %cst_378 [2] : vector<2x8x32xf32> to vector<2x8xf32>
    %1484 = vector.shape_cast %1483 : vector<2x8xf32> to vector<2x8x1xf32>
    %cst_379 = arith.constant 3.200000e+01 : f32
    %1485 = vector.broadcast %cst_379 : f32 to vector<2x8x1xf32>
    %1486 = arith.divf %1484, %1485 : vector<2x8x1xf32>
    %1487 = vector.broadcast %1479 : vector<2x8x1xf32> to vector<2x8x32xf32>
    %1488 = arith.subf %1475, %1487 : vector<2x8x32xf32>
    %cst_380 = arith.constant 9.99999974E-6 : f32
    %1489 = vector.broadcast %cst_380 : f32 to vector<2x8x1xf32>
    %1490 = arith.addf %1486, %1489 : vector<2x8x1xf32>
    %1491 = math.rsqrt %1490 : vector<2x8x1xf32>
    %1492 = vector.broadcast %1491 : vector<2x8x1xf32> to vector<2x8x32xf32>
    %1493 = arith.mulf %1488, %1492 : vector<2x8x32xf32>
    %1494 = vector.shape_cast %30 : vector<1x32xf32> to vector<1x1x32xf32>
    %1495 = vector.broadcast %1494 : vector<1x1x32xf32> to vector<2x8x32xf32>
    %1496 = arith.mulf %1493, %1495 : vector<2x8x32xf32>
    %1497 = vector.shape_cast %31 : vector<1x32xf32> to vector<1x1x32xf32>
    %1498 = vector.broadcast %1497 : vector<1x1x32xf32> to vector<2x8x32xf32>
    %1499 = arith.addf %1496, %1498 : vector<2x8x32xf32>
    "tpu.trace_start"() <{level = 10 : i32, message = "bsh,hk->bsk"}> : () -> ()
    %cst_381 = arith.constant dense<0.000000e+00> : vector<2x8x128xf32>
    %1500 = tpu.matmul %1499, %39, %cst_381 {dimension_numbers = #tpu.dot_dimension_numbers<[2], [0], [0, 1], [1], [0, 0, 0, 1, 1, 1], [], []>} : vector<2x8x32xf32>, vector<32x128xf32>, vector<2x8x128xf32> -> vector<2x8x128xf32>
    "tpu.trace_stop"() : () -> ()
    %1501 = vector.shape_cast %50 : vector<1x128xf32> to vector<1x1x128xf32>
    %1502 = vector.broadcast %1501 : vector<1x1x128xf32> to vector<2x8x128xf32>
    %1503 = arith.addf %1500, %1502 : vector<2x8x128xf32>
    %1504 = vector.extract_strided_slice %1503 {offsets = [0, 0, 0], sizes = [2, 8, 32], strides = [1, 1, 1]} : vector<2x8x128xf32> to vector<2x8x32xf32>
    %1505 = vector.extract_strided_slice %1503 {offsets = [0, 0, 32], sizes = [2, 8, 32], strides = [1, 1, 1]} : vector<2x8x128xf32> to vector<2x8x32xf32>
    %1506 = vector.extract_strided_slice %1503 {offsets = [0, 0, 64], sizes = [2, 8, 32], strides = [1, 1, 1]} : vector<2x8x128xf32> to vector<2x8x32xf32>
    "tpu.trace_start"() <{level = 10 : i32, message = "bsh,bth->bst"}> : () -> ()
    %cst_382 = arith.constant dense<0.000000e+00> : vector<2x8x8xf32>
    %1507 = tpu.matmul %1504, %1505, %cst_382 {dimension_numbers = #tpu.dot_dimension_numbers<[2], [2], [1], [1], [0, 0, 0, 1, 1, 1], [0], [0]>} : vector<2x8x32xf32>, vector<2x8x32xf32>, vector<2x8x8xf32> -> vector<2x8x8xf32>
    "tpu.trace_stop"() : () -> ()
    %cst_383 = arith.constant 0.176776692 : f32
    %1508 = vector.broadcast %cst_383 : f32 to vector<2x8x8xf32>
    %1509 = arith.mulf %1507, %1508 : vector<2x8x8xf32>
    %1510 = vector.broadcast %74 : vector<1x8x8xf32> to vector<2x8x8xf32>
    %1511 = arith.addf %1509, %1510 : vector<2x8x8xf32>
    %cst_384 = arith.constant dense<0xFF800000> : vector<2x8xf32>
    %1512 = vector.multi_reduction <maximumf>, %1511, %cst_384 [2] : vector<2x8x8xf32> to vector<2x8xf32>
    %1513 = vector.shape_cast %1512 : vector<2x8xf32> to vector<2x8x1xf32>
    %1514 = vector.broadcast %1513 : vector<2x8x1xf32> to vector<2x8x8xf32>
    %1515 = arith.subf %1511, %1514 : vector<2x8x8xf32>
    %1516 = math.exp %1515 : vector<2x8x8xf32>
    %cst_385 = arith.constant dense<0.000000e+00> : vector<2x8xf32>
    %1517 = vector.multi_reduction <add>, %1516, %cst_385 [2] : vector<2x8x8xf32> to vector<2x8xf32>
    %1518 = vector.shape_cast %1517 : vector<2x8xf32> to vector<2x8x1xf32>
    %1519 = tpu.reciprocal %1518 {approx = true} : vector<2x8x1xf32> -> vector<2x8x1xf32>
    %1520 = vector.broadcast %1519 : vector<2x8x1xf32> to vector<2x8x8xf32>
    %1521 = arith.mulf %1516, %1520 : vector<2x8x8xf32>
    "tpu.trace_start"() <{level = 10 : i32, message = "bst,bth->bsh"}> : () -> ()
    %cst_386 = arith.constant dense<0.000000e+00> : vector<2x8x32xf32>
    %1522 = tpu.matmul %1521, %1506, %cst_386 {dimension_numbers = #tpu.dot_dimension_numbers<[2], [1], [1], [2], [0, 0, 0, 1, 1, 2], [0], [0]>} : vector<2x8x8xf32>, vector<2x8x32xf32>, vector<2x8x32xf32> -> vector<2x8x32xf32>
    "tpu.trace_stop"() : () -> ()
    "tpu.trace_start"() <{level = 10 : i32, message = "bsh,hk->bsk"}> : () -> ()
    %cst_387 = arith.constant dense<0.000000e+00> : vector<2x8x32xf32>
    %1523 = tpu.matmul %1522, %41, %cst_387 {dimension_numbers = #tpu.dot_dimension_numbers<[2], [0], [0, 1], [1], [0, 0, 0, 1, 1, 1], [], []>} : vector<2x8x32xf32>, vector<32x32xf32>, vector<2x8x32xf32> -> vector<2x8x32xf32>
    "tpu.trace_stop"() : () -> ()
    %1524 = vector.shape_cast %51 : vector<1x32xf32> to vector<1x1x32xf32>
    %1525 = vector.broadcast %1524 : vector<1x1x32xf32> to vector<2x8x32xf32>
    %1526 = arith.addf %1523, %1525 : vector<2x8x32xf32>
    %1527 = arith.addf %1499, %1526 : vector<2x8x32xf32>
    %cst_388 = arith.constant dense<0.000000e+00> : vector<2x8xf32>
    %1528 = vector.multi_reduction <add>, %1527, %cst_388 [2] : vector<2x8x32xf32> to vector<2x8xf32>
    %1529 = vector.shape_cast %1528 : vector<2x8xf32> to vector<2x8x1xf32>
    %cst_389 = arith.constant 3.200000e+01 : f32
    %1530 = vector.broadcast %cst_389 : f32 to vector<2x8x1xf32>
    %1531 = arith.divf %1529, %1530 : vector<2x8x1xf32>
    %1532 = vector.broadcast %1531 : vector<2x8x1xf32> to vector<2x8x32xf32>
    %1533 = arith.subf %1527, %1532 : vector<2x8x32xf32>
    %1534 = arith.mulf %1533, %1533 : vector<2x8x32xf32>
    %cst_390 = arith.constant dense<0.000000e+00> : vector<2x8xf32>
    %1535 = vector.multi_reduction <add>, %1534, %cst_390 [2] : vector<2x8x32xf32> to vector<2x8xf32>
    %1536 = vector.shape_cast %1535 : vector<2x8xf32> to vector<2x8x1xf32>
    %cst_391 = arith.constant 3.200000e+01 : f32
    %1537 = vector.broadcast %cst_391 : f32 to vector<2x8x1xf32>
    %1538 = arith.divf %1536, %1537 : vector<2x8x1xf32>
    %1539 = vector.broadcast %1531 : vector<2x8x1xf32> to vector<2x8x32xf32>
    %1540 = arith.subf %1527, %1539 : vector<2x8x32xf32>
    %cst_392 = arith.constant 9.99999974E-6 : f32
    %1541 = vector.broadcast %cst_392 : f32 to vector<2x8x1xf32>
    %1542 = arith.addf %1538, %1541 : vector<2x8x1xf32>
    %1543 = math.rsqrt %1542 : vector<2x8x1xf32>
    %1544 = vector.broadcast %1543 : vector<2x8x1xf32> to vector<2x8x32xf32>
    %1545 = arith.mulf %1540, %1544 : vector<2x8x32xf32>
    %1546 = vector.shape_cast %56 : vector<1x32xf32> to vector<1x1x32xf32>
    %1547 = vector.broadcast %1546 : vector<1x1x32xf32> to vector<2x8x32xf32>
    %1548 = arith.mulf %1545, %1547 : vector<2x8x32xf32>
    %1549 = vector.shape_cast %57 : vector<1x32xf32> to vector<1x1x32xf32>
    %1550 = vector.broadcast %1549 : vector<1x1x32xf32> to vector<2x8x32xf32>
    %1551 = arith.addf %1548, %1550 : vector<2x8x32xf32>
    %1552 = vector.shape_cast %67 : vector<2x32xf32> to vector<2x1x32xf32>
    %1553 = vector.broadcast %1552 : vector<2x1x32xf32> to vector<2x8x32xf32>
    %1554 = arith.addf %1551, %1553 : vector<2x8x32xf32>
    %cst_393 = arith.constant dense<0.000000e+00> : vector<2x8xf32>
    %1555 = vector.multi_reduction <add>, %1554, %cst_393 [2] : vector<2x8x32xf32> to vector<2x8xf32>
    %1556 = vector.shape_cast %1555 : vector<2x8xf32> to vector<2x8x1xf32>
    %cst_394 = arith.constant 3.200000e+01 : f32
    %1557 = vector.broadcast %cst_394 : f32 to vector<2x8x1xf32>
    %1558 = arith.divf %1556, %1557 : vector<2x8x1xf32>
    %1559 = vector.broadcast %1558 : vector<2x8x1xf32> to vector<2x8x32xf32>
    %1560 = arith.subf %1554, %1559 : vector<2x8x32xf32>
    %1561 = arith.mulf %1560, %1560 : vector<2x8x32xf32>
    %cst_395 = arith.constant dense<0.000000e+00> : vector<2x8xf32>
    %1562 = vector.multi_reduction <add>, %1561, %cst_395 [2] : vector<2x8x32xf32> to vector<2x8xf32>
    %1563 = vector.shape_cast %1562 : vector<2x8xf32> to vector<2x8x1xf32>
    %cst_396 = arith.constant 3.200000e+01 : f32
    %1564 = vector.broadcast %cst_396 : f32 to vector<2x8x1xf32>
    %1565 = arith.divf %1563, %1564 : vector<2x8x1xf32>
    %1566 = vector.broadcast %1558 : vector<2x8x1xf32> to vector<2x8x32xf32>
    %1567 = arith.subf %1554, %1566 : vector<2x8x32xf32>
    %cst_397 = arith.constant 9.99999974E-6 : f32
    %1568 = vector.broadcast %cst_397 : f32 to vector<2x8x1xf32>
    %1569 = arith.addf %1565, %1568 : vector<2x8x1xf32>
    %1570 = math.rsqrt %1569 : vector<2x8x1xf32>
    %1571 = vector.broadcast %1570 : vector<2x8x1xf32> to vector<2x8x32xf32>
    %1572 = arith.mulf %1567, %1571 : vector<2x8x32xf32>
    %1573 = vector.shape_cast %58 : vector<1x32xf32> to vector<1x1x32xf32>
    %1574 = vector.broadcast %1573 : vector<1x1x32xf32> to vector<2x8x32xf32>
    %1575 = arith.mulf %1572, %1574 : vector<2x8x32xf32>
    %1576 = vector.shape_cast %59 : vector<1x32xf32> to vector<1x1x32xf32>
    %1577 = vector.broadcast %1576 : vector<1x1x32xf32> to vector<2x8x32xf32>
    %1578 = arith.addf %1575, %1577 : vector<2x8x32xf32>
    "tpu.trace_start"() <{level = 10 : i32, message = "bsh,hf->bsf"}> : () -> ()
    %cst_398 = arith.constant dense<0.000000e+00> : vector<2x8x128xf32>
    %1579 = tpu.matmul %1578, %47, %cst_398 {dimension_numbers = #tpu.dot_dimension_numbers<[2], [0], [0, 1], [1], [0, 0, 0, 1, 1, 1], [], []>} : vector<2x8x32xf32>, vector<32x128xf32>, vector<2x8x128xf32> -> vector<2x8x128xf32>
    "tpu.trace_stop"() : () -> ()
    %1580 = vector.shape_cast %54 : vector<1x128xf32> to vector<1x1x128xf32>
    %1581 = vector.broadcast %1580 : vector<1x1x128xf32> to vector<2x8x128xf32>
    %1582 = arith.addf %1579, %1581 : vector<2x8x128xf32>
    %cst_399 = arith.constant 0.000000e+00 : f32
    %1583 = vector.broadcast %cst_399 : f32 to vector<2x8x128xf32>
    %1584 = arith.maximumf %1582, %1583 : vector<2x8x128xf32>
    "tpu.trace_start"() <{level = 10 : i32, message = "bsf,fh->bsh"}> : () -> ()
    %cst_400 = arith.constant dense<0.000000e+00> : vector<2x8x32xf32>
    %1585 = tpu.matmul %1584, %49, %cst_400 {dimension_numbers = #tpu.dot_dimension_numbers<[2], [0], [0, 1], [1], [0, 0, 0, 1, 1, 1], [], []>} : vector<2x8x128xf32>, vector<128x32xf32>, vector<2x8x32xf32> -> vector<2x8x32xf32>
    "tpu.trace_stop"() : () -> ()
    %1586 = vector.shape_cast %55 : vector<1x32xf32> to vector<1x1x32xf32>
    %1587 = vector.broadcast %1586 : vector<1x1x32xf32> to vector<2x8x32xf32>
    %1588 = arith.addf %1585, %1587 : vector<2x8x32xf32>
    %1589 = arith.addf %1578, %1588 : vector<2x8x32xf32>
    %cst_401 = arith.constant dense<0.000000e+00> : vector<2x8xf32>
    %1590 = vector.multi_reduction <add>, %1589, %cst_401 [2] : vector<2x8x32xf32> to vector<2x8xf32>
    %1591 = vector.shape_cast %1590 : vector<2x8xf32> to vector<2x8x1xf32>
    %cst_402 = arith.constant 3.200000e+01 : f32
    %1592 = vector.broadcast %cst_402 : f32 to vector<2x8x1xf32>
    %1593 = arith.divf %1591, %1592 : vector<2x8x1xf32>
    %1594 = vector.broadcast %1593 : vector<2x8x1xf32> to vector<2x8x32xf32>
    %1595 = arith.subf %1589, %1594 : vector<2x8x32xf32>
    %1596 = arith.mulf %1595, %1595 : vector<2x8x32xf32>
    %cst_403 = arith.constant dense<0.000000e+00> : vector<2x8xf32>
    %1597 = vector.multi_reduction <add>, %1596, %cst_403 [2] : vector<2x8x32xf32> to vector<2x8xf32>
    %1598 = vector.shape_cast %1597 : vector<2x8xf32> to vector<2x8x1xf32>
    %cst_404 = arith.constant 3.200000e+01 : f32
    %1599 = vector.broadcast %cst_404 : f32 to vector<2x8x1xf32>
    %1600 = arith.divf %1598, %1599 : vector<2x8x1xf32>
    %1601 = vector.broadcast %1593 : vector<2x8x1xf32> to vector<2x8x32xf32>
    %1602 = arith.subf %1589, %1601 : vector<2x8x32xf32>
    %cst_405 = arith.constant 9.99999974E-6 : f32
    %1603 = vector.broadcast %cst_405 : f32 to vector<2x8x1xf32>
    %1604 = arith.addf %1600, %1603 : vector<2x8x1xf32>
    %1605 = math.rsqrt %1604 : vector<2x8x1xf32>
    %1606 = vector.broadcast %1605 : vector<2x8x1xf32> to vector<2x8x32xf32>
    %1607 = arith.mulf %1602, %1606 : vector<2x8x32xf32>
    %1608 = vector.shape_cast %60 : vector<1x32xf32> to vector<1x1x32xf32>
    %1609 = vector.broadcast %1608 : vector<1x1x32xf32> to vector<2x8x32xf32>
    %1610 = arith.mulf %1607, %1609 : vector<2x8x32xf32>
    %1611 = vector.shape_cast %61 : vector<1x32xf32> to vector<1x1x32xf32>
    %1612 = vector.broadcast %1611 : vector<1x1x32xf32> to vector<2x8x32xf32>
    %1613 = arith.addf %1610, %1612 : vector<2x8x32xf32>
    %1614 = vector.extract_strided_slice %1613 {offsets = [0, 5, 0], sizes = [2, 1, 32], strides = [1, 1, 1]} : vector<2x8x32xf32> to vector<2x1x32xf32>
    %1615 = vector.shape_cast %1614 : vector<2x1x32xf32> to vector<2x32xf32>
    %cst_406 = arith.constant dense<0.000000e+00> : vector<2x16xf32>
    %1616 = tpu.matmul %1615, %5, %cst_406 {dimension_numbers = #tpu.dot_dimension_numbers<[1], [0], [0], [1], [0, 0, 1, 1], [], []>} : vector<2x32xf32>, vector<32x16xf32>, vector<2x16xf32> -> vector<2x16xf32>
    %1617 = vector.broadcast %6 : vector<1x16xf32> to vector<2x16xf32>
    %1618 = arith.addf %1616, %1617 : vector<2x16xf32>
    %c5_i32_407 = arith.constant 5 : i32
    %1619 = vector.broadcast %c5_i32_407 : i32 to vector<6x2x16xi32>
    %1620 = arith.cmpi eq, %85, %1619 : vector<6x2x16xi32>
    %1621 = vector.shape_cast %1618 : vector<2x16xf32> to vector<1x2x16xf32>
    %1622 = vector.shape_cast %1621 : vector<1x2x16xf32> to vector<1x2x16xf32>
    %1623 = vector.broadcast %1622 : vector<1x2x16xf32> to vector<6x2x16xf32>
    %1624 = arith.select %1620, %1623, %1365 : vector<6x2x16xi1>, vector<6x2x16xf32>
    %c0_408 = arith.constant 0 : index
    %c0_409 = arith.constant 0 : index
    %c0_410 = arith.constant 0 : index
    %1625 = vector.load %arg4[%c0_408, %c0_409, %c0_410] : memref<6x2x16xf32, #tpu.memory_space<vmem>>, vector<6x2x16xf32>
    tpu.vector_store %arg4[%c0_408, %c0_409, %c0_410], %1624 {strides = array<i32>} : memref<6x2x16xf32, #tpu.memory_space<vmem>>, vector<6x2x16xf32>,
    return
  }
}

</mosaic_0001>

<bundles_post_ra>
// kernel: tpu_custom_call.1
= control target key start
LH: loop header
LB: loop body
LE: loop exit
PB: predicated region body
PF: predicated region fallthrough
CT: control target
= control target key end

     0   :  { %9 = vsyncpa [#allocation3], 0  ;;  %s15988_s0 = inlined_call_operand.vmem [shape: f32[2,32], index: 0, kind: input, shape index: {}]   ;;  %s15989_s1 = inlined_call_operand.hbm [shape: f32[13,32,128], index: 1, kind: input, shape index: {}]   ;;  %s15990_s2 = inlined_call_operand.vmem [shape: f32[2,128,32], index: 2, kind: input, shape index: {}]   ;;  %s15991_s3 = inlined_call_operand.vmem [shape: f32[25,128], index: 3, kind: input, shape index: {}]   ;;  %s15992_s4 = inlined_call_operand.hbm [shape: f32[6,2,16], index: 4, kind: output, shape index: {}]  }
   0x1   :  { %10 = vsyncpa [#allocation4], 0  ;;  %s13977_s15 = smov [#allocation2]   ;;  %s13929_s19 = scalar_lea.hbm %s15989_s1, 6656 }
   0x2   :  { %s18_s16 = sshll.u32 %s13977_s15, 4  ;;  %p13930_p0 = scmp.ne.s32.totalorder %s15989_s1, %s13929_s19  ;;  %s19_s16 = int_to_ptr.vmem [resolvable:$true] %s18_s16 }
   0x3   :  { %p13933_p1 = scmp.lt.u32.totalorder %s13929_s19, %s15989_s1 }
   0x5   :  { %p13935_p2 = pnand %p13933_p1, %p13930_p0 }
   0x7   :  { %13938 = shalt.err (!%p13935_p2)
}
   0x8   :  { %s13939_s24 = scalar_lea.vmem %s19_s16, 6656  ;;  %p13944_p4 = scmp.lt.s32.totalorder %s19_s16, %s19_s16 }
   0x9   :  { %p13940_p3 = scmp.ne.s32.totalorder %s19_s16, %s13939_s24  ;;  %p13945_p5 = scmp.lt.s32.totalorder %s13939_s24, %s13939_s24 }
   0xb   :  { %p13946_p6 = por %p13945_p5, %p13944_p4 }
   0xd   :  { %p13947_p7 = pnand %p13946_p6, %p13940_p3 }
   0xf   :  { %13950 = shalt.err (!%p13947_p7)
}
  0x10   :  { %s13978_s25 = smov 128   ;;  %s13979_s26 = smov 8  }
  0x11   :  { %24 = dma.hbm_to_vmem [thread:$0]  %s15989_s1, 6656, %s19_s16, [#allocation3], %s13978_s25, %s13978_s25, %s13979_s26  }
  0x12   :  { %13973 = dma.done.wait [#allocation3], 6656  }
  0x13   :  { %13974 = vsyncadd [#allocation3], 4294960640  ;;  %v15993_v0 = vmov 0.0|0.0   ;;  %vm13981_vm0 = vmmov 0   ;;  %v16002_v1 = vmov 0.0   ;;  %v54_v2 = vld [vmem:[#allocation2 + $0xa0] sm:$0xff]  ;;  %v456_v15 = vlaneseq }
  0x14   :  { %12841 = vmatprep.subr.bf16.mxu0 %v15993_v0  ;;  %11641 = vmatprep.mubr.msk.f32.mxu0 %vm13981_vm0, %v16002_v1  ;;  %v55_v3 = vld [vmem:[#allocation2 + $0xa8] sm:$0xff]  ;;  %v56_v4 = vld [vmem:[#allocation2 + $0xb0] sm:$0xff]  ;;  %v57_v6 = vld [vmem:[#allocation2 + $0xb8] sm:$0xff]  ;;  %vm100_vm1 = vcmask 261120   ;;  %vm466_vm5 = vcmask 130048   ;;  %s13983_s9 = smov 96  }
  0x15   :  { %12859 = vmatprep.subr.bf16.mxu1 %v15993_v0  ;;  %11674 = vmatprep.mubr.msk.f32.mxu1 %vm13981_vm0, %v16002_v1  ;;  %v12842_v5 = vpack.c.bf16 %v55_v3, %v54_v2  ;;  %v12845_v7 = vpack.c.bf16 %v57_v6, %v56_v4  ;;  %v59_v8 = vld [vmem:[#allocation2 + $0xc0] sm:$0xff]  ;;  %v60_v9 = vld [vmem:[#allocation2 + $0xc8] sm:$0xff]  ;;  %v61_v12 = vld [vmem:[#allocation2 + $0xd0] sm:$0xff]  ;;  %v14046_v19 = vshrl.u32 %v456_v15, 7  ;;  %v14048_v20 = vand.u32 127, %v456_v15  ;;  %s13985_s10 = smov 64  }
  0x16   :  { %v42_v10 = vld [vmem:[%s15988_s0] sm:$0x3]  ;;  %v12848_v11 = vpack.c.bf16 %v60_v9, %v59_v8  ;;  %v62_v13 = vld [vmem:[#allocation2 + $0xd8] sm:$0xff]  ;;  %v263_v17 = vld [vmem:[#allocation2 + $0x148] sm:$0xff]  ;;  %v13984_v2 = vmov -1e+30  }
  0x17   :  { %12843 = vmatpush3.bf16.msra.mxu0 %v12842_v5  ;;  %v12851_v14 = vpack.c.bf16 %v62_v13, %v61_v12  ;;  %v262_v16 = vld [vmem:[#allocation2 + $0x140] sm:$0xff]  ;;  %v264_v25 = vld [vmem:[#allocation2 + $0x150] sm:$0xff]  ;;  %v265_v26 = vld [vmem:[#allocation2 + $0x158] sm:$0xff]  ;;  %vm462_vm2 = vcmp.eq.s32.totalorder %v14046_v19, 0  ;;  %vm463_vm3 = vcmp.eq.s32.totalorder %v14048_v20, 15  ;;  %vm460_vm6 = vcmp.le.s32.totalorder %v14048_v20, %v14046_v19 }
  0x18   :  { %12844 = vmatprep.subr.bf16.mxu0 %v15993_v0  ;;  %v10824_v18 = vld [vmem:[%s15991_s3 + $0x3] ss:$0 sm:$0xff]  ;;  %v12854_v22 = vpack.c.bf16 %v263_v17, %v262_v16  ;;  %v33_v28 = vld [vmem:[#allocation2 + $0x8] sm:$0xff]  ;;  %v12857_v29 = vpack.c.bf16 %v265_v26, %v264_v25  ;;  %vm464_vm4 = vmand %vm462_vm2, %vm463_vm3  ;;  %v14116_v3 = vsel %vm460_vm6, 0.0, %v13984_v2  ;;  %vm788_vm7 = vcmask 64512  }
  0x19   :  { %v32_v27 = vld [vmem:[#allocation2] sm:$0xff]  ;;  %v14060_v31 = vsel %vm464_vm4, 1.0, %v16002_v1  ;;  %v268_v33 = vld [vmem:[#allocation2 + $0x168] sm:$0xff]  ;;  %v269_v35 = vld [vmem:[#allocation2 + $0x170] sm:$0xff]  ;;  %vm2196_vm8 = vcmask 1041409   ;;  %vm2272_vm9 = vcmask 123904  }
  0x1a   :  { %v14056_v30 = vpack.c.bf16 %v33_v28, %v32_v27  ;;  %v267_v32 = vld [vmem:[#allocation2 + $0x160] sm:$0xff]  ;;  %v270_v36 = vld [vmem:[#allocation2 + $0x178] sm:$0xff]  ;;  %v45_v39 = vld [vmem:[#allocation2 + $0x68] sm:$0xff]  ;;  %vm2284_vm10 = vcmp.eq.s32.totalorder %v14046_v19, 1  ;;  %vm3987_vm11 = vcmp.eq.s32.totalorder %v14046_v19, 2  ;;  %vm5692_vm12 = vcmp.eq.s32.totalorder %v14046_v19, 3 }
  0x1b   :  { %12846 = vmatpush3.bf16.msra.mxu0 %v12845_v7  ;;  %v12860_v34 = vpack.c.bf16 %v268_v33, %v267_v32  ;;  %v12863_v37 = vpack.c.bf16 %v270_v36, %v269_v35  ;;  %v44_v38 = vld [vmem:[#allocation2 + $0x60] sm:$0xff]  ;;  %v10844_v43 = vld [vmem:[%s15991_s3 + $0xf] ss:$0 sm:$0xff]  ;;  %v46_v44 = vld [vmem:[#allocation2 + $0x70] sm:$0xff]  ;;  %vm7398_vm13 = vcmp.eq.s32.totalorder %v14046_v19, 4  ;;  %vm9105_vm14 = vcmp.eq.s32.totalorder %v14046_v19, 5 }
  0x1c   :  { %12847 = vmatprep.subr.bf16.mxu0 %v15993_v0  ;;  %v14072_v40 = vpack.c.bf16 %v45_v39, %v44_v38  ;;  %v47_v45 = vld [vmem:[#allocation2 + $0x78] sm:$0xff]  ;;  %v35_v50 = vld [vmem:[#allocation2 + $0x20] sm:$0xff]  ;;  %v50_v27 = vld [vmem:[#allocation2 + $0x88] sm:$0xff] }
  0x1d   :  { %12861 = vmatpush3.bf16.msra.mxu1 %v12860_v34  ;;  %v14080_v49 = vpack.c.bf16 %v47_v45, %v46_v44  ;;  %v10850_v57 = vld [vmem:[%s15991_s3 + $0x1] ss:$0 sm:$0xff]  ;;  %v51_v38 = vld [vmem:[#allocation2 + $0x90] sm:$0xff]  ;;  %v52_v39 = vld [vmem:[#allocation2 + $0x98] sm:$0xff] }
  0x1e   :  { %11642 = vmatmul.mubr.msk.f32.vlgmr.msra.gmra.mrb[0].mxu0 %vm100_vm1, %v42_v10  ;;  %12862 = vmatprep.subr.bf16.mxu1 %v15993_v0  ;;  %v49_v26 = vld [vmem:[#allocation2 + $0x80] sm:$0xff] }
  0x1f   :  { %12849 = vmatpush3.bf16.msra.mxu0 %v12848_v11  ;;  %11652 = vmatprep.mubr.msk.f32.mxu0 %vm13981_vm0, %v16002_v1  ;;  %16065 = vst [vmem:[#allocation8_spill] sm:$0xff] %v14080_v49  ;;  %v14126_v28 = vpack.c.bf16 %v50_v27, %v49_v26  ;;  %v10863_v27 = vld [vmem:[%s15991_s3 + $0x8] ss:$0 sm:$0xff] }
  0x20   :  { %12850 = vmatprep.subr.bf16.mxu0 %v15993_v0 }
  0x21   :  { %12864 = vmatpush3.bf16.msra.mxu1 %v12863_v37 }
  0x22   :  { %12870 = vmatprep.subr.bf16.mxu1 %v14072_v40 }
  0x23   :  { %12852 = vmatpush3.bf16.msra.mxu0 %v12851_v14 }
  0x24   :  { %12853 = vmatprep.subr.bf16.mxu0 %v15993_v0 }
  0xf1   :  { %v170_v21 = vpop.f32.mrb[0].mxu0 }
  0xf2   :  { %v171_v23 = vadd.f32 %v10824_v18, %v170_v21  ;;  %v11643_v24 = vpop.f32.mrb[1].mxu0 }
  0xf4   :  { %11653 = vmatmul.mubr.msk.f32.vlgmr.msra.gmra.mrb[2].mxu0 %vm100_vm1, %v171_v23 }
  0xf5   :  { %12855 = vmatpush3.bf16.msra.mxu0 %v12854_v22  ;;  %11663 = vmatprep.mubr.msk.f32.mxu0 %vm13981_vm0, %v16002_v1 }
  0xf6   :  { %12856 = vmatprep.subr.bf16.mxu0 %v15993_v0 }
  0xf9   :  { %12858 = vmatpush3.bf16.msra.mxu0 %v12857_v29 }
  0xfa   :  { %12866 = vmatprep.subr.bf16.mxu0 %v14056_v30 }
  0xfc   :  { %11664 = vmatmul.mubr.msk.f32.vlgmr.msra.gmra.mrb[4].mxu0 %vm100_vm1, %v42_v10 }
  0xfd   :  { %12868 = vmatpush3.bf16.msra.mxu0 %v14056_v30  ;;  %11681 = vmatprep.mubr.msk.f32.mxu0 %vm466_vm5, %v14060_v31 }
  0xfe   :  { %11695 = vmatprep.subr.mxu0 %v16002_v1 }
 0x100   :  { %11682 = vmatmul.mubr.msk.f32.vlgmr.msra.gmra.mrb[6].mxu0 %vm466_vm5, %v14060_v31 }
 0x101   :  { %11697 = vmatprep.mubr.msk.f32.mxu0 %vm13981_vm0, %v16002_v1 }
 0x1c7   :  { %v14075_v41 = vpop.f32.mrb[2].mxu0 }
 0x1c8   :  { %v11654_v42 = vpop.f32.mrb[3].mxu0 }
 0x1c9   :  { %v14132_v42 = vpack.c.bf16 %v52_v39, %v51_v38 }
 0x1cf   :  { %v375_v46 = vpop.f32.mrb[4].mxu0 }
 0x1d0   :  { %v376_v47 = vadd.f32 %v10844_v43, %v375_v46  ;;  %v11665_v48 = vpop.f32.mrb[5].mxu0 }
 0x1d2   :  { %11675 = vmatmul.mubr.msk.f32.vlgmr.msra.gmra.mrb[0].mxu1 %vm100_vm1, %v376_v47  ;;  %v10859_v47 = vld [vmem:[%s15991_s3 + $0x2] ss:$0 sm:$0xff] }
 0x1d3   :  { %12872 = vmatpush3.bf16.msra.mxu1 %v14072_v40  ;;  %v11683_v51 = vpop.f32.mrb[6].mxu0 }
 0x1d4   :  { %v536_v52 = vpop.f32.mrb[7].mxu0  ;;  %12874 = vmatprep.subr.bf16.mxu1 %v14080_v49  ;;  %v14090_v54 = vadd.f32 %v11683_v51, %v35_v50 }
 0x1d5   :  { %v14085_v53 = vadd.f32 %v536_v52, %v35_v50 }
 0x1d7   :  { %12876 = vmatpush3.bf16.msra.mxu1 %v14080_v49  ;;  %11692 = vmatprep.mubr.msk.f32.mxu1 %vm100_vm1, %v14085_v53 }
 0x1d8   :  { %11705 = vmatprep.subr.mxu1 %v16002_v1 }
 0x1da   :  { %11693 = vmatmul.mubr.msk.f32.vlgmr.msra.gmra.mrb[2].mxu1 %vm100_vm1, %v14090_v54 }
 0x1db   :  { %11707 = vmatprep.mubr.msk.f32.mxu1 %vm13981_vm0, %v16002_v1 }
 0x2a5   :  { %v14097_v55 = vpop.f32.mrb[0].mxu1 }
 0x2a6   :  { %v11676_v56 = vpop.f32.mrb[1].mxu1 }
 0x2ad   :  { %v11694_v58 = vpop.f32.mrb[2].mxu1 }
 0x2ae   :  { %v621_v59 = vpop.f32.mrb[3].mxu1  ;;  %v627_v61 = vadd.f32 %v11694_v58, %v10850_v57 }
 0x2af   :  { %v622_v60 = vadd.f32 %v10850_v57, %v621_v59 }
 0x2b1   :  { %631 = vrot.lane.b32.xlu0 %v622_v60, %s13983_s9 }
 0x2b5   :  { %708 = vrot.lane.b32.xlu0 %v627_v61, %s13983_s9 }
 0x323   :  { %v632_v62 = vpop.permute.xlu0 %631 }
 0x324   :  { %11696 = vmatpush3.xpose.msk.msra.mxu0 %vm100_vm1, %v632_v62 }
 0x325   :  { %11700 = vmatprep.subr.mxu0 %v16002_v1 }
 0x327   :  { %11698 = vmatmul.mubr.msk.f32.vlgmr.msra.gmra.mrb[8].mxu0 %vm100_vm1, %v622_v60  ;;  %v709_v63 = vpop.permute.xlu0 %708 }
 0x328   :  { %11701 = vmatpush3.xpose.msk.msra.mxu0 %vm100_vm1, %v709_v63  ;;  %11702 = vmatprep.mubr.msk.f32.mxu0 %vm13981_vm0, %v16002_v1 }
 0x329   :  { %11710 = vmatprep.subr.mxu0 %v16002_v1 }
 0x32b   :  { %11703 = vmatmul.mubr.msk.f32.vlgmr.msra.gmra.mrb[10].mxu0 %vm100_vm1, %v627_v61 }
 0x32c   :  { %11712 = vmatprep.mubr.msk.f32.mxu0 %vm13981_vm0, %v16002_v1 }
 0x3fa   :  { %v703_v4 = vpop.f32.mrb[8].mxu0 }
 0x3fb   :  { %v784_v5 = vmul.f32 0.17677669, %v703_v4  ;;  %v11699_v6 = vpop.f32.mrb[9].mxu0 }
 0x3fd   :  { %v786_v7 = vadd.f32 %v784_v5, %v14116_v3 }
 0x3fe   :  { %v780_v8 = vpop.f32.mrb[10].mxu0 }
 0x3ff   :  { %v785_v9 = vmul.f32 0.17677669, %v780_v8  ;;  %v11704_v10 = vpop.f32.mrb[11].mxu0  ;;  %v789_v11 = vsel %vm788_vm7, %v786_v7, -inf }
 0x400   :  { %790 = vmax.xlane.f32.xlu1 %v789_v11 }
 0x401   :  { %v787_v12 = vadd.f32 %v785_v9, %v14116_v3 }
 0x403   :  { %v792_v13 = vsel %vm788_vm7, %v787_v12, -inf }
 0x404   :  { %793 = vmax.xlane.f32.xlu1 %v792_v13 }
 0x415   :  { %811 = vrot.lane.b32.xlu1 %v622_v60, %s13985_s10 }
 0x48d   :  { %v791_v14 = vpop.xlane.xlu1 %790 }
 0x48e   :  { %v795_v15 = vsub.f32 %v786_v7, %v791_v14  ;;  %v10826_v14 = vld [vmem:[%s15991_s3 + $0x4] ss:$0 sm:$0xff] }
 0x490   :  { %v797_v16 = vmul.f32 1.442695, %v795_v15 }
 0x491   :  { %v794_v17 = vpop.xlane.xlu1 %793 }
 0x492   :  { %13610 = vpow2.f32 %v797_v16  ;;  %v796_v18 = vsub.f32 %v787_v12, %v794_v17 }
 0x494   :  { %v799_v20 = vmul.f32 1.442695, %v796_v18  ;;  %v248_v18 = vadd.f32 %v10826_v14, %v14075_v41 }
 0x495   :  { %v812_v21 = vpop.permute.xlu1 %811 }
 0x496   :  { %13612 = vpow2.f32 %v799_v20  ;;  %11706 = vmatpush3.msra.mxu1 %v812_v21 }
 0x497   :  { %12878 = vmatprep.subr.bf16.mxu1 %v14126_v28 }
 0x49c   :  { %v13611_v22 = vpop.eup %13610 }
 0x49d   :  { %v801_v23 = vsel %vm788_vm7, %v13611_v22, 0.0 }
 0x49e   :  { %802 = vadd.xlane.f32.xlu0 %v801_v23  ;;  %v14159_v23 = vsub.s32 0, %v14046_v19 }
 0x4a0   :  { %v13613_v24 = vpop.eup %13612 }
 0x4a1   :  { %v804_v25 = vsel %vm788_vm7, %v13613_v24, 0.0 }
 0x4a2   :  { %805 = vadd.xlane.f32.xlu1 %v804_v25 }
 0x4b3   :  { %887 = vrot.lane.b32.xlu1 %v627_v61, %s13985_s10 }
 0x52b   :  { %v803_v29 = vpop.xlane.xlu0 %802 }
 0x52c   :  { %13614 = vrcp.f32 %v803_v29 }
 0x52f   :  { %v806_v32 = vpop.xlane.xlu1 %805 }
 0x530   :  { %13616 = vrcp.f32 %v806_v32 }
 0x533   :  { %v888_v33 = vpop.permute.xlu1 %887 }
 0x534   :  { %11711 = vmatpush3.msra.mxu0 %v888_v33 }
 0x536   :  { %v13615_v34 = vpop.eup %13614 }
 0x537   :  { %v809_v35 = vmul.f32 %v13615_v34, %v13611_v22  ;;  %v10862_v22 = vld [vmem:[%s15991_s3 + $0x7] ss:$0 sm:$0xff] }
 0x539   :  { %11708 = vmatmul.mubr.msk.f32.vlgmr.msra.gmra.mrb[4].mxu1 %vm788_vm7, %v809_v35 }
 0x53a   :  { %v13617_v36 = vpop.eup %13616  ;;  %12880 = vmatpush3.bf16.msra.mxu1 %v14126_v28 }
 0x53b   :  { %v810_v37 = vmul.f32 %v13617_v36, %v13613_v24  ;;  %12882 = vmatprep.subr.bf16.mxu1 %v14132_v42 }
 0x53d   :  { %11713 = vmatmul.mubr.msk.f32.vlgmr.msra.gmra.mrb[12].mxu0 %vm788_vm7, %v810_v37 }
 0x53e   :  { %12884 = vmatpush3.bf16.msra.mxu1 %v14132_v42 }
 0x60c   :  { %v883_v43 = vpop.f32.mrb[4].mxu1 }
 0x60d   :  { %v11709_v44 = vpop.f32.mrb[5].mxu1  ;;  %11723 = vmatprep.mubr.msk.f32.mxu1 %vm100_vm1, %v883_v43 }
 0x610   :  { %v959_v45 = vpop.f32.mrb[12].mxu0 }
 0x611   :  { %v11714_v46 = vpop.f32.mrb[13].mxu0  ;;  %11724 = vmatmul.mubr.msk.f32.vlgmr.msra.gmra.mrb[6].mxu1 %vm100_vm1, %v959_v45 }
 0x6e4   :  { %v11725_v48 = vpop.f32.mrb[6].mxu1 }
 0x6e5   :  { %v1045_v50 = vadd.f32 %v11725_v48, %v10859_v47  ;;  %v1039_v51 = vpop.f32.mrb[7].mxu1 }
 0x6e6   :  { %v1040_v52 = vadd.f32 %v10859_v47, %v1039_v51 }
 0x6e7   :  { %v1049_v56 = vadd.f32 %v1045_v50, %v14090_v54 }
 0x6e8   :  { %v1048_v57 = vadd.f32 %v1040_v52, %v14085_v53  ;;  %v13986_v53 = vmov 1966171168  }
 0x6e9   :  { %v1053_v58 = vsel %vm100_vm1, %v1049_v56, 0.0  ;;  %v1091_v8 = vunpack.c.l.s4 %v13986_v53  ;;  %v71_v53 = vld [vmem:[%s15990_s2 + $0x18] sm:$0xff] }
 0x6ea   :  { %1054 = vadd.xlane.f32.xlu0 %v1053_v58  ;;  %v1050_v59 = vsel %vm100_vm1, %v1048_v57, 0.0 }
 0x6eb   :  { %1051 = vadd.xlane.f32.xlu1 %v1050_v59  ;;  %v1092_v12 = vunpack.c.0.s8 %v1091_v8 }
 0x6ed   :  { %v14151_v17 = vsub.s32 %v1092_v12, %v14046_v19  ;;  %v74_v12 = vld [vmem:[%s15990_s2 + $0x30] sm:$0xff] }
 0x6ef   :  { %v1096_v20 = vrot.slane %v248_v18, %v14151_v17 }
 0x6f1   :  { %v1097_v24 = vcombine.high %v1096_v20, %v1096_v20  ;;  %v1104_v25 = vrot.slane %v1096_v20, %v14151_v17  ;;  %v78_v20 = vld [vmem:[%s15990_s2 + $0x50] sm:$0xff] }
 0x6f3   :  { %v1111_v32 = vrot.slane %v1097_v24, %v14151_v17  ;;  %v14167_v33 = vrot.slane %v1104_v25, %v14159_v23  ;;  %v80_v24 = vld [vmem:[%s15990_s2 + $0x60] sm:$0xff]  ;;  %v81_v25 = vld [vmem:[%s15990_s2 + $0x68] sm:$0xff] }
 0x6f5   :  { %16066 = vst [vmem:[#allocation9_spill] sm:$0xff] %v14167_v33  ;;  %v14171_v38 = vrot.slane %v1111_v32, %v14159_v23 }
 0x6f7   :  { %16067 = vst [vmem:[#allocation10_spill] sm:$0xff] %v14171_v38 }
 0x777   :  { %v1055_v60 = vpop.xlane.xlu0 %1054 }
 0x778   :  { %v1058_v61 = vmul.f32 0.03125, %v1055_v60  ;;  %v1052_v62 = vpop.xlane.xlu1 %1051  ;;  %v64_v60 = vld [vmem:[#allocation2 + $0xe0] sm:$0xff] }
 0x779   :  { %v1057_v63 = vmul.f32 0.03125, %v1052_v62 }
 0x77a   :  { %v1060_v2 = vsub.f32 %v1049_v56, %v1058_v61  ;;  %v65_v61 = vld [vmem:[#allocation2 + $0xe8] sm:$0xff] }
 0x77b   :  { %v1059_v4 = vsub.f32 %v1048_v57, %v1057_v63  ;;  %v14186_v62 = vpack.c.bf16 %v65_v61, %v64_v60  ;;  %v66_v63 = vld [vmem:[#allocation2 + $0xf0] sm:$0xff] }
 0x77c   :  { %v1062_v7 = vmul.f32 %v1060_v2, %v1060_v2 }
 0x77d   :  { %v1061_v5 = vmul.f32 %v1059_v4, %v1059_v4  ;;  %12886 = vmatprep.subr.bf16.mxu0 %v14186_v62 }
 0x77e   :  { %v1066_v54 = vsel %vm100_vm1, %v1062_v7, 0.0  ;;  %12888 = vmatpush3.bf16.msra.mxu0 %v14186_v62  ;;  %v70_v7 = vld [vmem:[%s15990_s2 + $0x10] sm:$0xff] }
 0x77f   :  { %v1063_v6 = vsel %vm100_vm1, %v1061_v5, 0.0  ;;  %v68_v5 = vld [vmem:[%s15990_s2] sm:$0xff]  ;;  %v14208_v8 = vpack.c.bf16 %v71_v53, %v70_v7 }
 0x780   :  { %1064 = vadd.xlane.f32.xlu0 %v1063_v6  ;;  %v69_v6 = vld [vmem:[%s15990_s2 + $0x8] sm:$0xff] }
 0x784   :  { %1067 = vadd.xlane.f32.xlu0 %v1066_v54  ;;  %v14203_v54 = vpack.c.bf16 %v69_v6, %v68_v5  ;;  %v10869_v5 = vld [vmem:[%s15991_s3 + $0x6] ss:$0 sm:$0xff] }
 0x786   :  { %12894 = vmatprep.subr.bf16.mxu1 %v14203_v54 }
 0x787   :  { %12896 = vmatpush3.bf16.msra.mxu1 %v14203_v54 }
 0x788   :  { %12898 = vmatprep.subr.bf16.mxu1 %v14208_v8 }
 0x78b   :  { %12900 = vmatpush3.bf16.msra.mxu1 %v14208_v8 }
 0x80d   :  { %v1065_v9 = vpop.xlane.xlu0 %1064 }
 0x80e   :  { %v1069_v10 = vmul.f32 0.03125, %v1065_v9  ;;  %v72_v9 = vld [vmem:[%s15990_s2 + $0x20] sm:$0xff] }
 0x810   :  { %v1071_v11 = vadd.f32 1e-05, %v1069_v10  ;;  %v73_v10 = vld [vmem:[%s15990_s2 + $0x28] sm:$0xff] }
 0x811   :  { %v1068_v13 = vpop.xlane.xlu0 %1067 }
 0x812   :  { %13618 = vrsqrt.f32 %v1071_v11  ;;  %v1070_v15 = vmul.f32 0.03125, %v1068_v13  ;;  %v14219_v11 = vpack.c.bf16 %v73_v10, %v72_v9  ;;  %v75_v13 = vld [vmem:[%s15990_s2 + $0x38] sm:$0xff] }
 0x813   :  { %v14229_v14 = vpack.c.bf16 %v75_v13, %v74_v12 }
 0x814   :  { %v1072_v16 = vadd.f32 1e-05, %v1070_v15  ;;  %12902 = vmatprep.subr.bf16.mxu1 %v14219_v11  ;;  %v76_v15 = vld [vmem:[%s15990_s2 + $0x40] sm:$0xff] }
 0x815   :  { %12904 = vmatpush3.bf16.msra.mxu1 %v14219_v11 }
 0x816   :  { %13620 = vrsqrt.f32 %v1072_v16  ;;  %v77_v16 = vld [vmem:[%s15990_s2 + $0x48] sm:$0xff]  ;;  %12906 = vmatprep.subr.bf16.mxu1 %v14229_v14 }
 0x817   :  { %v14239_v18 = vpack.c.bf16 %v77_v16, %v76_v15 }
 0x819   :  { %12908 = vmatpush3.bf16.msra.mxu1 %v14229_v14 }
 0x81a   :  { %12910 = vmatprep.subr.bf16.mxu1 %v14239_v18 }
 0x81c   :  { %v13619_v21 = vpop.eup %13618 }
 0x81d   :  { %v1075_v26 = vmul.f32 %v13619_v21, %v1059_v4  ;;  %v79_v21 = vld [vmem:[%s15990_s2 + $0x58] sm:$0xff]  ;;  %12912 = vmatpush3.bf16.msra.mxu1 %v14239_v18 }
 0x81f   :  { %v1081_v41 = vmul.f32 %v10862_v22, %v1075_v26  ;;  %v14259_v26 = vpack.c.bf16 %v81_v25, %v80_v24 }
 0x820   :  { %v13621_v29 = vpop.eup %13620 }
 0x821   :  { %v1087_v34 = vadd.f32 %v10863_v27, %v1081_v41  ;;  %v1076_v35 = vmul.f32 %v13621_v29, %v1060_v2  ;;  %v67_v2 = vld [vmem:[#allocation2 + $0xf8] sm:$0xff] }
 0x822   :  { %v14190_v4 = vpack.c.bf16 %v67_v2, %v66_v63 }
 0x823   :  { %v1122_v36 = vadd.f32 %v14167_v33, %v1087_v34  ;;  %v1082_v37 = vmul.f32 %v10862_v22, %v1076_v35  ;;  %v14249_v22 = vpack.c.bf16 %v79_v21, %v78_v20 }
 0x824   :  { %12890 = vmatprep.subr.bf16.mxu0 %v14190_v4 }
 0x825   :  { %v1124_v39 = vsel %vm100_vm1, %v1122_v36, 0.0  ;;  %v1088_v43 = vadd.f32 %v10863_v27, %v1082_v37  ;;  %12892 = vmatpush3.bf16.msra.mxu0 %v14190_v4  ;;  %12914 = vmatprep.subr.bf16.mxu1 %v14249_v22  ;;  %v10864_v37 = vld [vmem:[%s15991_s3 + $0x9] ss:$0 sm:$0xff] }
 0x826   :  { %1125 = vadd.xlane.f32.xlu0 %v1124_v39  ;;  %12916 = vmatpush3.bf16.msra.mxu1 %v14249_v22 }
 0x827   :  { %v1123_v44 = vadd.f32 %v14171_v38, %v1088_v43  ;;  %12918 = vmatprep.subr.bf16.mxu1 %v14259_v26  ;;  %v10865_v43 = vld [vmem:[%s15991_s3 + $0xa] ss:$0 sm:$0xff] }
 0x829   :  { %v1127_v45 = vsel %vm100_vm1, %v1123_v44, 0.0 }
 0x82a   :  { %1128 = vadd.xlane.f32.xlu0 %v1127_v45  ;;  %12920 = vmatpush3.bf16.msra.mxu1 %v14259_v26 }
 0x8b3   :  { %v1126_v46 = vpop.xlane.xlu0 %1125 }
 0x8b4   :  { %v1130_v47 = vmul.f32 0.03125, %v1126_v46 }
 0x8b6   :  { %v14176_v48 = vsub.f32 %v1122_v36, %v1130_v47 }
 0x8b7   :  { %v1129_v50 = vpop.xlane.xlu0 %1128 }
 0x8b8   :  { %v1131_v51 = vmul.f32 0.03125, %v1129_v50  ;;  %v1134_v52 = vmul.f32 %v14176_v48, %v14176_v48 }
 0x8ba   :  { %v14180_v56 = vsub.f32 %v1123_v44, %v1131_v51  ;;  %v1136_v57 = vsel %vm100_vm1, %v1134_v52, 0.0  ;;  %v82_v52 = vld [vmem:[%s15990_s2 + $0x70] sm:$0xff] }
 0x8bb   :  { %1137 = vadd.xlane.f32.xlu0 %v1136_v57 }
 0x8bc   :  { %v1135_v58 = vmul.f32 %v14180_v56, %v14180_v56 }
 0x8be   :  { %v1139_v59 = vsel %vm100_vm1, %v1135_v58, 0.0 }
 0x8bf   :  { %1140 = vadd.xlane.f32.xlu0 %v1139_v59 }
 0x948   :  { %v1138_v27 = vpop.xlane.xlu0 %1137 }
 0x949   :  { %v1142_v41 = vmul.f32 0.03125, %v1138_v27 }
 0x94b   :  { %v1144_v29 = vadd.f32 1e-05, %v1142_v41 }
 0x94c   :  { %v1141_v32 = vpop.xlane.xlu0 %1140 }
 0x94d   :  { %13622 = vrsqrt.f32 %v1144_v29  ;;  %v1143_v34 = vmul.f32 0.03125, %v1141_v32 }
 0x94f   :  { %v1145_v35 = vadd.f32 1e-05, %v1143_v34 }
 0x951   :  { %13624 = vrsqrt.f32 %v1145_v35  ;;  %v252_v35 = vld [vmem:[#allocation2 + $0x100] sm:$0xff] }
 0x957   :  { %v13623_v36 = vpop.eup %13622 }
 0x958   :  { %v1148_v39 = vmul.f32 %v13623_v36, %v14176_v48  ;;  %v83_v48 = vld [vmem:[%s15990_s2 + $0x78] sm:$0xff]  ;;  %v253_v36 = vld [vmem:[#allocation2 + $0x108] sm:$0xff] }
 0x959   :  { %v14280_v57 = vpack.c.bf16 %v83_v48, %v82_v52 }
 0x95a   :  { %v1154_v44 = vmul.f32 %v10864_v37, %v1148_v39  ;;  %v254_v39 = vld [vmem:[#allocation2 + $0x110] sm:$0xff] }
 0x95b   :  { %v13625_v45 = vpop.eup %13624  ;;  %12922 = vmatprep.subr.bf16.mxu1 %v14280_v57 }
 0x95c   :  { %v1149_v46 = vmul.f32 %v13625_v45, %v14180_v56  ;;  %v1160_v47 = vadd.f32 %v10865_v43, %v1154_v44  ;;  %12924 = vmatpush3.bf16.msra.mxu1 %v14280_v57  ;;  %v10866_v56 = vld [vmem:[%s15991_s3 + $0x5] ss:$0 sm:$0xff] }
 0x95e   :  { %11734 = vmatprep.mubr.msk.f32.mxu0 %vm100_vm1, %v1160_v47  ;;  %v1155_v50 = vmul.f32 %v10864_v37, %v1149_v46  ;;  %v14294_v37 = vpack.c.bf16 %v253_v36, %v252_v35 }
 0x960   :  { %v1161_v51 = vadd.f32 %v10865_v43, %v1155_v50  ;;  %12926 = vmatprep.subr.bf16.mxu0 %v14294_v37  ;;  %v255_v43 = vld [vmem:[#allocation2 + $0x118] sm:$0xff] }
 0x961   :  { %v14298_v44 = vpack.c.bf16 %v255_v43, %v254_v39 }
 0x962   :  { %11735 = vmatmul.mubr.msk.f32.vlgmr.msra.gmra.mrb[14].mxu0 %vm100_vm1, %v1161_v51 }
 0x963   :  { %12928 = vmatpush3.bf16.msra.mxu0 %v14294_v37  ;;  %16068 = vst [vmem:[#allocation11_spill] sm:$0xff] %v14298_v44 }
 0x964   :  { %12930 = vmatprep.subr.bf16.mxu0 %v14298_v44 }
 0x967   :  { %12932 = vmatpush3.bf16.msra.mxu0 %v14298_v44 }
 0x968   :  { %11783 = vmatprep.subr.mxu0 %v16002_v1 }
 0xa35   :  { %v11736_v58 = vpop.f32.mrb[14].mxu0 }
 0xa36   :  { %v1244_v59 = vadd.f32 %v11736_v58, %v10866_v56  ;;  %v1238_v60 = vpop.f32.mrb[15].mxu0 }
 0xa37   :  { %v1239_v61 = vadd.f32 %v10866_v56, %v1238_v60  ;;  %v10870_v56 = vld [vmem:[%s15991_s3 + $0xb] ss:$0 sm:$0xff] }
 0xa38   :  { %v1248_v2 = vmax.f32 %v1244_v59, 0.0 }
 0xa39   :  { %v1247_v63 = vmax.f32 %v1239_v61, 0.0  ;;  %v10871_v61 = vld [vmem:[%s15991_s3 + $0xc] ss:$0 sm:$0xff] }
 0xa3b   :  { %11769 = vmatprep.mubr.f32.mxu1 %v1247_v63 }
 0xa3c   :  { %11770 = vmatmul.mubr.f32.vlgmr.msra.gmra.mrb[8].mxu1 %v1248_v2 }
 0xb0f   :  { %v11771_v6 = vpop.f32.mrb[8].mxu1 }
 0xb10   :  { %v1325_v7 = vadd.f32 %v11771_v6, %v10869_v5  ;;  %v1319_v53 = vpop.f32.mrb[9].mxu1 }
 0xb11   :  { %v1320_v9 = vadd.f32 %v10869_v5, %v1319_v53 }
 0xb12   :  { %v1329_v10 = vadd.f32 %v1325_v7, %v1161_v51  ;;  %v10872_v7 = vld [vmem:[%s15991_s3 + $0xd] ss:$0 sm:$0xff] }
 0xb13   :  { %v1328_v12 = vadd.f32 %v1320_v9, %v1160_v47 }
 0xb14   :  { %v1333_v13 = vsel %vm100_vm1, %v1329_v10, 0.0 }
 0xb15   :  { %1334 = vadd.xlane.f32.xlu1 %v1333_v13  ;;  %v1330_v15 = vsel %vm100_vm1, %v1328_v12, 0.0 }
 0xb16   :  { %1331 = vadd.xlane.f32.xlu0 %v1330_v15 }
 0xba2   :  { %v1335_v16 = vpop.xlane.xlu1 %1334 }
 0xba3   :  { %v1337_v20 = vmul.f32 0.03125, %v1335_v16  ;;  %v1332_v21 = vpop.xlane.xlu0 %1331 }
 0xba4   :  { %v1336_v24 = vmul.f32 0.03125, %v1332_v21 }
 0xba5   :  { %v1339_v25 = vsub.f32 %v1329_v10, %v1337_v20 }
 0xba6   :  { %v1338_v27 = vsub.f32 %v1328_v12, %v1336_v24 }
 0xba7   :  { %v1341_v41 = vmul.f32 %v1339_v25, %v1339_v25 }
 0xba8   :  { %v1340_v29 = vmul.f32 %v1338_v27, %v1338_v27 }
 0xba9   :  { %v1345_v32 = vsel %vm100_vm1, %v1341_v41, 0.0 }
 0xbaa   :  { %1346 = vadd.xlane.f32.xlu1 %v1345_v32  ;;  %v1342_v34 = vsel %vm100_vm1, %v1340_v29, 0.0 }
 0xbab   :  { %1343 = vadd.xlane.f32.xlu0 %v1342_v34 }
 0xc37   :  { %v1347_v45 = vpop.xlane.xlu1 %1346 }
 0xc38   :  { %v1349_v46 = vmul.f32 0.03125, %v1347_v45  ;;  %v1344_v47 = vpop.xlane.xlu0 %1343 }
 0xc39   :  { %v1348_v50 = vmul.f32 0.03125, %v1344_v47 }
 0xc3a   :  { %v1351_v51 = vadd.f32 1e-05, %v1349_v46 }
 0xc3b   :  { %v1350_v52 = vadd.f32 1e-05, %v1348_v50 }
 0xc3c   :  { %13626 = vrsqrt.f32 %v1351_v51 }
 0xc3d   :  { %13628 = vrsqrt.f32 %v1350_v52 }
 0xc46   :  { %v13627_v48 = vpop.eup %13626 }
 0xc47   :  { %v13629_v58 = vpop.eup %13628  ;;  %v1355_v59 = vmul.f32 %v13627_v48, %v1339_v25 }
 0xc48   :  { %v1354_v60 = vmul.f32 %v13629_v58, %v1338_v27 }
 0xc49   :  { %v1361_v63 = vmul.f32 %v10870_v56, %v1355_v59  ;;  %v257_v59 = vld [vmem:[#allocation2 + $0x120] sm:$0xff] }
 0xc4a   :  { %v1360_v2 = vmul.f32 %v10870_v56, %v1354_v60  ;;  %v258_v60 = vld [vmem:[#allocation2 + $0x128] sm:$0xff] }
 0xc4b   :  { %v14311_v6 = vadd.f32 %v10871_v61, %v1361_v63 }
 0xc4c   :  { %v14309_v5 = vadd.f32 %v10871_v61, %v1360_v2  ;;  %v14343_v2 = vpack.c.bf16 %v258_v60, %v257_v59 }
 0xc4e   :  { %11780 = vmatprep.mubr.msk.f32.mxu0 %vm100_vm1, %v14309_v5 }
 0xc4f   :  { %11781 = vmatmul.mubr.msk.f32.vlgmr.msra.gmra.mrb[16].mxu0 %vm100_vm1, %v14311_v6 }
 0xc50   :  { %11785 = vmatprep.mubr.msk.f32.mxu0 %vm13981_vm0, %v16002_v1 }
 0xd22   :  { %v11782_v53 = vpop.f32.mrb[16].mxu0 }
 0xd23   :  { %v1450_v9 = vadd.f32 %v11782_v53, %v10872_v7  ;;  %v1444_v10 = vpop.f32.mrb[17].mxu0 }
 0xd24   :  { %v1445_v12 = vadd.f32 %v10872_v7, %v1444_v10  ;;  %v259_v10 = vld [vmem:[#allocation2 + $0x130] sm:$0xff] }
 0xd25   :  { %1531 = vrot.lane.b32.xlu1 %v1450_v9, %s13983_s9 }
 0xd26   :  { %1454 = vrot.lane.b32.xlu0 %v1445_v12, %s13983_s9 }
 0xd97   :  { %v1532_v15 = vpop.permute.xlu1 %1531 }
 0xd98   :  { %v1455_v13 = vpop.permute.xlu0 %1454 }
 0xd99   :  { %11784 = vmatpush3.xpose.msk.msra.mxu0 %vm100_vm1, %v1455_v13 }
 0xd9a   :  { %11788 = vmatprep.subr.mxu0 %v16002_v1 }
 0xd9c   :  { %11786 = vmatmul.mubr.msk.f32.vlgmr.msra.gmra.mrb[18].mxu0 %vm100_vm1, %v1445_v12 }
 0xd9d   :  { %11789 = vmatpush3.xpose.msk.msra.mxu0 %vm100_vm1, %v1532_v15  ;;  %11790 = vmatprep.mubr.msk.f32.mxu0 %vm13981_vm0, %v16002_v1 }
 0xd9e   :  { %11793 = vmatprep.subr.mxu0 %v16002_v1 }
 0xda0   :  { %11791 = vmatmul.mubr.msk.f32.vlgmr.msra.gmra.mrb[20].mxu0 %vm100_vm1, %v1450_v9 }
 0xda1   :  { %11795 = vmatprep.mubr.msk.f32.mxu0 %vm13981_vm0, %v16002_v1 }
 0xe6f   :  { %v1526_v16 = vpop.f32.mrb[18].mxu0 }
 0xe70   :  { %v1607_v20 = vmul.f32 0.17677669, %v1526_v16  ;;  %v11787_v21 = vpop.f32.mrb[19].mxu0 }
 0xe72   :  { %v1609_v24 = vadd.f32 %v1607_v20, %v14116_v3 }
 0xe73   :  { %v1603_v25 = vpop.f32.mrb[20].mxu0 }
 0xe74   :  { %v1608_v27 = vmul.f32 0.17677669, %v1603_v25  ;;  %v11792_v41 = vpop.f32.mrb[21].mxu0  ;;  %v1611_v29 = vsel %vm788_vm7, %v1609_v24, -inf }
 0xe75   :  { %1612 = vmax.xlane.f32.xlu1 %v1611_v29 }
 0xe76   :  { %v1610_v32 = vadd.f32 %v1608_v27, %v14116_v3 }
 0xe78   :  { %v1614_v34 = vsel %vm788_vm7, %v1610_v32, -inf }
 0xe79   :  { %1615 = vmax.xlane.f32.xlu0 %v1614_v34 }
 0xf02   :  { %v1613_v35 = vpop.xlane.xlu1 %1612 }
 0xf03   :  { %v1617_v36 = vsub.f32 %v1609_v24, %v1613_v35  ;;  %v10881_v24 = vld [vmem:[%s15991_s3 + $0xe] ss:$0 sm:$0xff] }
 0xf05   :  { %v1619_v39 = vmul.f32 1.442695, %v1617_v36 }
 0xf06   :  { %v1616_v43 = vpop.xlane.xlu0 %1615 }
 0xf07   :  { %13630 = vpow2.f32 %v1619_v39  ;;  %v1618_v45 = vsub.f32 %v1610_v32, %v1616_v43 }
 0xf09   :  { %v1621_v46 = vmul.f32 1.442695, %v1618_v45 }
 0xf0b   :  { %13632 = vpow2.f32 %v1621_v46 }
 0xf11   :  { %v13631_v47 = vpop.eup %13630 }
 0xf12   :  { %v1623_v50 = vsel %vm788_vm7, %v13631_v47, 0.0 }
 0xf13   :  { %1624 = vadd.xlane.f32.xlu0 %v1623_v50 }
 0xf15   :  { %v13633_v51 = vpop.eup %13632 }
 0xf16   :  { %v1626_v52 = vsel %vm788_vm7, %v13633_v51, 0.0 }
 0xf17   :  { %1627 = vadd.xlane.f32.xlu1 %v1626_v52 }
 0xf28   :  { %1709 = vrot.lane.b32.xlu1 %v1450_v9, %s13985_s10 }
 0xf29   :  { %1633 = vrot.lane.b32.xlu0 %v1445_v12, %s13985_s10  ;;  %v260_v12 = vld [vmem:[#allocation2 + $0x138] sm:$0xff] }
 0xf2a   :  { %v14351_v13 = vpack.c.bf16 %v260_v12, %v259_v10  ;;  %v10884_v12 = vld [vmem:[%s15991_s3 + $0x13] ss:$0 sm:$0xff] }
 0xfa0   :  { %v1625_v48 = vpop.xlane.xlu0 %1624 }
 0xfa1   :  { %13634 = vrcp.f32 %v1625_v48 }
 0xfa4   :  { %v1628_v56 = vpop.xlane.xlu1 %1627  ;;  %v1634_v58 = vpop.permute.xlu0 %1633 }
 0xfa5   :  { %13636 = vrcp.f32 %v1628_v56  ;;  %11794 = vmatpush3.msra.mxu0 %v1634_v58  ;;  %v10846_v56 = vld [vmem:[%s15991_s3 + $0x10] ss:$0 sm:$0xff] }
 0xfa6   :  { %11798 = vmatprep.subr.mxu0 %v16002_v1 }
 0xfa8   :  { %v1710_v7 = vpop.permute.xlu1 %1709 }
 0xfab   :  { %v13635_v61 = vpop.eup %13634 }
 0xfac   :  { %v1631_v63 = vmul.f32 %v13635_v61, %v13631_v47 }
 0xfae   :  { %11796 = vmatmul.mubr.msk.f32.vlgmr.msra.gmra.mrb[22].mxu0 %vm788_vm7, %v1631_v63  ;;  %v453_v63 = vadd.f32 %v10846_v56, %v14097_v55  ;;  %v10885_v55 = vld [vmem:[%s15991_s3 + $0x14] ss:$0 sm:$0xff] }
 0xfaf   :  { %v13637_v53 = vpop.eup %13636  ;;  %11799 = vmatpush3.msra.mxu0 %v1710_v7  ;;  %11800 = vmatprep.mubr.msk.f32.mxu0 %vm13981_vm0, %v16002_v1 }
 0xfb0   :  { %v1632_v9 = vmul.f32 %v13637_v53, %v13633_v51  ;;  %12934 = vmatprep.subr.bf16.mxu0 %v14343_v2  ;;  %v1917_v53 = vrot.slane %v453_v63, %v14151_v17  ;;  %v275_v63 = vld [vmem:[#allocation2 + $0x198] sm:$0xff] }
 0xfb2   :  { %11801 = vmatmul.mubr.msk.f32.vlgmr.msra.gmra.mrb[24].mxu0 %vm788_vm7, %v1632_v9  ;;  %v1918_v9 = vcombine.high %v1917_v53, %v1917_v53 }
 0xfb3   :  { %12936 = vmatpush3.bf16.msra.mxu0 %v14343_v2 }
 0xfb4   :  { %12938 = vmatprep.subr.bf16.mxu0 %v14351_v13 }
 0xfb7   :  { %12940 = vmatpush3.bf16.msra.mxu0 %v14351_v13 }
0x1081   :  { %v1705_v15 = vpop.f32.mrb[22].mxu0 }
0x1082   :  { %v11797_v16 = vpop.f32.mrb[23].mxu0  ;;  %11811 = vmatprep.mubr.msk.f32.mxu0 %vm100_vm1, %v1705_v15 }
0x1083   :  { %v1932_v16 = vrot.slane %v1918_v9, %v14151_v17  ;;  %v10829_v9 = vld [vmem:[%s15990_s2 + $0x88] sm:$0xff] }
0x1085   :  { %v1781_v20 = vpop.f32.mrb[24].mxu0 }
0x1086   :  { %v11802_v21 = vpop.f32.mrb[25].mxu0  ;;  %11812 = vmatmul.mubr.msk.f32.vlgmr.msra.gmra.mrb[26].mxu0 %vm100_vm1, %v1781_v20 }
0x1087   :  { %v1925_v21 = vrot.slane %v1917_v53, %v14151_v17  ;;  %v10828_v53 = vld [vmem:[%s15990_s2 + $0x80] sm:$0xff] }
0x1159   :  { %v11813_v25 = vpop.f32.mrb[26].mxu0 }
0x115a   :  { %v1867_v27 = vadd.f32 %v11813_v25, %v10881_v24  ;;  %v1861_v41 = vpop.f32.mrb[27].mxu0 }
0x115b   :  { %v1862_v29 = vadd.f32 %v10881_v24, %v1861_v41  ;;  %v14380_v41 = vrot.slane %v1932_v16, %v14159_v23 }
0x115c   :  { %v1871_v32 = vadd.f32 %v1867_v27, %v14311_v6 }
0x115d   :  { %v1870_v34 = vadd.f32 %v1862_v29, %v14309_v5  ;;  %16069 = vst [vmem:[#allocation12_spill] sm:$0xff] %v14380_v41 }
0x115e   :  { %v1875_v35 = vsel %vm100_vm1, %v1871_v32, 0.0 }
0x115f   :  { %1876 = vadd.xlane.f32.xlu0 %v1875_v35  ;;  %v1872_v36 = vsel %vm100_vm1, %v1870_v34, 0.0 }
0x1160   :  { %1873 = vadd.xlane.f32.xlu1 %v1872_v36 }
0x11ec   :  { %v1877_v39 = vpop.xlane.xlu0 %1876 }
0x11ed   :  { %v1879_v43 = vmul.f32 0.03125, %v1877_v39  ;;  %v1874_v45 = vpop.xlane.xlu1 %1873 }
0x11ee   :  { %v1878_v46 = vmul.f32 0.03125, %v1874_v45 }
0x11ef   :  { %v1881_v47 = vsub.f32 %v1871_v32, %v1879_v43  ;;  %v14383_v32 = vrot.slane %v1925_v21, %v14159_v23  ;;  %v10833_v21 = vld [vmem:[%s15990_s2 + $0xa8] sm:$0xff] }
0x11f0   :  { %v1880_v50 = vsub.f32 %v1870_v34, %v1878_v46 }
0x11f1   :  { %v1883_v51 = vmul.f32 %v1881_v47, %v1881_v47  ;;  %16070 = vst [vmem:[#allocation13_spill] sm:$0xff] %v14383_v32 }
0x11f2   :  { %v1882_v52 = vmul.f32 %v1880_v50, %v1880_v50 }
0x11f3   :  { %v1887_v48 = vsel %vm100_vm1, %v1883_v51, 0.0 }
0x11f4   :  { %1888 = vadd.xlane.f32.xlu1 %v1887_v48  ;;  %v1884_v6 = vsel %vm100_vm1, %v1882_v52, 0.0 }
0x11f5   :  { %1885 = vadd.xlane.f32.xlu0 %v1884_v6 }
0x1281   :  { %v1889_v5 = vpop.xlane.xlu1 %1888 }
0x1282   :  { %v1891_v58 = vmul.f32 0.03125, %v1889_v5  ;;  %v1886_v59 = vpop.xlane.xlu0 %1885 }
0x1283   :  { %v1890_v60 = vmul.f32 0.03125, %v1886_v59  ;;  %v273_v59 = vld [vmem:[#allocation2 + $0x188] sm:$0xff] }
0x1284   :  { %v1893_v61 = vadd.f32 1e-05, %v1891_v58  ;;  %v272_v58 = vld [vmem:[#allocation2 + $0x180] sm:$0xff] }
0x1285   :  { %v1892_v7 = vadd.f32 1e-05, %v1890_v60  ;;  %v14399_v60 = vpack.c.bf16 %v273_v59, %v272_v58 }
0x1286   :  { %13638 = vrsqrt.f32 %v1893_v61  ;;  %v274_v61 = vld [vmem:[#allocation2 + $0x190] sm:$0xff] }
0x1287   :  { %13640 = vrsqrt.f32 %v1892_v7  ;;  %12942 = vmatprep.subr.bf16.mxu1 %v14399_v60  ;;  %v14402_v7 = vpack.c.bf16 %v275_v63, %v274_v61  ;;  %v14481_v61 = vld [vmem:[%s15991_s3 + $0x15] ss:$0 sm:$0xff] }
0x1288   :  { %12944 = vmatpush3.bf16.msra.mxu1 %v14399_v60 }
0x1289   :  { %16071 = vst [vmem:[#allocation14_spill] sm:$0xff] %v14402_v7  ;;  %12946 = vmatprep.subr.bf16.mxu1 %v14402_v7 }
0x128c   :  { %12948 = vmatpush3.bf16.msra.mxu1 %v14402_v7 }
0x128d   :  { %12981 = vmatprep.subr.bf16.mxu1 %v15993_v0 }
0x1290   :  { %v13639_v10 = vpop.eup %13638 }
0x1291   :  { %v13641_v15 = vpop.eup %13640  ;;  %v1897_v20 = vmul.f32 %v13639_v10, %v1881_v47  ;;  %v10830_v10 = vld [vmem:[%s15990_s2 + $0x90] sm:$0xff] }
0x1292   :  { %v1896_v24 = vmul.f32 %v13641_v15, %v1880_v50  ;;  %v10831_v15 = vld [vmem:[%s15990_s2 + $0x98] sm:$0xff] }
0x1293   :  { %v1903_v25 = vmul.f32 %v10884_v12, %v1897_v20  ;;  %v14422_v16 = vpack.c.bf16 %v10831_v15, %v10830_v10  ;;  %v10832_v20 = vld [vmem:[%s15990_s2 + $0xa0] sm:$0xff]  ;;  %v14488_v10 = vld [vmem:[%s15991_s3 + $0x16] ss:$0 sm:$0xff] }
0x1294   :  { %v1902_v27 = vmul.f32 %v10884_v12, %v1896_v24  ;;  %v14417_v12 = vpack.c.bf16 %v10829_v9, %v10828_v53  ;;  %v10834_v24 = vld [vmem:[%s15990_s2 + $0xb0] sm:$0xff] }
0x1295   :  { %v1909_v29 = vadd.f32 %v10885_v55, %v1903_v25  ;;  %v10835_v25 = vld [vmem:[%s15990_s2 + $0xb8] sm:$0xff] }
0x1296   :  { %v1908_v34 = vadd.f32 %v10885_v55, %v1902_v27  ;;  %12950 = vmatprep.subr.bf16.mxu0 %v14417_v12  ;;  %v14433_v55 = vpack.c.bf16 %v10833_v21, %v10832_v20  ;;  %v14443_v27 = vpack.c.bf16 %v10835_v25, %v10834_v24 }
0x1297   :  { %v1944_v35 = vadd.f32 %v14380_v41, %v1909_v29  ;;  %12952 = vmatpush3.bf16.msra.mxu0 %v14417_v12  ;;  %v10836_v29 = vld [vmem:[%s15990_s2 + $0xc0] sm:$0xff] }
0x1298   :  { %v1943_v36 = vadd.f32 %v14383_v32, %v1908_v34  ;;  %12954 = vmatprep.subr.bf16.mxu0 %v14422_v16  ;;  %v10837_v34 = vld [vmem:[%s15990_s2 + $0xc8] sm:$0xff] }
0x1299   :  { %v1948_v39 = vsel %vm100_vm1, %v1944_v35, 0.0 }
0x129a   :  { %1949 = vadd.xlane.f32.xlu1 %v1948_v39  ;;  %v1945_v43 = vsel %vm100_vm1, %v1943_v36, 0.0  ;;  %v10839_v39 = vld [vmem:[%s15990_s2 + $0xd8] sm:$0xff] }
0x129b   :  { %1946 = vadd.xlane.f32.xlu0 %v1945_v43  ;;  %12956 = vmatpush3.bf16.msra.mxu0 %v14422_v16 }
0x129c   :  { %12958 = vmatprep.subr.bf16.mxu0 %v14433_v55 }
0x129f   :  { %12960 = vmatpush3.bf16.msra.mxu0 %v14433_v55 }
0x12a0   :  { %12962 = vmatprep.subr.bf16.mxu0 %v14443_v27 }
0x12a3   :  { %12964 = vmatpush3.bf16.msra.mxu0 %v14443_v27 }
0x1327   :  { %v1950_v45 = vpop.xlane.xlu1 %1949 }
0x1328   :  { %v1952_v46 = vmul.f32 0.03125, %v1950_v45  ;;  %v1947_v47 = vpop.xlane.xlu0 %1946  ;;  %v10840_v45 = vld [vmem:[%s15990_s2 + $0xe0] sm:$0xff] }
0x1329   :  { %v1951_v50 = vmul.f32 0.03125, %v1947_v47 }
0x132a   :  { %v14389_v51 = vsub.f32 %v1944_v35, %v1952_v46  ;;  %v14453_v35 = vpack.c.bf16 %v10837_v34, %v10836_v29  ;;  %v10841_v46 = vld [vmem:[%s15990_s2 + $0xe8] sm:$0xff]  ;;  %v14512_v29 = vld [vmem:[%s15991_s3 + $0x11] ss:$0 sm:$0xff] }
0x132b   :  { %v14391_v52 = vsub.f32 %v1943_v36, %v1951_v50  ;;  %v10838_v36 = vld [vmem:[%s15990_s2 + $0xd0] sm:$0xff]  ;;  %v14473_v47 = vpack.c.bf16 %v10841_v46, %v10840_v45 }
0x132c   :  { %v1956_v48 = vmul.f32 %v14389_v51, %v14389_v51  ;;  %12966 = vmatprep.subr.bf16.mxu0 %v14453_v35  ;;  %v14463_v43 = vpack.c.bf16 %v10839_v39, %v10838_v36 }
0x132d   :  { %v1955_v6 = vmul.f32 %v14391_v52, %v14391_v52  ;;  %12968 = vmatpush3.bf16.msra.mxu0 %v14453_v35 }
0x132e   :  { %v1960_v5 = vsel %vm100_vm1, %v1956_v48, 0.0  ;;  %12970 = vmatprep.subr.bf16.mxu0 %v14463_v43 }
0x132f   :  { %1961 = vadd.xlane.f32.xlu1 %v1960_v5  ;;  %v1957_v56 = vsel %vm100_vm1, %v1955_v6, 0.0 }
0x1330   :  { %1958 = vadd.xlane.f32.xlu0 %v1957_v56 }
0x1331   :  { %12972 = vmatpush3.bf16.msra.mxu0 %v14463_v43 }
0x1332   :  { %12974 = vmatprep.subr.bf16.mxu0 %v14473_v47 }
0x1335   :  { %12976 = vmatpush3.bf16.msra.mxu0 %v14473_v47 }
0x13bc   :  { %v1962_v50 = vpop.xlane.xlu1 %1961 }
0x13bd   :  { %v1964_v48 = vmul.f32 0.03125, %v1962_v50  ;;  %v1959_v6 = vpop.xlane.xlu0 %1958 }
0x13be   :  { %v1963_v5 = vmul.f32 0.03125, %v1959_v6 }
0x13bf   :  { %v1966_v56 = vadd.f32 1e-05, %v1964_v48  ;;  %v14521_v48 = vld [vmem:[%s15991_s3 + $0x12] ss:$0 sm:$0xff] }
0x13c0   :  { %v1965_v58 = vadd.f32 1e-05, %v1963_v5 }
0x13c1   :  { %13642 = vrsqrt.f32 %v1966_v56 }
0x13c2   :  { %13644 = vrsqrt.f32 %v1965_v58 }
0x13cb   :  { %v13643_v59 = vpop.eup %13642 }
0x13cc   :  { %v13645_v63 = vpop.eup %13644  ;;  %v1970_v53 = vmul.f32 %v13643_v59, %v14389_v51  ;;  %v10842_v51 = vld [vmem:[%s15990_s2 + $0xf0] sm:$0xff] }
0x13cd   :  { %v1969_v9 = vmul.f32 %v13645_v63, %v14391_v52  ;;  %v10843_v52 = vld [vmem:[%s15990_s2 + $0xf8] sm:$0xff] }
0x13ce   :  { %v1976_v15 = vmul.f32 %v14481_v61, %v1970_v53  ;;  %v14504_v25 = vpack.c.bf16 %v10843_v52, %v10842_v51 }
0x13cf   :  { %v1975_v20 = vmul.f32 %v14481_v61, %v1969_v9 }
0x13d0   :  { %v1982_v24 = vadd.f32 %v14488_v10, %v1976_v15  ;;  %12978 = vmatprep.subr.bf16.mxu0 %v14504_v25 }
0x13d1   :  { %v1981_v21 = vadd.f32 %v14488_v10, %v1975_v20  ;;  %12980 = vmatpush3.bf16.msra.mxu0 %v14504_v25 }
0x13d2   :  { %11899 = vmatprep.subr.mxu0 %v16002_v1 }
0x13d3   :  { %11822 = vmatprep.mubr.msk.f32.mxu1 %vm100_vm1, %v1981_v21 }
0x13d4   :  { %11823 = vmatmul.mubr.msk.f32.vlgmr.msra.gmra.mrb[10].mxu1 %vm100_vm1, %v1982_v24 }
0x13d5   :  { %11868 = vmatprep.mubr.msk.f32.mxu1 %vm13981_vm0, %v16002_v1 }
0x14a7   :  { %v11824_v34 = vpop.f32.mrb[10].mxu1 }
0x14a8   :  { %v2065_v36 = vadd.f32 %v11824_v34, %v14512_v29  ;;  %v2059_v39 = vpop.f32.mrb[11].mxu1 }
0x14a9   :  { %v2060_v45 = vadd.f32 %v14512_v29, %v2059_v39 }
0x14aa   :  { %v2069_v50 = vmax.f32 %v2065_v36, 0.0 }
0x14ab   :  { %v2068_v46 = vmax.f32 %v2060_v45, 0.0 }
0x14ad   :  { %11857 = vmatprep.mubr.f32.mxu0 %v2068_v46 }
0x14ae   :  { %11858 = vmatmul.mubr.f32.vlgmr.msra.gmra.mrb[28].mxu0 %v2069_v50  ;;  %v38_v50 = vld [vmem:[#allocation2 + $0x48] sm:$0xff] }
0x14af   :  { %11901 = vmatprep.mubr.msk.f32.mxu0 %vm13981_vm0, %v16002_v1 }
0x1581   :  { %v11859_v6 = vpop.f32.mrb[28].mxu0 }
0x1582   :  { %v2146_v5 = vadd.f32 %v11859_v6, %v14521_v48  ;;  %v2140_v56 = vpop.f32.mrb[29].mxu0 }
0x1583   :  { %v2141_v58 = vadd.f32 %v14521_v48, %v2140_v56  ;;  %v40_v56 = vld [vmem:[#allocation2 + $0x58] sm:$0xff] }
0x1584   :  { %v2150_v59 = vadd.f32 %v2146_v5, %v1982_v24  ;;  %v39_v5 = vld [vmem:[#allocation2 + $0x50] sm:$0xff] }
0x1585   :  { %v2149_v63 = vadd.f32 %v2141_v58, %v1981_v21  ;;  %v37_v21 = vld [vmem:[#allocation2 + $0x40] sm:$0xff]  ;;  %v14532_v58 = vpack.c.bf16 %v40_v56, %v39_v5 }
0x1586   :  { %v2154_v53 = vsel %vm100_vm1, %v2150_v59, 0.0  ;;  %v14529_v6 = vpack.c.bf16 %v38_v50, %v37_v21 }
0x1587   :  { %2155 = vadd.xlane.f32.xlu0 %v2154_v53  ;;  %v2151_v9 = vsel %vm100_vm1, %v2149_v63, 0.0 }
0x1588   :  { %2152 = vadd.xlane.f32.xlu1 %v2151_v9  ;;  %12983 = vmatpush3.bf16.msra.mxu1 %v14529_v6 }
0x1589   :  { %12984 = vmatprep.subr.bf16.mxu1 %v15993_v0 }
0x158c   :  { %12986 = vmatpush3.bf16.msra.mxu1 %v14532_v58 }
0x158d   :  { %12988 = vmatprep.subr.bf16.mxu1 %v14056_v30 }
0x1614   :  { %v2156_v15 = vpop.xlane.xlu0 %2155 }
0x1615   :  { %v2158_v20 = vmul.f32 0.03125, %v2156_v15  ;;  %v2153_v51 = vpop.xlane.xlu1 %2152 }
0x1616   :  { %v2157_v52 = vmul.f32 0.03125, %v2153_v51 }
0x1617   :  { %v2160_v34 = vsub.f32 %v2150_v59, %v2158_v20 }
0x1618   :  { %v2159_v36 = vsub.f32 %v2149_v63, %v2157_v52  ;;  %v14540_v52 = vld [vmem:[%s15991_s3 + $0x17] ss:$0 sm:$0xff] }
0x1619   :  { %v2162_v39 = vmul.f32 %v2160_v34, %v2160_v34 }
0x161a   :  { %v2161_v45 = vmul.f32 %v2159_v36, %v2159_v36 }
0x161b   :  { %v2166_v46 = vsel %vm100_vm1, %v2162_v39, 0.0 }
0x161c   :  { %2167 = vadd.xlane.f32.xlu0 %v2166_v46  ;;  %v2163_v24 = vsel %vm100_vm1, %v2161_v45, 0.0 }
0x161d   :  { %2164 = vadd.xlane.f32.xlu1 %v2163_v24  ;;  %v14545_v24 = vld [vmem:[%s15991_s3 + $0x18] ss:$0 sm:$0xff] }
0x16a9   :  { %v2168_v59 = vpop.xlane.xlu0 %2167 }
0x16aa   :  { %v2170_v63 = vmul.f32 0.03125, %v2168_v59  ;;  %v2165_v53 = vpop.xlane.xlu1 %2164 }
0x16ab   :  { %v2169_v9 = vmul.f32 0.03125, %v2165_v53 }
0x16ac   :  { %v2172_v15 = vadd.f32 1e-05, %v2170_v63 }
0x16ad   :  { %v2171_v20 = vadd.f32 1e-05, %v2169_v9 }
0x16ae   :  { %13646 = vrsqrt.f32 %v2172_v15 }
0x16af   :  { %13648 = vrsqrt.f32 %v2171_v20 }
0x16b8   :  { %v13647_v51 = vpop.eup %13646 }
0x16b9   :  { %v13649_v39 = vpop.eup %13648  ;;  %v2176_v45 = vmul.f32 %v13647_v51, %v2160_v34  ;;  %v14558_v34 = vld [vmem:[%s15991_s3] ss:$0 sm:$0xff] }
0x16ba   :  { %v2175_v46 = vmul.f32 %v13649_v39, %v2159_v36 }
0x16bb   :  { %v2182_v21 = vmul.f32 %v14540_v52, %v2176_v45 }
0x16bc   :  { %v2181_v50 = vmul.f32 %v14540_v52, %v2175_v46 }
0x16bd   :  { %v2188_v5 = vadd.f32 %v14545_v24, %v2182_v21 }
0x16be   :  { %v2187_v56 = vadd.f32 %v14545_v24, %v2181_v50 }
0x16bf   :  { %v2195_v59 = vrot.slane %v2188_v5, 7 }
0x16c1   :  { %v2197_v63 = vsel %vm2196_vm8, %v2195_v59, %v2187_v56 }
0x16c2   :  { %11869 = vmatmul.mubr.msk.f32.vlgmr.msra.gmra.mrb[12].mxu1 %vm100_vm1, %v2197_v63 }
0x16c3   :  { %12990 = vmatpush3.bf16.msra.mxu1 %v14056_v30 }
0x16c4   :  { %12992 = vmatprep.subr.bf16.mxu1 %v14072_v40 }
0x1795   :  { %v2266_v36 = vpop.f32.mrb[12].mxu1 }
0x1796   :  { %v2267_v53 = vadd.f32 %v14558_v34, %v2266_v36  ;;  %v11870_v9 = vpop.f32.mrb[13].mxu1 }
0x1798   :  { %10801 = vst.msk [vmem:[#allocation5] sm:$0x3] %vm2272_vm9, %v2267_v53  ;;  %v2273_v15 = vsel %vm2272_vm9, %v2267_v53, -inf }
0x1799   :  { %2274 = vmax.xlane.f32.xlu0 %v2273_v15 }
0x1826   :  { %v2275_v20 = vpop.xlane.xlu0 %2274 }
0x1827   :  { %v2276_v51 = vsub.f32 %v2267_v53, %v2275_v20 }
0x1829   :  { %v2277_v39 = vmul.f32 1.442695, %v2276_v51 }
0x182b   :  { %13650 = vpow2.f32 %v2277_v39 }
0x1835   :  { %v13651_v45 = vpop.eup %13650 }
0x1836   :  { %v2279_v46 = vsel %vm2272_vm9, %v13651_v45, 0.0 }
0x1837   :  { %2280 = vadd.xlane.f32.xlu1 %v2279_v46 }
0x18c4   :  { %v2281_v21 = vpop.xlane.xlu1 %2280 }
0x18c5   :  { %13652 = vrcp.f32 %v2281_v21 }
0x18cf   :  { %v13653_v50 = vpop.eup %13652 }
0x18d0   :  { %v2283_v5 = vmul.f32 %v13653_v50, %v13651_v45  ;;  %v14584_v45 = vld [vmem:[#allocation2 + $0x20] sm:$0xff] }
0x18d1   :  { %16073 = vst [vmem:[#allocation16_spill] sm:$0xff] %v14584_v45  ;;  %v14601_v50 = vld [vmem:[%s15991_s3 + $0x1] ss:$0 sm:$0xff] }
0x18d2   :  { %v2292_v56 = vrot.slane %v2283_v5, %v14151_v17  ;;  %16074 = vst [vmem:[#allocation17_spill] sm:$0xff] %v14601_v50 }
0x18d4   :  { %v2293_v59 = vcombine.high %v2292_v56, %v2292_v56  ;;  %v2300_v63 = vrot.slane %v2292_v56, %v14151_v17 }
0x18d6   :  { %v2311_v36 = vrot.slane %v2300_v63, %v14159_v23  ;;  %v2307_v53 = vrot.slane %v2293_v59, %v14151_v17 }
0x18d8   :  { %v14570_v9 = vsel %vm2284_vm10, %v2311_v36, %v14060_v31  ;;  %v2315_v15 = vrot.slane %v2307_v53, %v14159_v23 }
0x18d9   :  { %11875 = vmatprep.mubr.msk.f32.mxu1 %vm466_vm5, %v14570_v9 }
0x18da   :  { %v14576_v20 = vsel %vm2284_vm10, %v2315_v15, %v14060_v31 }
0x18db   :  { %16072 = vst [vmem:[#allocation15_spill] sm:$0xff] %v14576_v20  ;;  %11876 = vmatmul.mubr.msk.f32.vlgmr.msra.gmra.mrb[14].mxu1 %vm466_vm5, %v14576_v20 }
0x18dc   :  { %12994 = vmatpush3.bf16.msra.mxu1 %v14072_v40 }
0x18dd   :  { %12996 = vmatprep.subr.bf16.mxu1 %v14080_v49 }
0x18e0   :  { %12998 = vmatpush3.bf16.msra.mxu1 %v14080_v49 }
0x18e1   :  { %11889 = vmatprep.subr.mxu1 %v16002_v1 }
0x19ae   :  { %v11877_v51 = vpop.f32.mrb[14].mxu1 }
0x19af   :  { %v2392_v39 = vpop.f32.mrb[15].mxu1  ;;  %v14590_v31 = vadd.f32 %v14584_v45, %v11877_v51 }
0x19b0   :  { %v14587_v46 = vadd.f32 %v14584_v45, %v2392_v39 }
0x19b2   :  { %11886 = vmatprep.mubr.msk.f32.mxu1 %vm100_vm1, %v14587_v46 }
0x19b3   :  { %11887 = vmatmul.mubr.msk.f32.vlgmr.msra.gmra.mrb[16].mxu1 %vm100_vm1, %v14590_v31 }
0x19b4   :  { %11891 = vmatprep.mubr.msk.f32.mxu1 %vm13981_vm0, %v16002_v1 }
0x1a86   :  { %v11888_v21 = vpop.f32.mrb[16].mxu1 }
0x1a87   :  { %v2479_v5 = vadd.f32 %v14601_v50, %v11888_v21  ;;  %v2473_v56 = vpop.f32.mrb[17].mxu1 }
0x1a88   :  { %v2474_v59 = vadd.f32 %v14601_v50, %v2473_v56 }
0x1a89   :  { %2560 = vrot.lane.b32.xlu1 %v2479_v5, %s13983_s9 }
0x1a8a   :  { %2483 = vrot.lane.b32.xlu0 %v2474_v59, %s13983_s9 }
0x1afb   :  { %v2561_v36 = vpop.permute.xlu1 %2560 }
0x1afc   :  { %v2484_v63 = vpop.permute.xlu0 %2483 }
0x1afd   :  { %11890 = vmatpush3.xpose.msk.msra.mxu1 %vm100_vm1, %v2484_v63 }
0x1afe   :  { %11894 = vmatprep.subr.mxu1 %v16002_v1 }
0x1b00   :  { %11892 = vmatmul.mubr.msk.f32.vlgmr.msra.gmra.mrb[18].mxu1 %vm100_vm1, %v2474_v59 }
0x1b01   :  { %11895 = vmatpush3.xpose.msk.msra.mxu1 %vm100_vm1, %v2561_v36  ;;  %11896 = vmatprep.mubr.msk.f32.mxu1 %vm13981_vm0, %v16002_v1 }
0x1b02   :  { %11904 = vmatprep.subr.mxu1 %v16002_v1 }
0x1b04   :  { %11897 = vmatmul.mubr.msk.f32.vlgmr.msra.gmra.mrb[20].mxu1 %vm100_vm1, %v2479_v5 }
0x1b05   :  { %11906 = vmatprep.mubr.msk.f32.mxu1 %vm13981_vm0, %v16002_v1 }
0x1bd3   :  { %v2555_v53 = vpop.f32.mrb[18].mxu1 }
0x1bd4   :  { %v2636_v15 = vmul.f32 0.17677669, %v2555_v53  ;;  %v11893_v51 = vpop.f32.mrb[19].mxu1 }
0x1bd6   :  { %v2638_v39 = vadd.f32 %v2636_v15, %v14116_v3 }
0x1bd7   :  { %v2632_v21 = vpop.f32.mrb[20].mxu1 }
0x1bd8   :  { %v2637_v56 = vmul.f32 0.17677669, %v2632_v21  ;;  %v11898_v63 = vpop.f32.mrb[21].mxu1  ;;  %v2640_v36 = vsel %vm788_vm7, %v2638_v39, -inf }
0x1bd9   :  { %2641 = vmax.xlane.f32.xlu1 %v2640_v36 }
0x1bda   :  { %v2639_v0 = vadd.f32 %v2637_v56, %v14116_v3 }
0x1bdc   :  { %v2643_v50 = vsel %vm788_vm7, %v2639_v0, -inf }
0x1bdd   :  { %2644 = vmax.xlane.f32.xlu0 %v2643_v50 }
0x1c66   :  { %v2642_v45 = vpop.xlane.xlu1 %2641 }
0x1c67   :  { %v2646_v49 = vsub.f32 %v2638_v39, %v2642_v45 }
0x1c69   :  { %v2648_v20 = vmul.f32 1.442695, %v2646_v49 }
0x1c6a   :  { %v2645_v1 = vpop.xlane.xlu0 %2644 }
0x1c6b   :  { %13654 = vpow2.f32 %v2648_v20  ;;  %v2647_v53 = vsub.f32 %v2639_v0, %v2645_v1 }
0x1c6d   :  { %v2650_v51 = vmul.f32 1.442695, %v2647_v53 }
0x1c6f   :  { %13656 = vpow2.f32 %v2650_v51 }
0x1c75   :  { %v13655_v15 = vpop.eup %13654 }
0x1c76   :  { %v2652_v21 = vsel %vm788_vm7, %v13655_v15, 0.0 }
0x1c77   :  { %2653 = vadd.xlane.f32.xlu0 %v2652_v21  ;;  %v14658_v21 = vld [vmem:[%s15991_s3 + $0x2] ss:$0 sm:$0xff] }
0x1c78   :  { %16075 = vst [vmem:[#allocation18_spill] sm:$0xff] %v14658_v21 }
0x1c79   :  { %v13657_v63 = vpop.eup %13656 }
0x1c7a   :  { %v2655_v36 = vsel %vm788_vm7, %v13657_v63, 0.0 }
0x1c7b   :  { %2656 = vadd.xlane.f32.xlu1 %v2655_v36 }
0x1c8c   :  { %2738 = vrot.lane.b32.xlu1 %v2479_v5, %s13985_s10 }
0x1c8d   :  { %2662 = vrot.lane.b32.xlu0 %v2474_v59, %s13985_s10 }
0x1d04   :  { %v2654_v50 = vpop.xlane.xlu0 %2653 }
0x1d05   :  { %13658 = vrcp.f32 %v2654_v50 }
0x1d08   :  { %v2657_v49 = vpop.xlane.xlu1 %2656  ;;  %v2663_v45 = vpop.permute.xlu0 %2662 }
0x1d09   :  { %13660 = vrcp.f32 %v2657_v49  ;;  %11900 = vmatpush3.msra.mxu0 %v2663_v45 }
0x1d0a   :  { %13000 = vmatprep.subr.bf16.mxu0 %v14126_v28 }
0x1d0c   :  { %v2739_v0 = vpop.permute.xlu1 %2738 }
0x1d0d   :  { %11905 = vmatpush3.msra.mxu1 %v2739_v0 }
0x1d0e   :  { %13008 = vmatprep.subr.bf16.mxu1 %v14186_v62 }
0x1d0f   :  { %v13659_v1 = vpop.eup %13658 }
0x1d10   :  { %v2660_v20 = vmul.f32 %v13659_v1, %v13655_v15 }
0x1d12   :  { %11902 = vmatmul.mubr.msk.f32.vlgmr.msra.gmra.mrb[30].mxu0 %vm788_vm7, %v2660_v20 }
0x1d13   :  { %v13661_v39 = vpop.eup %13660  ;;  %13002 = vmatpush3.bf16.msra.mxu0 %v14126_v28 }
0x1d14   :  { %v2661_v5 = vmul.f32 %v13661_v39, %v13657_v63  ;;  %13004 = vmatprep.subr.bf16.mxu0 %v14132_v42 }
0x1d16   :  { %11907 = vmatmul.mubr.msk.f32.vlgmr.msra.gmra.mrb[22].mxu1 %vm788_vm7, %v2661_v5 }
0x1d17   :  { %13006 = vmatpush3.bf16.msra.mxu0 %v14132_v42  ;;  %13010 = vmatpush3.bf16.msra.mxu1 %v14186_v62 }
0x1d18   :  { %13012 = vmatprep.subr.bf16.mxu1 %v14190_v4  ;;  %13016 = vmatprep.subr.bf16.mxu0 %v14203_v54 }
0x1d1b   :  { %13014 = vmatpush3.bf16.msra.mxu1 %v14190_v4 }
0x1d1c   :  { %13048 = vmatprep.subr.bf16.mxu1 %v14294_v37 }
0x1de5   :  { %v2734_v59 = vpop.f32.mrb[30].mxu0 }
0x1de6   :  { %v11903_v56 = vpop.f32.mrb[31].mxu0  ;;  %11917 = vmatprep.mubr.msk.f32.mxu0 %vm100_vm1, %v2734_v59 }
0x1de9   :  { %v2810_v53 = vpop.f32.mrb[22].mxu1 }
0x1dea   :  { %v11908_v51 = vpop.f32.mrb[23].mxu1  ;;  %11918 = vmatmul.mubr.msk.f32.vlgmr.msra.gmra.mrb[32].mxu0 %vm100_vm1, %v2810_v53 }
0x1deb   :  { %13018 = vmatpush3.bf16.msra.mxu0 %v14203_v54 }
0x1dec   :  { %13020 = vmatprep.subr.bf16.mxu0 %v14208_v8 }
0x1def   :  { %13022 = vmatpush3.bf16.msra.mxu0 %v14208_v8 }
0x1df0   :  { %13024 = vmatprep.subr.bf16.mxu0 %v14219_v11 }
0x1df3   :  { %13026 = vmatpush3.bf16.msra.mxu0 %v14219_v11 }
0x1df4   :  { %13028 = vmatprep.subr.bf16.mxu0 %v14229_v14 }
0x1df7   :  { %13030 = vmatpush3.bf16.msra.mxu0 %v14229_v14 }
0x1df8   :  { %13032 = vmatprep.subr.bf16.mxu0 %v14239_v18 }
0x1dfb   :  { %13034 = vmatpush3.bf16.msra.mxu0 %v14239_v18 }
0x1dfc   :  { %13036 = vmatprep.subr.bf16.mxu0 %v14249_v22 }
0x1dff   :  { %13038 = vmatpush3.bf16.msra.mxu0 %v14249_v22 }
0x1e00   :  { %13040 = vmatprep.subr.bf16.mxu0 %v14259_v26 }
0x1e03   :  { %13042 = vmatpush3.bf16.msra.mxu0 %v14259_v26 }
0x1e04   :  { %13044 = vmatprep.subr.bf16.mxu0 %v14280_v57 }
0x1e07   :  { %13046 = vmatpush3.bf16.msra.mxu0 %v14280_v57 }
0x1e08   :  { %13064 = vmatprep.subr.bf16.mxu0 %v14399_v60 }
0x1ebd   :  { %v11919_v15 = vpop.f32.mrb[32].mxu0 }
0x1ebe   :  { %v2892_v63 = vadd.f32 %v14658_v21, %v11919_v15  ;;  %v2886_v36 = vpop.f32.mrb[33].mxu0 }
0x1ebf   :  { %v2887_v50 = vadd.f32 %v14658_v21, %v2886_v36 }
0x1ec0   :  { %v2896_v49 = vadd.f32 %v2892_v63, %v14590_v31 }
0x1ec1   :  { %v2895_v45 = vadd.f32 %v2887_v50, %v14587_v46 }
0x1ec2   :  { %v2900_v0 = vsel %vm100_vm1, %v2896_v49, 0.0 }
0x1ec3   :  { %2901 = vadd.xlane.f32.xlu0 %v2900_v0  ;;  %v2897_v1 = vsel %vm100_vm1, %v2895_v45, 0.0 }
0x1ec4   :  { %2898 = vadd.xlane.f32.xlu1 %v2897_v1 }
0x1f50   :  { %v2902_v20 = vpop.xlane.xlu0 %2901 }
0x1f51   :  { %v2904_v39 = vmul.f32 0.03125, %v2902_v20  ;;  %v2899_v5 = vpop.xlane.xlu1 %2898 }
0x1f52   :  { %v2903_v59 = vmul.f32 0.03125, %v2899_v5 }
0x1f53   :  { %v2906_v56 = vsub.f32 %v2896_v49, %v2904_v39  ;;  %v14671_v39 = vld [vmem:[%s15991_s3 + $0x7] ss:$0 sm:$0xff] }
0x1f54   :  { %v2905_v53 = vsub.f32 %v2895_v45, %v2903_v59 }
0x1f55   :  { %v2908_v51 = vmul.f32 %v2906_v56, %v2906_v56 }
0x1f56   :  { %v2907_v15 = vmul.f32 %v2905_v53, %v2905_v53 }
0x1f57   :  { %v2912_v36 = vsel %vm100_vm1, %v2908_v51, 0.0 }
0x1f58   :  { %2913 = vadd.xlane.f32.xlu1 %v2912_v36  ;;  %v2909_v31 = vsel %vm100_vm1, %v2907_v15, 0.0  ;;  %v14678_v15 = vld [vmem:[%s15991_s3 + $0x8] ss:$0 sm:$0xff] }
0x1f59   :  { %2910 = vadd.xlane.f32.xlu0 %v2909_v31  ;;  %16076 = vst [vmem:[#allocation19_spill] sm:$0xff] %v14678_v15 }
0x1fe5   :  { %v2914_v46 = vpop.xlane.xlu1 %2913 }
0x1fe6   :  { %v2916_v63 = vmul.f32 0.03125, %v2914_v46  ;;  %v2911_v50 = vpop.xlane.xlu0 %2910 }
0x1fe7   :  { %v2915_v0 = vmul.f32 0.03125, %v2911_v50 }
0x1fe8   :  { %v2918_v21 = vadd.f32 1e-05, %v2916_v63 }
0x1fe9   :  { %v2917_v1 = vadd.f32 1e-05, %v2915_v0 }
0x1fea   :  { %13662 = vrsqrt.f32 %v2918_v21 }
0x1feb   :  { %13664 = vrsqrt.f32 %v2917_v1 }
0x1ff4   :  { %v13663_v20 = vpop.eup %13662 }
0x1ff5   :  { %v13665_v5 = vpop.eup %13664  ;;  %v2922_v49 = vmul.f32 %v13663_v20, %v2906_v56 }
0x1ff6   :  { %v2921_v45 = vmul.f32 %v13665_v5, %v2905_v53 }
0x1ff7   :  { %v2924_v59 = vmul.f32 %v14671_v39, %v2922_v49 }
0x1ff8   :  { %v2923_v51 = vmul.f32 %v14671_v39, %v2921_v45 }
0x1ff9   :  { %v2926_v21 = vadd.f32 %v14678_v15, %v2924_v59 }
0x1ffa   :  { %v2925_v36 = vadd.f32 %v14678_v15, %v2923_v51 }
0x1ffb   :  { %v2928_v56 = vadd.f32 %v2926_v21, %v14171_v38 }
0x1ffc   :  { %v2927_v53 = vadd.f32 %v2925_v36, %v14167_v33 }
0x1ffd   :  { %v2932_v31 = vsel %vm100_vm1, %v2928_v56, 0.0 }
0x1ffe   :  { %2933 = vadd.xlane.f32.xlu1 %v2932_v31  ;;  %v2929_v46 = vsel %vm100_vm1, %v2927_v53, 0.0 }
0x1fff   :  { %2930 = vadd.xlane.f32.xlu0 %v2929_v46 }
0x208b   :  { %v2934_v63 = vpop.xlane.xlu1 %2933 }
0x208c   :  { %v2936_v50 = vmul.f32 0.03125, %v2934_v63  ;;  %v2931_v0 = vpop.xlane.xlu0 %2930 }
0x208d   :  { %v2935_v1 = vmul.f32 0.03125, %v2931_v0 }
0x208e   :  { %v2938_v20 = vsub.f32 %v2928_v56, %v2936_v50  ;;  %v14691_v50 = vld [vmem:[%s15991_s3 + $0x9] ss:$0 sm:$0xff] }
0x208f   :  { %v2937_v5 = vsub.f32 %v2927_v53, %v2935_v1  ;;  %16077 = vst [vmem:[#allocation20_spill] sm:$0xff] %v14691_v50 }
0x2090   :  { %v2940_v49 = vmul.f32 %v2938_v20, %v2938_v20 }
0x2091   :  { %v2939_v45 = vmul.f32 %v2937_v5, %v2937_v5 }
0x2092   :  { %v2944_v59 = vsel %vm100_vm1, %v2940_v49, 0.0 }
0x2093   :  { %2945 = vadd.xlane.f32.xlu1 %v2944_v59  ;;  %v2941_v51 = vsel %vm100_vm1, %v2939_v45, 0.0  ;;  %v14698_v45 = vld [vmem:[%s15991_s3 + $0xa] ss:$0 sm:$0xff]  ;;  %v14711_v59 = vld [vmem:[%s15991_s3 + $0x5] ss:$0 sm:$0xff] }
0x2094   :  { %2942 = vadd.xlane.f32.xlu0 %v2941_v51  ;;  %16078 = vst [vmem:[#allocation21_spill] sm:$0xff] %v14698_v45  ;;  %16080 = vst [vmem:[#allocation22_spill] sm:$0xff] %v14711_v59 }
0x2120   :  { %v2946_v21 = vpop.xlane.xlu1 %2945 }
0x2121   :  { %v2948_v36 = vmul.f32 0.03125, %v2946_v21  ;;  %v2943_v31 = vpop.xlane.xlu0 %2942 }
0x2122   :  { %v2947_v33 = vmul.f32 0.03125, %v2943_v31 }
0x2123   :  { %v2950_v38 = vadd.f32 1e-05, %v2948_v36 }
0x2124   :  { %v2949_v46 = vadd.f32 1e-05, %v2947_v33 }
0x2125   :  { %13666 = vrsqrt.f32 %v2950_v38 }
0x2126   :  { %13668 = vrsqrt.f32 %v2949_v46 }
0x212f   :  { %v13667_v63 = vpop.eup %13666 }
0x2130   :  { %v13669_v0 = vpop.eup %13668  ;;  %v2954_v56 = vmul.f32 %v13667_v63, %v2938_v20  ;;  %v16079_v20 = vmov 0.0   ;;  %v16081_v63 = vmov 0.0|0.0  }
0x2131   :  { %v2953_v53 = vmul.f32 %v13669_v0, %v2937_v5 }
0x2132   :  { %v2956_v1 = vmul.f32 %v14691_v50, %v2954_v56  ;;  %v14722_v56 = vld [vmem:[%s15991_s3 + $0x6] ss:$0 sm:$0xff] }
0x2133   :  { %v2955_v49 = vmul.f32 %v14691_v50, %v2953_v53 }
0x2134   :  { %v2958_v38 = vadd.f32 %v14698_v45, %v2956_v1 }
0x2135   :  { %v2957_v33 = vadd.f32 %v14698_v45, %v2955_v49 }
0x2137   :  { %11928 = vmatprep.mubr.msk.f32.mxu1 %vm100_vm1, %v2957_v33 }
0x2138   :  { %11929 = vmatmul.mubr.msk.f32.vlgmr.msra.gmra.mrb[24].mxu1 %vm100_vm1, %v2958_v38 }
0x2139   :  { %13050 = vmatpush3.bf16.msra.mxu1 %v14294_v37 }
0x213a   :  { %13052 = vmatprep.subr.bf16.mxu1 %v14298_v44 }
0x213d   :  { %13054 = vmatpush3.bf16.msra.mxu1 %v14298_v44 }
0x213e   :  { %11977 = vmatprep.subr.mxu1 %v16079_v20 }
0x220b   :  { %v11930_v5 = vpop.f32.mrb[24].mxu1 }
0x220c   :  { %v3037_v51 = vadd.f32 %v14711_v59, %v11930_v5  ;;  %v3031_v21 = vpop.f32.mrb[25].mxu1 }
0x220d   :  { %v3032_v36 = vadd.f32 %v14711_v59, %v3031_v21 }
0x220e   :  { %v3041_v46 = vmax.f32 %v3037_v51, 0.0 }
0x220f   :  { %v3040_v31 = vmax.f32 %v3032_v36, 0.0 }
0x2211   :  { %11963 = vmatprep.mubr.f32.mxu0 %v3040_v31 }
0x2212   :  { %11964 = vmatmul.mubr.f32.vlgmr.msra.gmra.mrb[34].mxu0 %v3041_v46 }
0x2213   :  { %13066 = vmatpush3.bf16.msra.mxu0 %v14399_v60 }
0x2214   :  { %13068 = vmatprep.subr.bf16.mxu0 %v14402_v7 }
0x2217   :  { %13070 = vmatpush3.bf16.msra.mxu0 %v14402_v7 }
0x2218   :  { %13103 = vmatprep.subr.bf16.mxu0 %v16081_v63 }
0x22e5   :  { %v11965_v0 = vpop.f32.mrb[34].mxu0 }
0x22e6   :  { %v3114_v53 = vadd.f32 %v14722_v56, %v11965_v0  ;;  %v3108_v1 = vpop.f32.mrb[35].mxu0 }
0x22e7   :  { %v3109_v49 = vadd.f32 %v14722_v56, %v3108_v1 }
0x22e8   :  { %v3118_v5 = vadd.f32 %v3114_v53, %v2958_v38 }
0x22e9   :  { %v3117_v51 = vadd.f32 %v3109_v49, %v2957_v33 }
0x22ea   :  { %v3122_v21 = vsel %vm100_vm1, %v3118_v5, 0.0 }
0x22eb   :  { %3123 = vadd.xlane.f32.xlu1 %v3122_v21  ;;  %v3119_v36 = vsel %vm100_vm1, %v3117_v51, 0.0 }
0x22ec   :  { %3120 = vadd.xlane.f32.xlu0 %v3119_v36 }
0x2378   :  { %v3124_v31 = vpop.xlane.xlu1 %3123 }
0x2379   :  { %v3126_v46 = vmul.f32 0.03125, %v3124_v31  ;;  %v3121_v7 = vpop.xlane.xlu0 %3120 }
0x237a   :  { %v3125_v59 = vmul.f32 0.03125, %v3121_v7 }
0x237b   :  { %v3128_v44 = vsub.f32 %v3118_v5, %v3126_v46  ;;  %v14740_v46 = vld [vmem:[%s15991_s3 + $0xc] ss:$0 sm:$0xff] }
0x237c   :  { %v3127_v45 = vsub.f32 %v3117_v51, %v3125_v59  ;;  %16083 = vst [vmem:[#allocation24_spill] sm:$0xff] %v14740_v46 }
0x237d   :  { %v3130_v50 = vmul.f32 %v3128_v44, %v3128_v44 }
0x237e   :  { %v3129_v15 = vmul.f32 %v3127_v45, %v3127_v45 }
0x237f   :  { %v3134_v0 = vsel %vm100_vm1, %v3130_v50, 0.0  ;;  %v14733_v50 = vld [vmem:[%s15991_s3 + $0xb] ss:$0 sm:$0xff] }
0x2380   :  { %3135 = vadd.xlane.f32.xlu1 %v3134_v0  ;;  %v3131_v38 = vsel %vm100_vm1, %v3129_v15, 0.0  ;;  %16082 = vst [vmem:[#allocation23_spill] sm:$0xff] %v14733_v50 }
0x2381   :  { %3132 = vadd.xlane.f32.xlu0 %v3131_v38  ;;  %v14757_v38 = vld [vmem:[%s15991_s3 + $0xd] ss:$0 sm:$0xff] }
0x2382   :  { %16084 = vst [vmem:[#allocation25_spill] sm:$0xff] %v14757_v38 }
0x240d   :  { %v3136_v33 = vpop.xlane.xlu1 %3135 }
0x240e   :  { %v3138_v53 = vmul.f32 0.03125, %v3136_v33  ;;  %v3133_v1 = vpop.xlane.xlu0 %3132 }
0x240f   :  { %v3137_v49 = vmul.f32 0.03125, %v3133_v1 }
0x2410   :  { %v3140_v21 = vadd.f32 1e-05, %v3138_v53 }
0x2411   :  { %v3139_v36 = vadd.f32 1e-05, %v3137_v49 }
0x2412   :  { %13670 = vrsqrt.f32 %v3140_v21 }
0x2413   :  { %13672 = vrsqrt.f32 %v3139_v36 }
0x241c   :  { %v13671_v31 = vpop.eup %13670 }
0x241d   :  { %v13673_v7 = vpop.eup %13672  ;;  %v3144_v5 = vmul.f32 %v13671_v31, %v3128_v44 }
0x241e   :  { %v3143_v59 = vmul.f32 %v13673_v7, %v3127_v45 }
0x241f   :  { %v3146_v15 = vmul.f32 %v14733_v50, %v3144_v5 }
0x2420   :  { %v3145_v51 = vmul.f32 %v14733_v50, %v3143_v59 }
0x2421   :  { %v14746_v44 = vadd.f32 %v14740_v46, %v3146_v15 }
0x2422   :  { %v14743_v0 = vadd.f32 %v14740_v46, %v3145_v51 }
0x2424   :  { %11974 = vmatprep.mubr.msk.f32.mxu1 %vm100_vm1, %v14743_v0 }
0x2425   :  { %11975 = vmatmul.mubr.msk.f32.vlgmr.msra.gmra.mrb[26].mxu1 %vm100_vm1, %v14746_v44 }
0x2426   :  { %11979 = vmatprep.mubr.msk.f32.mxu1 %vm13981_vm0, %v16079_v20 }
0x24f8   :  { %v11976_v45 = vpop.f32.mrb[26].mxu1 }
0x24f9   :  { %v3227_v33 = vadd.f32 %v14757_v38, %v11976_v45  ;;  %v3221_v53 = vpop.f32.mrb[27].mxu1 }
0x24fa   :  { %v3222_v1 = vadd.f32 %v14757_v38, %v3221_v53 }
0x24fb   :  { %3308 = vrot.lane.b32.xlu1 %v3227_v33, %s13983_s9 }
0x24fc   :  { %3231 = vrot.lane.b32.xlu0 %v3222_v1, %s13983_s9 }
0x256d   :  { %v3309_v21 = vpop.permute.xlu1 %3308 }
0x256e   :  { %v3232_v49 = vpop.permute.xlu0 %3231 }
0x256f   :  { %11978 = vmatpush3.xpose.msk.msra.mxu1 %vm100_vm1, %v3232_v49 }
0x2570   :  { %11982 = vmatprep.subr.mxu1 %v16079_v20 }
0x2572   :  { %11980 = vmatmul.mubr.msk.f32.vlgmr.msra.gmra.mrb[28].mxu1 %vm100_vm1, %v3222_v1 }
0x2573   :  { %11983 = vmatpush3.xpose.msk.msra.mxu1 %vm100_vm1, %v3309_v21  ;;  %11984 = vmatprep.mubr.msk.f32.mxu1 %vm13981_vm0, %v16079_v20 }
0x2574   :  { %11987 = vmatprep.subr.mxu1 %v16079_v20 }
0x2576   :  { %11985 = vmatmul.mubr.msk.f32.vlgmr.msra.gmra.mrb[30].mxu1 %vm100_vm1, %v3227_v33 }
0x2577   :  { %11989 = vmatprep.mubr.msk.f32.mxu1 %vm13981_vm0, %v16079_v20 }
0x2645   :  { %v3303_v36 = vpop.f32.mrb[28].mxu1 }
0x2646   :  { %v3384_v31 = vmul.f32 0.17677669, %v3303_v36  ;;  %v11981_v7 = vpop.f32.mrb[29].mxu1 }
0x2648   :  { %v3386_v5 = vadd.f32 %v3384_v31, %v14116_v3 }
0x2649   :  { %v3380_v59 = vpop.f32.mrb[30].mxu1 }
0x264a   :  { %v3385_v15 = vmul.f32 0.17677669, %v3380_v59  ;;  %v11986_v51 = vpop.f32.mrb[31].mxu1  ;;  %v3388_v45 = vsel %vm788_vm7, %v3386_v5, -inf }
0x264b   :  { %3389 = vmax.xlane.f32.xlu1 %v3388_v45 }
0x264c   :  { %v3387_v53 = vadd.f32 %v3385_v15, %v14116_v3 }
0x264e   :  { %v3391_v49 = vsel %vm788_vm7, %v3387_v53, -inf }
0x264f   :  { %3392 = vmax.xlane.f32.xlu0 %v3391_v49 }
0x26d8   :  { %v3390_v21 = vpop.xlane.xlu1 %3389 }
0x26d9   :  { %v3394_v38 = vsub.f32 %v3386_v5, %v3390_v21 }
0x26db   :  { %v3396_v46 = vmul.f32 1.442695, %v3394_v38 }
0x26dc   :  { %v3393_v50 = vpop.xlane.xlu0 %3392 }
0x26dd   :  { %13674 = vpow2.f32 %v3396_v46  ;;  %v3395_v36 = vsub.f32 %v3387_v53, %v3393_v50 }
0x26df   :  { %v3398_v7 = vmul.f32 1.442695, %v3395_v36 }
0x26e1   :  { %13676 = vpow2.f32 %v3398_v7 }
0x26e7   :  { %v13675_v31 = vpop.eup %13674 }
0x26e8   :  { %v3400_v59 = vsel %vm788_vm7, %v13675_v31, 0.0 }
0x26e9   :  { %3401 = vadd.xlane.f32.xlu0 %v3400_v59  ;;  %v14812_v59 = vld [vmem:[%s15991_s3 + $0xe] ss:$0 sm:$0xff] }
0x26ea   :  { %16085 = vst [vmem:[#allocation26_spill] sm:$0xff] %v14812_v59 }
0x26eb   :  { %v13677_v51 = vpop.eup %13676 }
0x26ec   :  { %v3403_v45 = vsel %vm788_vm7, %v13677_v51, 0.0 }
0x26ed   :  { %3404 = vadd.xlane.f32.xlu1 %v3403_v45 }
0x26fe   :  { %3486 = vrot.lane.b32.xlu1 %v3227_v33, %s13985_s10 }
0x26ff   :  { %3410 = vrot.lane.b32.xlu0 %v3222_v1, %s13985_s10 }
0x2776   :  { %v3402_v15 = vpop.xlane.xlu0 %3401 }
0x2777   :  { %13678 = vrcp.f32 %v3402_v15 }
0x277a   :  { %v3405_v38 = vpop.xlane.xlu1 %3404  ;;  %v3411_v5 = vpop.permute.xlu0 %3410 }
0x277b   :  { %13680 = vrcp.f32 %v3405_v38  ;;  %11988 = vmatpush3.msra.mxu1 %v3411_v5 }
0x277c   :  { %11992 = vmatprep.subr.mxu1 %v16079_v20 }
0x277e   :  { %v3487_v53 = vpop.permute.xlu1 %3486 }
0x2781   :  { %v13679_v50 = vpop.eup %13678 }
0x2782   :  { %v3408_v46 = vmul.f32 %v13679_v50, %v13675_v31 }
0x2784   :  { %11990 = vmatmul.mubr.msk.f32.vlgmr.msra.gmra.mrb[32].mxu1 %vm788_vm7, %v3408_v46 }
0x2785   :  { %v13681_v49 = vpop.eup %13680  ;;  %11993 = vmatpush3.msra.mxu1 %v3487_v53  ;;  %11994 = vmatprep.mubr.msk.f32.mxu1 %vm13981_vm0, %v16079_v20 }
0x2786   :  { %v3409_v33 = vmul.f32 %v13681_v49, %v13677_v51  ;;  %13056 = vmatprep.subr.bf16.mxu1 %v14343_v2 }
0x2788   :  { %11995 = vmatmul.mubr.msk.f32.vlgmr.msra.gmra.mrb[34].mxu1 %vm788_vm7, %v3409_v33 }
0x2789   :  { %13058 = vmatpush3.bf16.msra.mxu1 %v14343_v2 }
0x278a   :  { %13060 = vmatprep.subr.bf16.mxu1 %v14351_v13 }
0x278d   :  { %13062 = vmatpush3.bf16.msra.mxu1 %v14351_v13 }
0x278e   :  { %13072 = vmatprep.subr.bf16.mxu1 %v14417_v12 }
0x2857   :  { %v3482_v1 = vpop.f32.mrb[32].mxu1 }
0x2858   :  { %v11991_v21 = vpop.f32.mrb[33].mxu1  ;;  %12005 = vmatprep.mubr.msk.f32.mxu1 %vm100_vm1, %v3482_v1 }
0x285b   :  { %v3558_v36 = vpop.f32.mrb[34].mxu1 }
0x285c   :  { %v11996_v7 = vpop.f32.mrb[35].mxu1  ;;  %12006 = vmatmul.mubr.msk.f32.vlgmr.msra.gmra.mrb[36].mxu1 %vm100_vm1, %v3558_v36 }
0x285d   :  { %13074 = vmatpush3.bf16.msra.mxu1 %v14417_v12 }
0x285e   :  { %13076 = vmatprep.subr.bf16.mxu1 %v14422_v16 }
0x2861   :  { %13078 = vmatpush3.bf16.msra.mxu1 %v14422_v16 }
0x2862   :  { %13080 = vmatprep.subr.bf16.mxu1 %v14433_v55 }
0x2865   :  { %13082 = vmatpush3.bf16.msra.mxu1 %v14433_v55 }
0x2866   :  { %13084 = vmatprep.subr.bf16.mxu1 %v14443_v27 }
0x2869   :  { %13086 = vmatpush3.bf16.msra.mxu1 %v14443_v27 }
0x286a   :  { %13088 = vmatprep.subr.bf16.mxu1 %v14453_v35 }
0x286d   :  { %13090 = vmatpush3.bf16.msra.mxu1 %v14453_v35 }
0x286e   :  { %13092 = vmatprep.subr.bf16.mxu1 %v14463_v43 }
0x2871   :  { %13094 = vmatpush3.bf16.msra.mxu1 %v14463_v43 }
0x2872   :  { %13096 = vmatprep.subr.bf16.mxu1 %v14473_v47 }
0x2875   :  { %13098 = vmatpush3.bf16.msra.mxu1 %v14473_v47 }
0x2876   :  { %13100 = vmatprep.subr.bf16.mxu1 %v14504_v25 }
0x2879   :  { %13102 = vmatpush3.bf16.msra.mxu1 %v14504_v25 }
0x287a   :  { %12093 = vmatprep.subr.mxu1 %v16079_v20 }
0x292f   :  { %v12007_v31 = vpop.f32.mrb[36].mxu1 }
0x2930   :  { %v3640_v51 = vadd.f32 %v14812_v59, %v12007_v31  ;;  %v3634_v45 = vpop.f32.mrb[37].mxu1 }
0x2931   :  { %v3635_v15 = vadd.f32 %v14812_v59, %v3634_v45 }
0x2932   :  { %v3644_v38 = vadd.f32 %v3640_v51, %v14746_v44 }
0x2933   :  { %v3643_v5 = vadd.f32 %v3635_v15, %v14743_v0 }
0x2934   :  { %v3648_v50 = vsel %vm100_vm1, %v3644_v38, 0.0 }
0x2935   :  { %3649 = vadd.xlane.f32.xlu0 %v3648_v50  ;;  %v3645_v46 = vsel %vm100_vm1, %v3643_v5, 0.0 }
0x2936   :  { %3646 = vadd.xlane.f32.xlu1 %v3645_v46 }
0x29c2   :  { %v3650_v53 = vpop.xlane.xlu0 %3649 }
0x29c3   :  { %v3652_v49 = vmul.f32 0.03125, %v3650_v53  ;;  %v3647_v33 = vpop.xlane.xlu1 %3646 }
0x29c4   :  { %v3651_v1 = vmul.f32 0.03125, %v3647_v33 }
0x29c5   :  { %v3654_v21 = vsub.f32 %v3644_v38, %v3652_v49  ;;  %v14825_v49 = vld [vmem:[%s15991_s3 + $0x13] ss:$0 sm:$0xff] }
0x29c6   :  { %v3653_v36 = vsub.f32 %v3643_v5, %v3651_v1 }
0x29c7   :  { %v3656_v7 = vmul.f32 %v3654_v21, %v3654_v21 }
0x29c8   :  { %v3655_v31 = vmul.f32 %v3653_v36, %v3653_v36 }
0x29c9   :  { %v3660_v45 = vsel %vm100_vm1, %v3656_v7, 0.0 }
0x29ca   :  { %3661 = vadd.xlane.f32.xlu1 %v3660_v45  ;;  %v3657_v44 = vsel %vm100_vm1, %v3655_v31, 0.0  ;;  %v14832_v31 = vld [vmem:[%s15991_s3 + $0x14] ss:$0 sm:$0xff] }
0x29cb   :  { %3658 = vadd.xlane.f32.xlu0 %v3657_v44 }
0x2a57   :  { %v3662_v0 = vpop.xlane.xlu1 %3661 }
0x2a58   :  { %v3664_v51 = vmul.f32 0.03125, %v3662_v0  ;;  %v3659_v15 = vpop.xlane.xlu0 %3658 }
0x2a59   :  { %v3663_v50 = vmul.f32 0.03125, %v3659_v15 }
0x2a5a   :  { %v3666_v59 = vadd.f32 1e-05, %v3664_v51 }
0x2a5b   :  { %v3665_v46 = vadd.f32 1e-05, %v3663_v50 }
0x2a5c   :  { %13682 = vrsqrt.f32 %v3666_v59 }
0x2a5d   :  { %13684 = vrsqrt.f32 %v3665_v46 }
0x2a66   :  { %v13683_v53 = vpop.eup %13682 }
0x2a67   :  { %v13685_v33 = vpop.eup %13684  ;;  %v3670_v38 = vmul.f32 %v13683_v53, %v3654_v21 }
0x2a68   :  { %v3669_v5 = vmul.f32 %v13685_v33, %v3653_v36 }
0x2a69   :  { %v3672_v1 = vmul.f32 %v14825_v49, %v3670_v38 }
0x2a6a   :  { %v3671_v7 = vmul.f32 %v14825_v49, %v3669_v5 }
0x2a6b   :  { %v3674_v59 = vadd.f32 %v14832_v31, %v3672_v1 }
0x2a6c   :  { %v3673_v45 = vadd.f32 %v14832_v31, %v3671_v7 }
0x2a6d   :  { %v3676_v21 = vadd.f32 %v3674_v59, %v14380_v41 }
0x2a6e   :  { %v3675_v36 = vadd.f32 %v3673_v45, %v14383_v32 }
0x2a6f   :  { %v3680_v44 = vsel %vm100_vm1, %v3676_v21, 0.0 }
0x2a70   :  { %3681 = vadd.xlane.f32.xlu1 %v3680_v44  ;;  %v3677_v0 = vsel %vm100_vm1, %v3675_v36, 0.0 }
0x2a71   :  { %3678 = vadd.xlane.f32.xlu0 %v3677_v0 }
0x2afd   :  { %v3682_v51 = vpop.xlane.xlu1 %3681 }
0x2afe   :  { %v3684_v15 = vmul.f32 0.03125, %v3682_v51  ;;  %v3679_v50 = vpop.xlane.xlu0 %3678 }
0x2aff   :  { %v3683_v46 = vmul.f32 0.03125, %v3679_v50 }
0x2b00   :  { %v3686_v53 = vsub.f32 %v3676_v21, %v3684_v15 }
0x2b01   :  { %v3685_v33 = vsub.f32 %v3675_v36, %v3683_v46 }
0x2b02   :  { %v3688_v38 = vmul.f32 %v3686_v53, %v3686_v53 }
0x2b03   :  { %v3687_v5 = vmul.f32 %v3685_v33, %v3685_v33 }
0x2b04   :  { %v3692_v1 = vsel %vm100_vm1, %v3688_v38, 0.0 }
0x2b05   :  { %3693 = vadd.xlane.f32.xlu1 %v3692_v1  ;;  %v3689_v7 = vsel %vm100_vm1, %v3687_v5, 0.0 }
0x2b06   :  { %3690 = vadd.xlane.f32.xlu0 %v3689_v7 }
0x2b92   :  { %v3694_v59 = vpop.xlane.xlu1 %3693 }
0x2b93   :  { %v3696_v45 = vmul.f32 0.03125, %v3694_v59  ;;  %v3691_v44 = vpop.xlane.xlu0 %3690 }
0x2b94   :  { %v3695_v32 = vmul.f32 0.03125, %v3691_v44 }
0x2b95   :  { %v3698_v41 = vadd.f32 1e-05, %v3696_v45 }
0x2b96   :  { %v3697_v0 = vadd.f32 1e-05, %v3695_v32 }
0x2b97   :  { %13686 = vrsqrt.f32 %v3698_v41 }
0x2b98   :  { %13688 = vrsqrt.f32 %v3697_v0 }
0x2ba1   :  { %v13687_v51 = vpop.eup %13686 }
0x2ba2   :  { %v13689_v50 = vpop.eup %13688  ;;  %v3702_v21 = vmul.f32 %v13687_v51, %v3686_v53 }
0x2ba3   :  { %v3701_v36 = vmul.f32 %v13689_v50, %v3685_v33 }
0x2ba4   :  { %v3704_v15 = vmul.f32 %v14481_v61, %v3702_v21 }
0x2ba5   :  { %v3703_v46 = vmul.f32 %v14481_v61, %v3701_v36 }
0x2ba6   :  { %v3706_v5 = vadd.f32 %v14488_v10, %v3704_v15 }
0x2ba7   :  { %v3705_v38 = vadd.f32 %v14488_v10, %v3703_v46 }
0x2ba9   :  { %12016 = vmatprep.mubr.msk.f32.mxu0 %vm100_vm1, %v3705_v38 }
0x2baa   :  { %12017 = vmatmul.mubr.msk.f32.vlgmr.msra.gmra.mrb[36].mxu0 %vm100_vm1, %v3706_v5 }
0x2bab   :  { %13105 = vmatpush3.bf16.msra.mxu0 %v14529_v6  ;;  %12062 = vmatprep.mubr.msk.f32.mxu0 %vm13981_vm0, %v16079_v20 }
0x2bac   :  { %13106 = vmatprep.subr.bf16.mxu0 %v16081_v63 }
0x2baf   :  { %13108 = vmatpush3.bf16.msra.mxu0 %v14532_v58 }
0x2bb0   :  { %13110 = vmatprep.subr.bf16.mxu0 %v14056_v30 }
0x2c7d   :  { %v12018_v41 = vpop.f32.mrb[36].mxu0 }
0x2c7e   :  { %v3785_v32 = vadd.f32 %v12018_v41, %v14512_v29  ;;  %v3779_v61 = vpop.f32.mrb[37].mxu0 }
0x2c7f   :  { %v3780_v10 = vadd.f32 %v14512_v29, %v3779_v61 }
0x2c80   :  { %v3789_v33 = vmax.f32 %v3785_v32, 0.0 }
0x2c81   :  { %v3788_v53 = vmax.f32 %v3780_v10, 0.0 }
0x2c83   :  { %12051 = vmatprep.mubr.f32.mxu1 %v3788_v53 }
0x2c84   :  { %12052 = vmatmul.mubr.f32.vlgmr.msra.gmra.mrb[38].mxu1 %v3789_v33 }
0x2c85   :  { %12095 = vmatprep.mubr.msk.f32.mxu1 %vm13981_vm0, %v16079_v20 }
0x2d57   :  { %v12053_v1 = vpop.f32.mrb[38].mxu1 }
0x2d58   :  { %v3862_v7 = vadd.f32 %v12053_v1, %v14521_v48  ;;  %v3856_v59 = vpop.f32.mrb[39].mxu1 }
0x2d59   :  { %v3857_v45 = vadd.f32 %v14521_v48, %v3856_v59 }
0x2d5a   :  { %v3866_v44 = vadd.f32 %v3862_v7, %v3706_v5 }
0x2d5b   :  { %v3865_v0 = vadd.f32 %v3857_v45, %v3705_v38 }
0x2d5c   :  { %v3870_v51 = vsel %vm100_vm1, %v3866_v44, 0.0 }
0x2d5d   :  { %3871 = vadd.xlane.f32.xlu1 %v3870_v51  ;;  %v3867_v29 = vsel %vm100_vm1, %v3865_v0, 0.0 }
0x2d5e   :  { %3868 = vadd.xlane.f32.xlu0 %v3867_v29 }
0x2dea   :  { %v3872_v50 = vpop.xlane.xlu1 %3871 }
0x2deb   :  { %v3874_v21 = vmul.f32 0.03125, %v3872_v50  ;;  %v3869_v36 = vpop.xlane.xlu0 %3868 }
0x2dec   :  { %v3873_v15 = vmul.f32 0.03125, %v3869_v36 }
0x2ded   :  { %v3876_v46 = vsub.f32 %v3866_v44, %v3874_v21 }
0x2dee   :  { %v3875_v41 = vsub.f32 %v3865_v0, %v3873_v15 }
0x2def   :  { %v3878_v32 = vmul.f32 %v3876_v46, %v3876_v46 }
0x2df0   :  { %v3877_v61 = vmul.f32 %v3875_v41, %v3875_v41 }
0x2df1   :  { %v3882_v10 = vsel %vm100_vm1, %v3878_v32, 0.0 }
0x2df2   :  { %3883 = vadd.xlane.f32.xlu1 %v3882_v10  ;;  %v3879_v48 = vsel %vm100_vm1, %v3877_v61, 0.0 }
0x2df3   :  { %3880 = vadd.xlane.f32.xlu0 %v3879_v48 }
0x2e7f   :  { %v3884_v38 = vpop.xlane.xlu1 %3883 }
0x2e80   :  { %v3886_v5 = vmul.f32 0.03125, %v3884_v38  ;;  %v3881_v53 = vpop.xlane.xlu0 %3880 }
0x2e81   :  { %v3885_v33 = vmul.f32 0.03125, %v3881_v53 }
0x2e82   :  { %v3888_v1 = vadd.f32 1e-05, %v3886_v5 }
0x2e83   :  { %v3887_v7 = vadd.f32 1e-05, %v3885_v33 }
0x2e84   :  { %13690 = vrsqrt.f32 %v3888_v1 }
0x2e85   :  { %13692 = vrsqrt.f32 %v3887_v7 }
0x2e8e   :  { %v13691_v59 = vpop.eup %13690 }
0x2e8f   :  { %v13693_v45 = vpop.eup %13692  ;;  %v3892_v44 = vmul.f32 %v13691_v59, %v3876_v46 }
0x2e90   :  { %v3891_v0 = vmul.f32 %v13693_v45, %v3875_v41 }
0x2e91   :  { %v3894_v29 = vmul.f32 %v14540_v52, %v3892_v44 }
0x2e92   :  { %v3893_v51 = vmul.f32 %v14540_v52, %v3891_v0 }
0x2e93   :  { %v3896_v21 = vadd.f32 %v14545_v24, %v3894_v29 }
0x2e94   :  { %v3895_v50 = vadd.f32 %v14545_v24, %v3893_v51  ;;  %v16086_v51 = vld [vmem:[#allocation15_spill] sm:$0xff] }
0x2e96   :  { %v3899_v36 = vrot.slane %v3895_v50, 1  ;;  %v16087_v50 = vld [vmem:[#allocation8_spill] sm:$0xff] }
0x2e98   :  { %v3900_v15 = vsel %vm2196_vm8, %v3896_v21, %v3899_v36  ;;  %v16088_v36 = vld [vmem:[#allocation16_spill] sm:$0xff] }
0x2e99   :  { %12063 = vmatmul.mubr.msk.f32.vlgmr.msra.gmra.mrb[38].mxu0 %vm100_vm1, %v3900_v15 }
0x2e9a   :  { %13112 = vmatpush3.bf16.msra.mxu0 %v14056_v30 }
0x2e9b   :  { %13114 = vmatprep.subr.bf16.mxu0 %v14072_v40 }
0x2f6c   :  { %v3969_v32 = vpop.f32.mrb[38].mxu0 }
0x2f6d   :  { %v3970_v46 = vadd.f32 %v14558_v34, %v3969_v32  ;;  %v12064_v41 = vpop.f32.mrb[39].mxu0 }
0x2f6e   :  { %v16089_v41 = vld [vmem:[#allocation17_spill] sm:$0xff] }
0x2f6f   :  { %10802 = vst.msk [vmem:[#allocation5 + $0x2] sm:$0x3] %vm2272_vm9, %v3970_v46  ;;  %v3976_v52 = vsel %vm2272_vm9, %v3970_v46, -inf }
0x2f70   :  { %3977 = vmax.xlane.f32.xlu0 %v3976_v52 }
0x2ffd   :  { %v3978_v61 = vpop.xlane.xlu0 %3977 }
0x2ffe   :  { %v3979_v24 = vsub.f32 %v3970_v46, %v3978_v61 }
0x3000   :  { %v3980_v10 = vmul.f32 1.442695, %v3979_v24 }
0x3002   :  { %13694 = vpow2.f32 %v3980_v10 }
0x300c   :  { %v13695_v48 = vpop.eup %13694 }
0x300d   :  { %v3982_v38 = vsel %vm2272_vm9, %v13695_v48, 0.0 }
0x300e   :  { %3983 = vadd.xlane.f32.xlu1 %v3982_v38 }
0x309b   :  { %v3984_v5 = vpop.xlane.xlu1 %3983 }
0x309c   :  { %13696 = vrcp.f32 %v3984_v5 }
0x30a6   :  { %v13697_v53 = vpop.eup %13696 }
0x30a7   :  { %v3986_v33 = vmul.f32 %v13697_v53, %v13695_v48 }
0x30a9   :  { %v3995_v34 = vrot.slane %v3986_v33, %v14151_v17 }
0x30ab   :  { %v3996_v1 = vcombine.high %v3995_v34, %v3995_v34  ;;  %v4003_v7 = vrot.slane %v3995_v34, %v14151_v17 }
0x30ad   :  { %v4014_v59 = vrot.slane %v4003_v7, %v14159_v23  ;;  %v4010_v45 = vrot.slane %v3996_v1, %v14151_v17 }
0x30af   :  { %v14882_v44 = vsel %vm3987_vm11, %v4014_v59, %v14570_v9  ;;  %v4018_v0 = vrot.slane %v4010_v45, %v14159_v23 }
0x30b0   :  { %12069 = vmatprep.mubr.msk.f32.mxu0 %vm466_vm5, %v14882_v44 }
0x30b1   :  { %v14888_v29 = vsel %vm3987_vm11, %v4018_v0, %v16086_v51 }
0x30b2   :  { %12070 = vmatmul.mubr.msk.f32.vlgmr.msra.gmra.mrb[40].mxu0 %vm466_vm5, %v14888_v29 }
0x30b3   :  { %13116 = vmatpush3.bf16.msra.mxu0 %v14072_v40 }
0x30b4   :  { %13118 = vmatprep.subr.bf16.mxu0 %v16087_v50 }
0x30b7   :  { %13120 = vmatpush3.bf16.msra.mxu0 %v16087_v50 }
0x30b8   :  { %12083 = vmatprep.subr.mxu0 %v16079_v20 }
0x3185   :  { %v12071_v9 = vpop.f32.mrb[40].mxu0 }
0x3186   :  { %v4095_v21 = vpop.f32.mrb[41].mxu0  ;;  %v14900_v32 = vadd.f32 %v16088_v36, %v12071_v9 }
0x3187   :  { %v14897_v15 = vadd.f32 %v16088_v36, %v4095_v21 }
0x3189   :  { %12080 = vmatprep.mubr.msk.f32.mxu0 %vm100_vm1, %v14897_v15 }
0x318a   :  { %12081 = vmatmul.mubr.msk.f32.vlgmr.msra.gmra.mrb[42].mxu0 %vm100_vm1, %v14900_v32 }
0x318b   :  { %12085 = vmatprep.mubr.msk.f32.mxu0 %vm13981_vm0, %v16079_v20 }
0x325d   :  { %v12082_v46 = vpop.f32.mrb[42].mxu0 }
0x325e   :  { %v4182_v52 = vadd.f32 %v16089_v41, %v12082_v46  ;;  %v4176_v61 = vpop.f32.mrb[43].mxu0 }
0x325f   :  { %v4177_v24 = vadd.f32 %v16089_v41, %v4176_v61 }
0x3260   :  { %4263 = vrot.lane.b32.xlu1 %v4182_v52, %s13983_s9 }
0x3261   :  { %4186 = vrot.lane.b32.xlu0 %v4177_v24, %s13983_s9 }
0x32d2   :  { %v4264_v48 = vpop.permute.xlu1 %4263 }
0x32d3   :  { %v4187_v10 = vpop.permute.xlu0 %4186 }
0x32d4   :  { %12084 = vmatpush3.xpose.msk.msra.mxu0 %vm100_vm1, %v4187_v10 }
0x32d5   :  { %12088 = vmatprep.subr.mxu0 %v16079_v20 }
0x32d7   :  { %12086 = vmatmul.mubr.msk.f32.vlgmr.msra.gmra.mrb[44].mxu0 %vm100_vm1, %v4177_v24 }
0x32d8   :  { %12089 = vmatpush3.xpose.msk.msra.mxu0 %vm100_vm1, %v4264_v48  ;;  %12090 = vmatprep.mubr.msk.f32.mxu0 %vm13981_vm0, %v16079_v20 }
0x32d9   :  { %12098 = vmatprep.subr.mxu0 %v16079_v20 }
0x32db   :  { %12091 = vmatmul.mubr.msk.f32.vlgmr.msra.gmra.mrb[46].mxu0 %vm100_vm1, %v4182_v52 }
0x32dc   :  { %12100 = vmatprep.mubr.msk.f32.mxu0 %vm13981_vm0, %v16079_v20 }
0x33aa   :  { %v4258_v38 = vpop.f32.mrb[44].mxu0 }
0x33ab   :  { %v4339_v5 = vmul.f32 0.17677669, %v4258_v38  ;;  %v12087_v53 = vpop.f32.mrb[45].mxu0 }
0x33ad   :  { %v4341_v33 = vadd.f32 %v4339_v5, %v14116_v3 }
0x33ae   :  { %v4335_v34 = vpop.f32.mrb[46].mxu0 }
0x33af   :  { %v4340_v1 = vmul.f32 0.17677669, %v4335_v34  ;;  %v12092_v7 = vpop.f32.mrb[47].mxu0  ;;  %v4343_v59 = vsel %vm788_vm7, %v4341_v33, -inf }
0x33b0   :  { %4344 = vmax.xlane.f32.xlu1 %v4343_v59 }
0x33b1   :  { %v4342_v45 = vadd.f32 %v4340_v1, %v14116_v3 }
0x33b3   :  { %v4346_v0 = vsel %vm788_vm7, %v4342_v45, -inf }
0x33b4   :  { %4347 = vmax.xlane.f32.xlu0 %v4346_v0 }
0x343d   :  { %v4345_v51 = vpop.xlane.xlu1 %4344 }
0x343e   :  { %v4349_v9 = vsub.f32 %v4341_v33, %v4345_v51 }
0x3440   :  { %v4351_v21 = vmul.f32 1.442695, %v4349_v9 }
0x3441   :  { %v4348_v36 = vpop.xlane.xlu0 %4347 }
0x3442   :  { %13698 = vpow2.f32 %v4351_v21  ;;  %v4350_v46 = vsub.f32 %v4342_v45, %v4348_v36  ;;  %v16090_v21 = vld [vmem:[#allocation18_spill] sm:$0xff] }
0x3444   :  { %v4353_v41 = vmul.f32 1.442695, %v4350_v46 }
0x3446   :  { %13700 = vpow2.f32 %v4353_v41 }
0x344c   :  { %v13699_v61 = vpop.eup %13698 }
0x344d   :  { %v4355_v10 = vsel %vm788_vm7, %v13699_v61, 0.0 }
0x344e   :  { %4356 = vadd.xlane.f32.xlu0 %v4355_v10 }
0x3450   :  { %v13701_v48 = vpop.eup %13700 }
0x3451   :  { %v4358_v38 = vsel %vm788_vm7, %v13701_v48, 0.0 }
0x3452   :  { %4359 = vadd.xlane.f32.xlu1 %v4358_v38 }
0x3463   :  { %4441 = vrot.lane.b32.xlu1 %v4182_v52, %s13985_s10 }
0x3464   :  { %4365 = vrot.lane.b32.xlu0 %v4177_v24, %s13985_s10 }
0x34db   :  { %v4357_v5 = vpop.xlane.xlu0 %4356 }
0x34dc   :  { %13702 = vrcp.f32 %v4357_v5 }
0x34df   :  { %v4360_v53 = vpop.xlane.xlu1 %4359  ;;  %v4366_v33 = vpop.permute.xlu0 %4365 }
0x34e0   :  { %13704 = vrcp.f32 %v4360_v53  ;;  %12094 = vmatpush3.msra.mxu1 %v4366_v33 }
0x34e1   :  { %13122 = vmatprep.subr.bf16.mxu1 %v14126_v28 }
0x34e3   :  { %v4442_v34 = vpop.permute.xlu1 %4441 }
0x34e4   :  { %12099 = vmatpush3.msra.mxu0 %v4442_v34 }
0x34e5   :  { %13130 = vmatprep.subr.bf16.mxu0 %v14186_v62 }
0x34e6   :  { %v13703_v1 = vpop.eup %13702 }
0x34e7   :  { %v4363_v7 = vmul.f32 %v13703_v1, %v13699_v61 }
0x34e9   :  { %12096 = vmatmul.mubr.msk.f32.vlgmr.msra.gmra.mrb[40].mxu1 %vm788_vm7, %v4363_v7 }
0x34ea   :  { %v13705_v59 = vpop.eup %13704  ;;  %13124 = vmatpush3.bf16.msra.mxu1 %v14126_v28 }
0x34eb   :  { %v4364_v52 = vmul.f32 %v13705_v59, %v13701_v48  ;;  %13126 = vmatprep.subr.bf16.mxu1 %v14132_v42 }
0x34ed   :  { %12101 = vmatmul.mubr.msk.f32.vlgmr.msra.gmra.mrb[48].mxu0 %vm788_vm7, %v4364_v52 }
0x34ee   :  { %13128 = vmatpush3.bf16.msra.mxu1 %v14132_v42  ;;  %13132 = vmatpush3.bf16.msra.mxu0 %v14186_v62 }
0x34ef   :  { %13134 = vmatprep.subr.bf16.mxu0 %v14190_v4  ;;  %13138 = vmatprep.subr.bf16.mxu1 %v14203_v54 }
0x34f2   :  { %13136 = vmatpush3.bf16.msra.mxu0 %v14190_v4 }
0x34f3   :  { %13170 = vmatprep.subr.bf16.mxu0 %v14294_v37 }
0x35bc   :  { %v4437_v24 = vpop.f32.mrb[40].mxu1 }
0x35bd   :  { %v12097_v45 = vpop.f32.mrb[41].mxu1  ;;  %12111 = vmatprep.mubr.msk.f32.mxu1 %vm100_vm1, %v4437_v24 }
0x35c0   :  { %v4513_v0 = vpop.f32.mrb[48].mxu0 }
0x35c1   :  { %v12102_v51 = vpop.f32.mrb[49].mxu0  ;;  %12112 = vmatmul.mubr.msk.f32.vlgmr.msra.gmra.mrb[42].mxu1 %vm100_vm1, %v4513_v0 }
0x35c2   :  { %13140 = vmatpush3.bf16.msra.mxu1 %v14203_v54 }
0x35c3   :  { %13142 = vmatprep.subr.bf16.mxu1 %v14208_v8 }
0x35c6   :  { %13144 = vmatpush3.bf16.msra.mxu1 %v14208_v8 }
0x35c7   :  { %13146 = vmatprep.subr.bf16.mxu1 %v14219_v11 }
0x35ca   :  { %13148 = vmatpush3.bf16.msra.mxu1 %v14219_v11 }
0x35cb   :  { %13150 = vmatprep.subr.bf16.mxu1 %v14229_v14 }
0x35ce   :  { %13152 = vmatpush3.bf16.msra.mxu1 %v14229_v14 }
0x35cf   :  { %13154 = vmatprep.subr.bf16.mxu1 %v14239_v18 }
0x35d2   :  { %13156 = vmatpush3.bf16.msra.mxu1 %v14239_v18 }
0x35d3   :  { %13158 = vmatprep.subr.bf16.mxu1 %v14249_v22 }
0x35d6   :  { %13160 = vmatpush3.bf16.msra.mxu1 %v14249_v22 }
0x35d7   :  { %13162 = vmatprep.subr.bf16.mxu1 %v14259_v26 }
0x35da   :  { %13164 = vmatpush3.bf16.msra.mxu1 %v14259_v26 }
0x35db   :  { %13166 = vmatprep.subr.bf16.mxu1 %v14280_v57 }
0x35de   :  { %13168 = vmatpush3.bf16.msra.mxu1 %v14280_v57 }
0x35df   :  { %13186 = vmatprep.subr.bf16.mxu1 %v14399_v60 }
0x3694   :  { %v12113_v9 = vpop.f32.mrb[42].mxu1 }
0x3695   :  { %v4595_v36 = vadd.f32 %v16090_v21, %v12113_v9  ;;  %v4589_v46 = vpop.f32.mrb[43].mxu1 }
0x3696   :  { %v4590_v41 = vadd.f32 %v16090_v21, %v4589_v46 }
0x3697   :  { %v4599_v61 = vadd.f32 %v4595_v36, %v14900_v32 }
0x3698   :  { %v4598_v10 = vadd.f32 %v4590_v41, %v14897_v15 }
0x3699   :  { %v4603_v48 = vsel %vm100_vm1, %v4599_v61, 0.0 }
0x369a   :  { %4604 = vadd.xlane.f32.xlu0 %v4603_v48  ;;  %v4600_v38 = vsel %vm100_vm1, %v4598_v10, 0.0 }
0x369b   :  { %4601 = vadd.xlane.f32.xlu1 %v4600_v38  ;;  %v16091_v38 = vld [vmem:[#allocation19_spill] sm:$0xff] }
0x3727   :  { %v4605_v5 = vpop.xlane.xlu0 %4604 }
0x3728   :  { %v4607_v53 = vmul.f32 0.03125, %v4605_v5  ;;  %v4602_v33 = vpop.xlane.xlu1 %4601 }
0x3729   :  { %v4606_v34 = vmul.f32 0.03125, %v4602_v33  ;;  %v16092_v33 = vld [vmem:[#allocation10_spill] sm:$0xff] }
0x372a   :  { %v4609_v1 = vsub.f32 %v4599_v61, %v4607_v53 }
0x372b   :  { %v4608_v7 = vsub.f32 %v4598_v10, %v4606_v34 }
0x372c   :  { %v4611_v59 = vmul.f32 %v4609_v1, %v4609_v1 }
0x372d   :  { %v4610_v52 = vmul.f32 %v4608_v7, %v4608_v7 }
0x372e   :  { %v4615_v24 = vsel %vm100_vm1, %v4611_v59, 0.0  ;;  %v16093_v59 = vld [vmem:[#allocation9_spill] sm:$0xff] }
0x372f   :  { %4616 = vadd.xlane.f32.xlu1 %v4615_v24  ;;  %v4612_v32 = vsel %vm100_vm1, %v4610_v52, 0.0 }
0x3730   :  { %4613 = vadd.xlane.f32.xlu0 %v4612_v32 }
0x37bc   :  { %v4617_v15 = vpop.xlane.xlu1 %4616 }
0x37bd   :  { %v4619_v45 = vmul.f32 0.03125, %v4617_v15  ;;  %v4614_v0 = vpop.xlane.xlu0 %4613 }
0x37be   :  { %v4618_v51 = vmul.f32 0.03125, %v4614_v0 }
0x37bf   :  { %v4621_v9 = vadd.f32 1e-05, %v4619_v45 }
0x37c0   :  { %v4620_v21 = vadd.f32 1e-05, %v4618_v51 }
0x37c1   :  { %13706 = vrsqrt.f32 %v4621_v9 }
0x37c2   :  { %13708 = vrsqrt.f32 %v4620_v21 }
0x37cb   :  { %v13707_v36 = vpop.eup %13706 }
0x37cc   :  { %v13709_v46 = vpop.eup %13708  ;;  %v4625_v41 = vmul.f32 %v13707_v36, %v4609_v1 }
0x37cd   :  { %v4624_v61 = vmul.f32 %v13709_v46, %v4608_v7 }
0x37ce   :  { %v4627_v10 = vmul.f32 %v14671_v39, %v4625_v41 }
0x37cf   :  { %v4626_v48 = vmul.f32 %v14671_v39, %v4624_v61 }
0x37d0   :  { %v4629_v5 = vadd.f32 %v16091_v38, %v4627_v10 }
0x37d1   :  { %v4628_v53 = vadd.f32 %v16091_v38, %v4626_v48 }
0x37d2   :  { %v4631_v34 = vadd.f32 %v4629_v5, %v16092_v33 }
0x37d3   :  { %v4630_v52 = vadd.f32 %v4628_v53, %v16093_v59 }
0x37d4   :  { %v4635_v24 = vsel %vm100_vm1, %v4631_v34, 0.0 }
0x37d5   :  { %4636 = vadd.xlane.f32.xlu1 %v4635_v24  ;;  %v4632_v32 = vsel %vm100_vm1, %v4630_v52, 0.0  ;;  %v16094_v24 = vld [vmem:[#allocation20_spill] sm:$0xff] }
0x37d6   :  { %4633 = vadd.xlane.f32.xlu0 %v4632_v32 }
0x3862   :  { %v4637_v1 = vpop.xlane.xlu1 %4636 }
0x3863   :  { %v4639_v7 = vmul.f32 0.03125, %v4637_v1  ;;  %v4634_v15 = vpop.xlane.xlu0 %4633 }
0x3864   :  { %v4638_v45 = vmul.f32 0.03125, %v4634_v15 }
0x3865   :  { %v4641_v0 = vsub.f32 %v4631_v34, %v4639_v7  ;;  %v16095_v7 = vld [vmem:[#allocation21_spill] sm:$0xff] }
0x3866   :  { %v4640_v39 = vsub.f32 %v4630_v52, %v4638_v45 }
0x3867   :  { %v4643_v51 = vmul.f32 %v4641_v0, %v4641_v0 }
0x3868   :  { %v4642_v9 = vmul.f32 %v4640_v39, %v4640_v39 }
0x3869   :  { %v4647_v21 = vsel %vm100_vm1, %v4643_v51, 0.0  ;;  %v16096_v51 = vld [vmem:[#allocation11_spill] sm:$0xff] }
0x386a   :  { %4648 = vadd.xlane.f32.xlu1 %v4647_v21  ;;  %v4644_v36 = vsel %vm100_vm1, %v4642_v9, 0.0 }
0x386b   :  { %4645 = vadd.xlane.f32.xlu0 %v4644_v36 }
0x38f7   :  { %v4649_v46 = vpop.xlane.xlu1 %4648 }
0x38f8   :  { %v4651_v41 = vmul.f32 0.03125, %v4649_v46  ;;  %v4646_v61 = vpop.xlane.xlu0 %4645 }
0x38f9   :  { %v4650_v10 = vmul.f32 0.03125, %v4646_v61  ;;  %v16098_v61 = vld [vmem:[#allocation14_spill] sm:$0xff] }
0x38fa   :  { %v4653_v48 = vadd.f32 1e-05, %v4651_v41 }
0x38fb   :  { %v4652_v38 = vadd.f32 1e-05, %v4650_v10 }
0x38fc   :  { %13710 = vrsqrt.f32 %v4653_v48 }
0x38fd   :  { %13712 = vrsqrt.f32 %v4652_v38 }
0x3906   :  { %v13711_v5 = vpop.eup %13710 }
0x3907   :  { %v13713_v53 = vpop.eup %13712  ;;  %v4657_v34 = vmul.f32 %v13711_v5, %v4641_v0 }
0x3908   :  { %v4656_v52 = vmul.f32 %v13713_v53, %v4640_v39  ;;  %v16097_v39 = vld [vmem:[#allocation22_spill] sm:$0xff] }
0x3909   :  { %v4659_v32 = vmul.f32 %v16094_v24, %v4657_v34 }
0x390a   :  { %v4658_v1 = vmul.f32 %v16094_v24, %v4656_v52 }
0x390b   :  { %v4661_v45 = vadd.f32 %v16095_v7, %v4659_v32 }
0x390c   :  { %v4660_v15 = vadd.f32 %v16095_v7, %v4658_v1 }
0x390e   :  { %12122 = vmatprep.mubr.msk.f32.mxu0 %vm100_vm1, %v4660_v15 }
0x390f   :  { %12123 = vmatmul.mubr.msk.f32.vlgmr.msra.gmra.mrb[50].mxu0 %vm100_vm1, %v4661_v45 }
0x3910   :  { %13172 = vmatpush3.bf16.msra.mxu0 %v14294_v37 }
0x3911   :  { %13174 = vmatprep.subr.bf16.mxu0 %v16096_v51 }
0x3914   :  { %13176 = vmatpush3.bf16.msra.mxu0 %v16096_v51 }
0x3915   :  { %12171 = vmatprep.subr.mxu0 %v16079_v20 }
0x39e2   :  { %v12124_v0 = vpop.f32.mrb[50].mxu0 }
0x39e3   :  { %v4740_v9 = vadd.f32 %v16097_v39, %v12124_v0  ;;  %v4734_v21 = vpop.f32.mrb[51].mxu0 }
0x39e4   :  { %v4735_v36 = vadd.f32 %v16097_v39, %v4734_v21 }
0x39e5   :  { %v4744_v41 = vmax.f32 %v4740_v9, 0.0 }
0x39e6   :  { %v4743_v46 = vmax.f32 %v4735_v36, 0.0 }
0x39e8   :  { %12157 = vmatprep.mubr.f32.mxu1 %v4743_v46 }
0x39e9   :  { %12158 = vmatmul.mubr.f32.vlgmr.msra.gmra.mrb[44].mxu1 %v4744_v41 }
0x39ea   :  { %13188 = vmatpush3.bf16.msra.mxu1 %v14399_v60 }
0x39eb   :  { %13190 = vmatprep.subr.bf16.mxu1 %v16098_v61 }
0x39ee   :  { %13192 = vmatpush3.bf16.msra.mxu1 %v16098_v61 }
0x39ef   :  { %13225 = vmatprep.subr.bf16.mxu1 %v16081_v63 }
0x3abc   :  { %v12159_v10 = vpop.f32.mrb[44].mxu1 }
0x3abd   :  { %v4817_v48 = vadd.f32 %v14722_v56, %v12159_v10  ;;  %v4811_v38 = vpop.f32.mrb[45].mxu1 }
0x3abe   :  { %v4812_v5 = vadd.f32 %v14722_v56, %v4811_v38 }
0x3abf   :  { %v4821_v53 = vadd.f32 %v4817_v48, %v4661_v45 }
0x3ac0   :  { %v4820_v34 = vadd.f32 %v4812_v5, %v4660_v15 }
0x3ac1   :  { %v4825_v52 = vsel %vm100_vm1, %v4821_v53, 0.0 }
0x3ac2   :  { %4826 = vadd.xlane.f32.xlu1 %v4825_v52  ;;  %v4822_v24 = vsel %vm100_vm1, %v4820_v34, 0.0 }
0x3ac3   :  { %4823 = vadd.xlane.f32.xlu0 %v4822_v24  ;;  %v16099_v24 = vld [vmem:[#allocation23_spill] sm:$0xff] }
0x3b4f   :  { %v4827_v32 = vpop.xlane.xlu1 %4826 }
0x3b50   :  { %v4829_v1 = vmul.f32 0.03125, %v4827_v32  ;;  %v4824_v7 = vpop.xlane.xlu0 %4823 }
0x3b51   :  { %v4828_v0 = vmul.f32 0.03125, %v4824_v7  ;;  %v16100_v7 = vld [vmem:[#allocation24_spill] sm:$0xff] }
0x3b52   :  { %v4831_v39 = vsub.f32 %v4821_v53, %v4829_v1 }
0x3b53   :  { %v4830_v9 = vsub.f32 %v4820_v34, %v4828_v0 }
0x3b54   :  { %v4833_v21 = vmul.f32 %v4831_v39, %v4831_v39 }
0x3b55   :  { %v4832_v36 = vmul.f32 %v4830_v9, %v4830_v9 }
0x3b56   :  { %v4837_v46 = vsel %vm100_vm1, %v4833_v21, 0.0 }
0x3b57   :  { %4838 = vadd.xlane.f32.xlu1 %v4837_v46  ;;  %v4834_v56 = vsel %vm100_vm1, %v4832_v36, 0.0 }
0x3b58   :  { %4835 = vadd.xlane.f32.xlu0 %v4834_v56 }
0x3be4   :  { %v4839_v15 = vpop.xlane.xlu1 %4838 }
0x3be5   :  { %v4841_v45 = vmul.f32 0.03125, %v4839_v15  ;;  %v4836_v41 = vpop.xlane.xlu0 %4835 }
0x3be6   :  { %v4840_v10 = vmul.f32 0.03125, %v4836_v41 }
0x3be7   :  { %v4843_v48 = vadd.f32 1e-05, %v4841_v45 }
0x3be8   :  { %v4842_v38 = vadd.f32 1e-05, %v4840_v10 }
0x3be9   :  { %13714 = vrsqrt.f32 %v4843_v48 }
0x3bea   :  { %13716 = vrsqrt.f32 %v4842_v38 }
0x3bf3   :  { %v13715_v5 = vpop.eup %13714 }
0x3bf4   :  { %v13717_v52 = vpop.eup %13716  ;;  %v4847_v53 = vmul.f32 %v13715_v5, %v4831_v39 }
0x3bf5   :  { %v4846_v34 = vmul.f32 %v13717_v52, %v4830_v9  ;;  %v16101_v9 = vld [vmem:[#allocation25_spill] sm:$0xff] }
0x3bf6   :  { %v4849_v32 = vmul.f32 %v16099_v24, %v4847_v53 }
0x3bf7   :  { %v4848_v1 = vmul.f32 %v16099_v24, %v4846_v34 }
0x3bf8   :  { %v15006_v21 = vadd.f32 %v16100_v7, %v4849_v32 }
0x3bf9   :  { %v15003_v0 = vadd.f32 %v16100_v7, %v4848_v1 }
0x3bfb   :  { %12168 = vmatprep.mubr.msk.f32.mxu0 %vm100_vm1, %v15003_v0 }
0x3bfc   :  { %12169 = vmatmul.mubr.msk.f32.vlgmr.msra.gmra.mrb[52].mxu0 %vm100_vm1, %v15006_v21 }
0x3bfd   :  { %12173 = vmatprep.mubr.msk.f32.mxu0 %vm13981_vm0, %v16079_v20 }
0x3ccf   :  { %v12170_v39 = vpop.f32.mrb[52].mxu0 }
0x3cd0   :  { %v4930_v36 = vadd.f32 %v16101_v9, %v12170_v39  ;;  %v4924_v46 = vpop.f32.mrb[53].mxu0 }
0x3cd1   :  { %v4925_v56 = vadd.f32 %v16101_v9, %v4924_v46 }
0x3cd2   :  { %5011 = vrot.lane.b32.xlu1 %v4930_v36, %s13983_s9 }
0x3cd3   :  { %4934 = vrot.lane.b32.xlu0 %v4925_v56, %s13983_s9 }
0x3d44   :  { %v5012_v45 = vpop.permute.xlu1 %5011 }
0x3d45   :  { %v4935_v15 = vpop.permute.xlu0 %4934 }
0x3d46   :  { %12172 = vmatpush3.xpose.msk.msra.mxu0 %vm100_vm1, %v4935_v15 }
0x3d47   :  { %12176 = vmatprep.subr.mxu0 %v16079_v20 }
0x3d49   :  { %12174 = vmatmul.mubr.msk.f32.vlgmr.msra.gmra.mrb[54].mxu0 %vm100_vm1, %v4925_v56 }
0x3d4a   :  { %12177 = vmatpush3.xpose.msk.msra.mxu0 %vm100_vm1, %v5012_v45  ;;  %12178 = vmatprep.mubr.msk.f32.mxu0 %vm13981_vm0, %v16079_v20 }
0x3d4b   :  { %12181 = vmatprep.subr.mxu0 %v16079_v20 }
0x3d4d   :  { %12179 = vmatmul.mubr.msk.f32.vlgmr.msra.gmra.mrb[56].mxu0 %vm100_vm1, %v4930_v36 }
0x3d4e   :  { %12183 = vmatprep.mubr.msk.f32.mxu0 %vm13981_vm0, %v16079_v20 }
0x3e1c   :  { %v5006_v41 = vpop.f32.mrb[54].mxu0 }
0x3e1d   :  { %v5087_v10 = vmul.f32 0.17677669, %v5006_v41  ;;  %v12175_v48 = vpop.f32.mrb[55].mxu0 }
0x3e1f   :  { %v5089_v38 = vadd.f32 %v5087_v10, %v14116_v3 }
0x3e20   :  { %v5083_v5 = vpop.f32.mrb[56].mxu0 }
0x3e21   :  { %v5088_v52 = vmul.f32 0.17677669, %v5083_v5  ;;  %v12180_v53 = vpop.f32.mrb[57].mxu0  ;;  %v5091_v34 = vsel %vm788_vm7, %v5089_v38, -inf }
0x3e22   :  { %5092 = vmax.xlane.f32.xlu1 %v5091_v34 }
0x3e23   :  { %v5090_v24 = vadd.f32 %v5088_v52, %v14116_v3 }
0x3e25   :  { %v5094_v32 = vsel %vm788_vm7, %v5090_v24, -inf }
0x3e26   :  { %5095 = vmax.xlane.f32.xlu0 %v5094_v32 }
0x3eaf   :  { %v5093_v1 = vpop.xlane.xlu1 %5092 }
0x3eb0   :  { %v5097_v7 = vsub.f32 %v5089_v38, %v5093_v1 }
0x3eb2   :  { %v5099_v39 = vmul.f32 1.442695, %v5097_v7 }
0x3eb3   :  { %v5096_v9 = vpop.xlane.xlu0 %5095 }
0x3eb4   :  { %13718 = vpow2.f32 %v5099_v39  ;;  %v5098_v46 = vsub.f32 %v5090_v24, %v5096_v9 }
0x3eb6   :  { %v5101_v15 = vmul.f32 1.442695, %v5098_v46  ;;  %v16102_v46 = vld [vmem:[#allocation26_spill] sm:$0xff] }
0x3eb8   :  { %13720 = vpow2.f32 %v5101_v15 }
0x3ebe   :  { %v13719_v45 = vpop.eup %13718 }
0x3ebf   :  { %v5103_v41 = vsel %vm788_vm7, %v13719_v45, 0.0 }
0x3ec0   :  { %5104 = vadd.xlane.f32.xlu0 %v5103_v41 }
0x3ec2   :  { %v13721_v10 = vpop.eup %13720 }
0x3ec3   :  { %v5106_v48 = vsel %vm788_vm7, %v13721_v10, 0.0 }
0x3ec4   :  { %5107 = vadd.xlane.f32.xlu1 %v5106_v48 }
0x3ed5   :  { %5189 = vrot.lane.b32.xlu1 %v4930_v36, %s13985_s10 }
0x3ed6   :  { %5113 = vrot.lane.b32.xlu0 %v4925_v56, %s13985_s10 }
0x3f4d   :  { %v5105_v5 = vpop.xlane.xlu0 %5104 }
0x3f4e   :  { %13722 = vrcp.f32 %v5105_v5 }
0x3f51   :  { %v5108_v38 = vpop.xlane.xlu1 %5107  ;;  %v5114_v52 = vpop.permute.xlu0 %5113 }
0x3f52   :  { %13724 = vrcp.f32 %v5108_v38  ;;  %12182 = vmatpush3.msra.mxu0 %v5114_v52 }
0x3f53   :  { %12186 = vmatprep.subr.mxu0 %v16079_v20 }
0x3f55   :  { %v5190_v24 = vpop.permute.xlu1 %5189 }
0x3f58   :  { %v13723_v53 = vpop.eup %13722 }
0x3f59   :  { %v5111_v34 = vmul.f32 %v13723_v53, %v13719_v45 }
0x3f5b   :  { %12184 = vmatmul.mubr.msk.f32.vlgmr.msra.gmra.mrb[58].mxu0 %vm788_vm7, %v5111_v34 }
0x3f5c   :  { %v13725_v32 = vpop.eup %13724  ;;  %12187 = vmatpush3.msra.mxu0 %v5190_v24  ;;  %12188 = vmatprep.mubr.msk.f32.mxu0 %vm13981_vm0, %v16079_v20 }
0x3f5d   :  { %v5112_v36 = vmul.f32 %v13725_v32, %v13721_v10  ;;  %13178 = vmatprep.subr.bf16.mxu0 %v14343_v2 }
0x3f5f   :  { %12189 = vmatmul.mubr.msk.f32.vlgmr.msra.gmra.mrb[60].mxu0 %vm788_vm7, %v5112_v36 }
0x3f60   :  { %13180 = vmatpush3.bf16.msra.mxu0 %v14343_v2 }
0x3f61   :  { %13182 = vmatprep.subr.bf16.mxu0 %v14351_v13 }
0x3f64   :  { %13184 = vmatpush3.bf16.msra.mxu0 %v14351_v13 }
0x3f65   :  { %13194 = vmatprep.subr.bf16.mxu0 %v14417_v12 }
0x402e   :  { %v5185_v56 = vpop.f32.mrb[58].mxu0 }
0x402f   :  { %v12185_v1 = vpop.f32.mrb[59].mxu0  ;;  %12199 = vmatprep.mubr.msk.f32.mxu0 %vm100_vm1, %v5185_v56 }
0x4032   :  { %v5261_v7 = vpop.f32.mrb[60].mxu0 }
0x4033   :  { %v12190_v39 = vpop.f32.mrb[61].mxu0  ;;  %12200 = vmatmul.mubr.msk.f32.vlgmr.msra.gmra.mrb[62].mxu0 %vm100_vm1, %v5261_v7 }
0x4034   :  { %13196 = vmatpush3.bf16.msra.mxu0 %v14417_v12 }
0x4035   :  { %13198 = vmatprep.subr.bf16.mxu0 %v14422_v16 }
0x4038   :  { %13200 = vmatpush3.bf16.msra.mxu0 %v14422_v16 }
0x4039   :  { %13202 = vmatprep.subr.bf16.mxu0 %v14433_v55 }
0x403c   :  { %13204 = vmatpush3.bf16.msra.mxu0 %v14433_v55 }
0x403d   :  { %13206 = vmatprep.subr.bf16.mxu0 %v14443_v27 }
0x4040   :  { %13208 = vmatpush3.bf16.msra.mxu0 %v14443_v27 }
0x4041   :  { %13210 = vmatprep.subr.bf16.mxu0 %v14453_v35 }
0x4044   :  { %13212 = vmatpush3.bf16.msra.mxu0 %v14453_v35 }
0x4045   :  { %13214 = vmatprep.subr.bf16.mxu0 %v14463_v43 }
0x4048   :  { %13216 = vmatpush3.bf16.msra.mxu0 %v14463_v43 }
0x4049   :  { %13218 = vmatprep.subr.bf16.mxu0 %v14473_v47 }
0x404c   :  { %13220 = vmatpush3.bf16.msra.mxu0 %v14473_v47 }
0x404d   :  { %13222 = vmatprep.subr.bf16.mxu0 %v14504_v25 }
0x4050   :  { %13224 = vmatpush3.bf16.msra.mxu0 %v14504_v25 }
0x4051   :  { %12287 = vmatprep.subr.mxu0 %v16079_v20 }
0x4106   :  { %v12201_v9 = vpop.f32.mrb[62].mxu0 }
0x4107   :  { %v5343_v15 = vadd.f32 %v16102_v46, %v12201_v9  ;;  %v5337_v45 = vpop.f32.mrb[63].mxu0 }
0x4108   :  { %v5338_v41 = vadd.f32 %v16102_v46, %v5337_v45 }
0x4109   :  { %v5347_v10 = vadd.f32 %v5343_v15, %v15006_v21 }
0x410a   :  { %v5346_v48 = vadd.f32 %v5338_v41, %v15003_v0 }
0x410b   :  { %v5351_v5 = vsel %vm100_vm1, %v5347_v10, 0.0 }
0x410c   :  { %5352 = vadd.xlane.f32.xlu0 %v5351_v5  ;;  %v5348_v38 = vsel %vm100_vm1, %v5346_v48, 0.0 }
0x410d   :  { %5349 = vadd.xlane.f32.xlu1 %v5348_v38 }
0x4199   :  { %v5353_v52 = vpop.xlane.xlu0 %5352 }
0x419a   :  { %v5355_v53 = vmul.f32 0.03125, %v5353_v52  ;;  %v5350_v34 = vpop.xlane.xlu1 %5349 }
0x419b   :  { %v5354_v24 = vmul.f32 0.03125, %v5350_v34 }
0x419c   :  { %v5357_v32 = vsub.f32 %v5347_v10, %v5355_v53 }
0x419d   :  { %v5356_v36 = vsub.f32 %v5346_v48, %v5354_v24  ;;  %v16103_v24 = vld [vmem:[#allocation12_spill] sm:$0xff] }
0x419e   :  { %v5359_v56 = vmul.f32 %v5357_v32, %v5357_v32 }
0x419f   :  { %v5358_v1 = vmul.f32 %v5356_v36, %v5356_v36 }
0x41a0   :  { %v5363_v7 = vsel %vm100_vm1, %v5359_v56, 0.0 }
0x41a1   :  { %5364 = vadd.xlane.f32.xlu1 %v5363_v7  ;;  %v5360_v21 = vsel %vm100_vm1, %v5358_v1, 0.0  ;;  %v16104_v1 = vld [vmem:[#allocation13_spill] sm:$0xff] }
0x41a2   :  { %5361 = vadd.xlane.f32.xlu0 %v5360_v21 }
0x422e   :  { %v5365_v0 = vpop.xlane.xlu1 %5364 }
0x422f   :  { %v5367_v39 = vmul.f32 0.03125, %v5365_v0  ;;  %v5362_v9 = vpop.xlane.xlu0 %5361 }
0x4230   :  { %v5366_v46 = vmul.f32 0.03125, %v5362_v9 }
0x4231   :  { %v5369_v15 = vadd.f32 1e-05, %v5367_v39 }
0x4232   :  { %v5368_v45 = vadd.f32 1e-05, %v5366_v46 }
0x4233   :  { %13726 = vrsqrt.f32 %v5369_v15 }
0x4234   :  { %13728 = vrsqrt.f32 %v5368_v45 }
0x423d   :  { %v13727_v41 = vpop.eup %13726 }
0x423e   :  { %v13729_v5 = vpop.eup %13728  ;;  %v5373_v10 = vmul.f32 %v13727_v41, %v5357_v32 }
0x423f   :  { %v5372_v48 = vmul.f32 %v13729_v5, %v5356_v36 }
0x4240   :  { %v5375_v38 = vmul.f32 %v14825_v49, %v5373_v10 }
0x4241   :  { %v5374_v52 = vmul.f32 %v14825_v49, %v5372_v48 }
0x4242   :  { %v5377_v53 = vadd.f32 %v14832_v31, %v5375_v38 }
0x4243   :  { %v5376_v34 = vadd.f32 %v14832_v31, %v5374_v52 }
0x4244   :  { %v5379_v56 = vadd.f32 %v5377_v53, %v16103_v24 }
0x4245   :  { %v5378_v7 = vadd.f32 %v5376_v34, %v16104_v1 }
0x4246   :  { %v5383_v21 = vsel %vm100_vm1, %v5379_v56, 0.0 }
0x4247   :  { %5384 = vadd.xlane.f32.xlu1 %v5383_v21  ;;  %v5380_v0 = vsel %vm100_vm1, %v5378_v7, 0.0 }
0x4248   :  { %5381 = vadd.xlane.f32.xlu0 %v5380_v0  ;;  %v15085_v0 = vld [vmem:[%s15991_s3 + $0x15] ss:$0 sm:$0xff] }
0x42d4   :  { %v5385_v32 = vpop.xlane.xlu1 %5384 }
0x42d5   :  { %v5387_v36 = vmul.f32 0.03125, %v5385_v32  ;;  %v5382_v39 = vpop.xlane.xlu0 %5381 }
0x42d6   :  { %v5386_v9 = vmul.f32 0.03125, %v5382_v39  ;;  %v15092_v39 = vld [vmem:[%s15991_s3 + $0x16] ss:$0 sm:$0xff] }
0x42d7   :  { %v5389_v46 = vsub.f32 %v5379_v56, %v5387_v36 }
0x42d8   :  { %v5388_v49 = vsub.f32 %v5378_v7, %v5386_v9 }
0x42d9   :  { %v5391_v15 = vmul.f32 %v5389_v46, %v5389_v46 }
0x42da   :  { %v5390_v45 = vmul.f32 %v5388_v49, %v5388_v49 }
0x42db   :  { %v5395_v31 = vsel %vm100_vm1, %v5391_v15, 0.0 }
0x42dc   :  { %5396 = vadd.xlane.f32.xlu1 %v5395_v31  ;;  %v5392_v41 = vsel %vm100_vm1, %v5390_v45, 0.0 }
0x42dd   :  { %5393 = vadd.xlane.f32.xlu0 %v5392_v41 }
0x4369   :  { %v5397_v5 = vpop.xlane.xlu1 %5396 }
0x436a   :  { %v5399_v10 = vmul.f32 0.03125, %v5397_v5  ;;  %v5394_v48 = vpop.xlane.xlu0 %5393 }
0x436b   :  { %v5398_v38 = vmul.f32 0.03125, %v5394_v48 }
0x436c   :  { %v5401_v52 = vadd.f32 1e-05, %v5399_v10 }
0x436d   :  { %v5400_v53 = vadd.f32 1e-05, %v5398_v38  ;;  %v15116_v38 = vld [vmem:[%s15991_s3 + $0x12] ss:$0 sm:$0xff] }
0x436e   :  { %13730 = vrsqrt.f32 %v5401_v52 }
0x436f   :  { %13732 = vrsqrt.f32 %v5400_v53 }
0x4378   :  { %v13731_v34 = vpop.eup %13730 }
0x4379   :  { %v13733_v21 = vpop.eup %13732  ;;  %v5405_v56 = vmul.f32 %v13731_v34, %v5389_v46 }
0x437a   :  { %v5404_v7 = vmul.f32 %v13733_v21, %v5388_v49  ;;  %v15107_v49 = vld [vmem:[%s15991_s3 + $0x11] ss:$0 sm:$0xff] }
0x437b   :  { %v5407_v32 = vmul.f32 %v15085_v0, %v5405_v56  ;;  %16105 = vst [vmem:[#allocation15_spill] sm:$0xff] %v15107_v49 }
0x437c   :  { %v5406_v36 = vmul.f32 %v15085_v0, %v5404_v7 }
0x437d   :  { %v5409_v15 = vadd.f32 %v15092_v39, %v5407_v32 }
0x437e   :  { %v5408_v9 = vadd.f32 %v15092_v39, %v5406_v36 }
0x4380   :  { %12210 = vmatprep.mubr.msk.f32.mxu1 %vm100_vm1, %v5408_v9 }
0x4381   :  { %12211 = vmatmul.mubr.msk.f32.vlgmr.msra.gmra.mrb[46].mxu1 %vm100_vm1, %v5409_v15 }
0x4382   :  { %13227 = vmatpush3.bf16.msra.mxu1 %v14529_v6  ;;  %12256 = vmatprep.mubr.msk.f32.mxu1 %vm13981_vm0, %v16079_v20 }
0x4383   :  { %13228 = vmatprep.subr.bf16.mxu1 %v16081_v63 }
0x4386   :  { %13230 = vmatpush3.bf16.msra.mxu1 %v14532_v58 }
0x4387   :  { %13232 = vmatprep.subr.bf16.mxu1 %v14056_v30 }
0x4454   :  { %v12212_v46 = vpop.f32.mrb[46].mxu1 }
0x4455   :  { %v5488_v45 = vadd.f32 %v15107_v49, %v12212_v46  ;;  %v5482_v31 = vpop.f32.mrb[47].mxu1 }
0x4456   :  { %v5483_v41 = vadd.f32 %v15107_v49, %v5482_v31 }
0x4457   :  { %v5492_v10 = vmax.f32 %v5488_v45, 0.0 }
0x4458   :  { %v5491_v5 = vmax.f32 %v5483_v41, 0.0 }
0x445a   :  { %12245 = vmatprep.mubr.f32.mxu0 %v5491_v5 }
0x445b   :  { %12246 = vmatmul.mubr.f32.vlgmr.msra.gmra.mrb[64].mxu0 %v5492_v10 }
0x445c   :  { %12289 = vmatprep.mubr.msk.f32.mxu0 %vm13981_vm0, %v16079_v20 }
0x452e   :  { %v12247_v48 = vpop.f32.mrb[64].mxu0 }
0x452f   :  { %v5565_v52 = vadd.f32 %v15116_v38, %v12247_v48  ;;  %v5559_v53 = vpop.f32.mrb[65].mxu0 }
0x4530   :  { %v5560_v34 = vadd.f32 %v15116_v38, %v5559_v53 }
0x4531   :  { %v5569_v21 = vadd.f32 %v5565_v52, %v5409_v15 }
0x4532   :  { %v5568_v56 = vadd.f32 %v5560_v34, %v5408_v9 }
0x4533   :  { %v5573_v7 = vsel %vm100_vm1, %v5569_v21, 0.0 }
0x4534   :  { %5574 = vadd.xlane.f32.xlu1 %v5573_v7  ;;  %v5570_v32 = vsel %vm100_vm1, %v5568_v56, 0.0 }
0x4535   :  { %5571 = vadd.xlane.f32.xlu0 %v5570_v32 }
0x45c1   :  { %v5575_v36 = vpop.xlane.xlu1 %5574 }
0x45c2   :  { %v5577_v46 = vmul.f32 0.03125, %v5575_v36  ;;  %v5572_v45 = vpop.xlane.xlu0 %5571 }
0x45c3   :  { %v5576_v31 = vmul.f32 0.03125, %v5572_v45 }
0x45c4   :  { %v5579_v41 = vsub.f32 %v5569_v21, %v5577_v46  ;;  %v15127_v46 = vld [vmem:[%s15991_s3 + $0x17] ss:$0 sm:$0xff] }
0x45c5   :  { %v5578_v5 = vsub.f32 %v5568_v56, %v5576_v31 }
0x45c6   :  { %v5581_v10 = vmul.f32 %v5579_v41, %v5579_v41 }
0x45c7   :  { %v5580_v49 = vmul.f32 %v5578_v5, %v5578_v5 }
0x45c8   :  { %v5585_v48 = vsel %vm100_vm1, %v5581_v10, 0.0  ;;  %v15134_v10 = vld [vmem:[%s15991_s3 + $0x18] ss:$0 sm:$0xff] }
0x45c9   :  { %5586 = vadd.xlane.f32.xlu1 %v5585_v48  ;;  %v5582_v15 = vsel %vm100_vm1, %v5580_v49, 0.0 }
0x45ca   :  { %5583 = vadd.xlane.f32.xlu0 %v5582_v15 }
0x4656   :  { %v5587_v9 = vpop.xlane.xlu1 %5586 }
0x4657   :  { %v5589_v52 = vmul.f32 0.03125, %v5587_v9  ;;  %v5584_v53 = vpop.xlane.xlu0 %5583 }
0x4658   :  { %v5588_v34 = vmul.f32 0.03125, %v5584_v53  ;;  %v15145_v53 = vld [vmem:[%s15991_s3] ss:$0 sm:$0xff] }
0x4659   :  { %v5591_v7 = vadd.f32 1e-05, %v5589_v52 }
0x465a   :  { %v5590_v32 = vadd.f32 1e-05, %v5588_v34 }
0x465b   :  { %13734 = vrsqrt.f32 %v5591_v7 }
0x465c   :  { %13736 = vrsqrt.f32 %v5590_v32 }
0x4665   :  { %v13735_v36 = vpop.eup %13734 }
0x4666   :  { %v13737_v45 = vpop.eup %13736  ;;  %v5595_v21 = vmul.f32 %v13735_v36, %v5579_v41 }
0x4667   :  { %v5594_v56 = vmul.f32 %v13737_v45, %v5578_v5 }
0x4668   :  { %v5597_v49 = vmul.f32 %v15127_v46, %v5595_v21 }
0x4669   :  { %v5596_v31 = vmul.f32 %v15127_v46, %v5594_v56 }
0x466a   :  { %v5599_v48 = vadd.f32 %v15134_v10, %v5597_v49 }
0x466b   :  { %v5598_v15 = vadd.f32 %v15134_v10, %v5596_v31 }
0x466c   :  { %v5603_v41 = vrot.slane %v5599_v48, 1 }
0x466d   :  { %v5602_v5 = vrot.slane %v5598_v15, 2 }
0x466f   :  { %v5604_v9 = vsel %vm2196_vm8, %v5603_v41, %v5602_v5 }
0x4670   :  { %12257 = vmatmul.mubr.msk.f32.vlgmr.msra.gmra.mrb[48].mxu1 %vm100_vm1, %v5604_v9 }
0x4671   :  { %13234 = vmatpush3.bf16.msra.mxu1 %v14056_v30 }
0x4672   :  { %13236 = vmatprep.subr.bf16.mxu1 %v14072_v40 }
0x4743   :  { %v5673_v52 = vpop.f32.mrb[48].mxu1 }
0x4744   :  { %v5674_v34 = vadd.f32 %v15145_v53, %v5673_v52  ;;  %v12258_v7 = vpop.f32.mrb[49].mxu1 }
0x4746   :  { %10803 = vst.msk [vmem:[#allocation5 + $0x4] sm:$0x3] %vm2272_vm9, %v5674_v34  ;;  %v5681_v32 = vsel %vm2272_vm9, %v5674_v34, -inf }
0x4747   :  { %5682 = vmax.xlane.f32.xlu0 %v5681_v32 }
0x47d4   :  { %v5683_v36 = vpop.xlane.xlu0 %5682 }
0x47d5   :  { %v5684_v45 = vsub.f32 %v5674_v34, %v5683_v36 }
0x47d7   :  { %v5685_v21 = vmul.f32 1.442695, %v5684_v45 }
0x47d9   :  { %13738 = vpow2.f32 %v5685_v21  ;;  %v15171_v21 = vld [vmem:[#allocation2 + $0x20] sm:$0xff] }
0x47da   :  { %16108 = vst [vmem:[#allocation18_spill] sm:$0xff] %v15171_v21 }
0x47e3   :  { %v13739_v56 = vpop.eup %13738 }
0x47e4   :  { %v5687_v49 = vsel %vm2272_vm9, %v13739_v56, 0.0 }
0x47e5   :  { %5688 = vadd.xlane.f32.xlu1 %v5687_v49 }
0x4872   :  { %v5689_v31 = vpop.xlane.xlu1 %5688 }
0x4873   :  { %13740 = vrcp.f32 %v5689_v31  ;;  %v15188_v31 = vld [vmem:[%s15991_s3 + $0x1] ss:$0 sm:$0xff] }
0x4874   :  { %16109 = vst [vmem:[#allocation19_spill] sm:$0xff] %v15188_v31 }
0x487d   :  { %v13741_v48 = vpop.eup %13740 }
0x487e   :  { %v5691_v15 = vmul.f32 %v13741_v48, %v13739_v56 }
0x4880   :  { %v5700_v41 = vrot.slane %v5691_v15, %v14151_v17 }
0x4882   :  { %v5701_v5 = vcombine.high %v5700_v41, %v5700_v41  ;;  %v5708_v9 = vrot.slane %v5700_v41, %v14151_v17 }
0x4884   :  { %v5719_v52 = vrot.slane %v5708_v9, %v14159_v23  ;;  %v5715_v34 = vrot.slane %v5701_v5, %v14151_v17 }
0x4886   :  { %v15157_v7 = vsel %vm5692_vm12, %v5719_v52, %v14882_v44  ;;  %v5723_v32 = vrot.slane %v5715_v34, %v14159_v23 }
0x4887   :  { %16106 = vst [vmem:[#allocation16_spill] sm:$0xff] %v15157_v7  ;;  %12263 = vmatprep.mubr.msk.f32.mxu1 %vm466_vm5, %v15157_v7 }
0x4888   :  { %v15163_v36 = vsel %vm5692_vm12, %v5723_v32, %v14888_v29 }
0x4889   :  { %16107 = vst [vmem:[#allocation17_spill] sm:$0xff] %v15163_v36  ;;  %12264 = vmatmul.mubr.msk.f32.vlgmr.msra.gmra.mrb[50].mxu1 %vm466_vm5, %v15163_v36 }
0x488a   :  { %13238 = vmatpush3.bf16.msra.mxu1 %v14072_v40 }
0x488b   :  { %13240 = vmatprep.subr.bf16.mxu1 %v16087_v50 }
0x488e   :  { %13242 = vmatpush3.bf16.msra.mxu1 %v16087_v50 }
0x488f   :  { %12277 = vmatprep.subr.mxu1 %v16079_v20 }
0x495c   :  { %v12265_v44 = vpop.f32.mrb[50].mxu1 }
0x495d   :  { %v5800_v45 = vpop.f32.mrb[51].mxu1  ;;  %v15177_v29 = vadd.f32 %v15171_v21, %v12265_v44 }
0x495e   :  { %v15174_v56 = vadd.f32 %v15171_v21, %v5800_v45 }
0x4960   :  { %12274 = vmatprep.mubr.msk.f32.mxu1 %vm100_vm1, %v15174_v56 }
0x4961   :  { %12275 = vmatmul.mubr.msk.f32.vlgmr.msra.gmra.mrb[52].mxu1 %vm100_vm1, %v15177_v29 }
0x4962   :  { %12279 = vmatprep.mubr.msk.f32.mxu1 %vm13981_vm0, %v16079_v20 }
0x4a34   :  { %v12276_v49 = vpop.f32.mrb[52].mxu1 }
0x4a35   :  { %v5887_v48 = vadd.f32 %v15188_v31, %v12276_v49  ;;  %v5881_v15 = vpop.f32.mrb[53].mxu1 }
0x4a36   :  { %v5882_v41 = vadd.f32 %v15188_v31, %v5881_v15 }
0x4a37   :  { %5968 = vrot.lane.b32.xlu1 %v5887_v48, %s13983_s9 }
0x4a38   :  { %5891 = vrot.lane.b32.xlu0 %v5882_v41, %s13983_s9 }
0x4aa9   :  { %v5969_v9 = vpop.permute.xlu1 %5968 }
0x4aaa   :  { %v5892_v5 = vpop.permute.xlu0 %5891 }
0x4aab   :  { %12278 = vmatpush3.xpose.msk.msra.mxu1 %vm100_vm1, %v5892_v5 }
0x4aac   :  { %12282 = vmatprep.subr.mxu1 %v16079_v20 }
0x4aae   :  { %12280 = vmatmul.mubr.msk.f32.vlgmr.msra.gmra.mrb[54].mxu1 %vm100_vm1, %v5882_v41 }
0x4aaf   :  { %12283 = vmatpush3.xpose.msk.msra.mxu1 %vm100_vm1, %v5969_v9  ;;  %12284 = vmatprep.mubr.msk.f32.mxu1 %vm13981_vm0, %v16079_v20 }
0x4ab0   :  { %12292 = vmatprep.subr.mxu1 %v16079_v20 }
0x4ab2   :  { %12285 = vmatmul.mubr.msk.f32.vlgmr.msra.gmra.mrb[56].mxu1 %vm100_vm1, %v5887_v48 }
0x4ab3   :  { %12294 = vmatprep.mubr.msk.f32.mxu1 %vm13981_vm0, %v16079_v20 }
0x4b81   :  { %v5963_v52 = vpop.f32.mrb[54].mxu1 }
0x4b82   :  { %v6044_v34 = vmul.f32 0.17677669, %v5963_v52  ;;  %v12281_v32 = vpop.f32.mrb[55].mxu1 }
0x4b84   :  { %v6046_v44 = vadd.f32 %v6044_v34, %v14116_v3 }
0x4b85   :  { %v6040_v45 = vpop.f32.mrb[56].mxu1 }
0x4b86   :  { %v6045_v49 = vmul.f32 0.17677669, %v6040_v45  ;;  %v12286_v15 = vpop.f32.mrb[57].mxu1  ;;  %v6048_v5 = vsel %vm788_vm7, %v6046_v44, -inf }
0x4b87   :  { %6049 = vmax.xlane.f32.xlu1 %v6048_v5 }
0x4b88   :  { %v6047_v9 = vadd.f32 %v6045_v49, %v14116_v3 }
0x4b8a   :  { %v6051_v31 = vsel %vm788_vm7, %v6047_v9, -inf }
0x4b8b   :  { %6052 = vmax.xlane.f32.xlu0 %v6051_v31 }
0x4c14   :  { %v6050_v21 = vpop.xlane.xlu1 %6049 }
0x4c15   :  { %v6054_v50 = vsub.f32 %v6046_v44, %v6050_v21 }
0x4c17   :  { %v6056_v36 = vmul.f32 1.442695, %v6054_v50 }
0x4c18   :  { %v6053_v7 = vpop.xlane.xlu0 %6052 }
0x4c19   :  { %13742 = vpow2.f32 %v6056_v36  ;;  %v6055_v52 = vsub.f32 %v6047_v9, %v6053_v7 }
0x4c1b   :  { %v6058_v32 = vmul.f32 1.442695, %v6055_v52 }
0x4c1d   :  { %13744 = vpow2.f32 %v6058_v32 }
0x4c23   :  { %v13743_v34 = vpop.eup %13742 }
0x4c24   :  { %v6060_v45 = vsel %vm788_vm7, %v13743_v34, 0.0 }
0x4c25   :  { %6061 = vadd.xlane.f32.xlu0 %v6060_v45  ;;  %v15245_v45 = vld [vmem:[%s15991_s3 + $0x2] ss:$0 sm:$0xff] }
0x4c26   :  { %16110 = vst [vmem:[#allocation20_spill] sm:$0xff] %v15245_v45 }
0x4c27   :  { %v13745_v15 = vpop.eup %13744 }
0x4c28   :  { %v6063_v5 = vsel %vm788_vm7, %v13745_v15, 0.0 }
0x4c29   :  { %6064 = vadd.xlane.f32.xlu1 %v6063_v5 }
0x4c3a   :  { %6146 = vrot.lane.b32.xlu1 %v5887_v48, %s13985_s10 }
0x4c3b   :  { %6070 = vrot.lane.b32.xlu0 %v5882_v41, %s13985_s10 }
0x4cb2   :  { %v6062_v31 = vpop.xlane.xlu0 %6061 }
0x4cb3   :  { %13746 = vrcp.f32 %v6062_v31 }
0x4cb6   :  { %v6065_v50 = vpop.xlane.xlu1 %6064  ;;  %v6071_v21 = vpop.permute.xlu0 %6070 }
0x4cb7   :  { %13748 = vrcp.f32 %v6065_v50  ;;  %12288 = vmatpush3.msra.mxu0 %v6071_v21 }
0x4cb8   :  { %13244 = vmatprep.subr.bf16.mxu0 %v14126_v28 }
0x4cba   :  { %v6147_v7 = vpop.permute.xlu1 %6146 }
0x4cbb   :  { %12293 = vmatpush3.msra.mxu1 %v6147_v7 }
0x4cbc   :  { %13252 = vmatprep.subr.bf16.mxu1 %v14186_v62 }
0x4cbd   :  { %v13747_v36 = vpop.eup %13746 }
0x4cbe   :  { %v6068_v44 = vmul.f32 %v13747_v36, %v13743_v34 }
0x4cc0   :  { %12290 = vmatmul.mubr.msk.f32.vlgmr.msra.gmra.mrb[66].mxu0 %vm788_vm7, %v6068_v44 }
0x4cc1   :  { %v13749_v49 = vpop.eup %13748  ;;  %13246 = vmatpush3.bf16.msra.mxu0 %v14126_v28 }
0x4cc2   :  { %v6069_v48 = vmul.f32 %v13749_v49, %v13745_v15  ;;  %13248 = vmatprep.subr.bf16.mxu0 %v14132_v42 }
0x4cc4   :  { %12295 = vmatmul.mubr.msk.f32.vlgmr.msra.gmra.mrb[58].mxu1 %vm788_vm7, %v6069_v48 }
0x4cc5   :  { %13250 = vmatpush3.bf16.msra.mxu0 %v14132_v42  ;;  %13254 = vmatpush3.bf16.msra.mxu1 %v14186_v62 }
0x4cc6   :  { %13256 = vmatprep.subr.bf16.mxu1 %v14190_v4  ;;  %13260 = vmatprep.subr.bf16.mxu0 %v14203_v54 }
0x4cc9   :  { %13258 = vmatpush3.bf16.msra.mxu1 %v14190_v4 }
0x4cca   :  { %13292 = vmatprep.subr.bf16.mxu1 %v14294_v37 }
0x4d93   :  { %v6142_v41 = vpop.f32.mrb[66].mxu0 }
0x4d94   :  { %v12291_v9 = vpop.f32.mrb[67].mxu0  ;;  %12305 = vmatprep.mubr.msk.f32.mxu0 %vm100_vm1, %v6142_v41 }
0x4d97   :  { %v6218_v52 = vpop.f32.mrb[58].mxu1 }
0x4d98   :  { %v12296_v32 = vpop.f32.mrb[59].mxu1  ;;  %12306 = vmatmul.mubr.msk.f32.vlgmr.msra.gmra.mrb[68].mxu0 %vm100_vm1, %v6218_v52 }
0x4d99   :  { %13262 = vmatpush3.bf16.msra.mxu0 %v14203_v54 }
0x4d9a   :  { %13264 = vmatprep.subr.bf16.mxu0 %v14208_v8 }
0x4d9d   :  { %13266 = vmatpush3.bf16.msra.mxu0 %v14208_v8 }
0x4d9e   :  { %13268 = vmatprep.subr.bf16.mxu0 %v14219_v11 }
0x4da1   :  { %13270 = vmatpush3.bf16.msra.mxu0 %v14219_v11 }
0x4da2   :  { %13272 = vmatprep.subr.bf16.mxu0 %v14229_v14 }
0x4da5   :  { %13274 = vmatpush3.bf16.msra.mxu0 %v14229_v14 }
0x4da6   :  { %13276 = vmatprep.subr.bf16.mxu0 %v14239_v18 }
0x4da9   :  { %13278 = vmatpush3.bf16.msra.mxu0 %v14239_v18 }
0x4daa   :  { %13280 = vmatprep.subr.bf16.mxu0 %v14249_v22 }
0x4dad   :  { %13282 = vmatpush3.bf16.msra.mxu0 %v14249_v22 }
0x4dae   :  { %13284 = vmatprep.subr.bf16.mxu0 %v14259_v26 }
0x4db1   :  { %13286 = vmatpush3.bf16.msra.mxu0 %v14259_v26 }
0x4db2   :  { %13288 = vmatprep.subr.bf16.mxu0 %v14280_v57 }
0x4db5   :  { %13290 = vmatpush3.bf16.msra.mxu0 %v14280_v57 }
0x4db6   :  { %13308 = vmatprep.subr.bf16.mxu0 %v14399_v60 }
0x4e6b   :  { %v12307_v34 = vpop.f32.mrb[68].mxu0 }
0x4e6c   :  { %v6300_v15 = vadd.f32 %v15245_v45, %v12307_v34  ;;  %v6294_v5 = vpop.f32.mrb[69].mxu0 }
0x4e6d   :  { %v6295_v31 = vadd.f32 %v15245_v45, %v6294_v5 }
0x4e6e   :  { %v6304_v50 = vadd.f32 %v6300_v15, %v15177_v29 }
0x4e6f   :  { %v6303_v21 = vadd.f32 %v6295_v31, %v15174_v56 }
0x4e70   :  { %v6308_v7 = vsel %vm100_vm1, %v6304_v50, 0.0 }
0x4e71   :  { %6309 = vadd.xlane.f32.xlu0 %v6308_v7  ;;  %v6305_v36 = vsel %vm100_vm1, %v6303_v21, 0.0 }
0x4e72   :  { %6306 = vadd.xlane.f32.xlu1 %v6305_v36 }
0x4efe   :  { %v6310_v44 = vpop.xlane.xlu0 %6309 }
0x4eff   :  { %v6312_v49 = vmul.f32 0.03125, %v6310_v44  ;;  %v6307_v48 = vpop.xlane.xlu1 %6306 }
0x4f00   :  { %v6311_v41 = vmul.f32 0.03125, %v6307_v48 }
0x4f01   :  { %v6314_v9 = vsub.f32 %v6304_v50, %v6312_v49  ;;  %v15258_v49 = vld [vmem:[%s15991_s3 + $0x7] ss:$0 sm:$0xff] }
0x4f02   :  { %v6313_v52 = vsub.f32 %v6303_v21, %v6311_v41 }
0x4f03   :  { %v6316_v32 = vmul.f32 %v6314_v9, %v6314_v9 }
0x4f04   :  { %v6315_v34 = vmul.f32 %v6313_v52, %v6313_v52 }
0x4f05   :  { %v6320_v5 = vsel %vm100_vm1, %v6316_v32, 0.0 }
0x4f06   :  { %6321 = vadd.xlane.f32.xlu1 %v6320_v5  ;;  %v6317_v29 = vsel %vm100_vm1, %v6315_v34, 0.0  ;;  %v15265_v34 = vld [vmem:[%s15991_s3 + $0x8] ss:$0 sm:$0xff] }
0x4f07   :  { %6318 = vadd.xlane.f32.xlu0 %v6317_v29 }
0x4f93   :  { %v6322_v56 = vpop.xlane.xlu1 %6321 }
0x4f94   :  { %v6324_v15 = vmul.f32 0.03125, %v6322_v56  ;;  %v6319_v31 = vpop.xlane.xlu0 %6318 }
0x4f95   :  { %v6323_v7 = vmul.f32 0.03125, %v6319_v31 }
0x4f96   :  { %v6326_v45 = vadd.f32 1e-05, %v6324_v15 }
0x4f97   :  { %v6325_v36 = vadd.f32 1e-05, %v6323_v7 }
0x4f98   :  { %13750 = vrsqrt.f32 %v6326_v45 }
0x4f99   :  { %13752 = vrsqrt.f32 %v6325_v36 }
0x4fa2   :  { %v13751_v44 = vpop.eup %13750 }
0x4fa3   :  { %v13753_v48 = vpop.eup %13752  ;;  %v6330_v50 = vmul.f32 %v13751_v44, %v6314_v9 }
0x4fa4   :  { %v6329_v21 = vmul.f32 %v13753_v48, %v6313_v52 }
0x4fa5   :  { %v6332_v41 = vmul.f32 %v15258_v49, %v6330_v50 }
0x4fa6   :  { %v6331_v32 = vmul.f32 %v15258_v49, %v6329_v21 }
0x4fa7   :  { %v6334_v45 = vadd.f32 %v15265_v34, %v6332_v41 }
0x4fa8   :  { %v6333_v5 = vadd.f32 %v15265_v34, %v6331_v32 }
0x4fa9   :  { %v6336_v9 = vadd.f32 %v6334_v45, %v16092_v33 }
0x4faa   :  { %v6335_v52 = vadd.f32 %v6333_v5, %v16093_v59 }
0x4fab   :  { %v6340_v29 = vsel %vm100_vm1, %v6336_v9, 0.0 }
0x4fac   :  { %6341 = vadd.xlane.f32.xlu1 %v6340_v29  ;;  %v6337_v56 = vsel %vm100_vm1, %v6335_v52, 0.0 }
0x4fad   :  { %6338 = vadd.xlane.f32.xlu0 %v6337_v56 }
0x5039   :  { %v6342_v15 = vpop.xlane.xlu1 %6341 }
0x503a   :  { %v6344_v31 = vmul.f32 0.03125, %v6342_v15  ;;  %v6339_v7 = vpop.xlane.xlu0 %6338 }
0x503b   :  { %v6343_v36 = vmul.f32 0.03125, %v6339_v7 }
0x503c   :  { %v6346_v44 = vsub.f32 %v6336_v9, %v6344_v31  ;;  %v15278_v31 = vld [vmem:[%s15991_s3 + $0x9] ss:$0 sm:$0xff] }
0x503d   :  { %v6345_v48 = vsub.f32 %v6335_v52, %v6343_v36 }
0x503e   :  { %v6348_v50 = vmul.f32 %v6346_v44, %v6346_v44 }
0x503f   :  { %v6347_v21 = vmul.f32 %v6345_v48, %v6345_v48 }
0x5040   :  { %v6352_v41 = vsel %vm100_vm1, %v6348_v50, 0.0 }
0x5041   :  { %6353 = vadd.xlane.f32.xlu1 %v6352_v41  ;;  %v6349_v32 = vsel %vm100_vm1, %v6347_v21, 0.0  ;;  %v15285_v21 = vld [vmem:[%s15991_s3 + $0xa] ss:$0 sm:$0xff] }
0x5042   :  { %6350 = vadd.xlane.f32.xlu0 %v6349_v32  ;;  %16111 = vst [vmem:[#allocation21_spill] sm:$0xff] %v15285_v21 }
0x50ce   :  { %v6354_v45 = vpop.xlane.xlu1 %6353 }
0x50cf   :  { %v6356_v5 = vmul.f32 0.03125, %v6354_v45  ;;  %v6351_v29 = vpop.xlane.xlu0 %6350 }
0x50d0   :  { %v6355_v59 = vmul.f32 0.03125, %v6351_v29 }
0x50d1   :  { %v6358_v33 = vadd.f32 1e-05, %v6356_v5 }
0x50d2   :  { %v6357_v56 = vadd.f32 1e-05, %v6355_v59 }
0x50d3   :  { %13754 = vrsqrt.f32 %v6358_v33 }
0x50d4   :  { %13756 = vrsqrt.f32 %v6357_v56 }
0x50dd   :  { %v13755_v15 = vpop.eup %13754 }
0x50de   :  { %v13757_v7 = vpop.eup %13756  ;;  %v6362_v9 = vmul.f32 %v13755_v15, %v6346_v44  ;;  %v15309_v15 = vld [vmem:[%s15991_s3 + $0x6] ss:$0 sm:$0xff] }
0x50df   :  { %v6361_v52 = vmul.f32 %v13757_v7, %v6345_v48  ;;  %v15298_v48 = vld [vmem:[%s15991_s3 + $0x5] ss:$0 sm:$0xff] }
0x50e0   :  { %v6364_v36 = vmul.f32 %v15278_v31, %v6362_v9  ;;  %16112 = vst [vmem:[#allocation22_spill] sm:$0xff] %v15298_v48 }
0x50e1   :  { %v6363_v50 = vmul.f32 %v15278_v31, %v6361_v52 }
0x50e2   :  { %v6366_v59 = vadd.f32 %v15285_v21, %v6364_v36 }
0x50e3   :  { %v6365_v33 = vadd.f32 %v15285_v21, %v6363_v50 }
0x50e5   :  { %12316 = vmatprep.mubr.msk.f32.mxu1 %vm100_vm1, %v6365_v33 }
0x50e6   :  { %12317 = vmatmul.mubr.msk.f32.vlgmr.msra.gmra.mrb[60].mxu1 %vm100_vm1, %v6366_v59 }
0x50e7   :  { %13294 = vmatpush3.bf16.msra.mxu1 %v14294_v37 }
0x50e8   :  { %13296 = vmatprep.subr.bf16.mxu1 %v16096_v51 }
0x50eb   :  { %13298 = vmatpush3.bf16.msra.mxu1 %v16096_v51 }
0x50ec   :  { %12365 = vmatprep.subr.mxu1 %v16079_v20 }
0x51b9   :  { %v12318_v44 = vpop.f32.mrb[60].mxu1 }
0x51ba   :  { %v6445_v41 = vadd.f32 %v15298_v48, %v12318_v44  ;;  %v6439_v32 = vpop.f32.mrb[61].mxu1 }
0x51bb   :  { %v6440_v45 = vadd.f32 %v15298_v48, %v6439_v32 }
0x51bc   :  { %v6449_v29 = vmax.f32 %v6445_v41, 0.0 }
0x51bd   :  { %v6448_v5 = vmax.f32 %v6440_v45, 0.0 }
0x51bf   :  { %12351 = vmatprep.mubr.f32.mxu0 %v6448_v5 }
0x51c0   :  { %12352 = vmatmul.mubr.f32.vlgmr.msra.gmra.mrb[70].mxu0 %v6449_v29 }
0x51c1   :  { %13310 = vmatpush3.bf16.msra.mxu0 %v14399_v60 }
0x51c2   :  { %13312 = vmatprep.subr.bf16.mxu0 %v16098_v61 }
0x51c5   :  { %13314 = vmatpush3.bf16.msra.mxu0 %v16098_v61 }
0x51c6   :  { %13347 = vmatprep.subr.bf16.mxu0 %v16081_v63 }
0x5293   :  { %v12353_v56 = vpop.f32.mrb[70].mxu0 }
0x5294   :  { %v6522_v7 = vadd.f32 %v15309_v15, %v12353_v56  ;;  %v6516_v9 = vpop.f32.mrb[71].mxu0 }
0x5295   :  { %v6517_v52 = vadd.f32 %v15309_v15, %v6516_v9 }
0x5296   :  { %v6526_v36 = vadd.f32 %v6522_v7, %v6366_v59 }
0x5297   :  { %v6525_v50 = vadd.f32 %v6517_v52, %v6365_v33 }
0x5298   :  { %v6530_v44 = vsel %vm100_vm1, %v6526_v36, 0.0 }
0x5299   :  { %6531 = vadd.xlane.f32.xlu1 %v6530_v44  ;;  %v6527_v41 = vsel %vm100_vm1, %v6525_v50, 0.0 }
0x529a   :  { %6528 = vadd.xlane.f32.xlu0 %v6527_v41 }
0x5326   :  { %v6532_v32 = vpop.xlane.xlu1 %6531 }
0x5327   :  { %v6534_v45 = vmul.f32 0.03125, %v6532_v32  ;;  %v6529_v5 = vpop.xlane.xlu0 %6528 }
0x5328   :  { %v6533_v29 = vmul.f32 0.03125, %v6529_v5 }
0x5329   :  { %v6536_v61 = vsub.f32 %v6526_v36, %v6534_v45 }
0x532a   :  { %v6535_v48 = vsub.f32 %v6525_v50, %v6533_v29  ;;  %v15327_v29 = vld [vmem:[%s15991_s3 + $0xc] ss:$0 sm:$0xff] }
0x532b   :  { %v6538_v51 = vmul.f32 %v6536_v61, %v6536_v61  ;;  %16114 = vst [vmem:[#allocation24_spill] sm:$0xff] %v15327_v29 }
0x532c   :  { %v6537_v21 = vmul.f32 %v6535_v48, %v6535_v48 }
0x532d   :  { %v6542_v56 = vsel %vm100_vm1, %v6538_v51, 0.0  ;;  %v15320_v51 = vld [vmem:[%s15991_s3 + $0xb] ss:$0 sm:$0xff] }
0x532e   :  { %6543 = vadd.xlane.f32.xlu1 %v6542_v56  ;;  %v6539_v59 = vsel %vm100_vm1, %v6537_v21, 0.0  ;;  %16113 = vst [vmem:[#allocation23_spill] sm:$0xff] %v15320_v51 }
0x532f   :  { %6540 = vadd.xlane.f32.xlu0 %v6539_v59  ;;  %v15344_v59 = vld [vmem:[%s15991_s3 + $0xd] ss:$0 sm:$0xff] }
0x5330   :  { %16115 = vst [vmem:[#allocation25_spill] sm:$0xff] %v15344_v59 }
0x53bb   :  { %v6544_v33 = vpop.xlane.xlu1 %6543 }
0x53bc   :  { %v6546_v7 = vmul.f32 0.03125, %v6544_v33  ;;  %v6541_v9 = vpop.xlane.xlu0 %6540 }
0x53bd   :  { %v6545_v52 = vmul.f32 0.03125, %v6541_v9 }
0x53be   :  { %v6548_v44 = vadd.f32 1e-05, %v6546_v7 }
0x53bf   :  { %v6547_v41 = vadd.f32 1e-05, %v6545_v52 }
0x53c0   :  { %13758 = vrsqrt.f32 %v6548_v44 }
0x53c1   :  { %13760 = vrsqrt.f32 %v6547_v41 }
0x53ca   :  { %v13759_v32 = vpop.eup %13758 }
0x53cb   :  { %v13761_v5 = vpop.eup %13760  ;;  %v6552_v36 = vmul.f32 %v13759_v32, %v6536_v61 }
0x53cc   :  { %v6551_v50 = vmul.f32 %v13761_v5, %v6535_v48 }
0x53cd   :  { %v6554_v21 = vmul.f32 %v15320_v51, %v6552_v36 }
0x53ce   :  { %v6553_v45 = vmul.f32 %v15320_v51, %v6551_v50 }
0x53cf   :  { %v15333_v61 = vadd.f32 %v15327_v29, %v6554_v21 }
0x53d0   :  { %v15330_v56 = vadd.f32 %v15327_v29, %v6553_v45 }
0x53d2   :  { %12362 = vmatprep.mubr.msk.f32.mxu1 %vm100_vm1, %v15330_v56 }
0x53d3   :  { %12363 = vmatmul.mubr.msk.f32.vlgmr.msra.gmra.mrb[62].mxu1 %vm100_vm1, %v15333_v61 }
0x53d4   :  { %12367 = vmatprep.mubr.msk.f32.mxu1 %vm13981_vm0, %v16079_v20 }
0x54a6   :  { %v12364_v48 = vpop.f32.mrb[62].mxu1 }
0x54a7   :  { %v6635_v33 = vadd.f32 %v15344_v59, %v12364_v48  ;;  %v6629_v7 = vpop.f32.mrb[63].mxu1 }
0x54a8   :  { %v6630_v9 = vadd.f32 %v15344_v59, %v6629_v7 }
0x54a9   :  { %6716 = vrot.lane.b32.xlu1 %v6635_v33, %s13983_s9 }
0x54aa   :  { %6639 = vrot.lane.b32.xlu0 %v6630_v9, %s13983_s9 }
0x551b   :  { %v6717_v44 = vpop.permute.xlu1 %6716 }
0x551c   :  { %v6640_v52 = vpop.permute.xlu0 %6639 }
0x551d   :  { %12366 = vmatpush3.xpose.msk.msra.mxu1 %vm100_vm1, %v6640_v52 }
0x551e   :  { %12370 = vmatprep.subr.mxu1 %v16079_v20 }
0x5520   :  { %12368 = vmatmul.mubr.msk.f32.vlgmr.msra.gmra.mrb[64].mxu1 %vm100_vm1, %v6630_v9 }
0x5521   :  { %12371 = vmatpush3.xpose.msk.msra.mxu1 %vm100_vm1, %v6717_v44  ;;  %12372 = vmatprep.mubr.msk.f32.mxu1 %vm13981_vm0, %v16079_v20 }
0x5522   :  { %12375 = vmatprep.subr.mxu1 %v16079_v20 }
0x5524   :  { %12373 = vmatmul.mubr.msk.f32.vlgmr.msra.gmra.mrb[66].mxu1 %vm100_vm1, %v6635_v33 }
0x5525   :  { %12377 = vmatprep.mubr.msk.f32.mxu1 %vm13981_vm0, %v16079_v20 }
0x55f3   :  { %v6711_v41 = vpop.f32.mrb[64].mxu1 }
0x55f4   :  { %v6792_v32 = vmul.f32 0.17677669, %v6711_v41  ;;  %v12369_v5 = vpop.f32.mrb[65].mxu1 }
0x55f6   :  { %v6794_v36 = vadd.f32 %v6792_v32, %v14116_v3 }
0x55f7   :  { %v6788_v50 = vpop.f32.mrb[66].mxu1 }
0x55f8   :  { %v6793_v21 = vmul.f32 0.17677669, %v6788_v50  ;;  %v12374_v45 = vpop.f32.mrb[67].mxu1  ;;  %v6796_v48 = vsel %vm788_vm7, %v6794_v36, -inf }
0x55f9   :  { %6797 = vmax.xlane.f32.xlu1 %v6796_v48 }
0x55fa   :  { %v6795_v7 = vadd.f32 %v6793_v21, %v14116_v3 }
0x55fc   :  { %v6799_v52 = vsel %vm788_vm7, %v6795_v7, -inf }
0x55fd   :  { %6800 = vmax.xlane.f32.xlu0 %v6799_v52 }
0x5686   :  { %v6798_v44 = vpop.xlane.xlu1 %6797 }
0x5687   :  { %v6802_v59 = vsub.f32 %v6794_v36, %v6798_v44 }
0x5689   :  { %v6804_v29 = vmul.f32 1.442695, %v6802_v59 }
0x568a   :  { %v6801_v51 = vpop.xlane.xlu0 %6800 }
0x568b   :  { %13762 = vpow2.f32 %v6804_v29  ;;  %v6803_v41 = vsub.f32 %v6795_v7, %v6801_v51 }
0x568d   :  { %v6806_v5 = vmul.f32 1.442695, %v6803_v41 }
0x568f   :  { %13764 = vpow2.f32 %v6806_v5 }
0x5695   :  { %v13763_v32 = vpop.eup %13762 }
0x5696   :  { %v6808_v50 = vsel %vm788_vm7, %v13763_v32, 0.0 }
0x5697   :  { %6809 = vadd.xlane.f32.xlu0 %v6808_v50  ;;  %v15399_v50 = vld [vmem:[%s15991_s3 + $0xe] ss:$0 sm:$0xff] }
0x5698   :  { %16116 = vst [vmem:[#allocation26_spill] sm:$0xff] %v15399_v50 }
0x5699   :  { %v13765_v45 = vpop.eup %13764 }
0x569a   :  { %v6811_v48 = vsel %vm788_vm7, %v13765_v45, 0.0 }
0x569b   :  { %6812 = vadd.xlane.f32.xlu1 %v6811_v48 }
0x56ac   :  { %6894 = vrot.lane.b32.xlu1 %v6635_v33, %s13985_s10 }
0x56ad   :  { %6818 = vrot.lane.b32.xlu0 %v6630_v9, %s13985_s10 }
0x5724   :  { %v6810_v21 = vpop.xlane.xlu0 %6809 }
0x5725   :  { %13766 = vrcp.f32 %v6810_v21 }
0x5728   :  { %v6813_v59 = vpop.xlane.xlu1 %6812  ;;  %v6819_v36 = vpop.permute.xlu0 %6818 }
0x5729   :  { %13768 = vrcp.f32 %v6813_v59  ;;  %12376 = vmatpush3.msra.mxu1 %v6819_v36 }
0x572a   :  { %12380 = vmatprep.subr.mxu1 %v16079_v20 }
0x572c   :  { %v6895_v7 = vpop.permute.xlu1 %6894 }
0x572f   :  { %v13767_v51 = vpop.eup %13766 }
0x5730   :  { %v6816_v29 = vmul.f32 %v13767_v51, %v13763_v32 }
0x5732   :  { %12378 = vmatmul.mubr.msk.f32.vlgmr.msra.gmra.mrb[68].mxu1 %vm788_vm7, %v6816_v29 }
0x5733   :  { %v13769_v52 = vpop.eup %13768  ;;  %12381 = vmatpush3.msra.mxu1 %v6895_v7  ;;  %12382 = vmatprep.mubr.msk.f32.mxu1 %vm13981_vm0, %v16079_v20 }
0x5734   :  { %v6817_v33 = vmul.f32 %v13769_v52, %v13765_v45  ;;  %13300 = vmatprep.subr.bf16.mxu1 %v14343_v2 }
0x5736   :  { %12383 = vmatmul.mubr.msk.f32.vlgmr.msra.gmra.mrb[70].mxu1 %vm788_vm7, %v6817_v33 }
0x5737   :  { %13302 = vmatpush3.bf16.msra.mxu1 %v14343_v2 }
0x5738   :  { %13304 = vmatprep.subr.bf16.mxu1 %v14351_v13 }
0x573b   :  { %13306 = vmatpush3.bf16.msra.mxu1 %v14351_v13 }
0x573c   :  { %13316 = vmatprep.subr.bf16.mxu1 %v14417_v12 }
0x5805   :  { %v6890_v9 = vpop.f32.mrb[68].mxu1 }
0x5806   :  { %v12379_v44 = vpop.f32.mrb[69].mxu1  ;;  %12393 = vmatprep.mubr.msk.f32.mxu1 %vm100_vm1, %v6890_v9 }
0x5809   :  { %v6966_v41 = vpop.f32.mrb[70].mxu1 }
0x580a   :  { %v12384_v5 = vpop.f32.mrb[71].mxu1  ;;  %12394 = vmatmul.mubr.msk.f32.vlgmr.msra.gmra.mrb[72].mxu1 %vm100_vm1, %v6966_v41 }
0x580b   :  { %13318 = vmatpush3.bf16.msra.mxu1 %v14417_v12 }
0x580c   :  { %13320 = vmatprep.subr.bf16.mxu1 %v14422_v16 }
0x580f   :  { %13322 = vmatpush3.bf16.msra.mxu1 %v14422_v16 }
0x5810   :  { %13324 = vmatprep.subr.bf16.mxu1 %v14433_v55 }
0x5813   :  { %13326 = vmatpush3.bf16.msra.mxu1 %v14433_v55 }
0x5814   :  { %13328 = vmatprep.subr.bf16.mxu1 %v14443_v27 }
0x5817   :  { %13330 = vmatpush3.bf16.msra.mxu1 %v14443_v27 }
0x5818   :  { %13332 = vmatprep.subr.bf16.mxu1 %v14453_v35 }
0x581b   :  { %13334 = vmatpush3.bf16.msra.mxu1 %v14453_v35 }
0x581c   :  { %13336 = vmatprep.subr.bf16.mxu1 %v14463_v43 }
0x581f   :  { %13338 = vmatpush3.bf16.msra.mxu1 %v14463_v43 }
0x5820   :  { %13340 = vmatprep.subr.bf16.mxu1 %v14473_v47 }
0x5823   :  { %13342 = vmatpush3.bf16.msra.mxu1 %v14473_v47 }
0x5824   :  { %13344 = vmatprep.subr.bf16.mxu1 %v14504_v25 }
0x5827   :  { %13346 = vmatpush3.bf16.msra.mxu1 %v14504_v25 }
0x5828   :  { %12481 = vmatprep.subr.mxu1 %v16079_v20 }
0x58dd   :  { %v12395_v32 = vpop.f32.mrb[72].mxu1 }
0x58de   :  { %v7048_v45 = vadd.f32 %v15399_v50, %v12395_v32  ;;  %v7042_v48 = vpop.f32.mrb[73].mxu1 }
0x58df   :  { %v7043_v21 = vadd.f32 %v15399_v50, %v7042_v48 }
0x58e0   :  { %v7052_v59 = vadd.f32 %v7048_v45, %v15333_v61 }
0x58e1   :  { %v7051_v36 = vadd.f32 %v7043_v21, %v15330_v56 }
0x58e2   :  { %v7056_v51 = vsel %vm100_vm1, %v7052_v59, 0.0 }
0x58e3   :  { %7057 = vadd.xlane.f32.xlu0 %v7056_v51  ;;  %v7053_v29 = vsel %vm100_vm1, %v7051_v36, 0.0 }
0x58e4   :  { %7054 = vadd.xlane.f32.xlu1 %v7053_v29 }
0x5970   :  { %v7058_v7 = vpop.xlane.xlu0 %7057 }
0x5971   :  { %v7060_v52 = vmul.f32 0.03125, %v7058_v7  ;;  %v7055_v33 = vpop.xlane.xlu1 %7054 }
0x5972   :  { %v7059_v9 = vmul.f32 0.03125, %v7055_v33 }
0x5973   :  { %v7062_v44 = vsub.f32 %v7052_v59, %v7060_v52  ;;  %v15412_v52 = vld [vmem:[%s15991_s3 + $0x13] ss:$0 sm:$0xff] }
0x5974   :  { %v7061_v41 = vsub.f32 %v7051_v36, %v7059_v9 }
0x5975   :  { %v7064_v5 = vmul.f32 %v7062_v44, %v7062_v44 }
0x5976   :  { %v7063_v32 = vmul.f32 %v7061_v41, %v7061_v41 }
0x5977   :  { %v7068_v48 = vsel %vm100_vm1, %v7064_v5, 0.0 }
0x5978   :  { %7069 = vadd.xlane.f32.xlu1 %v7068_v48  ;;  %v7065_v61 = vsel %vm100_vm1, %v7063_v32, 0.0  ;;  %v15419_v32 = vld [vmem:[%s15991_s3 + $0x14] ss:$0 sm:$0xff] }
0x5979   :  { %7066 = vadd.xlane.f32.xlu0 %v7065_v61 }
0x5a05   :  { %v7070_v56 = vpop.xlane.xlu1 %7069 }
0x5a06   :  { %v7072_v45 = vmul.f32 0.03125, %v7070_v56  ;;  %v7067_v21 = vpop.xlane.xlu0 %7066 }
0x5a07   :  { %v7071_v51 = vmul.f32 0.03125, %v7067_v21 }
0x5a08   :  { %v7074_v50 = vadd.f32 1e-05, %v7072_v45 }
0x5a09   :  { %v7073_v29 = vadd.f32 1e-05, %v7071_v51 }
0x5a0a   :  { %13770 = vrsqrt.f32 %v7074_v50 }
0x5a0b   :  { %13772 = vrsqrt.f32 %v7073_v29 }
0x5a14   :  { %v13771_v7 = vpop.eup %13770 }
0x5a15   :  { %v13773_v33 = vpop.eup %13772  ;;  %v7078_v59 = vmul.f32 %v13771_v7, %v7062_v44 }
0x5a16   :  { %v7077_v36 = vmul.f32 %v13773_v33, %v7061_v41 }
0x5a17   :  { %v7080_v9 = vmul.f32 %v15412_v52, %v7078_v59 }
0x5a18   :  { %v7079_v5 = vmul.f32 %v15412_v52, %v7077_v36 }
0x5a19   :  { %v7082_v50 = vadd.f32 %v15419_v32, %v7080_v9 }
0x5a1a   :  { %v7081_v48 = vadd.f32 %v15419_v32, %v7079_v5 }
0x5a1b   :  { %v7084_v44 = vadd.f32 %v7082_v50, %v16103_v24 }
0x5a1c   :  { %v7083_v41 = vadd.f32 %v7081_v48, %v16104_v1 }
0x5a1d   :  { %v7088_v61 = vsel %vm100_vm1, %v7084_v44, 0.0 }
0x5a1e   :  { %7089 = vadd.xlane.f32.xlu1 %v7088_v61  ;;  %v7085_v56 = vsel %vm100_vm1, %v7083_v41, 0.0 }
0x5a1f   :  { %7086 = vadd.xlane.f32.xlu0 %v7085_v56 }
0x5aab   :  { %v7090_v45 = vpop.xlane.xlu1 %7089 }
0x5aac   :  { %v7092_v21 = vmul.f32 0.03125, %v7090_v45  ;;  %v7087_v51 = vpop.xlane.xlu0 %7086 }
0x5aad   :  { %v7091_v29 = vmul.f32 0.03125, %v7087_v51 }
0x5aae   :  { %v7094_v7 = vsub.f32 %v7084_v44, %v7092_v21 }
0x5aaf   :  { %v7093_v33 = vsub.f32 %v7083_v41, %v7091_v29 }
0x5ab0   :  { %v7096_v59 = vmul.f32 %v7094_v7, %v7094_v7 }
0x5ab1   :  { %v7095_v36 = vmul.f32 %v7093_v33, %v7093_v33 }
0x5ab2   :  { %v7100_v9 = vsel %vm100_vm1, %v7096_v59, 0.0 }
0x5ab3   :  { %7101 = vadd.xlane.f32.xlu1 %v7100_v9  ;;  %v7097_v5 = vsel %vm100_vm1, %v7095_v36, 0.0 }
0x5ab4   :  { %7098 = vadd.xlane.f32.xlu0 %v7097_v5 }
0x5b40   :  { %v7102_v50 = vpop.xlane.xlu1 %7101 }
0x5b41   :  { %v7104_v48 = vmul.f32 0.03125, %v7102_v50  ;;  %v7099_v61 = vpop.xlane.xlu0 %7098 }
0x5b42   :  { %v7103_v1 = vmul.f32 0.03125, %v7099_v61 }
0x5b43   :  { %v7106_v24 = vadd.f32 1e-05, %v7104_v48 }
0x5b44   :  { %v7105_v56 = vadd.f32 1e-05, %v7103_v1  ;;  %v16117_v1 = vld [vmem:[#allocation15_spill] sm:$0xff] }
0x5b45   :  { %13774 = vrsqrt.f32 %v7106_v24 }
0x5b46   :  { %13776 = vrsqrt.f32 %v7105_v56 }
0x5b4f   :  { %v13775_v45 = vpop.eup %13774 }
0x5b50   :  { %v13777_v51 = vpop.eup %13776  ;;  %v7110_v44 = vmul.f32 %v13775_v45, %v7094_v7 }
0x5b51   :  { %v7109_v41 = vmul.f32 %v13777_v51, %v7093_v33 }
0x5b52   :  { %v7112_v21 = vmul.f32 %v15085_v0, %v7110_v44 }
0x5b53   :  { %v7111_v29 = vmul.f32 %v15085_v0, %v7109_v41 }
0x5b54   :  { %v7114_v36 = vadd.f32 %v15092_v39, %v7112_v21 }
0x5b55   :  { %v7113_v59 = vadd.f32 %v15092_v39, %v7111_v29 }
0x5b57   :  { %12404 = vmatprep.mubr.msk.f32.mxu0 %vm100_vm1, %v7113_v59 }
0x5b58   :  { %12405 = vmatmul.mubr.msk.f32.vlgmr.msra.gmra.mrb[72].mxu0 %vm100_vm1, %v7114_v36 }
0x5b59   :  { %13349 = vmatpush3.bf16.msra.mxu0 %v14529_v6  ;;  %12450 = vmatprep.mubr.msk.f32.mxu0 %vm13981_vm0, %v16079_v20 }
0x5b5a   :  { %13350 = vmatprep.subr.bf16.mxu0 %v16081_v63 }
0x5b5d   :  { %13352 = vmatpush3.bf16.msra.mxu0 %v14532_v58 }
0x5b5e   :  { %13354 = vmatprep.subr.bf16.mxu0 %v14056_v30 }
0x5c2b   :  { %v12406_v24 = vpop.f32.mrb[72].mxu0 }
0x5c2c   :  { %v7193_v0 = vadd.f32 %v16117_v1, %v12406_v24  ;;  %v7187_v7 = vpop.f32.mrb[73].mxu0 }
0x5c2d   :  { %v7188_v39 = vadd.f32 %v16117_v1, %v7187_v7 }
0x5c2e   :  { %v7197_v9 = vmax.f32 %v7193_v0, 0.0 }
0x5c2f   :  { %v7196_v33 = vmax.f32 %v7188_v39, 0.0 }
0x5c31   :  { %12439 = vmatprep.mubr.f32.mxu1 %v7196_v33 }
0x5c32   :  { %12440 = vmatmul.mubr.f32.vlgmr.msra.gmra.mrb[74].mxu1 %v7197_v9 }
0x5c33   :  { %12483 = vmatprep.mubr.msk.f32.mxu1 %vm13981_vm0, %v16079_v20 }
0x5d05   :  { %v12441_v5 = vpop.f32.mrb[74].mxu1 }
0x5d06   :  { %v7270_v50 = vadd.f32 %v15116_v38, %v12441_v5  ;;  %v7264_v48 = vpop.f32.mrb[75].mxu1 }
0x5d07   :  { %v7265_v61 = vadd.f32 %v15116_v38, %v7264_v48 }
0x5d08   :  { %v7274_v56 = vadd.f32 %v7270_v50, %v7114_v36 }
0x5d09   :  { %v7273_v45 = vadd.f32 %v7265_v61, %v7113_v59 }
0x5d0a   :  { %v7278_v51 = vsel %vm100_vm1, %v7274_v56, 0.0 }
0x5d0b   :  { %7279 = vadd.xlane.f32.xlu1 %v7278_v51  ;;  %v7275_v44 = vsel %vm100_vm1, %v7273_v45, 0.0 }
0x5d0c   :  { %7276 = vadd.xlane.f32.xlu0 %v7275_v44 }
0x5d98   :  { %v7280_v41 = vpop.xlane.xlu1 %7279 }
0x5d99   :  { %v7282_v21 = vmul.f32 0.03125, %v7280_v41  ;;  %v7277_v29 = vpop.xlane.xlu0 %7276 }
0x5d9a   :  { %v7281_v24 = vmul.f32 0.03125, %v7277_v29 }
0x5d9b   :  { %v7284_v1 = vsub.f32 %v7274_v56, %v7282_v21 }
0x5d9c   :  { %v7283_v0 = vsub.f32 %v7273_v45, %v7281_v24 }
0x5d9d   :  { %v7286_v7 = vmul.f32 %v7284_v1, %v7284_v1 }
0x5d9e   :  { %v7285_v39 = vmul.f32 %v7283_v0, %v7283_v0 }
0x5d9f   :  { %v7290_v33 = vsel %vm100_vm1, %v7286_v7, 0.0 }
0x5da0   :  { %7291 = vadd.xlane.f32.xlu1 %v7290_v33  ;;  %v7287_v38 = vsel %vm100_vm1, %v7285_v39, 0.0 }
0x5da1   :  { %7288 = vadd.xlane.f32.xlu0 %v7287_v38 }
0x5e2d   :  { %v7292_v59 = vpop.xlane.xlu1 %7291 }
0x5e2e   :  { %v7294_v36 = vmul.f32 0.03125, %v7292_v59  ;;  %v7289_v9 = vpop.xlane.xlu0 %7288 }
0x5e2f   :  { %v7293_v5 = vmul.f32 0.03125, %v7289_v9 }
0x5e30   :  { %v7296_v50 = vadd.f32 1e-05, %v7294_v36 }
0x5e31   :  { %v7295_v48 = vadd.f32 1e-05, %v7293_v5 }
0x5e32   :  { %13778 = vrsqrt.f32 %v7296_v50 }
0x5e33   :  { %13780 = vrsqrt.f32 %v7295_v48 }
0x5e3c   :  { %v13779_v61 = vpop.eup %13778 }
0x5e3d   :  { %v13781_v51 = vpop.eup %13780  ;;  %v7300_v56 = vmul.f32 %v13779_v61, %v7284_v1 }
0x5e3e   :  { %v7299_v45 = vmul.f32 %v13781_v51, %v7283_v0 }
0x5e3f   :  { %v7302_v44 = vmul.f32 %v15127_v46, %v7300_v56 }
0x5e40   :  { %v7301_v41 = vmul.f32 %v15127_v46, %v7299_v45 }
0x5e41   :  { %v7304_v21 = vadd.f32 %v15134_v10, %v7302_v44  ;;  %v16118_v44 = vld [vmem:[#allocation16_spill] sm:$0xff] }
0x5e42   :  { %v7303_v29 = vadd.f32 %v15134_v10, %v7301_v41 }
0x5e43   :  { %v7308_v24 = vrot.slane %v7304_v21, 2 }
0x5e44   :  { %v7307_v7 = vrot.slane %v7303_v29, 3  ;;  %v16119_v29 = vld [vmem:[#allocation17_spill] sm:$0xff] }
0x5e46   :  { %v7309_v39 = vsel %vm2196_vm8, %v7308_v24, %v7307_v7  ;;  %v16120_v7 = vld [vmem:[#allocation8_spill] sm:$0xff] }
0x5e47   :  { %12451 = vmatmul.mubr.msk.f32.vlgmr.msra.gmra.mrb[74].mxu0 %vm100_vm1, %v7309_v39 }
0x5e48   :  { %13356 = vmatpush3.bf16.msra.mxu0 %v14056_v30 }
0x5e49   :  { %13358 = vmatprep.subr.bf16.mxu0 %v14072_v40 }
0x5f1a   :  { %v7378_v1 = vpop.f32.mrb[74].mxu0 }
0x5f1b   :  { %v7379_v0 = vadd.f32 %v15145_v53, %v7378_v1  ;;  %v12452_v33 = vpop.f32.mrb[75].mxu0 }
0x5f1d   :  { %10804 = vst.msk [vmem:[#allocation5 + $0x6] sm:$0x3] %vm2272_vm9, %v7379_v0  ;;  %v7387_v46 = vsel %vm2272_vm9, %v7379_v0, -inf }
0x5f1e   :  { %7388 = vmax.xlane.f32.xlu0 %v7387_v46 }
0x5fab   :  { %v7389_v10 = vpop.xlane.xlu0 %7388 }
0x5fac   :  { %v7390_v38 = vsub.f32 %v7379_v0, %v7389_v10  ;;  %v16121_v0 = vld [vmem:[#allocation18_spill] sm:$0xff] }
0x5fae   :  { %v7391_v59 = vmul.f32 1.442695, %v7390_v38  ;;  %v16122_v38 = vld [vmem:[#allocation19_spill] sm:$0xff] }
0x5fb0   :  { %13782 = vpow2.f32 %v7391_v59 }
0x5fba   :  { %v13783_v36 = vpop.eup %13782 }
0x5fbb   :  { %v7393_v9 = vsel %vm2272_vm9, %v13783_v36, 0.0 }
0x5fbc   :  { %7394 = vadd.xlane.f32.xlu1 %v7393_v9 }
0x6049   :  { %v7395_v5 = vpop.xlane.xlu1 %7394 }
0x604a   :  { %13784 = vrcp.f32 %v7395_v5 }
0x6054   :  { %v13785_v50 = vpop.eup %13784 }
0x6055   :  { %v7397_v48 = vmul.f32 %v13785_v50, %v13783_v36 }
0x6057   :  { %v7406_v53 = vrot.slane %v7397_v48, %v14151_v17 }
0x6059   :  { %v7407_v61 = vcombine.high %v7406_v53, %v7406_v53  ;;  %v7414_v51 = vrot.slane %v7406_v53, %v14151_v17 }
0x605b   :  { %v7425_v56 = vrot.slane %v7414_v51, %v14159_v23  ;;  %v7421_v45 = vrot.slane %v7407_v61, %v14151_v17 }
0x605d   :  { %v15469_v41 = vsel %vm7398_vm13, %v7425_v56, %v16118_v44  ;;  %v7429_v21 = vrot.slane %v7421_v45, %v14159_v23 }
0x605e   :  { %12457 = vmatprep.mubr.msk.f32.mxu0 %vm466_vm5, %v15469_v41 }
0x605f   :  { %v15475_v24 = vsel %vm7398_vm13, %v7429_v21, %v16119_v29 }
0x6060   :  { %12458 = vmatmul.mubr.msk.f32.vlgmr.msra.gmra.mrb[76].mxu0 %vm466_vm5, %v15475_v24 }
0x6061   :  { %13360 = vmatpush3.bf16.msra.mxu0 %v14072_v40 }
0x6062   :  { %13362 = vmatprep.subr.bf16.mxu0 %v16120_v7 }
0x6065   :  { %13364 = vmatpush3.bf16.msra.mxu0 %v16120_v7 }
0x6066   :  { %12471 = vmatprep.subr.mxu0 %v16079_v20 }
0x6133   :  { %v12459_v39 = vpop.f32.mrb[76].mxu0 }
0x6134   :  { %v7506_v1 = vpop.f32.mrb[77].mxu0  ;;  %v15487_v46 = vadd.f32 %v16121_v0, %v12459_v39 }
0x6135   :  { %v15484_v33 = vadd.f32 %v16121_v0, %v7506_v1 }
0x6137   :  { %12468 = vmatprep.mubr.msk.f32.mxu0 %vm100_vm1, %v15484_v33 }
0x6138   :  { %12469 = vmatmul.mubr.msk.f32.vlgmr.msra.gmra.mrb[78].mxu0 %vm100_vm1, %v15487_v46 }
0x6139   :  { %12473 = vmatprep.mubr.msk.f32.mxu0 %vm13981_vm0, %v16079_v20 }
0x620b   :  { %v12470_v10 = vpop.f32.mrb[78].mxu0 }
0x620c   :  { %v7593_v59 = vadd.f32 %v16122_v38, %v12470_v10  ;;  %v7587_v36 = vpop.f32.mrb[79].mxu0 }
0x620d   :  { %v7588_v9 = vadd.f32 %v16122_v38, %v7587_v36 }
0x620e   :  { %7674 = vrot.lane.b32.xlu1 %v7593_v59, %s13983_s9 }
0x620f   :  { %7597 = vrot.lane.b32.xlu0 %v7588_v9, %s13983_s9 }
0x6280   :  { %v7675_v50 = vpop.permute.xlu1 %7674 }
0x6281   :  { %v7598_v5 = vpop.permute.xlu0 %7597 }
0x6282   :  { %12472 = vmatpush3.xpose.msk.msra.mxu0 %vm100_vm1, %v7598_v5 }
0x6283   :  { %12476 = vmatprep.subr.mxu0 %v16079_v20 }
0x6285   :  { %12474 = vmatmul.mubr.msk.f32.vlgmr.msra.gmra.mrb[80].mxu0 %vm100_vm1, %v7588_v9 }
0x6286   :  { %12477 = vmatpush3.xpose.msk.msra.mxu0 %vm100_vm1, %v7675_v50  ;;  %12478 = vmatprep.mubr.msk.f32.mxu0 %vm13981_vm0, %v16079_v20 }
0x6287   :  { %12486 = vmatprep.subr.mxu0 %v16079_v20 }
0x6289   :  { %12479 = vmatmul.mubr.msk.f32.vlgmr.msra.gmra.mrb[82].mxu0 %vm100_vm1, %v7593_v59 }
0x628a   :  { %12488 = vmatprep.mubr.msk.f32.mxu0 %vm13981_vm0, %v16079_v20 }
0x6358   :  { %v7669_v48 = vpop.f32.mrb[80].mxu0 }
0x6359   :  { %v7750_v53 = vmul.f32 0.17677669, %v7669_v48  ;;  %v12475_v61 = vpop.f32.mrb[81].mxu0 }
0x635b   :  { %v7752_v51 = vadd.f32 %v7750_v53, %v14116_v3 }
0x635c   :  { %v7746_v56 = vpop.f32.mrb[82].mxu0 }
0x635d   :  { %v7751_v45 = vmul.f32 0.17677669, %v7746_v56  ;;  %v12480_v44 = vpop.f32.mrb[83].mxu0  ;;  %v7754_v21 = vsel %vm788_vm7, %v7752_v51, -inf }
0x635e   :  { %7755 = vmax.xlane.f32.xlu1 %v7754_v21 }
0x635f   :  { %v7753_v29 = vadd.f32 %v7751_v45, %v14116_v3 }
0x6361   :  { %v7757_v39 = vsel %vm788_vm7, %v7753_v29, -inf }
0x6362   :  { %7758 = vmax.xlane.f32.xlu0 %v7757_v39 }
0x63eb   :  { %v7756_v1 = vpop.xlane.xlu1 %7755 }
0x63ec   :  { %v7760_v0 = vsub.f32 %v7752_v51, %v7756_v1 }
0x63ee   :  { %v7762_v10 = vmul.f32 1.442695, %v7760_v0 }
0x63ef   :  { %v7759_v38 = vpop.xlane.xlu0 %7758 }
0x63f0   :  { %13786 = vpow2.f32 %v7762_v10  ;;  %v7761_v36 = vsub.f32 %v7753_v29, %v7759_v38 }
0x63f2   :  { %v7764_v5 = vmul.f32 1.442695, %v7761_v36  ;;  %v16123_v36 = vld [vmem:[#allocation20_spill] sm:$0xff] }
0x63f4   :  { %13788 = vpow2.f32 %v7764_v5 }
0x63fa   :  { %v13787_v50 = vpop.eup %13786 }
0x63fb   :  { %v7766_v48 = vsel %vm788_vm7, %v13787_v50, 0.0 }
0x63fc   :  { %7767 = vadd.xlane.f32.xlu0 %v7766_v48 }
0x63fe   :  { %v13789_v53 = vpop.eup %13788 }
0x63ff   :  { %v7769_v61 = vsel %vm788_vm7, %v13789_v53, 0.0 }
0x6400   :  { %7770 = vadd.xlane.f32.xlu1 %v7769_v61 }
0x6411   :  { %7852 = vrot.lane.b32.xlu1 %v7593_v59, %s13985_s10 }
0x6412   :  { %7776 = vrot.lane.b32.xlu0 %v7588_v9, %s13985_s10 }
0x6489   :  { %v7768_v56 = vpop.xlane.xlu0 %7767 }
0x648a   :  { %13790 = vrcp.f32 %v7768_v56 }
0x648d   :  { %v7771_v51 = vpop.xlane.xlu1 %7770  ;;  %v7777_v45 = vpop.permute.xlu0 %7776 }
0x648e   :  { %13792 = vrcp.f32 %v7771_v51  ;;  %12482 = vmatpush3.msra.mxu1 %v7777_v45 }
0x648f   :  { %13366 = vmatprep.subr.bf16.mxu1 %v14126_v28 }
0x6491   :  { %v7853_v44 = vpop.permute.xlu1 %7852 }
0x6492   :  { %12487 = vmatpush3.msra.mxu0 %v7853_v44 }
0x6493   :  { %13374 = vmatprep.subr.bf16.mxu0 %v14186_v62 }
0x6494   :  { %v13791_v21 = vpop.eup %13790 }
0x6495   :  { %v7774_v29 = vmul.f32 %v13791_v21, %v13787_v50 }
0x6497   :  { %12484 = vmatmul.mubr.msk.f32.vlgmr.msra.gmra.mrb[76].mxu1 %vm788_vm7, %v7774_v29 }
0x6498   :  { %v13793_v39 = vpop.eup %13792  ;;  %13368 = vmatpush3.bf16.msra.mxu1 %v14126_v28 }
0x6499   :  { %v7775_v59 = vmul.f32 %v13793_v39, %v13789_v53  ;;  %13370 = vmatprep.subr.bf16.mxu1 %v14132_v42 }
0x649b   :  { %12489 = vmatmul.mubr.msk.f32.vlgmr.msra.gmra.mrb[84].mxu0 %vm788_vm7, %v7775_v59 }
0x649c   :  { %13372 = vmatpush3.bf16.msra.mxu1 %v14132_v42  ;;  %13376 = vmatpush3.bf16.msra.mxu0 %v14186_v62 }
0x649d   :  { %13378 = vmatprep.subr.bf16.mxu0 %v14190_v4  ;;  %13382 = vmatprep.subr.bf16.mxu1 %v14203_v54 }
0x64a0   :  { %13380 = vmatpush3.bf16.msra.mxu0 %v14190_v4 }
0x64a1   :  { %13414 = vmatprep.subr.bf16.mxu0 %v14294_v37 }
0x656a   :  { %v7848_v9 = vpop.f32.mrb[76].mxu1 }
0x656b   :  { %v12485_v1 = vpop.f32.mrb[77].mxu1  ;;  %12499 = vmatprep.mubr.msk.f32.mxu1 %vm100_vm1, %v7848_v9 }
0x656e   :  { %v7924_v0 = vpop.f32.mrb[84].mxu0 }
0x656f   :  { %v12490_v10 = vpop.f32.mrb[85].mxu0  ;;  %12500 = vmatmul.mubr.msk.f32.vlgmr.msra.gmra.mrb[78].mxu1 %vm100_vm1, %v7924_v0 }
0x6570   :  { %13384 = vmatpush3.bf16.msra.mxu1 %v14203_v54 }
0x6571   :  { %13386 = vmatprep.subr.bf16.mxu1 %v14208_v8 }
0x6574   :  { %13388 = vmatpush3.bf16.msra.mxu1 %v14208_v8 }
0x6575   :  { %13390 = vmatprep.subr.bf16.mxu1 %v14219_v11 }
0x6578   :  { %13392 = vmatpush3.bf16.msra.mxu1 %v14219_v11 }
0x6579   :  { %13394 = vmatprep.subr.bf16.mxu1 %v14229_v14 }
0x657c   :  { %13396 = vmatpush3.bf16.msra.mxu1 %v14229_v14 }
0x657d   :  { %13398 = vmatprep.subr.bf16.mxu1 %v14239_v18 }
0x6580   :  { %13400 = vmatpush3.bf16.msra.mxu1 %v14239_v18 }
0x6581   :  { %13402 = vmatprep.subr.bf16.mxu1 %v14249_v22 }
0x6584   :  { %13404 = vmatpush3.bf16.msra.mxu1 %v14249_v22 }
0x6585   :  { %13406 = vmatprep.subr.bf16.mxu1 %v14259_v26 }
0x6588   :  { %13408 = vmatpush3.bf16.msra.mxu1 %v14259_v26 }
0x6589   :  { %13410 = vmatprep.subr.bf16.mxu1 %v14280_v57 }
0x658c   :  { %13412 = vmatpush3.bf16.msra.mxu1 %v14280_v57 }
0x658d   :  { %13430 = vmatprep.subr.bf16.mxu1 %v14399_v60 }
0x6642   :  { %v12501_v38 = vpop.f32.mrb[78].mxu1 }
0x6643   :  { %v8006_v5 = vadd.f32 %v16123_v36, %v12501_v38  ;;  %v8000_v50 = vpop.f32.mrb[79].mxu1 }
0x6644   :  { %v8001_v48 = vadd.f32 %v16123_v36, %v8000_v50 }
0x6645   :  { %v8010_v53 = vadd.f32 %v8006_v5, %v15487_v46 }
0x6646   :  { %v8009_v61 = vadd.f32 %v8001_v48, %v15484_v33 }
0x6647   :  { %v8014_v56 = vsel %vm100_vm1, %v8010_v53, 0.0 }
0x6648   :  { %8015 = vadd.xlane.f32.xlu0 %v8014_v56  ;;  %v8011_v51 = vsel %vm100_vm1, %v8009_v61, 0.0 }
0x6649   :  { %8012 = vadd.xlane.f32.xlu1 %v8011_v51 }
0x66d5   :  { %v8016_v45 = vpop.xlane.xlu0 %8015 }
0x66d6   :  { %v8018_v44 = vmul.f32 0.03125, %v8016_v45  ;;  %v8013_v21 = vpop.xlane.xlu1 %8012 }
0x66d7   :  { %v8017_v29 = vmul.f32 0.03125, %v8013_v21 }
0x66d8   :  { %v8020_v39 = vsub.f32 %v8010_v53, %v8018_v44 }
0x66d9   :  { %v8019_v59 = vsub.f32 %v8009_v61, %v8017_v29  ;;  %v16124_v29 = vld [vmem:[#allocation10_spill] sm:$0xff] }
0x66da   :  { %v8022_v9 = vmul.f32 %v8020_v39, %v8020_v39 }
0x66db   :  { %v8021_v1 = vmul.f32 %v8019_v59, %v8019_v59 }
0x66dc   :  { %v8026_v0 = vsel %vm100_vm1, %v8022_v9, 0.0 }
0x66dd   :  { %8027 = vadd.xlane.f32.xlu1 %v8026_v0  ;;  %v8023_v46 = vsel %vm100_vm1, %v8021_v1, 0.0  ;;  %v16125_v1 = vld [vmem:[#allocation9_spill] sm:$0xff] }
0x66de   :  { %8024 = vadd.xlane.f32.xlu0 %v8023_v46 }
0x676a   :  { %v8028_v33 = vpop.xlane.xlu1 %8027 }
0x676b   :  { %v8030_v10 = vmul.f32 0.03125, %v8028_v33  ;;  %v8025_v38 = vpop.xlane.xlu0 %8024 }
0x676c   :  { %v8029_v36 = vmul.f32 0.03125, %v8025_v38 }
0x676d   :  { %v8032_v5 = vadd.f32 1e-05, %v8030_v10 }
0x676e   :  { %v8031_v50 = vadd.f32 1e-05, %v8029_v36 }
0x676f   :  { %13794 = vrsqrt.f32 %v8032_v5 }
0x6770   :  { %13796 = vrsqrt.f32 %v8031_v50 }
0x6779   :  { %v13795_v48 = vpop.eup %13794 }
0x677a   :  { %v13797_v56 = vpop.eup %13796  ;;  %v8036_v53 = vmul.f32 %v13795_v48, %v8020_v39 }
0x677b   :  { %v8035_v61 = vmul.f32 %v13797_v56, %v8019_v59 }
0x677c   :  { %v8038_v51 = vmul.f32 %v15258_v49, %v8036_v53 }
0x677d   :  { %v8037_v45 = vmul.f32 %v15258_v49, %v8035_v61 }
0x677e   :  { %v8040_v44 = vadd.f32 %v15265_v34, %v8038_v51 }
0x677f   :  { %v8039_v21 = vadd.f32 %v15265_v34, %v8037_v45 }
0x6780   :  { %v8042_v9 = vadd.f32 %v8040_v44, %v16124_v29 }
0x6781   :  { %v8041_v0 = vadd.f32 %v8039_v21, %v16125_v1 }
0x6782   :  { %v8046_v46 = vsel %vm100_vm1, %v8042_v9, 0.0 }
0x6783   :  { %8047 = vadd.xlane.f32.xlu1 %v8046_v46  ;;  %v8043_v33 = vsel %vm100_vm1, %v8041_v0, 0.0 }
0x6784   :  { %8044 = vadd.xlane.f32.xlu0 %v8043_v33 }
0x6810   :  { %v8048_v39 = vpop.xlane.xlu1 %8047 }
0x6811   :  { %v8050_v59 = vmul.f32 0.03125, %v8048_v39  ;;  %v8045_v10 = vpop.xlane.xlu0 %8044 }
0x6812   :  { %v8049_v38 = vmul.f32 0.03125, %v8045_v10 }
0x6813   :  { %v8052_v36 = vsub.f32 %v8042_v9, %v8050_v59  ;;  %v16126_v59 = vld [vmem:[#allocation21_spill] sm:$0xff] }
0x6814   :  { %v8051_v49 = vsub.f32 %v8041_v0, %v8049_v38 }
0x6815   :  { %v8054_v5 = vmul.f32 %v8052_v36, %v8052_v36 }
0x6816   :  { %v8053_v50 = vmul.f32 %v8051_v49, %v8051_v49 }
0x6817   :  { %v8058_v34 = vsel %vm100_vm1, %v8054_v5, 0.0  ;;  %v16127_v5 = vld [vmem:[#allocation11_spill] sm:$0xff] }
0x6818   :  { %8059 = vadd.xlane.f32.xlu1 %v8058_v34  ;;  %v8055_v48 = vsel %vm100_vm1, %v8053_v50, 0.0 }
0x6819   :  { %8056 = vadd.xlane.f32.xlu0 %v8055_v48 }
0x68a5   :  { %v8060_v56 = vpop.xlane.xlu1 %8059 }
0x68a6   :  { %v8062_v53 = vmul.f32 0.03125, %v8060_v56  ;;  %v8057_v61 = vpop.xlane.xlu0 %8056 }
0x68a7   :  { %v8061_v51 = vmul.f32 0.03125, %v8057_v61 }
0x68a8   :  { %v8064_v45 = vadd.f32 1e-05, %v8062_v53  ;;  %v16129_v53 = vld [vmem:[#allocation14_spill] sm:$0xff] }
0x68a9   :  { %v8063_v44 = vadd.f32 1e-05, %v8061_v51 }
0x68aa   :  { %13798 = vrsqrt.f32 %v8064_v45 }
0x68ab   :  { %13800 = vrsqrt.f32 %v8063_v44 }
0x68b4   :  { %v13799_v21 = vpop.eup %13798 }
0x68b5   :  { %v13801_v46 = vpop.eup %13800  ;;  %v8068_v9 = vmul.f32 %v13799_v21, %v8052_v36 }
0x68b6   :  { %v8067_v0 = vmul.f32 %v13801_v46, %v8051_v49  ;;  %v16128_v49 = vld [vmem:[#allocation22_spill] sm:$0xff] }
0x68b7   :  { %v8070_v33 = vmul.f32 %v15278_v31, %v8068_v9 }
0x68b8   :  { %v8069_v39 = vmul.f32 %v15278_v31, %v8067_v0 }
0x68b9   :  { %v8072_v38 = vadd.f32 %v16126_v59, %v8070_v33 }
0x68ba   :  { %v8071_v10 = vadd.f32 %v16126_v59, %v8069_v39 }
0x68bc   :  { %12510 = vmatprep.mubr.msk.f32.mxu0 %vm100_vm1, %v8071_v10 }
0x68bd   :  { %12511 = vmatmul.mubr.msk.f32.vlgmr.msra.gmra.mrb[86].mxu0 %vm100_vm1, %v8072_v38 }
0x68be   :  { %13416 = vmatpush3.bf16.msra.mxu0 %v14294_v37 }
0x68bf   :  { %13418 = vmatprep.subr.bf16.mxu0 %v16127_v5 }
0x68c2   :  { %13420 = vmatpush3.bf16.msra.mxu0 %v16127_v5 }
0x68c3   :  { %12559 = vmatprep.subr.mxu0 %v16079_v20 }
0x6990   :  { %v12512_v36 = vpop.f32.mrb[86].mxu0 }
0x6991   :  { %v8151_v50 = vadd.f32 %v16128_v49, %v12512_v36  ;;  %v8145_v31 = vpop.f32.mrb[87].mxu0 }
0x6992   :  { %v8146_v34 = vadd.f32 %v16128_v49, %v8145_v31 }
0x6993   :  { %v8155_v56 = vmax.f32 %v8151_v50, 0.0 }
0x6994   :  { %v8154_v48 = vmax.f32 %v8146_v34, 0.0 }
0x6996   :  { %12545 = vmatprep.mubr.f32.mxu1 %v8154_v48 }
0x6997   :  { %12546 = vmatmul.mubr.f32.vlgmr.msra.gmra.mrb[80].mxu1 %v8155_v56 }
0x6998   :  { %13432 = vmatpush3.bf16.msra.mxu1 %v14399_v60 }
0x6999   :  { %13434 = vmatprep.subr.bf16.mxu1 %v16129_v53 }
0x699c   :  { %13436 = vmatpush3.bf16.msra.mxu1 %v16129_v53 }
0x699d   :  { %13469 = vmatprep.subr.bf16.mxu1 %v16081_v63 }
0x6a6a   :  { %v12547_v61 = vpop.f32.mrb[80].mxu1 }
0x6a6b   :  { %v8228_v51 = vadd.f32 %v15309_v15, %v12547_v61  ;;  %v8222_v45 = vpop.f32.mrb[81].mxu1 }
0x6a6c   :  { %v8223_v44 = vadd.f32 %v15309_v15, %v8222_v45 }
0x6a6d   :  { %v8232_v21 = vadd.f32 %v8228_v51, %v8072_v38 }
0x6a6e   :  { %v8231_v46 = vadd.f32 %v8223_v44, %v8071_v10 }
0x6a6f   :  { %v8236_v9 = vsel %vm100_vm1, %v8232_v21, 0.0 }
0x6a70   :  { %8237 = vadd.xlane.f32.xlu1 %v8236_v9  ;;  %v8233_v0 = vsel %vm100_vm1, %v8231_v46, 0.0 }
0x6a71   :  { %8234 = vadd.xlane.f32.xlu0 %v8233_v0  ;;  %v16130_v0 = vld [vmem:[#allocation23_spill] sm:$0xff] }
0x6afd   :  { %v8238_v33 = vpop.xlane.xlu1 %8237 }
0x6afe   :  { %v8240_v39 = vmul.f32 0.03125, %v8238_v33  ;;  %v8235_v59 = vpop.xlane.xlu0 %8234 }
0x6aff   :  { %v8239_v36 = vmul.f32 0.03125, %v8235_v59  ;;  %v16131_v59 = vld [vmem:[#allocation24_spill] sm:$0xff] }
0x6b00   :  { %v8242_v49 = vsub.f32 %v8232_v21, %v8240_v39 }
0x6b01   :  { %v8241_v50 = vsub.f32 %v8231_v46, %v8239_v36 }
0x6b02   :  { %v8244_v31 = vmul.f32 %v8242_v49, %v8242_v49 }
0x6b03   :  { %v8243_v34 = vmul.f32 %v8241_v50, %v8241_v50 }
0x6b04   :  { %v8248_v48 = vsel %vm100_vm1, %v8244_v31, 0.0 }
0x6b05   :  { %8249 = vadd.xlane.f32.xlu1 %v8248_v48  ;;  %v8245_v15 = vsel %vm100_vm1, %v8243_v34, 0.0 }
0x6b06   :  { %8246 = vadd.xlane.f32.xlu0 %v8245_v15 }
0x6b92   :  { %v8250_v10 = vpop.xlane.xlu1 %8249 }
0x6b93   :  { %v8252_v38 = vmul.f32 0.03125, %v8250_v10  ;;  %v8247_v56 = vpop.xlane.xlu0 %8246 }
0x6b94   :  { %v8251_v61 = vmul.f32 0.03125, %v8247_v56 }
0x6b95   :  { %v8254_v51 = vadd.f32 1e-05, %v8252_v38 }
0x6b96   :  { %v8253_v45 = vadd.f32 1e-05, %v8251_v61 }
0x6b97   :  { %13802 = vrsqrt.f32 %v8254_v51 }
0x6b98   :  { %13804 = vrsqrt.f32 %v8253_v45 }
0x6ba1   :  { %v13803_v44 = vpop.eup %13802 }
0x6ba2   :  { %v13805_v9 = vpop.eup %13804  ;;  %v8258_v21 = vmul.f32 %v13803_v44, %v8242_v49 }
0x6ba3   :  { %v8257_v46 = vmul.f32 %v13805_v9, %v8241_v50  ;;  %v16132_v50 = vld [vmem:[#allocation25_spill] sm:$0xff] }
0x6ba4   :  { %v8260_v33 = vmul.f32 %v16130_v0, %v8258_v21 }
0x6ba5   :  { %v8259_v39 = vmul.f32 %v16130_v0, %v8257_v46 }
0x6ba6   :  { %v15593_v31 = vadd.f32 %v16131_v59, %v8260_v33 }
0x6ba7   :  { %v15590_v36 = vadd.f32 %v16131_v59, %v8259_v39 }
0x6ba9   :  { %12556 = vmatprep.mubr.msk.f32.mxu0 %vm100_vm1, %v15590_v36 }
0x6baa   :  { %12557 = vmatmul.mubr.msk.f32.vlgmr.msra.gmra.mrb[88].mxu0 %vm100_vm1, %v15593_v31 }
0x6bab   :  { %12561 = vmatprep.mubr.msk.f32.mxu0 %vm13981_vm0, %v16079_v20 }
0x6c7d   :  { %v12558_v49 = vpop.f32.mrb[88].mxu0 }
0x6c7e   :  { %v8341_v34 = vadd.f32 %v16132_v50, %v12558_v49  ;;  %v8335_v48 = vpop.f32.mrb[89].mxu0 }
0x6c7f   :  { %v8336_v15 = vadd.f32 %v16132_v50, %v8335_v48 }
0x6c80   :  { %8422 = vrot.lane.b32.xlu1 %v8341_v34, %s13983_s9 }
0x6c81   :  { %8345 = vrot.lane.b32.xlu0 %v8336_v15, %s13983_s9 }
0x6cf2   :  { %v8423_v38 = vpop.permute.xlu1 %8422 }
0x6cf3   :  { %v8346_v10 = vpop.permute.xlu0 %8345 }
0x6cf4   :  { %12560 = vmatpush3.xpose.msk.msra.mxu0 %vm100_vm1, %v8346_v10 }
0x6cf5   :  { %12564 = vmatprep.subr.mxu0 %v16079_v20 }
0x6cf7   :  { %12562 = vmatmul.mubr.msk.f32.vlgmr.msra.gmra.mrb[90].mxu0 %vm100_vm1, %v8336_v15 }
0x6cf8   :  { %12565 = vmatpush3.xpose.msk.msra.mxu0 %vm100_vm1, %v8423_v38  ;;  %12566 = vmatprep.mubr.msk.f32.mxu0 %vm13981_vm0, %v16079_v20 }
0x6cf9   :  { %12569 = vmatprep.subr.mxu0 %v16079_v20 }
0x6cfb   :  { %12567 = vmatmul.mubr.msk.f32.vlgmr.msra.gmra.mrb[92].mxu0 %vm100_vm1, %v8341_v34 }
0x6cfc   :  { %12571 = vmatprep.mubr.msk.f32.mxu0 %vm13981_vm0, %v16079_v20 }
0x6dca   :  { %v8417_v56 = vpop.f32.mrb[90].mxu0 }
0x6dcb   :  { %v8498_v61 = vmul.f32 0.17677669, %v8417_v56  ;;  %v12563_v51 = vpop.f32.mrb[91].mxu0 }
0x6dcd   :  { %v8500_v45 = vadd.f32 %v8498_v61, %v14116_v3 }
0x6dce   :  { %v8494_v44 = vpop.f32.mrb[92].mxu0 }
0x6dcf   :  { %v8499_v9 = vmul.f32 0.17677669, %v8494_v44  ;;  %v12568_v21 = vpop.f32.mrb[93].mxu0  ;;  %v8502_v46 = vsel %vm788_vm7, %v8500_v45, -inf }
0x6dd0   :  { %8503 = vmax.xlane.f32.xlu1 %v8502_v46 }
0x6dd1   :  { %v8501_v0 = vadd.f32 %v8499_v9, %v14116_v3 }
0x6dd3   :  { %v8505_v33 = vsel %vm788_vm7, %v8501_v0, -inf }
0x6dd4   :  { %8506 = vmax.xlane.f32.xlu0 %v8505_v33 }
0x6e5d   :  { %v8504_v39 = vpop.xlane.xlu1 %8503 }
0x6e5e   :  { %v8508_v59 = vsub.f32 %v8500_v45, %v8504_v39 }
0x6e60   :  { %v8510_v49 = vmul.f32 1.442695, %v8508_v59 }
0x6e61   :  { %v8507_v50 = vpop.xlane.xlu0 %8506 }
0x6e62   :  { %13806 = vpow2.f32 %v8510_v49  ;;  %v8509_v48 = vsub.f32 %v8501_v0, %v8507_v50 }
0x6e64   :  { %v8512_v10 = vmul.f32 1.442695, %v8509_v48  ;;  %v16133_v48 = vld [vmem:[#allocation26_spill] sm:$0xff] }
0x6e66   :  { %13808 = vpow2.f32 %v8512_v10 }
0x6e6c   :  { %v13807_v38 = vpop.eup %13806 }
0x6e6d   :  { %v8514_v56 = vsel %vm788_vm7, %v13807_v38, 0.0 }
0x6e6e   :  { %8515 = vadd.xlane.f32.xlu0 %v8514_v56 }
0x6e70   :  { %v13809_v61 = vpop.eup %13808 }
0x6e71   :  { %v8517_v51 = vsel %vm788_vm7, %v13809_v61, 0.0 }
0x6e72   :  { %8518 = vadd.xlane.f32.xlu1 %v8517_v51 }
0x6e83   :  { %8600 = vrot.lane.b32.xlu1 %v8341_v34, %s13985_s10 }
0x6e84   :  { %8524 = vrot.lane.b32.xlu0 %v8336_v15, %s13985_s10 }
0x6efb   :  { %v8516_v44 = vpop.xlane.xlu0 %8515 }
0x6efc   :  { %13810 = vrcp.f32 %v8516_v44 }
0x6eff   :  { %v8519_v45 = vpop.xlane.xlu1 %8518  ;;  %v8525_v9 = vpop.permute.xlu0 %8524 }
0x6f00   :  { %13812 = vrcp.f32 %v8519_v45  ;;  %12570 = vmatpush3.msra.mxu0 %v8525_v9 }
0x6f01   :  { %12574 = vmatprep.subr.mxu0 %v16079_v20 }
0x6f03   :  { %v8601_v0 = vpop.permute.xlu1 %8600 }
0x6f06   :  { %v13811_v21 = vpop.eup %13810 }
0x6f07   :  { %v8522_v46 = vmul.f32 %v13811_v21, %v13807_v38 }
0x6f09   :  { %12572 = vmatmul.mubr.msk.f32.vlgmr.msra.gmra.mrb[94].mxu0 %vm788_vm7, %v8522_v46 }
0x6f0a   :  { %v13813_v33 = vpop.eup %13812  ;;  %12575 = vmatpush3.msra.mxu0 %v8601_v0  ;;  %12576 = vmatprep.mubr.msk.f32.mxu0 %vm13981_vm0, %v16079_v20 }
0x6f0b   :  { %v8523_v34 = vmul.f32 %v13813_v33, %v13809_v61  ;;  %13422 = vmatprep.subr.bf16.mxu0 %v14343_v2 }
0x6f0d   :  { %12577 = vmatmul.mubr.msk.f32.vlgmr.msra.gmra.mrb[96].mxu0 %vm788_vm7, %v8523_v34 }
0x6f0e   :  { %13424 = vmatpush3.bf16.msra.mxu0 %v14343_v2 }
0x6f0f   :  { %13426 = vmatprep.subr.bf16.mxu0 %v14351_v13 }
0x6f12   :  { %13428 = vmatpush3.bf16.msra.mxu0 %v14351_v13 }
0x6f13   :  { %13438 = vmatprep.subr.bf16.mxu0 %v14417_v12 }
0x6fdc   :  { %v8596_v15 = vpop.f32.mrb[94].mxu0 }
0x6fdd   :  { %v12573_v39 = vpop.f32.mrb[95].mxu0  ;;  %12587 = vmatprep.mubr.msk.f32.mxu0 %vm100_vm1, %v8596_v15 }
0x6fe0   :  { %v8672_v59 = vpop.f32.mrb[96].mxu0 }
0x6fe1   :  { %v12578_v49 = vpop.f32.mrb[97].mxu0  ;;  %12588 = vmatmul.mubr.msk.f32.vlgmr.msra.gmra.mrb[98].mxu0 %vm100_vm1, %v8672_v59 }
0x6fe2   :  { %13440 = vmatpush3.bf16.msra.mxu0 %v14417_v12 }
0x6fe3   :  { %13442 = vmatprep.subr.bf16.mxu0 %v14422_v16 }
0x6fe6   :  { %13444 = vmatpush3.bf16.msra.mxu0 %v14422_v16 }
0x6fe7   :  { %13446 = vmatprep.subr.bf16.mxu0 %v14433_v55 }
0x6fea   :  { %13448 = vmatpush3.bf16.msra.mxu0 %v14433_v55 }
0x6feb   :  { %13450 = vmatprep.subr.bf16.mxu0 %v14443_v27 }
0x6fee   :  { %13452 = vmatpush3.bf16.msra.mxu0 %v14443_v27 }
0x6fef   :  { %13454 = vmatprep.subr.bf16.mxu0 %v14453_v35 }
0x6ff2   :  { %13456 = vmatpush3.bf16.msra.mxu0 %v14453_v35 }
0x6ff3   :  { %13458 = vmatprep.subr.bf16.mxu0 %v14463_v43 }
0x6ff6   :  { %13460 = vmatpush3.bf16.msra.mxu0 %v14463_v43 }
0x6ff7   :  { %13462 = vmatprep.subr.bf16.mxu0 %v14473_v47 }
0x6ffa   :  { %13464 = vmatpush3.bf16.msra.mxu0 %v14473_v47 }
0x6ffb   :  { %13466 = vmatprep.subr.bf16.mxu0 %v14504_v25 }
0x6ffe   :  { %13468 = vmatpush3.bf16.msra.mxu0 %v14504_v25 }
0x6fff   :  { %12675 = vmatprep.subr.mxu0 %v16079_v20 }
0x70b4   :  { %v12589_v50 = vpop.f32.mrb[98].mxu0 }
0x70b5   :  { %v8754_v10 = vadd.f32 %v16133_v48, %v12589_v50  ;;  %v8748_v38 = vpop.f32.mrb[99].mxu0 }
0x70b6   :  { %v8749_v56 = vadd.f32 %v16133_v48, %v8748_v38 }
0x70b7   :  { %v8758_v61 = vadd.f32 %v8754_v10, %v15593_v31 }
0x70b8   :  { %v8757_v51 = vadd.f32 %v8749_v56, %v15590_v36 }
0x70b9   :  { %v8762_v44 = vsel %vm100_vm1, %v8758_v61, 0.0 }
0x70ba   :  { %8763 = vadd.xlane.f32.xlu0 %v8762_v44  ;;  %v8759_v45 = vsel %vm100_vm1, %v8757_v51, 0.0 }
0x70bb   :  { %8760 = vadd.xlane.f32.xlu1 %v8759_v45 }
0x7147   :  { %v8764_v9 = vpop.xlane.xlu0 %8763 }
0x7148   :  { %v8766_v21 = vmul.f32 0.03125, %v8764_v9  ;;  %v8761_v46 = vpop.xlane.xlu1 %8760 }
0x7149   :  { %v8765_v0 = vmul.f32 0.03125, %v8761_v46 }
0x714a   :  { %v8768_v33 = vsub.f32 %v8758_v61, %v8766_v21 }
0x714b   :  { %v8767_v34 = vsub.f32 %v8757_v51, %v8765_v0  ;;  %v16134_v0 = vld [vmem:[#allocation12_spill] sm:$0xff] }
0x714c   :  { %v8770_v15 = vmul.f32 %v8768_v33, %v8768_v33 }
0x714d   :  { %v8769_v39 = vmul.f32 %v8767_v34, %v8767_v34 }
0x714e   :  { %v8774_v59 = vsel %vm100_vm1, %v8770_v15, 0.0 }
0x714f   :  { %8775 = vadd.xlane.f32.xlu1 %v8774_v59  ;;  %v8771_v31 = vsel %vm100_vm1, %v8769_v39, 0.0  ;;  %v16135_v39 = vld [vmem:[#allocation13_spill] sm:$0xff] }
0x7150   :  { %8772 = vadd.xlane.f32.xlu0 %v8771_v31 }
0x71dc   :  { %v8776_v36 = vpop.xlane.xlu1 %8775 }
0x71dd   :  { %v8778_v49 = vmul.f32 0.03125, %v8776_v36  ;;  %v8773_v50 = vpop.xlane.xlu0 %8772 }
0x71de   :  { %v8777_v48 = vmul.f32 0.03125, %v8773_v50 }
0x71df   :  { %v8780_v10 = vadd.f32 1e-05, %v8778_v49 }
0x71e0   :  { %v8779_v38 = vadd.f32 1e-05, %v8777_v48 }
0x71e1   :  { %13814 = vrsqrt.f32 %v8780_v10 }
0x71e2   :  { %13816 = vrsqrt.f32 %v8779_v38 }
0x71eb   :  { %v13815_v56 = vpop.eup %13814 }
0x71ec   :  { %v13817_v44 = vpop.eup %13816  ;;  %v8784_v61 = vmul.f32 %v13815_v56, %v8768_v33 }
0x71ed   :  { %v8783_v51 = vmul.f32 %v13817_v44, %v8767_v34 }
0x71ee   :  { %v8786_v45 = vmul.f32 %v15412_v52, %v8784_v61 }
0x71ef   :  { %v8785_v9 = vmul.f32 %v15412_v52, %v8783_v51 }
0x71f0   :  { %v8788_v21 = vadd.f32 %v15419_v32, %v8786_v45 }
0x71f1   :  { %v8787_v46 = vadd.f32 %v15419_v32, %v8785_v9 }
0x71f2   :  { %v8790_v15 = vadd.f32 %v8788_v21, %v16134_v0 }
0x71f3   :  { %v8789_v59 = vadd.f32 %v8787_v46, %v16135_v39 }
0x71f4   :  { %v8794_v31 = vsel %vm100_vm1, %v8790_v15, 0.0 }
0x71f5   :  { %8795 = vadd.xlane.f32.xlu1 %v8794_v31  ;;  %v8791_v36 = vsel %vm100_vm1, %v8789_v59, 0.0 }
0x71f6   :  { %8792 = vadd.xlane.f32.xlu0 %v8791_v36  ;;  %v15672_v36 = vld [vmem:[%s15991_s3 + $0x15] ss:$0 sm:$0xff] }
0x7282   :  { %v8796_v33 = vpop.xlane.xlu1 %8795 }
0x7283   :  { %v8798_v34 = vmul.f32 0.03125, %v8796_v33  ;;  %v8793_v49 = vpop.xlane.xlu0 %8792 }
0x7284   :  { %v8797_v50 = vmul.f32 0.03125, %v8793_v49  ;;  %v15679_v49 = vld [vmem:[%s15991_s3 + $0x16] ss:$0 sm:$0xff] }
0x7285   :  { %v8800_v48 = vsub.f32 %v8790_v15, %v8798_v34 }
0x7286   :  { %v8799_v52 = vsub.f32 %v8789_v59, %v8797_v50 }
0x7287   :  { %v8802_v10 = vmul.f32 %v8800_v48, %v8800_v48 }
0x7288   :  { %v8801_v38 = vmul.f32 %v8799_v52, %v8799_v52 }
0x7289   :  { %v8806_v32 = vsel %vm100_vm1, %v8802_v10, 0.0 }
0x728a   :  { %8807 = vadd.xlane.f32.xlu1 %v8806_v32  ;;  %v8803_v56 = vsel %vm100_vm1, %v8801_v38, 0.0 }
0x728b   :  { %8804 = vadd.xlane.f32.xlu0 %v8803_v56 }
0x7317   :  { %v8808_v44 = vpop.xlane.xlu1 %8807 }
0x7318   :  { %v8810_v61 = vmul.f32 0.03125, %v8808_v44  ;;  %v8805_v51 = vpop.xlane.xlu0 %8804 }
0x7319   :  { %v8809_v45 = vmul.f32 0.03125, %v8805_v51 }
0x731a   :  { %v8812_v9 = vadd.f32 1e-05, %v8810_v61 }
0x731b   :  { %v8811_v21 = vadd.f32 1e-05, %v8809_v45  ;;  %v15703_v45 = vld [vmem:[%s15991_s3 + $0x12] ss:$0 sm:$0xff] }
0x731c   :  { %13818 = vrsqrt.f32 %v8812_v9 }
0x731d   :  { %13820 = vrsqrt.f32 %v8811_v21 }
0x7326   :  { %v13819_v46 = vpop.eup %13818 }
0x7327   :  { %v13821_v31 = vpop.eup %13820  ;;  %v8816_v15 = vmul.f32 %v13819_v46, %v8800_v48 }
0x7328   :  { %v8815_v59 = vmul.f32 %v13821_v31, %v8799_v52  ;;  %v15694_v52 = vld [vmem:[%s15991_s3 + $0x11] ss:$0 sm:$0xff] }
0x7329   :  { %v8818_v33 = vmul.f32 %v15672_v36, %v8816_v15  ;;  %16136 = vst [vmem:[#allocation15_spill] sm:$0xff] %v15694_v52 }
0x732a   :  { %v8817_v34 = vmul.f32 %v15672_v36, %v8815_v59 }
0x732b   :  { %v8820_v10 = vadd.f32 %v15679_v49, %v8818_v33 }
0x732c   :  { %v8819_v50 = vadd.f32 %v15679_v49, %v8817_v34 }
0x732e   :  { %12598 = vmatprep.mubr.msk.f32.mxu1 %vm100_vm1, %v8819_v50 }
0x732f   :  { %12599 = vmatmul.mubr.msk.f32.vlgmr.msra.gmra.mrb[82].mxu1 %vm100_vm1, %v8820_v10 }
0x7330   :  { %13471 = vmatpush3.bf16.msra.mxu1 %v14529_v6  ;;  %12644 = vmatprep.mubr.msk.f32.mxu1 %vm13981_vm0, %v16079_v20 }
0x7331   :  { %13472 = vmatprep.subr.bf16.mxu1 %v16081_v63 }
0x7334   :  { %13474 = vmatpush3.bf16.msra.mxu1 %v14532_v58 }
0x7335   :  { %13476 = vmatprep.subr.bf16.mxu1 %v14056_v30 }
0x7402   :  { %v12600_v48 = vpop.f32.mrb[82].mxu1 }
0x7403   :  { %v8899_v38 = vadd.f32 %v15694_v52, %v12600_v48  ;;  %v8893_v32 = vpop.f32.mrb[83].mxu1 }
0x7404   :  { %v8894_v56 = vadd.f32 %v15694_v52, %v8893_v32 }
0x7405   :  { %v8903_v61 = vmax.f32 %v8899_v38, 0.0 }
0x7406   :  { %v8902_v44 = vmax.f32 %v8894_v56, 0.0 }
0x7408   :  { %12633 = vmatprep.mubr.f32.mxu0 %v8902_v44 }
0x7409   :  { %12634 = vmatmul.mubr.f32.vlgmr.msra.gmra.mrb[100].mxu0 %v8903_v61 }
0x740a   :  { %12677 = vmatprep.mubr.msk.f32.mxu0 %vm13981_vm0, %v16079_v20 }
0x74dc   :  { %v12635_v51 = vpop.f32.mrb[100].mxu0 }
0x74dd   :  { %v8976_v9 = vadd.f32 %v15703_v45, %v12635_v51  ;;  %v8970_v21 = vpop.f32.mrb[101].mxu0 }
0x74de   :  { %v8971_v46 = vadd.f32 %v15703_v45, %v8970_v21 }
0x74df   :  { %v8980_v31 = vadd.f32 %v8976_v9, %v8820_v10 }
0x74e0   :  { %v8979_v15 = vadd.f32 %v8971_v46, %v8819_v50 }
0x74e1   :  { %v8984_v59 = vsel %vm100_vm1, %v8980_v31, 0.0 }
0x74e2   :  { %8985 = vadd.xlane.f32.xlu1 %v8984_v59  ;;  %v8981_v33 = vsel %vm100_vm1, %v8979_v15, 0.0 }
0x74e3   :  { %8982 = vadd.xlane.f32.xlu0 %v8981_v33 }
0x756f   :  { %v8986_v34 = vpop.xlane.xlu1 %8985 }
0x7570   :  { %v8988_v48 = vmul.f32 0.03125, %v8986_v34  ;;  %v8983_v38 = vpop.xlane.xlu0 %8982 }
0x7571   :  { %v8987_v32 = vmul.f32 0.03125, %v8983_v38 }
0x7572   :  { %v8990_v56 = vsub.f32 %v8980_v31, %v8988_v48  ;;  %v15714_v48 = vld [vmem:[%s15991_s3 + $0x17] ss:$0 sm:$0xff] }
0x7573   :  { %v8989_v44 = vsub.f32 %v8979_v15, %v8987_v32 }
0x7574   :  { %v8992_v61 = vmul.f32 %v8990_v56, %v8990_v56 }
0x7575   :  { %v8991_v52 = vmul.f32 %v8989_v44, %v8989_v44 }
0x7576   :  { %v8996_v51 = vsel %vm100_vm1, %v8992_v61, 0.0  ;;  %v15721_v61 = vld [vmem:[%s15991_s3 + $0x18] ss:$0 sm:$0xff] }
0x7577   :  { %8997 = vadd.xlane.f32.xlu1 %v8996_v51  ;;  %v8993_v10 = vsel %vm100_vm1, %v8991_v52, 0.0 }
0x7578   :  { %8994 = vadd.xlane.f32.xlu0 %v8993_v10 }
0x7604   :  { %v8998_v50 = vpop.xlane.xlu1 %8997 }
0x7605   :  { %v9000_v9 = vmul.f32 0.03125, %v8998_v50  ;;  %v8995_v21 = vpop.xlane.xlu0 %8994 }
0x7606   :  { %v8999_v46 = vmul.f32 0.03125, %v8995_v21  ;;  %v15732_v21 = vld [vmem:[%s15991_s3] ss:$0 sm:$0xff] }
0x7607   :  { %v9002_v59 = vadd.f32 1e-05, %v9000_v9 }
0x7608   :  { %v9001_v33 = vadd.f32 1e-05, %v8999_v46 }
0x7609   :  { %13822 = vrsqrt.f32 %v9002_v59 }
0x760a   :  { %13824 = vrsqrt.f32 %v9001_v33 }
0x7613   :  { %v13823_v34 = vpop.eup %13822 }
0x7614   :  { %v13825_v38 = vpop.eup %13824  ;;  %v9006_v31 = vmul.f32 %v13823_v34, %v8990_v56 }
0x7615   :  { %v9005_v15 = vmul.f32 %v13825_v38, %v8989_v44 }
0x7616   :  { %v9008_v52 = vmul.f32 %v15714_v48, %v9006_v31 }
0x7617   :  { %v9007_v32 = vmul.f32 %v15714_v48, %v9005_v15 }
0x7618   :  { %v9010_v51 = vadd.f32 %v15721_v61, %v9008_v52 }
0x7619   :  { %v9009_v10 = vadd.f32 %v15721_v61, %v9007_v32 }
0x761a   :  { %v9014_v56 = vrot.slane %v9010_v51, 3 }
0x761b   :  { %v9013_v44 = vrot.slane %v9009_v10, 4 }
0x761d   :  { %v9015_v50 = vsel %vm2196_vm8, %v9014_v56, %v9013_v44 }
0x761e   :  { %12645 = vmatmul.mubr.msk.f32.vlgmr.msra.gmra.mrb[84].mxu1 %vm100_vm1, %v9015_v50 }
0x761f   :  { %13478 = vmatpush3.bf16.msra.mxu1 %v14056_v30 }
0x7620   :  { %13480 = vmatprep.subr.bf16.mxu1 %v14072_v40 }
0x76f1   :  { %v9084_v9 = vpop.f32.mrb[84].mxu1 }
0x76f2   :  { %v9085_v46 = vadd.f32 %v15732_v21, %v9084_v9  ;;  %v12646_v59 = vpop.f32.mrb[85].mxu1 }
0x76f4   :  { %10805 = vst.msk [vmem:[#allocation5 + $0x8] sm:$0x3] %vm2272_vm9, %v9085_v46  ;;  %v9094_v33 = vsel %vm2272_vm9, %v9085_v46, -inf }
0x76f5   :  { %9095 = vmax.xlane.f32.xlu0 %v9094_v33 }
0x7782   :  { %v9096_v34 = vpop.xlane.xlu0 %9095 }
0x7783   :  { %v9097_v38 = vsub.f32 %v9085_v46, %v9096_v34  ;;  %v13914_v34 = vld [vmem:[#allocation2 + $0x20] sm:$0xff] }
0x7785   :  { %v9098_v31 = vmul.f32 1.442695, %v9097_v38 }
0x7787   :  { %13826 = vpow2.f32 %v9098_v31 }
0x7791   :  { %v13827_v30 = vpop.eup %13826 }
0x7792   :  { %v9100_v15 = vsel %vm2272_vm9, %v13827_v30, 0.0 }
0x7793   :  { %9101 = vadd.xlane.f32.xlu1 %v9100_v15 }
0x7820   :  { %v9102_v52 = vpop.xlane.xlu1 %9101 }
0x7821   :  { %13828 = vrcp.f32 %v9102_v52 }
0x782b   :  { %v13829_v32 = vpop.eup %13828 }
0x782c   :  { %v9104_v51 = vmul.f32 %v13829_v32, %v13827_v30 }
0x782e   :  { %v9113_v10 = vrot.slane %v9104_v51, %v14151_v17 }
0x7830   :  { %v9114_v56 = vcombine.high %v9113_v10, %v9113_v10  ;;  %v9121_v44 = vrot.slane %v9113_v10, %v14151_v17 }
0x7832   :  { %v9132_v50 = vrot.slane %v9121_v44, %v14159_v23  ;;  %v9128_v9 = vrot.slane %v9114_v56, %v14151_v17 }
0x7834   :  { %v9139_v46 = vsel %vm9105_vm14, %v9132_v50, %v15469_v41  ;;  %v9136_v59 = vrot.slane %v9128_v9, %v14159_v23 }
0x7835   :  { %12651 = vmatprep.mubr.msk.f32.mxu1 %vm466_vm5, %v9139_v46 }
0x7836   :  { %v9140_v33 = vsel %vm9105_vm14, %v9136_v59, %v15475_v24  ;;  %v13915_v24 = vld [vmem:[%s15991_s3 + $0x1] ss:$0 sm:$0xff] }
0x7837   :  { %12652 = vmatmul.mubr.msk.f32.vlgmr.msra.gmra.mrb[86].mxu1 %vm466_vm5, %v9140_v33 }
0x7838   :  { %13482 = vmatpush3.bf16.msra.mxu1 %v14072_v40 }
0x7839   :  { %13484 = vmatprep.subr.bf16.mxu1 %v16120_v7 }
0x783c   :  { %13486 = vmatpush3.bf16.msra.mxu1 %v16120_v7 }
0x783d   :  { %12665 = vmatprep.subr.mxu1 %v16079_v20 }
0x790a   :  { %v12653_v19 = vpop.f32.mrb[86].mxu1 }
0x790b   :  { %v9213_v17 = vpop.f32.mrb[87].mxu1  ;;  %v15754_v23 = vadd.f32 %v13914_v34, %v12653_v19 }
0x790c   :  { %v15752_v41 = vadd.f32 %v13914_v34, %v9213_v17 }
0x790e   :  { %12662 = vmatprep.mubr.msk.f32.mxu1 %vm100_vm1, %v15752_v41 }
0x790f   :  { %12663 = vmatmul.mubr.msk.f32.vlgmr.msra.gmra.mrb[88].mxu1 %vm100_vm1, %v15754_v23 }
0x7910   :  { %12667 = vmatprep.mubr.msk.f32.mxu1 %vm13981_vm0, %v16079_v20 }
0x79e2   :  { %v12664_v40 = vpop.f32.mrb[88].mxu1 }
0x79e3   :  { %v9300_v7 = vadd.f32 %v13915_v24, %v12664_v40  ;;  %v9294_v38 = vpop.f32.mrb[89].mxu1 }
0x79e4   :  { %v9295_v31 = vadd.f32 %v13915_v24, %v9294_v38 }
0x79e5   :  { %9381 = vrot.lane.b32.xlu1 %v9300_v7, %s13983_s9 }
0x79e6   :  { %9304 = vrot.lane.b32.xlu0 %v9295_v31, %s13983_s9 }
0x7a57   :  { %v9382_v15 = vpop.permute.xlu1 %9381 }
0x7a58   :  { %v9305_v30 = vpop.permute.xlu0 %9304 }
0x7a59   :  { %12666 = vmatpush3.xpose.msk.msra.mxu1 %vm100_vm1, %v9305_v30 }
0x7a5a   :  { %12670 = vmatprep.subr.mxu1 %v16079_v20 }
0x7a5c   :  { %12668 = vmatmul.mubr.msk.f32.vlgmr.msra.gmra.mrb[90].mxu1 %vm100_vm1, %v9295_v31 }
0x7a5d   :  { %12671 = vmatpush3.xpose.msk.msra.mxu1 %vm100_vm1, %v9382_v15  ;;  %12672 = vmatprep.mubr.msk.f32.mxu1 %vm13981_vm0, %v16079_v20 }
0x7a5e   :  { %12680 = vmatprep.subr.mxu1 %v16079_v20 }
0x7a60   :  { %12673 = vmatmul.mubr.msk.f32.vlgmr.msra.gmra.mrb[92].mxu1 %vm100_vm1, %v9300_v7 }
0x7a61   :  { %12682 = vmatprep.mubr.msk.f32.mxu1 %vm13981_vm0, %v16079_v20 }
0x7b2f   :  { %v9376_v52 = vpop.f32.mrb[90].mxu1 }
0x7b30   :  { %v9457_v32 = vmul.f32 0.17677669, %v9376_v52  ;;  %v12669_v51 = vpop.f32.mrb[91].mxu1 }
0x7b32   :  { %v9459_v10 = vadd.f32 %v9457_v32, %v14116_v3 }
0x7b33   :  { %v9453_v56 = vpop.f32.mrb[92].mxu1 }
0x7b34   :  { %v9458_v44 = vmul.f32 0.17677669, %v9453_v56  ;;  %v12674_v50 = vpop.f32.mrb[93].mxu1  ;;  %v9461_v9 = vsel %vm788_vm7, %v9459_v10, -inf }
0x7b35   :  { %9462 = vmax.xlane.f32.xlu1 %v9461_v9 }
0x7b36   :  { %v9460_v46 = vadd.f32 %v9458_v44, %v14116_v3 }
0x7b38   :  { %v9464_v59 = vsel %vm788_vm7, %v9460_v46, -inf }
0x7b39   :  { %9465 = vmax.xlane.f32.xlu0 %v9464_v59 }
0x7bc2   :  { %v9463_v33 = vpop.xlane.xlu1 %9462 }
0x7bc3   :  { %v9467_v19 = vsub.f32 %v9459_v10, %v9463_v33 }
0x7bc5   :  { %v9469_v17 = vmul.f32 1.442695, %v9467_v19 }
0x7bc6   :  { %v9466_v34 = vpop.xlane.xlu0 %9465 }
0x7bc7   :  { %13830 = vpow2.f32 %v9469_v17  ;;  %v9468_v40 = vsub.f32 %v9460_v46, %v9466_v34 }
0x7bc9   :  { %v9471_v24 = vmul.f32 1.442695, %v9468_v40 }
0x7bcb   :  { %13832 = vpow2.f32 %v9471_v24 }
0x7bd1   :  { %v13831_v38 = vpop.eup %13830 }
0x7bd2   :  { %v9473_v30 = vsel %vm788_vm7, %v13831_v38, 0.0 }
0x7bd3   :  { %9474 = vadd.xlane.f32.xlu0 %v9473_v30 }
0x7bd5   :  { %v13833_v15 = vpop.eup %13832 }
0x7bd6   :  { %v9476_v52 = vsel %vm788_vm7, %v13833_v15, 0.0 }
0x7bd7   :  { %9477 = vadd.xlane.f32.xlu1 %v9476_v52 }
0x7be8   :  { %9559 = vrot.lane.b32.xlu1 %v9300_v7, %s13985_s10 }
0x7be9   :  { %9483 = vrot.lane.b32.xlu0 %v9295_v31, %s13985_s10 }
0x7c60   :  { %v9475_v32 = vpop.xlane.xlu0 %9474 }
0x7c61   :  { %13834 = vrcp.f32 %v9475_v32 }
0x7c64   :  { %v9478_v51 = vpop.xlane.xlu1 %9477  ;;  %v9484_v10 = vpop.permute.xlu0 %9483 }
0x7c65   :  { %13836 = vrcp.f32 %v9478_v51  ;;  %12676 = vmatpush3.msra.mxu0 %v9484_v10 }
0x7c66   :  { %13488 = vmatprep.subr.bf16.mxu0 %v14126_v28 }
0x7c68   :  { %v9560_v56 = vpop.permute.xlu1 %9559 }
0x7c69   :  { %12681 = vmatpush3.msra.mxu1 %v9560_v56 }
0x7c6a   :  { %13496 = vmatprep.subr.bf16.mxu1 %v14186_v62 }
0x7c6b   :  { %v13835_v44 = vpop.eup %13834 }
0x7c6c   :  { %v9481_v50 = vmul.f32 %v13835_v44, %v13831_v38 }
0x7c6e   :  { %12678 = vmatmul.mubr.msk.f32.vlgmr.msra.gmra.mrb[102].mxu0 %vm788_vm7, %v9481_v50 }
0x7c6f   :  { %v13837_v9 = vpop.eup %13836  ;;  %13490 = vmatpush3.bf16.msra.mxu0 %v14126_v28 }
0x7c70   :  { %v9482_v7 = vmul.f32 %v13837_v9, %v13833_v15  ;;  %13492 = vmatprep.subr.bf16.mxu0 %v14132_v42  ;;  %v13917_v9 = vld [vmem:[%s15991_s3 + $0x7] ss:$0 sm:$0xff] }
0x7c72   :  { %12683 = vmatmul.mubr.msk.f32.vlgmr.msra.gmra.mrb[94].mxu1 %vm788_vm7, %v9482_v7 }
0x7c73   :  { %13494 = vmatpush3.bf16.msra.mxu0 %v14132_v42  ;;  %13498 = vmatpush3.bf16.msra.mxu1 %v14186_v62  ;;  %v13916_v62 = vld [vmem:[%s15991_s3 + $0x2] ss:$0 sm:$0xff] }
0x7c74   :  { %13500 = vmatprep.subr.bf16.mxu1 %v14190_v4  ;;  %13504 = vmatprep.subr.bf16.mxu0 %v14203_v54 }
0x7c77   :  { %13502 = vmatpush3.bf16.msra.mxu1 %v14190_v4 }
0x7c78   :  { %13536 = vmatprep.subr.bf16.mxu1 %v14294_v37 }
0x7d41   :  { %v9555_v31 = vpop.f32.mrb[102].mxu0 }
0x7d42   :  { %v12679_v46 = vpop.f32.mrb[103].mxu0  ;;  %12693 = vmatprep.mubr.msk.f32.mxu0 %vm100_vm1, %v9555_v31 }
0x7d43   :  { %v13918_v46 = vld [vmem:[%s15991_s3 + $0x8] ss:$0 sm:$0xff] }
0x7d45   :  { %v9631_v28 = vpop.f32.mrb[94].mxu1 }
0x7d46   :  { %v12684_v59 = vpop.f32.mrb[95].mxu1  ;;  %12694 = vmatmul.mubr.msk.f32.vlgmr.msra.gmra.mrb[104].mxu0 %vm100_vm1, %v9631_v28 }
0x7d47   :  { %13506 = vmatpush3.bf16.msra.mxu0 %v14203_v54 }
0x7d48   :  { %13508 = vmatprep.subr.bf16.mxu0 %v14208_v8 }
0x7d4b   :  { %13510 = vmatpush3.bf16.msra.mxu0 %v14208_v8 }
0x7d4c   :  { %13512 = vmatprep.subr.bf16.mxu0 %v14219_v11 }
0x7d4f   :  { %13514 = vmatpush3.bf16.msra.mxu0 %v14219_v11 }
0x7d50   :  { %13516 = vmatprep.subr.bf16.mxu0 %v14229_v14 }
0x7d53   :  { %13518 = vmatpush3.bf16.msra.mxu0 %v14229_v14 }
0x7d54   :  { %13520 = vmatprep.subr.bf16.mxu0 %v14239_v18 }
0x7d57   :  { %13522 = vmatpush3.bf16.msra.mxu0 %v14239_v18 }
0x7d58   :  { %13524 = vmatprep.subr.bf16.mxu0 %v14249_v22 }
0x7d5b   :  { %13526 = vmatpush3.bf16.msra.mxu0 %v14249_v22 }
0x7d5c   :  { %13528 = vmatprep.subr.bf16.mxu0 %v14259_v26 }
0x7d5f   :  { %13530 = vmatpush3.bf16.msra.mxu0 %v14259_v26 }
0x7d60   :  { %13532 = vmatprep.subr.bf16.mxu0 %v14280_v57 }
0x7d63   :  { %13534 = vmatpush3.bf16.msra.mxu0 %v14280_v57 }
0x7d64   :  { %13552 = vmatprep.subr.bf16.mxu0 %v14399_v60 }
0x7e19   :  { %v12695_v42 = vpop.f32.mrb[104].mxu0 }
0x7e1a   :  { %v9713_v4 = vadd.f32 %v13916_v62, %v12695_v42  ;;  %v9707_v54 = vpop.f32.mrb[105].mxu0 }
0x7e1b   :  { %v9708_v8 = vadd.f32 %v13916_v62, %v9707_v54 }
0x7e1c   :  { %v9717_v11 = vadd.f32 %v9713_v4, %v15754_v23 }
0x7e1d   :  { %v9716_v14 = vadd.f32 %v9708_v8, %v15752_v41 }
0x7e1e   :  { %v9721_v18 = vsel %vm100_vm1, %v9717_v11, 0.0 }
0x7e1f   :  { %9722 = vadd.xlane.f32.xlu0 %v9721_v18  ;;  %v9718_v22 = vsel %vm100_vm1, %v9716_v14, 0.0 }
0x7e20   :  { %9719 = vadd.xlane.f32.xlu1 %v9718_v22 }
0x7eac   :  { %v9723_v26 = vpop.xlane.xlu0 %9722 }
0x7ead   :  { %v9725_v57 = vmul.f32 0.03125, %v9723_v26  ;;  %v9720_v33 = vpop.xlane.xlu1 %9719 }
0x7eae   :  { %v9724_v19 = vmul.f32 0.03125, %v9720_v33 }
0x7eaf   :  { %v9727_v17 = vsub.f32 %v9717_v11, %v9725_v57 }
0x7eb0   :  { %v9726_v34 = vsub.f32 %v9716_v14, %v9724_v19 }
0x7eb1   :  { %v9729_v40 = vmul.f32 %v9727_v17, %v9727_v17 }
0x7eb2   :  { %v9728_v24 = vmul.f32 %v9726_v34, %v9726_v34 }
0x7eb3   :  { %v9733_v38 = vsel %vm100_vm1, %v9729_v40, 0.0 }
0x7eb4   :  { %9734 = vadd.xlane.f32.xlu1 %v9733_v38  ;;  %v9730_v23 = vsel %vm100_vm1, %v9728_v24, 0.0 }
0x7eb5   :  { %9731 = vadd.xlane.f32.xlu0 %v9730_v23 }
0x7f41   :  { %v9735_v41 = vpop.xlane.xlu1 %9734 }
0x7f42   :  { %v9737_v30 = vmul.f32 0.03125, %v9735_v41  ;;  %v9732_v15 = vpop.xlane.xlu0 %9731 }
0x7f43   :  { %v9736_v52 = vmul.f32 0.03125, %v9732_v15 }
0x7f44   :  { %v9739_v32 = vadd.f32 1e-05, %v9737_v30 }
0x7f45   :  { %v9738_v51 = vadd.f32 1e-05, %v9736_v52  ;;  %v13919_v52 = vld [vmem:[%s15991_s3 + $0x9] ss:$0 sm:$0xff] }
0x7f46   :  { %13838 = vrsqrt.f32 %v9739_v32 }
0x7f47   :  { %13840 = vrsqrt.f32 %v9738_v51 }
0x7f50   :  { %v13839_v10 = vpop.eup %13838 }
0x7f51   :  { %v13841_v56 = vpop.eup %13840  ;;  %v9743_v44 = vmul.f32 %v13839_v10, %v9727_v17  ;;  %v13920_v10 = vld [vmem:[%s15991_s3 + $0xa] ss:$0 sm:$0xff] }
0x7f52   :  { %v9742_v50 = vmul.f32 %v13841_v56, %v9726_v34 }
0x7f53   :  { %v9745_v7 = vmul.f32 %v13917_v9, %v9743_v44 }
0x7f54   :  { %v9744_v31 = vmul.f32 %v13917_v9, %v9742_v50  ;;  %v13921_v9 = vld [vmem:[%s15991_s3 + $0x5] ss:$0 sm:$0xff] }
0x7f55   :  { %v9747_v28 = vadd.f32 %v13918_v46, %v9745_v7 }
0x7f56   :  { %v9746_v59 = vadd.f32 %v13918_v46, %v9744_v31 }
0x7f57   :  { %v9749_v42 = vadd.f32 %v9747_v28, %v16124_v29 }
0x7f58   :  { %v9748_v62 = vadd.f32 %v9746_v59, %v16125_v1 }
0x7f59   :  { %v9753_v4 = vsel %vm100_vm1, %v9749_v42, 0.0 }
0x7f5a   :  { %9754 = vadd.xlane.f32.xlu1 %v9753_v4  ;;  %v9750_v54 = vsel %vm100_vm1, %v9748_v62, 0.0 }
0x7f5b   :  { %9751 = vadd.xlane.f32.xlu0 %v9750_v54 }
0x7fe7   :  { %v9755_v8 = vpop.xlane.xlu1 %9754 }
0x7fe8   :  { %v9757_v11 = vmul.f32 0.03125, %v9755_v8  ;;  %v9752_v14 = vpop.xlane.xlu0 %9751 }
0x7fe9   :  { %v9756_v18 = vmul.f32 0.03125, %v9752_v14 }
0x7fea   :  { %v9759_v22 = vsub.f32 %v9749_v42, %v9757_v11 }
0x7feb   :  { %v9758_v26 = vsub.f32 %v9748_v62, %v9756_v18 }
0x7fec   :  { %v9761_v57 = vmul.f32 %v9759_v22, %v9759_v22 }
0x7fed   :  { %v9760_v33 = vmul.f32 %v9758_v26, %v9758_v26 }
0x7fee   :  { %v9765_v19 = vsel %vm100_vm1, %v9761_v57, 0.0 }
0x7fef   :  { %9766 = vadd.xlane.f32.xlu1 %v9765_v19  ;;  %v9762_v29 = vsel %vm100_vm1, %v9760_v33, 0.0 }
0x7ff0   :  { %9763 = vadd.xlane.f32.xlu0 %v9762_v29 }
0x807c   :  { %v9767_v1 = vpop.xlane.xlu1 %9766 }
0x807d   :  { %v9769_v17 = vmul.f32 0.03125, %v9767_v1  ;;  %v9764_v34 = vpop.xlane.xlu0 %9763 }
0x807e   :  { %v9768_v40 = vmul.f32 0.03125, %v9764_v34 }
0x807f   :  { %v9771_v24 = vadd.f32 1e-05, %v9769_v17 }
0x8080   :  { %v9770_v38 = vadd.f32 1e-05, %v9768_v40 }
0x8081   :  { %13842 = vrsqrt.f32 %v9771_v24 }
0x8082   :  { %13844 = vrsqrt.f32 %v9770_v38 }
0x808b   :  { %v13843_v23 = vpop.eup %13842 }
0x808c   :  { %v13845_v41 = vpop.eup %13844  ;;  %v9775_v30 = vmul.f32 %v13843_v23, %v9759_v22 }
0x808d   :  { %v9774_v15 = vmul.f32 %v13845_v41, %v9758_v26 }
0x808e   :  { %v9777_v32 = vmul.f32 %v13919_v52, %v9775_v30 }
0x808f   :  { %v9776_v51 = vmul.f32 %v13919_v52, %v9774_v15 }
0x8090   :  { %v9779_v44 = vadd.f32 %v13920_v10, %v9777_v32  ;;  %v13923_v32 = vld [vmem:[%s15991_s3 + $0xb] ss:$0 sm:$0xff] }
0x8091   :  { %v9778_v56 = vadd.f32 %v13920_v10, %v9776_v51 }
0x8093   :  { %12704 = vmatprep.mubr.msk.f32.mxu1 %vm100_vm1, %v9778_v56 }
0x8094   :  { %12705 = vmatmul.mubr.msk.f32.vlgmr.msra.gmra.mrb[96].mxu1 %vm100_vm1, %v9779_v44 }
0x8095   :  { %13538 = vmatpush3.bf16.msra.mxu1 %v14294_v37 }
0x8096   :  { %13540 = vmatprep.subr.bf16.mxu1 %v16127_v5 }
0x8099   :  { %13542 = vmatpush3.bf16.msra.mxu1 %v16127_v5  ;;  %v13922_v5 = vld [vmem:[%s15991_s3 + $0x6] ss:$0 sm:$0xff] }
0x809a   :  { %12753 = vmatprep.subr.mxu1 %v16079_v20 }
0x8167   :  { %v12706_v50 = vpop.f32.mrb[96].mxu1 }
0x8168   :  { %v9858_v7 = vadd.f32 %v13921_v9, %v12706_v50  ;;  %v9852_v31 = vpop.f32.mrb[97].mxu1 }
0x8169   :  { %v9853_v46 = vadd.f32 %v13921_v9, %v9852_v31 }
0x816a   :  { %v9862_v59 = vmax.f32 %v9858_v7, 0.0  ;;  %v13925_v7 = vld [vmem:[%s15991_s3 + $0xd] ss:$0 sm:$0xff] }
0x816b   :  { %v9861_v28 = vmax.f32 %v9853_v46, 0.0 }
0x816d   :  { %12739 = vmatprep.mubr.f32.mxu0 %v9861_v28 }
0x816e   :  { %12740 = vmatmul.mubr.f32.vlgmr.msra.gmra.mrb[106].mxu0 %v9862_v59 }
0x816f   :  { %13554 = vmatpush3.bf16.msra.mxu0 %v14399_v60 }
0x8170   :  { %13556 = vmatprep.subr.bf16.mxu0 %v16129_v53 }
0x8173   :  { %13558 = vmatpush3.bf16.msra.mxu0 %v16129_v53 }
0x8174   :  { %13591 = vmatprep.subr.bf16.mxu0 %v16081_v63 }
0x8241   :  { %v12741_v37 = vpop.f32.mrb[106].mxu0 }
0x8242   :  { %v9935_v42 = vadd.f32 %v13922_v5, %v12741_v37  ;;  %v9929_v62 = vpop.f32.mrb[107].mxu0 }
0x8243   :  { %v9930_v4 = vadd.f32 %v13922_v5, %v9929_v62 }
0x8244   :  { %v9939_v54 = vadd.f32 %v9935_v42, %v9779_v44 }
0x8245   :  { %v9938_v8 = vadd.f32 %v9930_v4, %v9778_v56  ;;  %v13924_v56 = vld [vmem:[%s15991_s3 + $0xc] ss:$0 sm:$0xff] }
0x8246   :  { %v9943_v11 = vsel %vm100_vm1, %v9939_v54, 0.0 }
0x8247   :  { %9944 = vadd.xlane.f32.xlu1 %v9943_v11  ;;  %v9940_v60 = vsel %vm100_vm1, %v9938_v8, 0.0 }
0x8248   :  { %9941 = vadd.xlane.f32.xlu0 %v9940_v60 }
0x82d4   :  { %v9945_v14 = vpop.xlane.xlu1 %9944 }
0x82d5   :  { %v9947_v53 = vmul.f32 0.03125, %v9945_v14  ;;  %v9942_v18 = vpop.xlane.xlu0 %9941 }
0x82d6   :  { %v9946_v22 = vmul.f32 0.03125, %v9942_v18 }
0x82d7   :  { %v9949_v26 = vsub.f32 %v9939_v54, %v9947_v53 }
0x82d8   :  { %v9948_v57 = vsub.f32 %v9938_v8, %v9946_v22 }
0x82d9   :  { %v9951_v33 = vmul.f32 %v9949_v26, %v9949_v26 }
0x82da   :  { %v9950_v19 = vmul.f32 %v9948_v57, %v9948_v57 }
0x82db   :  { %v9955_v29 = vsel %vm100_vm1, %v9951_v33, 0.0 }
0x82dc   :  { %9956 = vadd.xlane.f32.xlu1 %v9955_v29  ;;  %v9952_v1 = vsel %vm100_vm1, %v9950_v19, 0.0 }
0x82dd   :  { %9953 = vadd.xlane.f32.xlu0 %v9952_v1 }
0x8369   :  { %v9957_v17 = vpop.xlane.xlu1 %9956 }
0x836a   :  { %v9959_v34 = vmul.f32 0.03125, %v9957_v17  ;;  %v9954_v40 = vpop.xlane.xlu0 %9953 }
0x836b   :  { %v9958_v24 = vmul.f32 0.03125, %v9954_v40 }
0x836c   :  { %v9961_v38 = vadd.f32 1e-05, %v9959_v34 }
0x836d   :  { %v9960_v23 = vadd.f32 1e-05, %v9958_v24 }
0x836e   :  { %13846 = vrsqrt.f32 %v9961_v38 }
0x836f   :  { %13848 = vrsqrt.f32 %v9960_v23 }
0x8378   :  { %v13847_v41 = vpop.eup %13846 }
0x8379   :  { %v13849_v30 = vpop.eup %13848  ;;  %v9965_v15 = vmul.f32 %v13847_v41, %v9949_v26 }
0x837a   :  { %v9964_v52 = vmul.f32 %v13849_v30, %v9948_v57 }
0x837b   :  { %v9967_v51 = vmul.f32 %v13923_v32, %v9965_v15 }
0x837c   :  { %v9966_v10 = vmul.f32 %v13923_v32, %v9964_v52 }
0x837d   :  { %v15870_v50 = vadd.f32 %v13924_v56, %v9967_v51 }
0x837e   :  { %v15868_v44 = vadd.f32 %v13924_v56, %v9966_v10 }
0x8380   :  { %12750 = vmatprep.mubr.msk.f32.mxu1 %vm100_vm1, %v15868_v44 }
0x8381   :  { %12751 = vmatmul.mubr.msk.f32.vlgmr.msra.gmra.mrb[98].mxu1 %vm100_vm1, %v15870_v50 }
0x8382   :  { %12755 = vmatprep.mubr.msk.f32.mxu1 %vm13981_vm0, %v16079_v20 }
0x8454   :  { %v12752_v9 = vpop.f32.mrb[98].mxu1 }
0x8455   :  { %v10048_v31 = vadd.f32 %v13925_v7, %v12752_v9  ;;  %v10042_v46 = vpop.f32.mrb[99].mxu1 }
0x8456   :  { %v10043_v28 = vadd.f32 %v13925_v7, %v10042_v46 }
0x8457   :  { %10129 = vrot.lane.b32.xlu1 %v10048_v31, %s13983_s9 }
0x8458   :  { %10052 = vrot.lane.b32.xlu0 %v10043_v28, %s13983_s9 }
0x84c9   :  { %v10130_v37 = vpop.permute.xlu1 %10129 }
0x84ca   :  { %v10053_v59 = vpop.permute.xlu0 %10052 }
0x84cb   :  { %12754 = vmatpush3.xpose.msk.msra.mxu1 %vm100_vm1, %v10053_v59 }
0x84cc   :  { %12758 = vmatprep.subr.mxu1 %v16079_v20 }
0x84ce   :  { %12756 = vmatmul.mubr.msk.f32.vlgmr.msra.gmra.mrb[100].mxu1 %vm100_vm1, %v10043_v28 }
0x84cf   :  { %12759 = vmatpush3.xpose.msk.msra.mxu1 %vm100_vm1, %v10130_v37  ;;  %12760 = vmatprep.mubr.msk.f32.mxu1 %vm13981_vm0, %v16079_v20 }
0x84d0   :  { %12763 = vmatprep.subr.mxu1 %v16079_v20 }
0x84d2   :  { %12761 = vmatmul.mubr.msk.f32.vlgmr.msra.gmra.mrb[102].mxu1 %vm100_vm1, %v10048_v31 }
0x84d3   :  { %12765 = vmatprep.mubr.msk.f32.mxu1 %vm13981_vm0, %v16079_v20 }
0x85a1   :  { %v10124_v5 = vpop.f32.mrb[100].mxu1 }
0x85a2   :  { %v10205_v42 = vmul.f32 0.17677669, %v10124_v5  ;;  %v12757_v62 = vpop.f32.mrb[101].mxu1 }
0x85a4   :  { %v10207_v4 = vadd.f32 %v10205_v42, %v14116_v3 }
0x85a5   :  { %v10201_v54 = vpop.f32.mrb[102].mxu1 }
0x85a6   :  { %v10206_v8 = vmul.f32 0.17677669, %v10201_v54  ;;  %v12762_v11 = vpop.f32.mrb[103].mxu1  ;;  %v10209_v60 = vsel %vm788_vm7, %v10207_v4, -inf }
0x85a7   :  { %10210 = vmax.xlane.f32.xlu1 %v10209_v60 }
0x85a8   :  { %v10208_v14 = vadd.f32 %v10206_v8, %v14116_v3 }
0x85aa   :  { %v10212_v53 = vsel %vm788_vm7, %v10208_v14, -inf }
0x85ab   :  { %10213 = vmax.xlane.f32.xlu0 %v10212_v53  ;;  %v13927_v53 = vld [vmem:[%s15991_s3 + $0x13] ss:$0 sm:$0xff] }
0x8634   :  { %v10211_v18 = vpop.xlane.xlu1 %10210 }
0x8635   :  { %v10215_v22 = vsub.f32 %v10207_v4, %v10211_v18 }
0x8637   :  { %v10217_v26 = vmul.f32 1.442695, %v10215_v22 }
0x8638   :  { %v10214_v57 = vpop.xlane.xlu0 %10213 }
0x8639   :  { %13850 = vpow2.f32 %v10217_v26  ;;  %v10216_v33 = vsub.f32 %v10208_v14, %v10214_v57  ;;  %v13928_v26 = vld [vmem:[%s15991_s3 + $0x14] ss:$0 sm:$0xff] }
0x863b   :  { %v10219_v19 = vmul.f32 1.442695, %v10216_v33 }
0x863d   :  { %13852 = vpow2.f32 %v10219_v19 }
0x8643   :  { %v13851_v29 = vpop.eup %13850 }
0x8644   :  { %v10221_v1 = vsel %vm788_vm7, %v13851_v29, 0.0 }
0x8645   :  { %10222 = vadd.xlane.f32.xlu0 %v10221_v1 }
0x8647   :  { %v13853_v17 = vpop.eup %13852 }
0x8648   :  { %v10224_v34 = vsel %vm788_vm7, %v13853_v17, 0.0 }
0x8649   :  { %10225 = vadd.xlane.f32.xlu1 %v10224_v34 }
0x865a   :  { %10307 = vrot.lane.b32.xlu1 %v10048_v31, %s13985_s10 }
0x865b   :  { %10231 = vrot.lane.b32.xlu0 %v10043_v28, %s13985_s10 }
0x86d2   :  { %v10223_v3 = vpop.xlane.xlu0 %10222 }
0x86d3   :  { %13854 = vrcp.f32 %v10223_v3 }
0x86d6   :  { %v10226_v40 = vpop.xlane.xlu1 %10225  ;;  %v10232_v24 = vpop.permute.xlu0 %10231 }
0x86d7   :  { %13856 = vrcp.f32 %v10226_v40  ;;  %12764 = vmatpush3.msra.mxu1 %v10232_v24 }
0x86d8   :  { %12768 = vmatprep.subr.mxu1 %v16079_v20 }
0x86da   :  { %v10308_v41 = vpop.permute.xlu1 %10307 }
0x86dd   :  { %v13855_v38 = vpop.eup %13854 }
0x86de   :  { %v10229_v23 = vmul.f32 %v13855_v38, %v13851_v29 }
0x86e0   :  { %12766 = vmatmul.mubr.msk.f32.vlgmr.msra.gmra.mrb[104].mxu1 %vm788_vm7, %v10229_v23 }
0x86e1   :  { %v13857_v30 = vpop.eup %13856  ;;  %12769 = vmatpush3.msra.mxu1 %v10308_v41  ;;  %12770 = vmatprep.mubr.msk.f32.mxu1 %vm13981_vm0, %v16079_v20 }
0x86e2   :  { %v10230_v15 = vmul.f32 %v13857_v30, %v13853_v17  ;;  %13544 = vmatprep.subr.bf16.mxu1 %v14343_v2 }
0x86e4   :  { %12771 = vmatmul.mubr.msk.f32.vlgmr.msra.gmra.mrb[106].mxu1 %vm788_vm7, %v10230_v15 }
0x86e5   :  { %13546 = vmatpush3.bf16.msra.mxu1 %v14343_v2 }
0x86e6   :  { %13548 = vmatprep.subr.bf16.mxu1 %v14351_v13 }
0x86e9   :  { %13550 = vmatpush3.bf16.msra.mxu1 %v14351_v13  ;;  %v13926_v13 = vld [vmem:[%s15991_s3 + $0xe] ss:$0 sm:$0xff]  ;;  %s13987_s3 = smov [#allocation5]  }
0x86ea   :  { %13560 = vmatprep.subr.bf16.mxu1 %v14417_v12  ;;  %s10812_s16 = sshll.u32 %s13987_s3, 4  ;;  %s10813_s16 = int_to_ptr.vmem [resolvable:$true] %s10812_s16 }
0x86eb   :  { %s13951_s17 = scalar_lea.vmem %s10813_s16, 192  ;;  %p13956_p9 = scmp.lt.s32.totalorder %s10813_s16, %s10813_s16 }
0x86ec   :  { %p13952_p8 = scmp.ne.s32.totalorder %s10813_s16, %s13951_s17  ;;  %p13957_p10 = scmp.lt.s32.totalorder %s13951_s17, %s13951_s17 }
0x86ee   :  { %p13958_p11 = por %p13957_p10, %p13956_p9 }
0x86f0   :  { %p13959_p12 = pnand %p13958_p11, %p13952_p8 }
0x87b3   :  { %v10303_v52 = vpop.f32.mrb[104].mxu1 }
0x87b4   :  { %v12767_v32 = vpop.f32.mrb[105].mxu1  ;;  %12781 = vmatprep.mubr.msk.f32.mxu1 %vm100_vm1, %v10303_v52 }
0x87b7   :  { %v10379_v51 = vpop.f32.mrb[106].mxu1 }
0x87b8   :  { %v12772_v10 = vpop.f32.mrb[107].mxu1  ;;  %12782 = vmatmul.mubr.msk.f32.vlgmr.msra.gmra.mrb[108].mxu1 %vm100_vm1, %v10379_v51 }
0x87b9   :  { %13562 = vmatpush3.bf16.msra.mxu1 %v14417_v12 }
0x87ba   :  { %13564 = vmatprep.subr.bf16.mxu1 %v14422_v16 }
0x87bd   :  { %13566 = vmatpush3.bf16.msra.mxu1 %v14422_v16 }
0x87be   :  { %13568 = vmatprep.subr.bf16.mxu1 %v14433_v55 }
0x87c1   :  { %13570 = vmatpush3.bf16.msra.mxu1 %v14433_v55 }
0x87c2   :  { %13572 = vmatprep.subr.bf16.mxu1 %v14443_v27 }
0x87c5   :  { %13574 = vmatpush3.bf16.msra.mxu1 %v14443_v27 }
0x87c6   :  { %13576 = vmatprep.subr.bf16.mxu1 %v14453_v35 }
0x87c9   :  { %13578 = vmatpush3.bf16.msra.mxu1 %v14453_v35 }
0x87ca   :  { %13580 = vmatprep.subr.bf16.mxu1 %v14463_v43 }
0x87cd   :  { %13582 = vmatpush3.bf16.msra.mxu1 %v14463_v43 }
0x87ce   :  { %13584 = vmatprep.subr.bf16.mxu1 %v14473_v47 }
0x87d1   :  { %13586 = vmatpush3.bf16.msra.mxu1 %v14473_v47 }
0x87d2   :  { %13588 = vmatprep.subr.bf16.mxu1 %v14504_v25 }
0x87d5   :  { %13590 = vmatpush3.bf16.msra.mxu1 %v14504_v25 }
0x888b   :  { %v12783_v2 = vpop.f32.mrb[108].mxu1 }
0x888c   :  { %v10461_v12 = vadd.f32 %v13926_v13, %v12783_v2  ;;  %v10455_v16 = vpop.f32.mrb[109].mxu1 }
0x888d   :  { %v10456_v55 = vadd.f32 %v13926_v13, %v10455_v16 }
0x888e   :  { %v10465_v27 = vadd.f32 %v10461_v12, %v15870_v50 }
0x888f   :  { %v10464_v35 = vadd.f32 %v10456_v55, %v15868_v44 }
0x8890   :  { %v10469_v43 = vsel %vm100_vm1, %v10465_v27, 0.0 }
0x8891   :  { %10470 = vadd.xlane.f32.xlu0 %v10469_v43  ;;  %v10466_v47 = vsel %vm100_vm1, %v10464_v35, 0.0 }
0x8892   :  { %10467 = vadd.xlane.f32.xlu1 %v10466_v47 }
0x891e   :  { %v10471_v56 = vpop.xlane.xlu0 %10470 }
0x891f   :  { %v10473_v25 = vmul.f32 0.03125, %v10471_v56  ;;  %v10468_v9 = vpop.xlane.xlu1 %10467 }
0x8920   :  { %v10472_v7 = vmul.f32 0.03125, %v10468_v9 }
0x8921   :  { %v10475_v31 = vsub.f32 %v10465_v27, %v10473_v25  ;;  %v16137_v25 = vld [vmem:[#allocation15_spill] sm:$0xff] }
0x8922   :  { %v10474_v46 = vsub.f32 %v10464_v35, %v10472_v7 }
0x8923   :  { %v10477_v28 = vmul.f32 %v10475_v31, %v10475_v31 }
0x8924   :  { %v10476_v59 = vmul.f32 %v10474_v46, %v10474_v46 }
0x8925   :  { %v10481_v37 = vsel %vm100_vm1, %v10477_v28, 0.0 }
0x8926   :  { %10482 = vadd.xlane.f32.xlu1 %v10481_v37  ;;  %v10478_v50 = vsel %vm100_vm1, %v10476_v59, 0.0 }
0x8927   :  { %10479 = vadd.xlane.f32.xlu0 %v10478_v50 }
0x89b3   :  { %v10483_v44 = vpop.xlane.xlu1 %10482 }
0x89b4   :  { %v10485_v5 = vmul.f32 0.03125, %v10483_v44  ;;  %v10480_v42 = vpop.xlane.xlu0 %10479 }
0x89b5   :  { %v10484_v62 = vmul.f32 0.03125, %v10480_v42 }
0x89b6   :  { %v10487_v4 = vadd.f32 1e-05, %v10485_v5 }
0x89b7   :  { %v10486_v54 = vadd.f32 1e-05, %v10484_v62 }
0x89b8   :  { %13858 = vrsqrt.f32 %v10487_v4 }
0x89b9   :  { %13860 = vrsqrt.f32 %v10486_v54 }
0x89c2   :  { %v13859_v8 = vpop.eup %13858 }
0x89c3   :  { %v13861_v11 = vpop.eup %13860  ;;  %v10491_v60 = vmul.f32 %v13859_v8, %v10475_v31 }
0x89c4   :  { %v10490_v14 = vmul.f32 %v13861_v11, %v10474_v46 }
0x89c5   :  { %v10493_v18 = vmul.f32 %v13927_v53, %v10491_v60 }
0x89c6   :  { %v10492_v22 = vmul.f32 %v13927_v53, %v10490_v14 }
0x89c7   :  { %v10495_v57 = vadd.f32 %v13928_v26, %v10493_v18 }
0x89c8   :  { %v10494_v33 = vadd.f32 %v13928_v26, %v10492_v22 }
0x89c9   :  { %v10497_v19 = vadd.f32 %v10495_v57, %v16134_v0 }
0x89ca   :  { %v10496_v29 = vadd.f32 %v10494_v33, %v16135_v39 }
0x89cb   :  { %v10501_v1 = vsel %vm100_vm1, %v10497_v19, 0.0 }
0x89cc   :  { %10502 = vadd.xlane.f32.xlu1 %v10501_v1  ;;  %v10498_v17 = vsel %vm100_vm1, %v10496_v29, 0.0 }
0x89cd   :  { %10499 = vadd.xlane.f32.xlu0 %v10498_v17 }
0x8a59   :  { %v10503_v34 = vpop.xlane.xlu1 %10502 }
0x8a5a   :  { %v10505_v3 = vmul.f32 0.03125, %v10503_v34  ;;  %v10500_v40 = vpop.xlane.xlu0 %10499 }
0x8a5b   :  { %v10504_v24 = vmul.f32 0.03125, %v10500_v40 }
0x8a5c   :  { %v10507_v38 = vsub.f32 %v10497_v19, %v10505_v3 }
0x8a5d   :  { %v10506_v23 = vsub.f32 %v10496_v29, %v10504_v24 }
0x8a5e   :  { %v10509_v41 = vmul.f32 %v10507_v38, %v10507_v38 }
0x8a5f   :  { %v10508_v30 = vmul.f32 %v10506_v23, %v10506_v23 }
0x8a60   :  { %v10513_v15 = vsel %vm100_vm1, %v10509_v41, 0.0 }
0x8a61   :  { %10514 = vadd.xlane.f32.xlu1 %v10513_v15  ;;  %v10510_v0 = vsel %vm100_vm1, %v10508_v30, 0.0 }
0x8a62   :  { %10511 = vadd.xlane.f32.xlu0 %v10510_v0 }
0x8aee   :  { %v10515_v39 = vpop.xlane.xlu1 %10514 }
0x8aef   :  { %v10517_v52 = vmul.f32 0.03125, %v10515_v39  ;;  %v10512_v32 = vpop.xlane.xlu0 %10511 }
0x8af0   :  { %v10516_v51 = vmul.f32 0.03125, %v10512_v32 }
0x8af1   :  { %v10519_v10 = vadd.f32 1e-05, %v10517_v52 }
0x8af2   :  { %v10518_v2 = vadd.f32 1e-05, %v10516_v51 }
0x8af3   :  { %13862 = vrsqrt.f32 %v10519_v10 }
0x8af4   :  { %13864 = vrsqrt.f32 %v10518_v2 }
0x8afd   :  { %v13863_v13 = vpop.eup %13862 }
0x8afe   :  { %v13865_v12 = vpop.eup %13864  ;;  %v10523_v16 = vmul.f32 %v13863_v13, %v10507_v38 }
0x8aff   :  { %v10522_v55 = vmul.f32 %v13865_v12, %v10506_v23 }
0x8b00   :  { %v10525_v27 = vmul.f32 %v15672_v36, %v10523_v16 }
0x8b01   :  { %v10524_v35 = vmul.f32 %v15672_v36, %v10522_v55 }
0x8b02   :  { %v10527_v47 = vadd.f32 %v15679_v49, %v10525_v27 }
0x8b03   :  { %v10526_v43 = vadd.f32 %v15679_v49, %v10524_v35 }
0x8b05   :  { %12792 = vmatprep.mubr.msk.f32.mxu0 %vm100_vm1, %v10526_v43 }
0x8b06   :  { %12793 = vmatmul.mubr.msk.f32.vlgmr.msra.gmra.mrb[108].mxu0 %vm100_vm1, %v10527_v47 }
0x8b07   :  { %13593 = vmatpush3.bf16.msra.mxu0 %v14529_v6  ;;  %12838 = vmatprep.mubr.msk.f32.mxu0 %vm13981_vm0, %v16079_v20 }
0x8b08   :  { %13594 = vmatprep.subr.bf16.mxu0 %v16081_v63 }
0x8b0b   :  { %13596 = vmatpush3.bf16.msra.mxu0 %v14532_v58 }
0x8bd9   :  { %v12794_v56 = vpop.f32.mrb[108].mxu0 }
0x8bda   :  { %v10606_v36 = vadd.f32 %v16137_v25, %v12794_v56  ;;  %v10600_v9 = vpop.f32.mrb[109].mxu0 }
0x8bdb   :  { %v10601_v7 = vadd.f32 %v16137_v25, %v10600_v9 }
0x8bdc   :  { %v10610_v31 = vmax.f32 %v10606_v36, 0.0 }
0x8bdd   :  { %v10609_v49 = vmax.f32 %v10601_v7, 0.0 }
0x8bdf   :  { %12827 = vmatprep.mubr.f32.mxu1 %v10609_v49 }
0x8be0   :  { %12828 = vmatmul.mubr.f32.vlgmr.msra.gmra.mrb[110].mxu1 %v10610_v31 }
0x8cb3   :  { %v12829_v46 = vpop.f32.mrb[110].mxu1 }
0x8cb4   :  { %v10683_v6 = vadd.f32 %v15703_v45, %v12829_v46  ;;  %v10677_v28 = vpop.f32.mrb[111].mxu1 }
0x8cb5   :  { %v10678_v20 = vadd.f32 %v15703_v45, %v10677_v28 }
0x8cb6   :  { %v10687_v59 = vadd.f32 %v10683_v6, %v10527_v47 }
0x8cb7   :  { %v10686_v63 = vadd.f32 %v10678_v20, %v10526_v43 }
0x8cb8   :  { %v10691_v58 = vsel %vm100_vm1, %v10687_v59, 0.0 }
0x8cb9   :  { %10692 = vadd.xlane.f32.xlu1 %v10691_v58  ;;  %v10688_v37 = vsel %vm100_vm1, %v10686_v63, 0.0 }
0x8cba   :  { %10689 = vadd.xlane.f32.xlu0 %v10688_v37 }
0x8d46   :  { %v10693_v50 = vpop.xlane.xlu1 %10692 }
0x8d47   :  { %v10695_v44 = vmul.f32 0.03125, %v10693_v50  ;;  %v10690_v5 = vpop.xlane.xlu0 %10689 }
0x8d48   :  { %v10694_v42 = vmul.f32 0.03125, %v10690_v5 }
0x8d49   :  { %v10697_v62 = vsub.f32 %v10687_v59, %v10695_v44 }
0x8d4a   :  { %v10696_v4 = vsub.f32 %v10686_v63, %v10694_v42 }
0x8d4b   :  { %v10699_v54 = vmul.f32 %v10697_v62, %v10697_v62 }
0x8d4c   :  { %v10698_v8 = vmul.f32 %v10696_v4, %v10696_v4 }
0x8d4d   :  { %v10703_v11 = vsel %vm100_vm1, %v10699_v54, 0.0 }
0x8d4e   :  { %10704 = vadd.xlane.f32.xlu1 %v10703_v11  ;;  %v10700_v45 = vsel %vm100_vm1, %v10698_v8, 0.0 }
0x8d4f   :  { %10701 = vadd.xlane.f32.xlu0 %v10700_v45 }
0x8ddb   :  { %v10705_v60 = vpop.xlane.xlu1 %10704 }
0x8ddc   :  { %v10707_v14 = vmul.f32 0.03125, %v10705_v60  ;;  %v10702_v53 = vpop.xlane.xlu0 %10701 }
0x8ddd   :  { %v10706_v18 = vmul.f32 0.03125, %v10702_v53 }
0x8dde   :  { %v10709_v22 = vadd.f32 1e-05, %v10707_v14 }
0x8ddf   :  { %v10708_v26 = vadd.f32 1e-05, %v10706_v18 }
0x8de0   :  { %13866 = vrsqrt.f32 %v10709_v22 }
0x8de1   :  { %13868 = vrsqrt.f32 %v10708_v26 }
0x8dea   :  { %v13867_v57 = vpop.eup %13866 }
0x8deb   :  { %v13869_v33 = vpop.eup %13868  ;;  %v10713_v19 = vmul.f32 %v13867_v57, %v10697_v62 }
0x8dec   :  { %v10712_v29 = vmul.f32 %v13869_v33, %v10696_v4 }
0x8ded   :  { %v10715_v1 = vmul.f32 %v15714_v48, %v10713_v19 }
0x8dee   :  { %v10714_v17 = vmul.f32 %v15714_v48, %v10712_v29 }
0x8def   :  { %v10717_v34 = vadd.f32 %v15721_v61, %v10715_v1 }
0x8df0   :  { %v10716_v3 = vadd.f32 %v15721_v61, %v10714_v17 }
0x8df1   :  { %v10721_v40 = vrot.slane %v10717_v34, 4 }
0x8df2   :  { %v10720_v24 = vrot.slane %v10716_v3, 5 }
0x8df4   :  { %v10722_v38 = vsel %vm2196_vm8, %v10721_v40, %v10720_v24 }
0x8df5   :  { %12839 = vmatmul.mubr.msk.f32.vlgmr.msra.gmra.mrb[110].mxu0 %vm100_vm1, %v10722_v38 }
0x8ec8   :  { %v10791_v23 = vpop.f32.mrb[110].mxu0 }
0x8ec9   :  { %v10792_v41 = vadd.f32 %v15732_v21, %v10791_v23  ;;  %v12840_v30 = vpop.f32.mrb[111].mxu0 }
0x8ecb   :  { %10806 = vst.msk [vmem:[#allocation5 + $0xa] sm:$0x3] %vm2272_vm9, %v10792_v41 }
0x8ecc   :  { %13962 = shalt.err (!%p13959_p12)
}
0x8ecd   :  { %s13963_s20 = scalar_lea.hbm %s15992_s4, 192 }
0x8ece   :  { %p13964_p13 = scmp.ne.s32.totalorder %s15992_s4, %s13963_s20  ;;  %p13967_p0 = scmp.lt.u32.totalorder %s13963_s20, %s15992_s4 }
0x8ed0   :  { %p13969_p1 = pnand %p13967_p0, %p13964_p13 }
0x8ed2   :  { %13972 = shalt.err (!%p13969_p1)
}
0x8ed3   :  { %s13988_s25 = smov 32   ;;  %s13989_s26 = smov 2  }
0x8ed4   :  { %10818 = dma.vmem_to_hbm [thread:$0]  %s10813_s16, 192, %s15992_s4, [#allocation4], %s13988_s25, %s13988_s25, %s13989_s26  }
0x8ed5   :  { %13975 = dma.done.wait [#allocation4], 192  }
0x8ed6   :  { %13976 = vsyncadd [#allocation4], 4294967104 }
0x8ed7   :  { %10822 = vsyncpa [#allocation3], 1 }
0x8ed8   :  { %10823 = vsyncpa [#allocation4], 1 }

</bundles_post_ra>
